<compile_context>
chip_gen: v6e
topology: v6e:2x2x1
jax: 0.10.0
libtpu: 0.0.40
codegen_flags: <defaults>
</compile_context>

<pallas_src>
import math

import jax
import jax.numpy as jnp
from jax.experimental import pallas as pl
from jax.experimental.pallas import tpu as pltpu

D_MODEL = 32
NHEAD = 4
D_K = D_MODEL // NHEAD
D_FF = 4 * D_MODEL
LN_EPS = 1e-5  # torch.nn.LayerNorm default


def encoder_layer_kernel(
    x_ref,
    wq_ref, bq_ref, wk_ref, bk_ref, wv_ref, bv_ref, wo_ref, bo_ref,
    g1_ref, be1_ref,
    w1_ref, bf1_ref, w2_ref, bf2_ref,
    g2_ref, be2_ref,
    o_ref,
):
    f32 = jnp.float32
    bf16 = jnp.bfloat16

    b_blk, L, D = x_ref.shape
    N = b_blk * L

    # Flatten the (B_blk, L) leading dims into one row axis (layout-free: D
    # stays last, L is a multiple of the 8-sublane tile).
    x = x_ref[...].reshape(N, D)  # (N, D) f32

    def linear_bf16(inp_f32, w_ref, b_ref):
        # bf16 MXU inputs, f32 accumulate, f32 bias add.
        return (
            jnp.dot(inp_f32.astype(bf16), w_ref[...], preferred_element_type=f32)
            + b_ref[...]
        )

    # ---- multi-head self-attention ----
    q = linear_bf16(x, wq_ref, bq_ref)  # (N, D) f32
    k = linear_bf16(x, wk_ref, bk_ref)
    v = linear_bf16(x, wv_ref, bv_ref)

    scale = 1.0 / math.sqrt(D_K)
    attn_proj = jnp.zeros((N, D), f32)
    for h in range(NHEAD):  # static unroll over 4 heads (batched over B_blk)
        lo = h * D_K
        qh = q[:, lo:lo + D_K].reshape(b_blk, L, D_K).astype(bf16)
        kh = k[:, lo:lo + D_K].reshape(b_blk, L, D_K).astype(bf16)
        vh = v[:, lo:lo + D_K].reshape(b_blk, L, D_K).astype(bf16)

        # scores: (B_blk, L, L), f32 accumulate
        s = jnp.einsum("bqd,bkd->bqk", qh, kh, preferred_element_type=f32) * scale
        s = s - jnp.max(s, axis=-1, keepdims=True)
        e = jnp.exp(s)
        denom = jnp.sum(e, axis=-1, keepdims=True)
        p = e * pl.reciprocal(denom, approx=True)  # softmax(-1), EUP recip

        oh = jnp.einsum("bqk,bkd->bqd", p.astype(bf16), vh,
                        preferred_element_type=f32)        # (B_blk, L, D_K)
        oh = oh.reshape(N, D_K).astype(bf16)
        # accumulate the output projection per head -> no lane concatenate
        attn_proj = attn_proj + jnp.dot(oh, wo_ref[h], preferred_element_type=f32)

    x2 = attn_proj + bo_ref[...]
    x = x + x2  # residual (dropout == identity in eval)

    def layer_norm(inp, g_ref, b_ref):
        mu = jnp.mean(inp, axis=-1, keepdims=True)
        var = jnp.mean(jnp.square(inp - mu), axis=-1, keepdims=True)
        return (inp - mu) * jax.lax.rsqrt(var + LN_EPS) * g_ref[...] + b_ref[...]

    x = layer_norm(x, g1_ref, be1_ref)

    # ---- feed-forward network ----
    h1 = jnp.maximum(linear_bf16(x, w1_ref, bf1_ref), 0.0)  # ReLU
    x2 = linear_bf16(h1, w2_ref, bf2_ref)
    x = x + x2
    x = layer_norm(x, g2_ref, be2_ref)

    o_ref[...] = x.reshape(b_blk, L, D).astype(o_ref.dtype)


def _pick_batch_block(B, L, max_rows=1024):
    """Largest divisor of B such that the fused row count stays modest and the
    grid keeps >= 2 iterations (feeds both TensorCores on v7x)."""
    best = 1
    for d in range(1, B + 1):
        if B % d != 0:
            continue
        if d * L > max_rows:
            continue
        if B >= 2 and (B // d) < 2:
            continue
        best = d
    return best


def transformer_encoder_layer(x, params, b_blk=None):
    """x: (B, L, D_MODEL) float32. Returns (B, L, D_MODEL) float32."""
    B, L, D = x.shape
    assert D == D_MODEL

    if b_blk is None:
        b_blk = _pick_batch_block(B, L)
    assert B % b_blk == 0
    grid = (B // b_blk,)

    bf16 = jnp.bfloat16
    # Cast matmul weights to bf16 once on the host; pre-split Wo per head so
    # the kernel can accumulate the output projection instead of concatenating.
    param_vals = [
        params["wq"].astype(bf16), params["bq"],
        params["wk"].astype(bf16), params["bk"],
        params["wv"].astype(bf16), params["bv"],
        params["wo"].reshape(NHEAD, D_K, D_MODEL).astype(bf16), params["bo"],
        params["g1"], params["be1"],
        params["w1"].astype(bf16), params["bf1"],
        params["w2"].astype(bf16), params["bf2"],
        params["g2"], params["be2"],
    ]

    x_spec = pl.BlockSpec((b_blk, L, D), lambda b: (b, 0, 0))
    # NOTE: bind p.ndim as a default arg (late-binding fix).
    param_specs = [
        pl.BlockSpec(p.shape, lambda b, nd=p.ndim: (0,) * nd) for p in param_vals
    ]

    return pl.pallas_call(
        encoder_layer_kernel,
        out_shape=jax.ShapeDtypeStruct((B, L, D), x.dtype),
        grid_spec=pltpu.PrefetchScalarGridSpec(
            num_scalar_prefetch=0,
            grid=grid,
            in_specs=[x_spec] + param_specs,
            out_specs=pl.BlockSpec((b_blk, L, D), lambda b: (b, 0, 0)),
        ),
        compiler_params=pltpu.CompilerParams(
            dimension_semantics=("parallel",)
        ),
    )(x, *param_vals)


# ---------------- parameter init (deterministic, matches module shapes) ----
def xavier_uniform(key, fan_in, fan_out, gain=1.0):
    bound = gain * math.sqrt(6.0 / (fan_in + fan_out))
    return jax.random.uniform(
        key, (fan_in, fan_out), jnp.float32, minval=-bound, maxval=bound
    )


def init_params(key):
    keys = jax.random.split(key, 8)
    g_attn = 1.0 / math.sqrt(2.0)
    p = {}
    # attention linears: weights xavier(gain=1/sqrt(2)), biases 0
    p["wq"] = xavier_uniform(keys[0], D_MODEL, D_MODEL, g_attn)
    p["wk"] = xavier_uniform(keys[1], D_MODEL, D_MODEL, g_attn)
    p["wv"] = xavier_uniform(keys[2], D_MODEL, D_MODEL, g_attn)
    p["wo"] = xavier_uniform(keys[3], D_MODEL, D_MODEL, g_attn)
    p["bq"] = jnp.zeros((1, D_MODEL), jnp.float32)
    p["bk"] = jnp.zeros((1, D_MODEL), jnp.float32)
    p["bv"] = jnp.zeros((1, D_MODEL), jnp.float32)
    p["bo"] = jnp.zeros((1, D_MODEL), jnp.float32)
    # layer norms
    p["g1"] = jnp.ones((1, D_MODEL), jnp.float32)
    p["be1"] = jnp.zeros((1, D_MODEL), jnp.float32)
    p["g2"] = jnp.ones((1, D_MODEL), jnp.float32)
    p["be2"] = jnp.zeros((1, D_MODEL), jnp.float32)
    # FFN: weights xavier(gain=1), biases ~ default nn.Linear uniform init
    p["w1"] = xavier_uniform(keys[4], D_MODEL, D_FF, 1.0)
    p["w2"] = xavier_uniform(keys[5], D_FF, D_MODEL, 1.0)
    b1_bound = 1.0 / math.sqrt(D_MODEL)
    b2_bound = 1.0 / math.sqrt(D_FF)
    p["bf1"] = jax.random.uniform(
        keys[6], (1, D_FF), jnp.float32, minval=-b1_bound, maxval=b1_bound
    )
    p["bf2"] = jax.random.uniform(
        keys[7], (1, D_MODEL), jnp.float32, minval=-b2_bound, maxval=b2_bound
    )
    return p


# ---------------- pure-JAX f32 reference (mirrors the PyTorch forward) -----
def reference(x, p):
    B, L, _ = x.shape

    def lin(a, w, b):
        return a @ w + b

    def ln(a, g, b):
        mu = a.mean(-1, keepdims=True)
        var = ((a - mu) ** 2).mean(-1, keepdims=True)
        return (a - mu) / jnp.sqrt(var + LN_EPS) * g + b

    q = lin(x, p["wq"], p["bq"]).reshape(B, L, NHEAD, D_K).transpose(0, 2, 1, 3)
    k = lin(x, p["wk"], p["bk"]).reshape(B, L, NHEAD, D_K).transpose(0, 2, 1, 3)
    v = lin(x, p["wv"], p["bv"]).reshape(B, L, NHEAD, D_K).transpose(0, 2, 1, 3)
    s = (q / math.sqrt(D_K)) @ k.transpose(0, 1, 3, 2)
    pattn = jax.nn.softmax(s, axis=-1)
    a = (pattn @ v).transpose(0, 2, 1, 3).reshape(B, L, D_MODEL)
    x = ln(x + lin(a, p["wo"], p["bo"]), p["g1"], p["be1"])
    h1 = jnp.maximum(lin(x, p["w1"], p["bf1"]), 0.0)
    x = ln(x + lin(h1, p["w2"], p["bf2"]), p["g2"], p["be2"])
    return x


if __name__ == "__main__":
    key = jax.random.PRNGKey(0)
    k_x, k_p = jax.random.split(key)

    # Small shapes, but enough batch to exercise batch fusion (B_blk=16 -> 128
    # fused rows per grid step, 2 parallel grid steps).
    B, L = 32, 8
    x = jax.random.normal(k_x, (B, L, D_MODEL), jnp.float32)
    params = init_params(k_p)

    out = transformer_encoder_layer(x, params)
    out = jax.block_until_ready(out)

    ref = reference(x, params)
    assert out.shape == (B, L, D_MODEL)
    # Tolerance loosened vs. the pure-f32 reference: bf16 MXU inputs (f32
    # accumulation) + approx EUP reciprocal in the softmax.
    max_err = float(jnp.max(jnp.abs(out - ref)))
    assert max_err < 5e-2, f"max abs err = {max_err}"

    print("KERNEL_OK")
</pallas_src>

<mosaic_0001>
module attributes {stable_mosaic.version = 11 : i64} {
  func.func @encoder_layer_kernel(%arg0: i32, %arg1: memref<16x8x32xf32, #tpu.memory_space<vmem>>, %arg2: memref<32x32xbf16, #tpu.memory_space<vmem>>, %arg3: memref<1x32xf32, #tpu.memory_space<vmem>>, %arg4: memref<32x32xbf16, #tpu.memory_space<vmem>>, %arg5: memref<1x32xf32, #tpu.memory_space<vmem>>, %arg6: memref<32x32xbf16, #tpu.memory_space<vmem>>, %arg7: memref<1x32xf32, #tpu.memory_space<vmem>>, %arg8: memref<4x8x32xbf16, #tpu.memory_space<vmem>>, %arg9: memref<1x32xf32, #tpu.memory_space<vmem>>, %arg10: memref<1x32xf32, #tpu.memory_space<vmem>>, %arg11: memref<1x32xf32, #tpu.memory_space<vmem>>, %arg12: memref<32x128xbf16, #tpu.memory_space<vmem>>, %arg13: memref<1x128xf32, #tpu.memory_space<vmem>>, %arg14: memref<128x32xbf16, #tpu.memory_space<vmem>>, %arg15: memref<1x32xf32, #tpu.memory_space<vmem>>, %arg16: memref<1x32xf32, #tpu.memory_space<vmem>>, %arg17: memref<1x32xf32, #tpu.memory_space<vmem>>, %arg18: memref<16x8x32xf32, #tpu.memory_space<vmem>>) attributes {dimension_semantics = [#tpu.dimension_semantics<parallel>], iteration_bounds = array<i64: 2>, scalar_prefetch = 0 : i64, scratch_operands = 0 : i64, tpu.core_type = #tpu.core_type<tc>, window_params = [{transform_indices = @transform_0, window_bounds = array<i64: 16, 8, 32>}, {pipeline_mode = #tpu.pipeline_mode<synchronous>, transform_indices = @transform_1, window_bounds = array<i64: 32, 32>}, {pipeline_mode = #tpu.pipeline_mode<synchronous>, transform_indices = @transform_2, window_bounds = array<i64: 1, 32>}, {pipeline_mode = #tpu.pipeline_mode<synchronous>, transform_indices = @transform_3, window_bounds = array<i64: 32, 32>}, {pipeline_mode = #tpu.pipeline_mode<synchronous>, transform_indices = @transform_4, window_bounds = array<i64: 1, 32>}, {pipeline_mode = #tpu.pipeline_mode<synchronous>, transform_indices = @transform_5, window_bounds = array<i64: 32, 32>}, {pipeline_mode = #tpu.pipeline_mode<synchronous>, transform_indices = @transform_6, window_bounds = array<i64: 1, 32>}, {pipeline_mode = #tpu.pipeline_mode<synchronous>, transform_indices = @transform_7, window_bounds = array<i64: 4, 8, 32>}, {pipeline_mode = #tpu.pipeline_mode<synchronous>, transform_indices = @transform_8, window_bounds = array<i64: 1, 32>}, {pipeline_mode = #tpu.pipeline_mode<synchronous>, transform_indices = @transform_9, window_bounds = array<i64: 1, 32>}, {pipeline_mode = #tpu.pipeline_mode<synchronous>, transform_indices = @transform_10, window_bounds = array<i64: 1, 32>}, {pipeline_mode = #tpu.pipeline_mode<synchronous>, transform_indices = @transform_11, window_bounds = array<i64: 32, 128>}, {pipeline_mode = #tpu.pipeline_mode<synchronous>, transform_indices = @transform_12, window_bounds = array<i64: 1, 128>}, {pipeline_mode = #tpu.pipeline_mode<synchronous>, transform_indices = @transform_13, window_bounds = array<i64: 128, 32>}, {pipeline_mode = #tpu.pipeline_mode<synchronous>, transform_indices = @transform_14, window_bounds = array<i64: 1, 32>}, {pipeline_mode = #tpu.pipeline_mode<synchronous>, transform_indices = @transform_15, window_bounds = array<i64: 1, 32>}, {pipeline_mode = #tpu.pipeline_mode<synchronous>, transform_indices = @transform_16, window_bounds = array<i64: 1, 32>}, {transform_indices = @transform_17, window_bounds = array<i64: 16, 8, 32>}]} {
    %c0 = arith.constant 0 : index
    %c0_0 = arith.constant 0 : index
    %c0_1 = arith.constant 0 : index
    %0 = vector.load %arg1[%c0, %c0_0, %c0_1] : memref<16x8x32xf32, #tpu.memory_space<vmem>>, vector<16x8x32xf32>
    %1 = vector.shape_cast %0 : vector<16x8x32xf32> to vector<128x32xf32>
    %2 = arith.truncf %1 : vector<128x32xf32> to vector<128x32xbf16>
    %c0_2 = arith.constant 0 : index
    %c0_3 = arith.constant 0 : index
    %3 = vector.load %arg2[%c0_2, %c0_3] : memref<32x32xbf16, #tpu.memory_space<vmem>>, vector<32x32xbf16>
    %cst = arith.constant dense<0.000000e+00> : vector<128x32xf32>
    %4 = tpu.matmul %2, %3, %cst {dimension_numbers = #tpu.dot_dimension_numbers<[1], [0], [0], [1], [0, 0, 1, 1], [], []>} : vector<128x32xbf16>, vector<32x32xbf16>, vector<128x32xf32> -> vector<128x32xf32>
    %c0_4 = arith.constant 0 : index
    %c0_5 = arith.constant 0 : index
    %5 = vector.load %arg3[%c0_4, %c0_5] : memref<1x32xf32, #tpu.memory_space<vmem>>, vector<1x32xf32>
    %6 = vector.broadcast %5 : vector<1x32xf32> to vector<128x32xf32>
    %7 = arith.addf %4, %6 : vector<128x32xf32>
    %8 = arith.truncf %1 : vector<128x32xf32> to vector<128x32xbf16>
    %c0_6 = arith.constant 0 : index
    %c0_7 = arith.constant 0 : index
    %9 = vector.load %arg4[%c0_6, %c0_7] : memref<32x32xbf16, #tpu.memory_space<vmem>>, vector<32x32xbf16>
    %cst_8 = arith.constant dense<0.000000e+00> : vector<128x32xf32>
    %10 = tpu.matmul %8, %9, %cst_8 {dimension_numbers = #tpu.dot_dimension_numbers<[1], [0], [0], [1], [0, 0, 1, 1], [], []>} : vector<128x32xbf16>, vector<32x32xbf16>, vector<128x32xf32> -> vector<128x32xf32>
    %c0_9 = arith.constant 0 : index
    %c0_10 = arith.constant 0 : index
    %11 = vector.load %arg5[%c0_9, %c0_10] : memref<1x32xf32, #tpu.memory_space<vmem>>, vector<1x32xf32>
    %12 = vector.broadcast %11 : vector<1x32xf32> to vector<128x32xf32>
    %13 = arith.addf %10, %12 : vector<128x32xf32>
    %14 = arith.truncf %1 : vector<128x32xf32> to vector<128x32xbf16>
    %c0_11 = arith.constant 0 : index
    %c0_12 = arith.constant 0 : index
    %15 = vector.load %arg6[%c0_11, %c0_12] : memref<32x32xbf16, #tpu.memory_space<vmem>>, vector<32x32xbf16>
    %cst_13 = arith.constant dense<0.000000e+00> : vector<128x32xf32>
    %16 = tpu.matmul %14, %15, %cst_13 {dimension_numbers = #tpu.dot_dimension_numbers<[1], [0], [0], [1], [0, 0, 1, 1], [], []>} : vector<128x32xbf16>, vector<32x32xbf16>, vector<128x32xf32> -> vector<128x32xf32>
    %c0_14 = arith.constant 0 : index
    %c0_15 = arith.constant 0 : index
    %17 = vector.load %arg7[%c0_14, %c0_15] : memref<1x32xf32, #tpu.memory_space<vmem>>, vector<1x32xf32>
    %18 = vector.broadcast %17 : vector<1x32xf32> to vector<128x32xf32>
    %19 = arith.addf %16, %18 : vector<128x32xf32>
    %cst_16 = arith.constant 0.000000e+00 : f32
    %20 = vector.broadcast %cst_16 : f32 to vector<128x32xf32>
    %21 = vector.extract_strided_slice %7 {offsets = [0, 0], sizes = [128, 8], strides = [1, 1]} : vector<128x32xf32> to vector<128x8xf32>
    %22 = vector.shape_cast %21 : vector<128x8xf32> to vector<16x8x8xf32>
    %23 = arith.truncf %22 : vector<16x8x8xf32> to vector<16x8x8xbf16>
    %24 = vector.extract_strided_slice %13 {offsets = [0, 0], sizes = [128, 8], strides = [1, 1]} : vector<128x32xf32> to vector<128x8xf32>
    %25 = vector.shape_cast %24 : vector<128x8xf32> to vector<16x8x8xf32>
    %26 = arith.truncf %25 : vector<16x8x8xf32> to vector<16x8x8xbf16>
    %27 = vector.extract_strided_slice %19 {offsets = [0, 0], sizes = [128, 8], strides = [1, 1]} : vector<128x32xf32> to vector<128x8xf32>
    %28 = vector.shape_cast %27 : vector<128x8xf32> to vector<16x8x8xf32>
    %29 = arith.truncf %28 : vector<16x8x8xf32> to vector<16x8x8xbf16>
    "tpu.trace_start"() <{level = 10 : i32, message = "bqd,bkd->bqk"}> : () -> ()
    %cst_17 = arith.constant dense<0.000000e+00> : vector<16x8x8xf32>
    %30 = tpu.matmul %23, %26, %cst_17 {dimension_numbers = #tpu.dot_dimension_numbers<[2], [2], [1], [1], [0, 0, 0, 1, 1, 1], [0], [0]>} : vector<16x8x8xbf16>, vector<16x8x8xbf16>, vector<16x8x8xf32> -> vector<16x8x8xf32>
    "tpu.trace_stop"() : () -> ()
    %cst_18 = arith.constant 0.353553385 : f32
    %31 = vector.broadcast %cst_18 : f32 to vector<16x8x8xf32>
    %32 = arith.mulf %30, %31 : vector<16x8x8xf32>
    %cst_19 = arith.constant dense<0xFF800000> : vector<16x8xf32>
    %33 = vector.multi_reduction <maximumf>, %32, %cst_19 [2] : vector<16x8x8xf32> to vector<16x8xf32>
    %34 = vector.shape_cast %33 : vector<16x8xf32> to vector<16x8x1xf32>
    %35 = vector.broadcast %34 : vector<16x8x1xf32> to vector<16x8x8xf32>
    %36 = arith.subf %32, %35 : vector<16x8x8xf32>
    %37 = math.exp %36 : vector<16x8x8xf32>
    %cst_20 = arith.constant dense<0.000000e+00> : vector<16x8xf32>
    %38 = vector.multi_reduction <add>, %37, %cst_20 [2] : vector<16x8x8xf32> to vector<16x8xf32>
    %39 = vector.shape_cast %38 : vector<16x8xf32> to vector<16x8x1xf32>
    %40 = tpu.reciprocal %39 {approx = true} : vector<16x8x1xf32> -> vector<16x8x1xf32>
    %41 = vector.broadcast %40 : vector<16x8x1xf32> to vector<16x8x8xf32>
    %42 = arith.mulf %37, %41 : vector<16x8x8xf32>
    %43 = arith.truncf %42 : vector<16x8x8xf32> to vector<16x8x8xbf16>
    "tpu.trace_start"() <{level = 10 : i32, message = "bqk,bkd->bqd"}> : () -> ()
    %cst_21 = arith.constant dense<0.000000e+00> : vector<16x8x8xf32>
    %44 = tpu.matmul %43, %29, %cst_21 {dimension_numbers = #tpu.dot_dimension_numbers<[2], [1], [1], [2], [0, 0, 0, 1, 1, 2], [0], [0]>} : vector<16x8x8xbf16>, vector<16x8x8xbf16>, vector<16x8x8xf32> -> vector<16x8x8xf32>
    "tpu.trace_stop"() : () -> ()
    %45 = vector.shape_cast %44 : vector<16x8x8xf32> to vector<128x8xf32>
    %46 = arith.truncf %45 : vector<128x8xf32> to vector<128x8xbf16>
    %c0_22 = arith.constant 0 : index
    %c0_23 = arith.constant 0 : index
    %c0_24 = arith.constant 0 : index
    %47 = vector.load %arg8[%c0_22, %c0_23, %c0_24] : memref<4x8x32xbf16, #tpu.memory_space<vmem>>, vector<1x8x32xbf16>
    %48 = vector.shape_cast %47 : vector<1x8x32xbf16> to vector<8x32xbf16>
    %cst_25 = arith.constant dense<0.000000e+00> : vector<128x32xf32>
    %49 = tpu.matmul %46, %48, %cst_25 {dimension_numbers = #tpu.dot_dimension_numbers<[1], [0], [0], [1], [0, 0, 1, 1], [], []>} : vector<128x8xbf16>, vector<8x32xbf16>, vector<128x32xf32> -> vector<128x32xf32>
    %50 = arith.addf %20, %49 : vector<128x32xf32>
    %51 = vector.extract_strided_slice %7 {offsets = [0, 8], sizes = [128, 8], strides = [1, 1]} : vector<128x32xf32> to vector<128x8xf32>
    %52 = vector.shape_cast %51 : vector<128x8xf32> to vector<16x8x8xf32>
    %53 = arith.truncf %52 : vector<16x8x8xf32> to vector<16x8x8xbf16>
    %54 = vector.extract_strided_slice %13 {offsets = [0, 8], sizes = [128, 8], strides = [1, 1]} : vector<128x32xf32> to vector<128x8xf32>
    %55 = vector.shape_cast %54 : vector<128x8xf32> to vector<16x8x8xf32>
    %56 = arith.truncf %55 : vector<16x8x8xf32> to vector<16x8x8xbf16>
    %57 = vector.extract_strided_slice %19 {offsets = [0, 8], sizes = [128, 8], strides = [1, 1]} : vector<128x32xf32> to vector<128x8xf32>
    %58 = vector.shape_cast %57 : vector<128x8xf32> to vector<16x8x8xf32>
    %59 = arith.truncf %58 : vector<16x8x8xf32> to vector<16x8x8xbf16>
    "tpu.trace_start"() <{level = 10 : i32, message = "bqd,bkd->bqk"}> : () -> ()
    %cst_26 = arith.constant dense<0.000000e+00> : vector<16x8x8xf32>
    %60 = tpu.matmul %53, %56, %cst_26 {dimension_numbers = #tpu.dot_dimension_numbers<[2], [2], [1], [1], [0, 0, 0, 1, 1, 1], [0], [0]>} : vector<16x8x8xbf16>, vector<16x8x8xbf16>, vector<16x8x8xf32> -> vector<16x8x8xf32>
    "tpu.trace_stop"() : () -> ()
    %cst_27 = arith.constant 0.353553385 : f32
    %61 = vector.broadcast %cst_27 : f32 to vector<16x8x8xf32>
    %62 = arith.mulf %60, %61 : vector<16x8x8xf32>
    %cst_28 = arith.constant dense<0xFF800000> : vector<16x8xf32>
    %63 = vector.multi_reduction <maximumf>, %62, %cst_28 [2] : vector<16x8x8xf32> to vector<16x8xf32>
    %64 = vector.shape_cast %63 : vector<16x8xf32> to vector<16x8x1xf32>
    %65 = vector.broadcast %64 : vector<16x8x1xf32> to vector<16x8x8xf32>
    %66 = arith.subf %62, %65 : vector<16x8x8xf32>
    %67 = math.exp %66 : vector<16x8x8xf32>
    %cst_29 = arith.constant dense<0.000000e+00> : vector<16x8xf32>
    %68 = vector.multi_reduction <add>, %67, %cst_29 [2] : vector<16x8x8xf32> to vector<16x8xf32>
    %69 = vector.shape_cast %68 : vector<16x8xf32> to vector<16x8x1xf32>
    %70 = tpu.reciprocal %69 {approx = true} : vector<16x8x1xf32> -> vector<16x8x1xf32>
    %71 = vector.broadcast %70 : vector<16x8x1xf32> to vector<16x8x8xf32>
    %72 = arith.mulf %67, %71 : vector<16x8x8xf32>
    %73 = arith.truncf %72 : vector<16x8x8xf32> to vector<16x8x8xbf16>
    "tpu.trace_start"() <{level = 10 : i32, message = "bqk,bkd->bqd"}> : () -> ()
    %cst_30 = arith.constant dense<0.000000e+00> : vector<16x8x8xf32>
    %74 = tpu.matmul %73, %59, %cst_30 {dimension_numbers = #tpu.dot_dimension_numbers<[2], [1], [1], [2], [0, 0, 0, 1, 1, 2], [0], [0]>} : vector<16x8x8xbf16>, vector<16x8x8xbf16>, vector<16x8x8xf32> -> vector<16x8x8xf32>
    "tpu.trace_stop"() : () -> ()
    %75 = vector.shape_cast %74 : vector<16x8x8xf32> to vector<128x8xf32>
    %76 = arith.truncf %75 : vector<128x8xf32> to vector<128x8xbf16>
    %c1 = arith.constant 1 : index
    %c0_31 = arith.constant 0 : index
    %c0_32 = arith.constant 0 : index
    %77 = vector.load %arg8[%c1, %c0_31, %c0_32] : memref<4x8x32xbf16, #tpu.memory_space<vmem>>, vector<1x8x32xbf16>
    %78 = vector.shape_cast %77 : vector<1x8x32xbf16> to vector<8x32xbf16>
    %cst_33 = arith.constant dense<0.000000e+00> : vector<128x32xf32>
    %79 = tpu.matmul %76, %78, %cst_33 {dimension_numbers = #tpu.dot_dimension_numbers<[1], [0], [0], [1], [0, 0, 1, 1], [], []>} : vector<128x8xbf16>, vector<8x32xbf16>, vector<128x32xf32> -> vector<128x32xf32>
    %80 = arith.addf %50, %79 : vector<128x32xf32>
    %81 = vector.extract_strided_slice %7 {offsets = [0, 16], sizes = [128, 8], strides = [1, 1]} : vector<128x32xf32> to vector<128x8xf32>
    %82 = vector.shape_cast %81 : vector<128x8xf32> to vector<16x8x8xf32>
    %83 = arith.truncf %82 : vector<16x8x8xf32> to vector<16x8x8xbf16>
    %84 = vector.extract_strided_slice %13 {offsets = [0, 16], sizes = [128, 8], strides = [1, 1]} : vector<128x32xf32> to vector<128x8xf32>
    %85 = vector.shape_cast %84 : vector<128x8xf32> to vector<16x8x8xf32>
    %86 = arith.truncf %85 : vector<16x8x8xf32> to vector<16x8x8xbf16>
    %87 = vector.extract_strided_slice %19 {offsets = [0, 16], sizes = [128, 8], strides = [1, 1]} : vector<128x32xf32> to vector<128x8xf32>
    %88 = vector.shape_cast %87 : vector<128x8xf32> to vector<16x8x8xf32>
    %89 = arith.truncf %88 : vector<16x8x8xf32> to vector<16x8x8xbf16>
    "tpu.trace_start"() <{level = 10 : i32, message = "bqd,bkd->bqk"}> : () -> ()
    %cst_34 = arith.constant dense<0.000000e+00> : vector<16x8x8xf32>
    %90 = tpu.matmul %83, %86, %cst_34 {dimension_numbers = #tpu.dot_dimension_numbers<[2], [2], [1], [1], [0, 0, 0, 1, 1, 1], [0], [0]>} : vector<16x8x8xbf16>, vector<16x8x8xbf16>, vector<16x8x8xf32> -> vector<16x8x8xf32>
    "tpu.trace_stop"() : () -> ()
    %cst_35 = arith.constant 0.353553385 : f32
    %91 = vector.broadcast %cst_35 : f32 to vector<16x8x8xf32>
    %92 = arith.mulf %90, %91 : vector<16x8x8xf32>
    %cst_36 = arith.constant dense<0xFF800000> : vector<16x8xf32>
    %93 = vector.multi_reduction <maximumf>, %92, %cst_36 [2] : vector<16x8x8xf32> to vector<16x8xf32>
    %94 = vector.shape_cast %93 : vector<16x8xf32> to vector<16x8x1xf32>
    %95 = vector.broadcast %94 : vector<16x8x1xf32> to vector<16x8x8xf32>
    %96 = arith.subf %92, %95 : vector<16x8x8xf32>
    %97 = math.exp %96 : vector<16x8x8xf32>
    %cst_37 = arith.constant dense<0.000000e+00> : vector<16x8xf32>
    %98 = vector.multi_reduction <add>, %97, %cst_37 [2] : vector<16x8x8xf32> to vector<16x8xf32>
    %99 = vector.shape_cast %98 : vector<16x8xf32> to vector<16x8x1xf32>
    %100 = tpu.reciprocal %99 {approx = true} : vector<16x8x1xf32> -> vector<16x8x1xf32>
    %101 = vector.broadcast %100 : vector<16x8x1xf32> to vector<16x8x8xf32>
    %102 = arith.mulf %97, %101 : vector<16x8x8xf32>
    %103 = arith.truncf %102 : vector<16x8x8xf32> to vector<16x8x8xbf16>
    "tpu.trace_start"() <{level = 10 : i32, message = "bqk,bkd->bqd"}> : () -> ()
    %cst_38 = arith.constant dense<0.000000e+00> : vector<16x8x8xf32>
    %104 = tpu.matmul %103, %89, %cst_38 {dimension_numbers = #tpu.dot_dimension_numbers<[2], [1], [1], [2], [0, 0, 0, 1, 1, 2], [0], [0]>} : vector<16x8x8xbf16>, vector<16x8x8xbf16>, vector<16x8x8xf32> -> vector<16x8x8xf32>
    "tpu.trace_stop"() : () -> ()
    %105 = vector.shape_cast %104 : vector<16x8x8xf32> to vector<128x8xf32>
    %106 = arith.truncf %105 : vector<128x8xf32> to vector<128x8xbf16>
    %c2 = arith.constant 2 : index
    %c0_39 = arith.constant 0 : index
    %c0_40 = arith.constant 0 : index
    %107 = vector.load %arg8[%c2, %c0_39, %c0_40] : memref<4x8x32xbf16, #tpu.memory_space<vmem>>, vector<1x8x32xbf16>
    %108 = vector.shape_cast %107 : vector<1x8x32xbf16> to vector<8x32xbf16>
    %cst_41 = arith.constant dense<0.000000e+00> : vector<128x32xf32>
    %109 = tpu.matmul %106, %108, %cst_41 {dimension_numbers = #tpu.dot_dimension_numbers<[1], [0], [0], [1], [0, 0, 1, 1], [], []>} : vector<128x8xbf16>, vector<8x32xbf16>, vector<128x32xf32> -> vector<128x32xf32>
    %110 = arith.addf %80, %109 : vector<128x32xf32>
    %111 = vector.extract_strided_slice %7 {offsets = [0, 24], sizes = [128, 8], strides = [1, 1]} : vector<128x32xf32> to vector<128x8xf32>
    %112 = vector.shape_cast %111 : vector<128x8xf32> to vector<16x8x8xf32>
    %113 = arith.truncf %112 : vector<16x8x8xf32> to vector<16x8x8xbf16>
    %114 = vector.extract_strided_slice %13 {offsets = [0, 24], sizes = [128, 8], strides = [1, 1]} : vector<128x32xf32> to vector<128x8xf32>
    %115 = vector.shape_cast %114 : vector<128x8xf32> to vector<16x8x8xf32>
    %116 = arith.truncf %115 : vector<16x8x8xf32> to vector<16x8x8xbf16>
    %117 = vector.extract_strided_slice %19 {offsets = [0, 24], sizes = [128, 8], strides = [1, 1]} : vector<128x32xf32> to vector<128x8xf32>
    %118 = vector.shape_cast %117 : vector<128x8xf32> to vector<16x8x8xf32>
    %119 = arith.truncf %118 : vector<16x8x8xf32> to vector<16x8x8xbf16>
    "tpu.trace_start"() <{level = 10 : i32, message = "bqd,bkd->bqk"}> : () -> ()
    %cst_42 = arith.constant dense<0.000000e+00> : vector<16x8x8xf32>
    %120 = tpu.matmul %113, %116, %cst_42 {dimension_numbers = #tpu.dot_dimension_numbers<[2], [2], [1], [1], [0, 0, 0, 1, 1, 1], [0], [0]>} : vector<16x8x8xbf16>, vector<16x8x8xbf16>, vector<16x8x8xf32> -> vector<16x8x8xf32>
    "tpu.trace_stop"() : () -> ()
    %cst_43 = arith.constant 0.353553385 : f32
    %121 = vector.broadcast %cst_43 : f32 to vector<16x8x8xf32>
    %122 = arith.mulf %120, %121 : vector<16x8x8xf32>
    %cst_44 = arith.constant dense<0xFF800000> : vector<16x8xf32>
    %123 = vector.multi_reduction <maximumf>, %122, %cst_44 [2] : vector<16x8x8xf32> to vector<16x8xf32>
    %124 = vector.shape_cast %123 : vector<16x8xf32> to vector<16x8x1xf32>
    %125 = vector.broadcast %124 : vector<16x8x1xf32> to vector<16x8x8xf32>
    %126 = arith.subf %122, %125 : vector<16x8x8xf32>
    %127 = math.exp %126 : vector<16x8x8xf32>
    %cst_45 = arith.constant dense<0.000000e+00> : vector<16x8xf32>
    %128 = vector.multi_reduction <add>, %127, %cst_45 [2] : vector<16x8x8xf32> to vector<16x8xf32>
    %129 = vector.shape_cast %128 : vector<16x8xf32> to vector<16x8x1xf32>
    %130 = tpu.reciprocal %129 {approx = true} : vector<16x8x1xf32> -> vector<16x8x1xf32>
    %131 = vector.broadcast %130 : vector<16x8x1xf32> to vector<16x8x8xf32>
    %132 = arith.mulf %127, %131 : vector<16x8x8xf32>
    %133 = arith.truncf %132 : vector<16x8x8xf32> to vector<16x8x8xbf16>
    "tpu.trace_start"() <{level = 10 : i32, message = "bqk,bkd->bqd"}> : () -> ()
    %cst_46 = arith.constant dense<0.000000e+00> : vector<16x8x8xf32>
    %134 = tpu.matmul %133, %119, %cst_46 {dimension_numbers = #tpu.dot_dimension_numbers<[2], [1], [1], [2], [0, 0, 0, 1, 1, 2], [0], [0]>} : vector<16x8x8xbf16>, vector<16x8x8xbf16>, vector<16x8x8xf32> -> vector<16x8x8xf32>
    "tpu.trace_stop"() : () -> ()
    %135 = vector.shape_cast %134 : vector<16x8x8xf32> to vector<128x8xf32>
    %136 = arith.truncf %135 : vector<128x8xf32> to vector<128x8xbf16>
    %c3 = arith.constant 3 : index
    %c0_47 = arith.constant 0 : index
    %c0_48 = arith.constant 0 : index
    %137 = vector.load %arg8[%c3, %c0_47, %c0_48] : memref<4x8x32xbf16, #tpu.memory_space<vmem>>, vector<1x8x32xbf16>
    %138 = vector.shape_cast %137 : vector<1x8x32xbf16> to vector<8x32xbf16>
    %cst_49 = arith.constant dense<0.000000e+00> : vector<128x32xf32>
    %139 = tpu.matmul %136, %138, %cst_49 {dimension_numbers = #tpu.dot_dimension_numbers<[1], [0], [0], [1], [0, 0, 1, 1], [], []>} : vector<128x8xbf16>, vector<8x32xbf16>, vector<128x32xf32> -> vector<128x32xf32>
    %140 = arith.addf %110, %139 : vector<128x32xf32>
    %c0_50 = arith.constant 0 : index
    %c0_51 = arith.constant 0 : index
    %141 = vector.load %arg9[%c0_50, %c0_51] : memref<1x32xf32, #tpu.memory_space<vmem>>, vector<1x32xf32>
    %142 = vector.broadcast %141 : vector<1x32xf32> to vector<128x32xf32>
    %143 = arith.addf %140, %142 : vector<128x32xf32>
    %144 = arith.addf %1, %143 : vector<128x32xf32>
    %cst_52 = arith.constant dense<0.000000e+00> : vector<128xf32>
    %145 = vector.multi_reduction <add>, %144, %cst_52 [1] : vector<128x32xf32> to vector<128xf32>
    %146 = vector.shape_cast %145 : vector<128xf32> to vector<128x1xf32>
    %cst_53 = arith.constant 3.200000e+01 : f32
    %147 = vector.broadcast %cst_53 : f32 to vector<128x1xf32>
    %148 = arith.divf %146, %147 : vector<128x1xf32>
    %149 = vector.broadcast %148 : vector<128x1xf32> to vector<128x32xf32>
    %150 = arith.subf %144, %149 : vector<128x32xf32>
    %151 = arith.mulf %150, %150 : vector<128x32xf32>
    %cst_54 = arith.constant dense<0.000000e+00> : vector<128xf32>
    %152 = vector.multi_reduction <add>, %151, %cst_54 [1] : vector<128x32xf32> to vector<128xf32>
    %153 = vector.shape_cast %152 : vector<128xf32> to vector<128x1xf32>
    %cst_55 = arith.constant 3.200000e+01 : f32
    %154 = vector.broadcast %cst_55 : f32 to vector<128x1xf32>
    %155 = arith.divf %153, %154 : vector<128x1xf32>
    %156 = vector.broadcast %148 : vector<128x1xf32> to vector<128x32xf32>
    %157 = arith.subf %144, %156 : vector<128x32xf32>
    %cst_56 = arith.constant 9.99999974E-6 : f32
    %158 = vector.broadcast %cst_56 : f32 to vector<128x1xf32>
    %159 = arith.addf %155, %158 : vector<128x1xf32>
    %160 = math.rsqrt %159 : vector<128x1xf32>
    %161 = vector.broadcast %160 : vector<128x1xf32> to vector<128x32xf32>
    %162 = arith.mulf %157, %161 : vector<128x32xf32>
    %c0_57 = arith.constant 0 : index
    %c0_58 = arith.constant 0 : index
    %163 = vector.load %arg10[%c0_57, %c0_58] : memref<1x32xf32, #tpu.memory_space<vmem>>, vector<1x32xf32>
    %164 = vector.broadcast %163 : vector<1x32xf32> to vector<128x32xf32>
    %165 = arith.mulf %162, %164 : vector<128x32xf32>
    %c0_59 = arith.constant 0 : index
    %c0_60 = arith.constant 0 : index
    %166 = vector.load %arg11[%c0_59, %c0_60] : memref<1x32xf32, #tpu.memory_space<vmem>>, vector<1x32xf32>
    %167 = vector.broadcast %166 : vector<1x32xf32> to vector<128x32xf32>
    %168 = arith.addf %165, %167 : vector<128x32xf32>
    %169 = arith.truncf %168 : vector<128x32xf32> to vector<128x32xbf16>
    %c0_61 = arith.constant 0 : index
    %c0_62 = arith.constant 0 : index
    %170 = vector.load %arg12[%c0_61, %c0_62] : memref<32x128xbf16, #tpu.memory_space<vmem>>, vector<32x128xbf16>
    %cst_63 = arith.constant dense<0.000000e+00> : vector<128x128xf32>
    %171 = tpu.matmul %169, %170, %cst_63 {dimension_numbers = #tpu.dot_dimension_numbers<[1], [0], [0], [1], [0, 0, 1, 1], [], []>} : vector<128x32xbf16>, vector<32x128xbf16>, vector<128x128xf32> -> vector<128x128xf32>
    %c0_64 = arith.constant 0 : index
    %c0_65 = arith.constant 0 : index
    %172 = vector.load %arg13[%c0_64, %c0_65] : memref<1x128xf32, #tpu.memory_space<vmem>>, vector<1x128xf32>
    %173 = vector.broadcast %172 : vector<1x128xf32> to vector<128x128xf32>
    %174 = arith.addf %171, %173 : vector<128x128xf32>
    %cst_66 = arith.constant 0.000000e+00 : f32
    %175 = vector.broadcast %cst_66 : f32 to vector<128x128xf32>
    %176 = arith.maximumf %174, %175 : vector<128x128xf32>
    %177 = arith.truncf %176 : vector<128x128xf32> to vector<128x128xbf16>
    %c0_67 = arith.constant 0 : index
    %c0_68 = arith.constant 0 : index
    %178 = vector.load %arg14[%c0_67, %c0_68] : memref<128x32xbf16, #tpu.memory_space<vmem>>, vector<128x32xbf16>
    %cst_69 = arith.constant dense<0.000000e+00> : vector<128x32xf32>
    %179 = tpu.matmul %177, %178, %cst_69 {dimension_numbers = #tpu.dot_dimension_numbers<[1], [0], [0], [1], [0, 0, 1, 1], [], []>} : vector<128x128xbf16>, vector<128x32xbf16>, vector<128x32xf32> -> vector<128x32xf32>
    %c0_70 = arith.constant 0 : index
    %c0_71 = arith.constant 0 : index
    %180 = vector.load %arg15[%c0_70, %c0_71] : memref<1x32xf32, #tpu.memory_space<vmem>>, vector<1x32xf32>
    %181 = vector.broadcast %180 : vector<1x32xf32> to vector<128x32xf32>
    %182 = arith.addf %179, %181 : vector<128x32xf32>
    %183 = arith.addf %168, %182 : vector<128x32xf32>
    %cst_72 = arith.constant dense<0.000000e+00> : vector<128xf32>
    %184 = vector.multi_reduction <add>, %183, %cst_72 [1] : vector<128x32xf32> to vector<128xf32>
    %185 = vector.shape_cast %184 : vector<128xf32> to vector<128x1xf32>
    %cst_73 = arith.constant 3.200000e+01 : f32
    %186 = vector.broadcast %cst_73 : f32 to vector<128x1xf32>
    %187 = arith.divf %185, %186 : vector<128x1xf32>
    %188 = vector.broadcast %187 : vector<128x1xf32> to vector<128x32xf32>
    %189 = arith.subf %183, %188 : vector<128x32xf32>
    %190 = arith.mulf %189, %189 : vector<128x32xf32>
    %cst_74 = arith.constant dense<0.000000e+00> : vector<128xf32>
    %191 = vector.multi_reduction <add>, %190, %cst_74 [1] : vector<128x32xf32> to vector<128xf32>
    %192 = vector.shape_cast %191 : vector<128xf32> to vector<128x1xf32>
    %cst_75 = arith.constant 3.200000e+01 : f32
    %193 = vector.broadcast %cst_75 : f32 to vector<128x1xf32>
    %194 = arith.divf %192, %193 : vector<128x1xf32>
    %195 = vector.broadcast %187 : vector<128x1xf32> to vector<128x32xf32>
    %196 = arith.subf %183, %195 : vector<128x32xf32>
    %cst_76 = arith.constant 9.99999974E-6 : f32
    %197 = vector.broadcast %cst_76 : f32 to vector<128x1xf32>
    %198 = arith.addf %194, %197 : vector<128x1xf32>
    %199 = math.rsqrt %198 : vector<128x1xf32>
    %200 = vector.broadcast %199 : vector<128x1xf32> to vector<128x32xf32>
    %201 = arith.mulf %196, %200 : vector<128x32xf32>
    %c0_77 = arith.constant 0 : index
    %c0_78 = arith.constant 0 : index
    %202 = vector.load %arg16[%c0_77, %c0_78] : memref<1x32xf32, #tpu.memory_space<vmem>>, vector<1x32xf32>
    %203 = vector.broadcast %202 : vector<1x32xf32> to vector<128x32xf32>
    %204 = arith.mulf %201, %203 : vector<128x32xf32>
    %c0_79 = arith.constant 0 : index
    %c0_80 = arith.constant 0 : index
    %205 = vector.load %arg17[%c0_79, %c0_80] : memref<1x32xf32, #tpu.memory_space<vmem>>, vector<1x32xf32>
    %206 = vector.broadcast %205 : vector<1x32xf32> to vector<128x32xf32>
    %207 = arith.addf %204, %206 : vector<128x32xf32>
    %208 = vector.shape_cast %207 : vector<128x32xf32> to vector<16x8x32xf32>
    %c0_81 = arith.constant 0 : index
    %c0_82 = arith.constant 0 : index
    %c0_83 = arith.constant 0 : index
    %209 = vector.load %arg18[%c0_81, %c0_82, %c0_83] : memref<16x8x32xf32, #tpu.memory_space<vmem>>, vector<16x8x32xf32>
    tpu.vector_store %arg18[%c0_81, %c0_82, %c0_83], %208 {strides = array<i32>} : memref<16x8x32xf32, #tpu.memory_space<vmem>>, vector<16x8x32xf32>,
    return
  }
  func.func @transform_0(%arg0: i32) -> (i32, i32, i32) {
    %c0_i32 = arith.constant 0 : i32
    %c0_i32_0 = arith.constant 0 : i32
    %c0_i32_1 = arith.constant 0 : i32
    return %arg0, %c0_i32, %c0_i32_0 : i32, i32, i32
  }
  func.func @transform_1(%arg0: i32) -> (i32, i32) {
    %c0_i32 = arith.constant 0 : i32
    %c0_i32_0 = arith.constant 0 : i32
    %c0_i32_1 = arith.constant 0 : i32
    return %c0_i32, %c0_i32_0 : i32, i32
  }
  func.func @transform_2(%arg0: i32) -> (i32, i32) {
    %c0_i32 = arith.constant 0 : i32
    %c0_i32_0 = arith.constant 0 : i32
    %c0_i32_1 = arith.constant 0 : i32
    return %c0_i32, %c0_i32_0 : i32, i32
  }
  func.func @transform_3(%arg0: i32) -> (i32, i32) {
    %c0_i32 = arith.constant 0 : i32
    %c0_i32_0 = arith.constant 0 : i32
    %c0_i32_1 = arith.constant 0 : i32
    return %c0_i32, %c0_i32_0 : i32, i32
  }
  func.func @transform_4(%arg0: i32) -> (i32, i32) {
    %c0_i32 = arith.constant 0 : i32
    %c0_i32_0 = arith.constant 0 : i32
    %c0_i32_1 = arith.constant 0 : i32
    return %c0_i32, %c0_i32_0 : i32, i32
  }
  func.func @transform_5(%arg0: i32) -> (i32, i32) {
    %c0_i32 = arith.constant 0 : i32
    %c0_i32_0 = arith.constant 0 : i32
    %c0_i32_1 = arith.constant 0 : i32
    return %c0_i32, %c0_i32_0 : i32, i32
  }
  func.func @transform_6(%arg0: i32) -> (i32, i32) {
    %c0_i32 = arith.constant 0 : i32
    %c0_i32_0 = arith.constant 0 : i32
    %c0_i32_1 = arith.constant 0 : i32
    return %c0_i32, %c0_i32_0 : i32, i32
  }
  func.func @transform_7(%arg0: i32) -> (i32, i32, i32) {
    %c0_i32 = arith.constant 0 : i32
    %c0_i32_0 = arith.constant 0 : i32
    %c0_i32_1 = arith.constant 0 : i32
    %c0_i32_2 = arith.constant 0 : i32
    return %c0_i32, %c0_i32_0, %c0_i32_1 : i32, i32, i32
  }
  func.func @transform_8(%arg0: i32) -> (i32, i32) {
    %c0_i32 = arith.constant 0 : i32
    %c0_i32_0 = arith.constant 0 : i32
    %c0_i32_1 = arith.constant 0 : i32
    return %c0_i32, %c0_i32_0 : i32, i32
  }
  func.func @transform_9(%arg0: i32) -> (i32, i32) {
    %c0_i32 = arith.constant 0 : i32
    %c0_i32_0 = arith.constant 0 : i32
    %c0_i32_1 = arith.constant 0 : i32
    return %c0_i32, %c0_i32_0 : i32, i32
  }
  func.func @transform_10(%arg0: i32) -> (i32, i32) {
    %c0_i32 = arith.constant 0 : i32
    %c0_i32_0 = arith.constant 0 : i32
    %c0_i32_1 = arith.constant 0 : i32
    return %c0_i32, %c0_i32_0 : i32, i32
  }
  func.func @transform_11(%arg0: i32) -> (i32, i32) {
    %c0_i32 = arith.constant 0 : i32
    %c0_i32_0 = arith.constant 0 : i32
    %c0_i32_1 = arith.constant 0 : i32
    return %c0_i32, %c0_i32_0 : i32, i32
  }
  func.func @transform_12(%arg0: i32) -> (i32, i32) {
    %c0_i32 = arith.constant 0 : i32
    %c0_i32_0 = arith.constant 0 : i32
    %c0_i32_1 = arith.constant 0 : i32
    return %c0_i32, %c0_i32_0 : i32, i32
  }
  func.func @transform_13(%arg0: i32) -> (i32, i32) {
    %c0_i32 = arith.constant 0 : i32
    %c0_i32_0 = arith.constant 0 : i32
    %c0_i32_1 = arith.constant 0 : i32
    return %c0_i32, %c0_i32_0 : i32, i32
  }
  func.func @transform_14(%arg0: i32) -> (i32, i32) {
    %c0_i32 = arith.constant 0 : i32
    %c0_i32_0 = arith.constant 0 : i32
    %c0_i32_1 = arith.constant 0 : i32
    return %c0_i32, %c0_i32_0 : i32, i32
  }
  func.func @transform_15(%arg0: i32) -> (i32, i32) {
    %c0_i32 = arith.constant 0 : i32
    %c0_i32_0 = arith.constant 0 : i32
    %c0_i32_1 = arith.constant 0 : i32
    return %c0_i32, %c0_i32_0 : i32, i32
  }
  func.func @transform_16(%arg0: i32) -> (i32, i32) {
    %c0_i32 = arith.constant 0 : i32
    %c0_i32_0 = arith.constant 0 : i32
    %c0_i32_1 = arith.constant 0 : i32
    return %c0_i32, %c0_i32_0 : i32, i32
  }
  func.func @transform_17(%arg0: i32) -> (i32, i32, i32) {
    %c0_i32 = arith.constant 0 : i32
    %c0_i32_0 = arith.constant 0 : i32
    %c0_i32_1 = arith.constant 0 : i32
    return %arg0, %c0_i32, %c0_i32_0 : i32, i32, i32
  }
}

</mosaic_0001>

<bundles_post_ra>
// kernel: tpu_custom_call.1
= control target key start
LH: loop header
LB: loop body
LE: loop exit
PB: predicated region body
PF: predicated region fallthrough
CT: control target
= control target key end

     0   :  { %s14903_s0 = inlined_call_operand.hbm [shape: f32[32,8,32], index: 0, kind: input, shape index: {}]   ;;  %s14904_s1 = inlined_call_operand.vmem [shape: bf16[32,32], index: 1, kind: input, shape index: {}]   ;;  %s14905_s2 = inlined_call_operand.vmem [shape: f32[1,32], index: 2, kind: input, shape index: {}]   ;;  %s14906_s3 = inlined_call_operand.vmem [shape: bf16[32,32], index: 3, kind: input, shape index: {}]   ;;  %s14907_s4 = inlined_call_operand.vmem [shape: f32[1,32], index: 4, kind: input, shape index: {}]   ;;  %s14908_s5 = inlined_call_operand.vmem [shape: bf16[32,32], index: 5, kind: input, shape index: {}]   ;;  %s14909_s6 = inlined_call_operand.vmem [shape: f32[1,32], index: 6, kind: input, shape index: {}]   ;;  %s14910_s7 = inlined_call_operand.vmem [shape: bf16[4,8,32], index: 7, kind: input, shape index: {}]   ;;  %s14911_s8 = inlined_call_operand.vmem [shape: f32[1,32], index: 8, kind: input, shape index: {}]   ;;  %s14912_s9 = inlined_call_operand.vmem [shape: f32[1,32], index: 9, kind: input, shape index: {}]   ;;  %s14913_s10 = inlined_call_operand.vmem [shape: f32[1,32], index: 10, kind: input, shape index: {}]   ;;  %s14914_s11 = inlined_call_operand.vmem [shape: bf16[32,128], index: 11, kind: input, shape index: {}]   ;;  %s14915_s12 = inlined_call_operand.vmem [shape: f32[1,128], index: 12, kind: input, shape index: {}]   ;;  %s14916_s13 = inlined_call_operand.vmem [shape: bf16[128,32], index: 13, kind: input, shape index: {}]   ;;  %s14917_s14 = inlined_call_operand.vmem [shape: f32[1,32], index: 14, kind: input, shape index: {}]   ;;  %s14918_s15 = inlined_call_operand.vmem [shape: f32[1,32], index: 15, kind: input, shape index: {}]   ;;  %s14919_s16 = inlined_call_operand.vmem [shape: f32[1,32], index: 16, kind: input, shape index: {}]   ;;  %s14920_s17 = inlined_call_operand.hbm [shape: f32[32,8,32], index: 17, kind: output, shape index: {}]  }
   0x1   :  { %15008 = sst [smem:[#allocation64_spill]] %s14903_s0 }
   0x2   :  { %15009 = sst [smem:[#allocation65_spill]] %s14904_s1 }
   0x3   :  { %15010 = sst [smem:[#allocation66_spill]] %s14905_s2 }
   0x4   :  { %15011 = sst [smem:[#allocation67_spill]] %s14906_s3 }
   0x5   :  { %15012 = sst [smem:[#allocation68_spill]] %s14919_s16 }
   0x6   :  { %15013 = sst [smem:[#allocation69_spill]] %s14920_s17 }
   0x7   :  { %22 = vsyncpa [#allocation3], 0 }
   0x8   :  { %24 = vsyncpa [#allocation3 + $0x1], 0 }
   0x9   :  { %25 = vsyncpa [#allocation4], 0 }
   0xa   :  { %27 = vsyncpa [#allocation4 + $0x1], 0  ;;  %s11810_s24 = smov 0   ;;  %s11812_s25 = smov 0  }
   0xb   :  { %s11814_s26 = smov 0   ;;  %s11816_s27 = smov 0  }
   0xc LB: > { %15014 = sst [smem:[#allocation8_spill]] %s11695_s24  ;;  %s11831_s28 = sadd.s32 4294967295, %s11707_s27   ;;  %s11707_s27 = sphi %s11816_s27, %s15231_s27   ;;  %s11703_s26 = sphi %s11814_s26, %s15233_s26   ;;  %s11699_s25 = sphi %s11812_s25, %s15235_s25   ;;  %s11695_s24 = sphi %s11810_s24, %s15234_s24  }
   0xd   : > { %15015 = sst [smem:[#allocation9_spill]] %s11703_s26  ;;  %s9663_s29 = sadd.s32 4294967294, %s11707_s27  }
   0xe   : > { %15016 = sst [smem:[#allocation10_spill]] %s11831_s28  ;;  %s11835_s0 = sadd.s32 1, %s11707_s27  }
   0xf   : > { %15017 = sst [smem:[#allocation11_spill]] %s11835_s0  ;;  %s40_s30 = sadd.s32 1, %s11703_s26 }
  0x10   : > { %s37_s18 = ssub.s32 %s11707_s27, %s11835_s0  ;;  %p47_p0 = scmp.ne.s32.totalorder %s11703_s26, %s11699_s25 }
  0x11   : > { %p38_p1 = scmp.eq.s32.totalorder %s37_s18, 0  ;;  %p48_p2 = scmp.eq.s32.totalorder %s11707_s27, 0 }
  0x12   : > { %p53_p3 = scmp.ne.s32.totalorder %s11699_s25, %s11695_s24  ;;  %p54_p4 = scmp.eq.s32.totalorder %s11831_s28, 0 }
  0x13   : > { %s11847_s19 = scalar_select %p38_p1, %s11703_s26, %s40_s30  }
  0x14   : > { %p11849_p5 = por %p48_p2, %p47_p0  ;;  %p11853_p6 = por %p54_p4, %p53_p3 }
  0x15   : > { %15018 = sst [smem:[#allocation12_spill]] %s11847_s19  ;;  %p413_p7 = scmp.eq.s32.totalorder %s11831_s28, 1 }
  0x16   : > { %s15020_s20 = scalar_select %p11853_p6, 1, 0 }
  0x17   : > { %p419_p8 = scmp.eq.s32.totalorder %s9663_s29, 1  ;;  %p11220_p10 = scmp.lt.s32.totalorder %s11707_s27, 2 }
  0x18   : > { %p11860_p11 = por %p413_p7, %p47_p0  ;;  %s487_s23 = sand.u32 1, %s11703_s26  }
  0x19   : > { %p11864_p12 = por %p419_p8, %p53_p3  ;;  %s9898_s30 = sshll.u32 %s11707_s27, 11 }
  0x1a   : > { %s15021_s21 = scalar_select %p11860_p11, 1, 0 }
  0x1b   : > { %s15023_s22 = scalar_select %p11864_p12, 1, 0 }
  0x1c   : > { %15022 = sst [smem:[#allocation13_spill]] %s15021_s21  ;;  %s9666_s18 = sshll.u32 %s487_s23, 7 }
  0x1d   : > { %15024 = sst [smem:[#allocation14_spill]] %s15023_s22  ;;  %s491_s29 = scalar_lea.vmem [#allocation2], %s9666_s18 }
  0x1e   : > { %s15025_s24 = sld [smem:[#allocation64_spill]]  ;;  %s498_s28 = sshll.u32 %s491_s29, 4  ;;  %s11881_s28 = int_to_ptr.vmem [resolvable:$true] %s498_s28 }
  0x1f   : > { %p11877_p13 = pnand %p11220_p10, %p11849_p5  ;;  %s11883_s26 = scalar_lea.sflag [#allocation3], %s487_s23 }
  0x21   : > { %p11617_p1 = pneg %p11877_p13 }
  0x24   : > { %s15026_s17 = smov %s15025_s24  ;;  %s11873_s16 = scalar_lea.hbm %s15025_s24, %s9898_s30 }
  0x25   : > { %s11615_s22 = scalar_lea.hbm %s11873_s16, 2048  ;;  %s11620_s19 = scalar_lea.hbm %s15026_s17, 4096 }
  0x26   : > { %p11616_p0 = scmp.ne.s32.totalorder %s11873_s16, %s11615_s22  ;;  %p11621_p4 = scmp.lt.s32.totalorder %s11873_s16, %s15026_s17 }
  0x27   : > { %p11622_p5 = scmp.lt.s32.totalorder %s11620_s19, %s11615_s22 }
  0x28   : > { %p11618_p2 = pnand %p11617_p1, %p11616_p0 }
  0x29   : > { %p11623_p7 = por %p11622_p5, %p11621_p4 }
  0x2a   : > { %p11619_p3 = pneg %p11618_p2 }
  0x2c   : > { %p11624_p8 = pnand %p11623_p7, %p11619_p3 }
  0x2e   : > { %11627 = shalt.err (!%p11624_p8)
}
  0x2f   : > { %s11628_s23 = scalar_lea.vmem %s11881_s28, 2048  ;;  %s11709_s18 = smov [#allocation2]  }
  0x30   : > { %p11629_p10 = scmp.ne.s32.totalorder %s11881_s28, %s11628_s23  ;;  %s11633_s29 = sshll.u32 %s11709_s18, 4  ;;  %s11634_s29 = int_to_ptr.vmem [resolvable:$false] %s11633_s29 }
  0x31   : > { %s11635_s24 = scalar_lea.vmem %s11634_s29, 4096  ;;  %p11636_p2 = scmp.lt.s32.totalorder %s11881_s28, %s11634_s29 }
  0x32   : > { %p11631_p9 = pnand %p11629_p10, %p11617_p1  ;;  %p11637_p12 = scmp.lt.s32.totalorder %s11635_s24, %s11628_s23 }
  0x34   : > { %p11632_p0 = pneg %p11631_p9  ;;  %p11638_p11 = por %p11637_p12, %p11636_p2 }
  0x36   : > { %p11639_p6 = pnand %p11638_p11, %p11632_p0 }
  0x38   : > { %11642 = shalt.err (!%p11639_p6)
}
  0x39   : > { %s11710_s22 = smov 128   ;;  %s11711_s0 = smov 8  }
  0x3a   : > { %11215 = dma.hbm_to_vmem [thread:$0]  (!%p11877_p13), %s11873_s16, 2048, %s11881_s28, %s11883_s26, %s11710_s22, %s11710_s22, %s11711_s0  }
  0x3b   : > { %p9669_p9 = scmp.ge.s32.totalorder %s11707_s27, 1  ;;  %p506_p1 = scmp.lt.s32.totalorder %s11707_s27, 3 }
  0x3d   : > { %p507_p3 = pnand %p9669_p9, %p506_p1 }
  0x3f   : > { %510 = sbr.rel (%p507_p3) target bundleno = 4709 (0x1265), region = 88 }
  0x44   : > { %s11907_s19 = sand.u32 1, %s11699_s25   ;;  %p15028_p6 = scmp.ne.s32.totalorder %s15020_s20, 0 }
  0x45   : > { %s9670_s1 = sshll.u32 %s11907_s19, 7  ;;  %s513_s30 = scalar_lea.sflag [#allocation3], %s11907_s19 }
  0x46   : > { %s11913_s23 = scalar_lea.vmem [#allocation2], %s9670_s1 }
  0x47   : > { %11686 = dma.done.wait (%p15028_p6), %s513_s30, 2048  }
  0x48   : > { %11688 = vsyncadd (%p15028_p6), %s513_s30, 4294965248  ;;  %s15029_s28 = sld [smem:[#allocation65_spill]]  ;;  %v578_v2 = vld [vmem:[%s11913_s23 + $0x40] sm:$0xff]  ;;  %v579_v3 = vld [vmem:[%s11913_s23 + $0x48] sm:$0xff]  ;;  %vm617_vm0 = vcmask 261120   ;;  %v14934_v30 = vmov 0.0  }
  0x49   : > { %v590_v4 = vpack.c.bf16 %v579_v3, %v578_v2  ;;  %v580_v5 = vld [vmem:[%s11913_s23 + $0x50] sm:$0xff]  ;;  %v581_v6 = vld [vmem:[%s11913_s23 + $0x58] sm:$0xff]  ;;  %v582_v7 = vld [vmem:[%s11913_s23 + $0x60] sm:$0xff]  ;;  %s15030_s3 = sld [smem:[#allocation67_spill]]  ;;  %vm11713_vm1 = vmmov 0   ;;  %vm1027_vm2 = vcmask 64512  }
  0x4a   : > { %v583_v8 = vld [vmem:[%s11913_s23 + $0x68] sm:$0xff]  ;;  %v591_v10 = vpack.c.bf16 %v581_v6, %v580_v5  ;;  %v570_v11 = vld [vmem:[%s11913_s23] sm:$0xff]  ;;  %v572_v14 = vld [vmem:[%s11913_s23 + $0x10] sm:$0xff]  ;;  %s15031_s2 = sld [smem:[#allocation66_spill]]  ;;  %vm1975_vm3 = vcmask 1043456   ;;  %s11714_s0 = smov 120  }
  0x4b   : > { %10260 = vmatprep.mubr.msk.bf16.mxu1 %vm617_vm0, %v590_v4  ;;  %v592_v12 = vpack.c.bf16 %v583_v8, %v582_v7  ;;  %v571_v13 = vld [vmem:[%s11913_s23 + $0x8] sm:$0xff]  ;;  %v573_v15 = vld [vmem:[%s11913_s23 + $0x18] sm:$0xff]  ;;  %v574_v18 = vld [vmem:[%s11913_s23 + $0x20] sm:$0xff]  ;;  %s11715_s30 = smov 112   ;;  %s11716_s20 = smov 104  }
  0x4c   : > { %v586_v17 = vpack.c.bf16 %v571_v13, %v570_v11  ;;  %v575_v19 = vld [vmem:[%s11913_s23 + $0x28] sm:$0xff]  ;;  %v584_v20 = vld [vmem:[%s11913_s23 + $0x70] sm:$0xff]  ;;  %v585_v21 = vld [vmem:[%s11913_s23 + $0x78] sm:$0xff]  ;;  %v587_v22 = vpack.c.bf16 %v573_v15, %v572_v14  ;;  %s15220_s16 = sld [smem:[#allocation68_spill]] }
  0x4d   : > { %v11267_v23 = vld [vmem:[%s14908_s5 + $0x8] sm:$0xff]   ;;  %v588_v24 = vpack.c.bf16 %v575_v19, %v574_v18  ;;  %v576_v25 = vld [vmem:[%s11913_s23 + $0x30] sm:$0xff]  ;;  %v577_v26 = vld [vmem:[%s11913_s23 + $0x38] sm:$0xff]  ;;  %v593_v27 = vpack.c.bf16 %v585_v21, %v584_v20  ;;  %s15222_s26 = sld [smem:[#allocation13_spill]] }
  0x4e   : > { %v11263_v0 = vld [vmem:[%s15029_s28 + $0x8] sm:$0xff]   ;;  %v11264_v1 = vld [vmem:[%s15029_s28] sm:$0xff]   ;;  %10252 = vmatprep.mubr.msk.bf16.mxu0 %vm617_vm0, %v586_v17  ;;  %v589_v28 = vpack.c.bf16 %v577_v26, %v576_v25  ;;  %s15223_s24 = sld [smem:[#allocation69_spill]] }
  0x4f   : > { %11200 = vmatprep.subr.bf16.mxu1 %v11263_v0  ;;  %10248 = vmatprep.subr.bf16.mxu0 %v11263_v0  ;;  %v11265_v9 = vld [vmem:[%s15030_s3 + $0x8] sm:$0xff]   ;;  %v11266_v16 = vld [vmem:[%s15030_s3] sm:$0xff]  }
  0x50   : > { %11202 = vmatpush3.bf16.msra.mxu1 %v11263_v0  ;;  %10249 = vmatpush3.bf16.msra.mxu0 %v11263_v0  ;;  %v11268_v29 = vld [vmem:[%s14908_s5] sm:$0xff]  }
  0x51   : > { %11201 = vmatprep.subr.bf16.mxu1 %v11264_v1  ;;  %10250 = vmatprep.subr.bf16.mxu0 %v11264_v1  ;;  %v11998_v38 = vld [vmem:[%s15031_s2] ss:$0 sm:$0xff] }
  0x52   : > { %v12008_v44 = vld [vmem:[%s14907_s4] ss:$0 sm:$0xff] }
  0x53   : > { %p15225_p12 = scmp.ne.s32.totalorder %s15222_s26, 0 }
  0x54   : > { %11203 = vmatpush3.bf16.msra.mxu1 %v11264_v1  ;;  %10251 = vmatpush3.bf16.msra.mxu0 %v11264_v1  ;;  %s15224_s22 = smov %s15223_s24 }
  0x55   : > { %10268 = vmatprep.subr.bf16.mxu1 %v11265_v9  ;;  %10288 = vmatprep.subr.bf16.mxu0 %v11267_v23 }
  0x57   : > { %10261 = vmatmul.mubr.msk.bf16.vlgmr.msra.gmra.mxu1 %vm617_vm0, %v591_v10  ;;  %10253 = vmatmul.mubr.msk.bf16.vlgmr.msra.gmra.mxu0 %vm617_vm0, %v587_v22 }
  0x58   : > { %10264 = vmatprep.mubr.msk.bf16.mxu1 %vm617_vm0, %v592_v12  ;;  %10269 = vmatpush3.bf16.msra.mxu1 %v11265_v9 }
  0x59   : > { %10270 = vmatprep.subr.bf16.mxu1 %v11266_v16  ;;  %10256 = vmatprep.mubr.msk.bf16.mxu0 %vm617_vm0, %v588_v24 }
  0x5a   : > { %10289 = vmatpush3.bf16.msra.mxu0 %v11267_v23 }
  0x5b   : > { %10290 = vmatprep.subr.bf16.mxu0 %v11268_v29 }
  0x5c   : > { %10271 = vmatpush3.bf16.msra.mxu1 %v11266_v16 }
  0x5d   : > { %10308 = vmatprep.subr.bf16.mxu1 %v14934_v30 }
  0x5e   : > { %10291 = vmatpush3.bf16.msra.mxu0 %v11268_v29 }
  0x5f   : > { %10265 = vmatmul.mubr.msk.bf16.gmra.mxu1 %vm617_vm0, %v593_v27  ;;  %10257 = vmatmul.mubr.msk.bf16.gmra.mxu0 %vm617_vm0, %v589_v28 }
  0x60   : > { %10272 = vmatprep.mubr.msk.bf16.mxu1 %vm617_vm0, %v586_v17  ;;  %10292 = vmatprep.mubr.msk.bf16.mxu0 %vm617_vm0, %v586_v17 }
  0x61   : > { %10332 = vmatprep.subr.bf16.mxu0 %v14934_v30 }
  0x67   : > { %10273 = vmatmul.mubr.msk.bf16.vlgmr.msra.gmra.mxu1 %vm617_vm0, %v587_v22  ;;  %10293 = vmatmul.mubr.msk.bf16.vlgmr.msra.gmra.mxu0 %vm617_vm0, %v587_v22 }
  0x68   : > { %10276 = vmatprep.mubr.msk.bf16.mxu1 %vm617_vm0, %v588_v24  ;;  %10296 = vmatprep.mubr.msk.bf16.mxu0 %vm617_vm0, %v588_v24 }
  0x6f   : > { %10277 = vmatmul.mubr.msk.bf16.gmra.mxu1 %vm617_vm0, %v589_v28  ;;  %10297 = vmatmul.mubr.msk.bf16.gmra.mxu0 %vm617_vm0, %v589_v28 }
  0x70   : > { %10280 = vmatprep.mubr.msk.bf16.mxu1 %vm617_vm0, %v590_v4  ;;  %10300 = vmatprep.mubr.msk.bf16.mxu0 %vm617_vm0, %v590_v4 }
  0x77   : > { %10281 = vmatmul.mubr.msk.bf16.gmra.mxu1 %vm617_vm0, %v591_v10  ;;  %10301 = vmatmul.mubr.msk.bf16.gmra.mxu0 %vm617_vm0, %v591_v10 }
  0x78   : > { %10284 = vmatprep.mubr.msk.bf16.mxu1 %vm617_vm0, %v592_v12  ;;  %10304 = vmatprep.mubr.msk.bf16.mxu0 %vm617_vm0, %v592_v12 }
  0x7f   : > { %10285 = vmatmul.mubr.msk.bf16.gmra.mxu1 %vm617_vm0, %v593_v27  ;;  %10305 = vmatmul.mubr.msk.bf16.gmra.mxu0 %vm617_vm0, %v593_v27 }
  0x80   : > { %10310 = vmatprep.mubr.msk.bf16.mxu1 %vm11713_vm1, %v14934_v30  ;;  %10334 = vmatprep.mubr.msk.bf16.mxu0 %vm11713_vm1, %v14934_v30 }
 0x117   : > { %v11983_v31 = vpop.f32.mrf.mxu1  ;;  %v10254_v37 = vpop.f32.mrf.mxu0 }
 0x118   : > { %v685_v19 = vadd.f32 %v10254_v37, %v11998_v38 }
 0x119   : > { %v11985_v32 = vpop.f32.mrf.mxu1  ;;  %v676_v42 = vpop.f32.mrf.mxu0 }
 0x11a   : > { %v677_v56 = vadd.f32 %v11998_v38, %v676_v42  ;;  %v12077_v24 = vpack.c.bf16 %v685_v19, %v685_v19  ;;  %v709_v37 = vadd.f32 %v11998_v38, %v11985_v32 }
 0x11b   : > { %v11987_v33 = vpop.f32.mrf.mxu1  ;;  %v12010_v46 = vpop.f32.mrf.mxu0 }
 0x11c   : > { %v12026_v63 = vpack.c.bf16 %v677_v56, %v677_v56  ;;  %v12103_v32 = vpack.c.bf16 %v709_v37, %v709_v37 }
 0x11d   : > { %v11989_v34 = vpop.f32.mrf.mxu1  ;;  %v679_v51 = vpop.f32.mrf.mxu0 }
 0x11e   : > { %v680_v8 = vadd.f32 %v11998_v38, %v679_v51  ;;  %15033 = vst [vmem:[#allocation16_spill] sm:$0xff] %v12103_v32  ;;  %v712_v19 = vadd.f32 %v11998_v38, %v11989_v34 }
 0x11f   : > { %v11991_v35 = vpop.f32.mrf.mxu1  ;;  %v10258_v55 = vpop.f32.mrf.mxu0 }
 0x120   : > { %v12049_v12 = vpack.c.bf16 %v680_v8, %v680_v8  ;;  %v701_v17 = vadd.f32 %v10258_v55, %v11998_v38 }
 0x121   : > { %v11993_v36 = vpop.f32.mrf.mxu1  ;;  %v692_v60 = vpop.f32.mrf.mxu0 }
 0x122   : > { %v693_v5 = vadd.f32 %v11998_v38, %v692_v60  ;;  %v12075_v23 = vpack.c.bf16 %v701_v17, %v701_v17 }
 0x123   : > { %v10267_v39 = vpop.f32.mrf.mxu1 }
 0x124   : > { %v12001_v40 = vadd.f32 %v10267_v39, %v11998_v38  ;;  %v12047_v11 = vpack.c.bf16 %v693_v5, %v693_v5  ;;  %v688_v39 = vadd.f32 %v12010_v46, %v11998_v38 }
 0x125   : > { %v12003_v41 = vpop.f32.mrf.mxu1 }
 0x127   : > { %v10274_v43 = vpop.f32.mrf.mxu1 }
 0x128   : > { %v805_v2 = vadd.f32 %v10274_v43, %v12008_v44  ;;  %v10259_v43 = vpop.f32.mrf.mxu0 }
 0x129   : > { %v796_v45 = vpop.f32.mrf.mxu1 }
 0x12a   : > { %v797_v47 = vadd.f32 %v12008_v44, %v796_v45  ;;  %v12045_v10 = vpack.c.bf16 %v805_v2, %v805_v2  ;;  %v695_v51 = vpop.f32.mrf.mxu0  ;;  %v725_v2 = vadd.f32 %v11998_v38, %v11993_v36 }
 0x12b   : > { %v10275_v48 = vpop.f32.mrf.mxu1  ;;  %v696_v55 = vadd.f32 %v11998_v38, %v695_v51 }
 0x12c   : > { %v12013_v49 = vpack.c.bf16 %v797_v47, %v797_v47  ;;  %v808_v16 = vadd.f32 %v10275_v48, %v12008_v44  ;;  %v1124_v18 = vsel %vm1027_vm2, %v12045_v10, 0  ;;  %v12105_v48 = vpack.c.bf16 %v688_v39, %v688_v39  ;;  %v10294_v17 = vpop.f32.mrf.mxu0 }
 0x12d   : > { %v799_v50 = vpop.f32.mrf.mxu1  ;;  %v12134_v60 = vpack.c.bf16 %v696_v55, %v696_v55 }
 0x12e   : > { %v800_v52 = vadd.f32 %v12008_v44, %v799_v50  ;;  %v1032_v53 = vsel %vm1027_vm2, %v12013_v49, 0  ;;  %v12073_v22 = vpack.c.bf16 %v808_v16, %v808_v16 }
 0x12f   : > { %v10278_v54 = vpop.f32.mrf.mxu1  ;;  %10309 = vmatpush3.bf16.xpose.msra.mxu1 %v1032_v53 }
 0x130   : > { %10314 = vmatprep.subr.bf16.mxu1 %v14934_v30  ;;  %v12020_v58 = vpack.c.bf16 %v800_v52, %v800_v52  ;;  %v821_v62 = vadd.f32 %v10278_v54, %v12008_v44  ;;  %v1170_v29 = vsel %vm1027_vm2, %v12073_v22, 0  ;;  %v717_v54 = vadd.f32 %v11983_v31, %v11998_v38 }
 0x131   : > { %v812_v57 = vpop.f32.mrf.mxu1 }
 0x132   : > { %v813_v59 = vadd.f32 %v12008_v44, %v812_v57  ;;  %v1078_v3 = vsel %vm1027_vm2, %v12020_v58, 0  ;;  %v12038_v7 = vpack.c.bf16 %v821_v62, %v821_v62 }
 0x133   : > { %v12023_v61 = vpop.f32.mrf.mxu1 }
 0x134   : > { %v12028_v0 = vpack.c.bf16 %v813_v59, %v813_v59  ;;  %v1308_v13 = vsel %vm1027_vm2, %v12038_v7, 0  ;;  %v824_v52 = vadd.f32 %v12023_v61, %v12008_v44  ;;  %v12131_v59 = vpack.c.bf16 %v717_v54, %v717_v54 }
 0x135   : > { %v815_v1 = vpop.f32.mrf.mxu1 }
 0x136   : > { %10311 = vmatmul.mubr.msk.bf16.vlgmr.msra.gmra.mxu1 %vm1027_vm2, %v12026_v63  ;;  %v1216_v4 = vsel %vm1027_vm2, %v12028_v0, 0  ;;  %v816_v28 = vadd.f32 %v12008_v44, %v815_v1  ;;  %v12129_v57 = vpack.c.bf16 %v824_v52, %v824_v52  ;;  %15035 = vst [vmem:[#allocation18_spill] sm:$0xff] %v12131_v59 }
 0x137   : > { %10315 = vmatpush3.bf16.xpose.msra.mxu1 %v1078_v3  ;;  %10333 = vmatpush3.bf16.xpose.msra.mxu0 %v1216_v4  ;;  %v10282_v6 = vpop.f32.mrf.mxu1  ;;  %v704_v3 = vadd.f32 %v10259_v43, %v11998_v38 }
 0x138   : > { %10316 = vmatprep.mubr.msk.bf16.mxu1 %vm11713_vm1, %v14934_v30  ;;  %10320 = vmatprep.subr.bf16.mxu1 %v14934_v30  ;;  %v837_v25 = vadd.f32 %v10282_v6, %v12008_v44  ;;  %v12101_v47 = vpack.c.bf16 %v816_v28, %v816_v28  ;;  %v1354_v1 = vsel %vm1027_vm2, %v12129_v57, 0  ;;  %v12158_v6 = vpack.c.bf16 %v725_v2, %v725_v2 }
 0x139   : > { %10344 = vmatprep.subr.bf16.mxu0 %v14934_v30  ;;  %v828_v9 = vpop.f32.mrf.mxu1  ;;  %v12160_v8 = vpack.c.bf16 %v704_v3, %v704_v3  ;;  %v12195_v28 = vpack.c.bf16 %v712_v19, %v712_v19  ;;  %v728_v2 = vadd.f32 %v11998_v38, %v12003_v41 }
 0x13a   : > { %v829_v14 = vadd.f32 %v12008_v44, %v828_v9  ;;  %v12093_v42 = vpack.c.bf16 %v837_v25, %v837_v25  ;;  %v1262_v53 = vsel %vm1027_vm2, %v12101_v47, 0  ;;  %15038 = vst [vmem:[#allocation21_spill] sm:$0xff] %v12158_v6  ;;  %v12167_v9 = vld [vmem:[%s14909_s6] ss:$0 sm:$0xff] }
 0x13b   : > { %v12054_v15 = vpop.f32.mrf.mxu1  ;;  %15039 = vst [vmem:[#allocation22_spill] sm:$0xff] %v12160_v8  ;;  %15041 = vst [vmem:[#allocation24_spill] sm:$0xff] %v12195_v28 }
 0x13c   : > { %v12065_v20 = vpack.c.bf16 %v829_v14, %v829_v14  ;;  %15032 = vst [vmem:[#allocation15_spill] sm:$0xff] %v12093_v42  ;;  %v1492_v46 = vsel %vm1027_vm2, %v12093_v42, 0  ;;  %v840_v14 = vadd.f32 %v12054_v15, %v12008_v44  ;;  %v733_v15 = vadd.f32 %v11991_v35, %v11998_v38 }
 0x13d   : > { %v831_v21 = vpop.f32.mrf.mxu1 }
 0x13e   : > { %10317 = vmatmul.mubr.msk.bf16.vlgmr.msra.gmra.mxu1 %vm1027_vm2, %v12049_v12  ;;  %10335 = vmatmul.mubr.msk.bf16.vlgmr.msra.gmra.mxu0 %vm1027_vm2, %v12047_v11  ;;  %v1400_v26 = vsel %vm1027_vm2, %v12065_v20, 0  ;;  %v832_v62 = vadd.f32 %v12008_v44, %v831_v21  ;;  %v916_v21 = vpop.f32.mrf.mxu0  ;;  %v12197_v35 = vpack.c.bf16 %v733_v15, %v733_v15 }
 0x13f   : > { %10321 = vmatpush3.bf16.xpose.msra.mxu1 %v1124_v18  ;;  %10345 = vmatpush3.bf16.xpose.msra.mxu0 %v1308_v13  ;;  %v10286_v27 = vpop.f32.mrf.mxu1  ;;  %v12178_v18 = vadd.f32 %v10294_v17, %v12167_v9 }
 0x140   : > { %10322 = vmatprep.mubr.msk.bf16.mxu1 %vm11713_vm1, %v14934_v30  ;;  %10346 = vmatprep.mubr.msk.bf16.mxu0 %vm11713_vm1, %v14934_v30  ;;  %v853_v31 = vadd.f32 %v10286_v27, %v12008_v44  ;;  %v12156_v5 = vpack.c.bf16 %v832_v62, %v832_v62  ;;  %v10295_v27 = vpop.f32.mrf.mxu0  ;;  %15042 = vst [vmem:[#allocation25_spill] sm:$0xff] %v12197_v35 }
 0x141   : > { %10326 = vmatprep.subr.bf16.mxu1 %v14934_v30  ;;  %10356 = vmatprep.subr.bf16.mxu0 %v14934_v30  ;;  %v844_v45 = vpop.f32.mrf.mxu1  ;;  %v12193_v34 = vadd.f32 %v10295_v27, %v12167_v9 }
 0x142   : > { %v845_v50 = vadd.f32 %v12008_v44, %v844_v45  ;;  %v12148_v4 = vpack.c.bf16 %v853_v31, %v853_v31  ;;  %15037 = vst [vmem:[#allocation20_spill] sm:$0xff] %v12156_v5  ;;  %v1446_v16 = vsel %vm1027_vm2, %v12156_v5, 0  ;;  %v919_v37 = vpop.f32.mrf.mxu0 }
 0x143   : > { %v10287_v13 = vpop.f32.mrf.mxu1 }
 0x144   : > { %v12121_v56 = vpack.c.bf16 %v845_v50, %v845_v50  ;;  %15036 = vst [vmem:[#allocation19_spill] sm:$0xff] %v12148_v4  ;;  %v1676_v36 = vsel %vm1027_vm2, %v12148_v4, 0  ;;  %v10298_v43 = vpop.f32.mrf.mxu0  ;;  %v856_v31 = vadd.f32 %v10287_v13, %v12008_v44 }
 0x145   : > { %v847_v25 = vpop.f32.mrf.mxu1  ;;  %v12209_v45 = vadd.f32 %v10298_v43, %v12167_v9  ;;  %v917_v43 = vadd.f32 %v12167_v9, %v916_v21 }
 0x146   : > { %10323 = vmatmul.mubr.msk.bf16.vlgmr.msra.gmra.mxu1 %vm1027_vm2, %v12077_v24  ;;  %10347 = vmatmul.mubr.msk.bf16.vlgmr.msra.gmra.mxu0 %vm1027_vm2, %v12075_v23  ;;  %15034 = vst [vmem:[#allocation17_spill] sm:$0xff] %v12121_v56  ;;  %v1584_v61 = vsel %vm1027_vm2, %v12121_v56, 0  ;;  %v932_v51 = vpop.f32.mrf.mxu0 }
 0x147   : > { %10327 = vmatpush3.bf16.xpose.msra.mxu1 %v1170_v29  ;;  %10357 = vmatpush3.bf16.xpose.msra.mxu0 %v1400_v26  ;;  %v12190_v26 = vpack.c.bf16 %v840_v14, %v840_v14  ;;  %v848_v29 = vadd.f32 %v12008_v44, %v847_v25  ;;  %v12219_v52 = vadd.f32 %v12167_v9, %v932_v51 }
 0x148   : > { %10328 = vmatprep.mubr.msk.bf16.mxu1 %vm11713_vm1, %v14934_v30  ;;  %10358 = vmatprep.mubr.msk.bf16.mxu0 %vm11713_vm1, %v14934_v30  ;;  %v12240_v44 = vpack.c.bf16 %v856_v31, %v856_v31  ;;  %v12279_v51 = vpack.c.bf16 %v917_v43, %v917_v43 }
 0x149   : > { %10338 = vmatprep.subr.bf16.mxu1 %v14934_v30  ;;  %10368 = vmatprep.subr.bf16.mxu0 %v14934_v30  ;;  %15040 = vst [vmem:[#allocation23_spill] sm:$0xff] %v12190_v26  ;;  %v1538_v39 = vsel %vm1027_vm2, %v12190_v26, 0  ;;  %v12213_v50 = vpack.c.bf16 %v848_v29, %v848_v29 }
 0x14a   : > { %15045 = vst [vmem:[#allocation28_spill] sm:$0xff] %v12240_v44  ;;  %v1722_v17 = vsel %vm1027_vm2, %v12240_v44, 0  ;;  %15052 = vst [vmem:[#allocation35_spill] sm:$0xff] %v12279_v51  ;;  %v1977_v31 = vsel %vm1975_vm3, %v12279_v51, 0 }
 0x14b   : > { %15043 = vst [vmem:[#allocation26_spill] sm:$0xff] %v12213_v50 }
 0x14e   : > { %10329 = vmatmul.mubr.msk.bf16.vlgmr.msra.gmra.mxu1 %vm1027_vm2, %v12105_v48  ;;  %10359 = vmatmul.mubr.msk.bf16.vlgmr.msra.gmra.mxu0 %vm1027_vm2, %v12103_v32 }
 0x14f   : > { %10339 = vmatpush3.bf16.xpose.msra.mxu1 %v1262_v53  ;;  %10369 = vmatpush3.bf16.xpose.msra.mxu0 %v1492_v46  ;;  %v720_v46 = vadd.f32 %v11987_v33, %v11998_v38  ;;  %v10299_v53 = vpop.f32.mrf.mxu0  ;;  %v1630_v33 = vsel %vm1027_vm2, %v12213_v50, 0 }
 0x150   : > { %10340 = vmatprep.mubr.msk.bf16.mxu1 %vm11713_vm1, %v14934_v30  ;;  %10370 = vmatprep.mubr.msk.bf16.mxu0 %vm11713_vm1, %v14934_v30  ;;  %v12222_v54 = vadd.f32 %v10299_v53, %v12167_v9 }
 0x151   : > { %10350 = vmatprep.subr.bf16.mxu1 %v14934_v30  ;;  %10380 = vmatprep.subr.bf16.mxu0 %v14934_v30  ;;  %v12224_v55 = vpack.c.bf16 %v720_v46, %v720_v46  ;;  %v920_v46 = vadd.f32 %v12167_v9, %v919_v37 }
 0x153   : > { %15044 = vst [vmem:[#allocation27_spill] sm:$0xff] %v12224_v55  ;;  %v12281_v53 = vpack.c.bf16 %v920_v46, %v920_v46 }
 0x155   : > { %15053 = vst [vmem:[#allocation36_spill] sm:$0xff] %v12281_v53 }
 0x156   : > { %10341 = vmatmul.mubr.msk.bf16.vlgmr.msra.gmra.mxu1 %vm1027_vm2, %v12134_v60  ;;  %10371 = vmatmul.mubr.msk.bf16.vlgmr.msra.gmra.mxu0 %vm1027_vm2, %v12131_v59 }
 0x157   : > { %10351 = vmatpush3.bf16.xpose.msra.mxu1 %v1354_v1  ;;  %10381 = vmatpush3.bf16.xpose.msra.mxu0 %v1584_v61  ;;  %v12229_v61 = vpop.f32.mrf.mxu0 }
 0x158   : > { %10352 = vmatprep.mubr.msk.bf16.mxu1 %vm11713_vm1, %v14934_v30  ;;  %10382 = vmatprep.mubr.msk.bf16.mxu0 %vm11713_vm1, %v14934_v30 }
 0x159   : > { %10362 = vmatprep.subr.bf16.mxu1 %v14934_v30  ;;  %10392 = vmatprep.subr.bf16.mxu0 %v14934_v30  ;;  %v10302_v62 = vpop.f32.mrf.mxu0 }
 0x15a   : > { %v12236_v1 = vadd.f32 %v10302_v62, %v12167_v9 }
 0x15b   : > { %v948_v3 = vpop.f32.mrf.mxu0 }
 0x15d   : > { %v10303_v13 = vpop.f32.mrf.mxu0 }
 0x15e   : > { %10353 = vmatmul.mubr.msk.bf16.vlgmr.msra.gmra.mxu1 %vm1027_vm2, %v12160_v8  ;;  %10383 = vmatmul.mubr.msk.bf16.vlgmr.msra.gmra.mxu0 %vm1027_vm2, %v12158_v6  ;;  %v12247_v14 = vadd.f32 %v10303_v13, %v12167_v9 }
 0x15f   : > { %10363 = vmatpush3.bf16.xpose.msra.mxu1 %v1446_v16  ;;  %10393 = vmatpush3.bf16.xpose.msra.mxu0 %v1676_v36  ;;  %v12244_v36 = vadd.f32 %v12167_v9, %v948_v3  ;;  %v12249_v16 = vpack.c.bf16 %v728_v2, %v728_v2  ;;  %v12253_v19 = vpop.f32.mrf.mxu0 }
 0x160   : > { %10364 = vmatprep.mubr.msk.bf16.mxu1 %vm11713_vm1, %v14934_v30  ;;  %10394 = vmatprep.mubr.msk.bf16.mxu0 %vm11713_vm1, %v14934_v30  ;;  %15046 = vst [vmem:[#allocation29_spill] sm:$0xff] %v12247_v14 }
 0x161   : > { %10374 = vmatprep.subr.bf16.mxu1 %v14934_v30  ;;  %10404 = vmatprep.subr.bf16.mxu0 %v14934_v30  ;;  %15047 = vst [vmem:[#allocation30_spill] sm:$0xff] %v12249_v16  ;;  %v10306_v38 = vpop.f32.mrf.mxu0 }
 0x162   : > { %v12260_v41 = vadd.f32 %v10306_v38, %v12167_v9 }
 0x163   : > { %v964_v15 = vpop.f32.mrf.mxu0 }
 0x164   : > { %15048 = vst [vmem:[#allocation31_spill] sm:$0xff] %v12260_v41  ;;  %v12264_v25 = vadd.f32 %v12167_v9, %v964_v15 }
 0x165   : > { %v10307_v27 = vpop.f32.mrf.mxu0 }
 0x166   : > { %10365 = vmatmul.mubr.msk.bf16.vlgmr.msra.gmra.mxu1 %vm1027_vm2, %v12195_v28  ;;  %10395 = vmatmul.mubr.msk.bf16.vlgmr.msra.gmra.mxu0 %vm1027_vm2, %v12197_v35  ;;  %15049 = vst [vmem:[#allocation32_spill] sm:$0xff] %v12264_v25  ;;  %v12267_v29 = vadd.f32 %v10307_v27, %v12167_v9 }
 0x167   : > { %10375 = vmatpush3.bf16.xpose.msra.mxu1 %v1538_v39  ;;  %10376 = vmatprep.mubr.msk.bf16.mxu1 %vm11713_vm1, %v14934_v30  ;;  %v12271_v39 = vpack.c.bf16 %v12001_v40, %v12001_v40  ;;  %v2023_v40 = vsel %vm1975_vm3, %v12281_v53, 0  ;;  %v12293_v3 = vpop.f32.mrf.mxu0 }
 0x168   : > { %10386 = vmatprep.subr.bf16.mxu1 %v14934_v30  ;;  %10406 = vmatprep.mubr.msk.bf16.mxu0 %vm11713_vm1, %v14934_v30  ;;  %15050 = vst [vmem:[#allocation33_spill] sm:$0xff] %v12267_v29  ;;  %15054 = vst [vmem:[#allocation37_spill] sm:$0xff] %v12293_v3 }
 0x169   : > { %15051 = vst [vmem:[#allocation34_spill] sm:$0xff] %v12271_v39  ;;  %10405 = vmatpush3.bf16.msra.mxu0 %v1977_v31 }
 0x16a   : > { %10416 = vmatprep.subr.bf16.mxu0 %v14934_v30 }
 0x16e   : > { %10377 = vmatmul.mubr.msk.bf16.vlgmr.msra.gmra.mxu1 %vm1027_vm2, %v12224_v55 }
 0x16f   : > { %10387 = vmatpush3.bf16.xpose.msra.mxu1 %v1630_v33  ;;  %10388 = vmatprep.mubr.msk.bf16.mxu1 %vm11713_vm1, %v14934_v30 }
 0x170   : > { %10398 = vmatprep.subr.bf16.mxu1 %v14934_v30 }
 0x176   : > { %10389 = vmatmul.mubr.msk.bf16.vlgmr.msra.gmra.mxu1 %vm1027_vm2, %v12249_v16 }
 0x177   : > { %10399 = vmatpush3.bf16.xpose.msra.mxu1 %v1722_v17  ;;  %10400 = vmatprep.mubr.msk.bf16.mxu1 %vm11713_vm1, %v14934_v30 }
 0x178   : > { %10410 = vmatprep.subr.bf16.mxu1 %v14934_v30 }
 0x17e   : > { %10401 = vmatmul.mubr.msk.bf16.vlgmr.msra.gmra.mxu1 %vm1027_vm2, %v12271_v39 }
 0x17f   : > { %10412 = vmatprep.mubr.msk.bf16.mxu1 %vm11713_vm1, %v14934_v30  ;;  %10411 = vmatpush3.bf16.msra.mxu1 %v2023_v40 }
 0x180   : > { %10422 = vmatprep.subr.bf16.mxu1 %v14934_v30 }
 0x1f6   : > { %v1068_v21 = vpop.f32.mrf.mxu1 }
 0x1f7   : > { %v12289_v33 = vmul.f32 0.35355338, %v1068_v21 }
 0x1f8   : > { %v10312_v37 = vpop.f32.mrf.mxu1 }
 0x1f9   : > { %v1780_v62 = vsel %vm1027_vm2, %v12289_v33, -inf }
 0x1fa   : > { %1781 = vmax.xlane.f32.xlu0 %v1780_v62  ;;  %v1071_v2 = vpop.f32.mrf.mxu1 }
 0x1fc   : > { %v10313_v13 = vpop.f32.mrf.mxu1 }
 0x1fe   : > { %v1114_v17 = vpop.f32.mrf.mxu1  ;;  %v1252_v38 = vpop.f32.mrf.mxu0 }
 0x1ff   : > { %v12295_v15 = vmul.f32 0.35355338, %v1114_v17  ;;  %v12297_v27 = vmul.f32 0.35355338, %v1252_v38 }
 0x200   : > { %v10318_v43 = vpop.f32.mrf.mxu1  ;;  %v10336_v46 = vpop.f32.mrf.mxu0 }
 0x201   : > { %v1783_v31 = vsel %vm1027_vm2, %v12295_v15, -inf  ;;  %v1792_v37 = vsel %vm1027_vm2, %v12297_v27, -inf }
 0x202   : > { %v1255_v40 = vpop.f32.mrf.mxu0  ;;  %1784 = vmax.xlane.f32.xlu0 %v1783_v31  ;;  %v1117_v21 = vpop.f32.mrf.mxu1 }
 0x204   : > { %v10319_v62 = vpop.f32.mrf.mxu1  ;;  %v10337_v2 = vpop.f32.mrf.mxu0 }
 0x206   : > { %v1344_v13 = vpop.f32.mrf.mxu0  ;;  %1793 = vmax.xlane.f32.xlu0 %v1792_v37  ;;  %v1160_v30 = vpop.f32.mrf.mxu1 }
 0x207   : > { %v12303_v17 = vmul.f32 0.35355338, %v1344_v13  ;;  %v12305_v38 = vmul.f32 0.35355338, %v1160_v30 }
 0x208   : > { %v10324_v43 = vpop.f32.mrf.mxu1  ;;  %v10348_v46 = vpop.f32.mrf.mxu0 }
 0x209   : > { %v1798_v29 = vsel %vm1027_vm2, %v12303_v17, -inf  ;;  %v1786_v31 = vsel %vm1027_vm2, %v12305_v38, -inf }
 0x20a   : > { %v1347_v40 = vpop.f32.mrf.mxu0  ;;  %1799 = vmax.xlane.f32.xlu0 %v1798_v29  ;;  %1787 = vmax.xlane.f32.xlu1 %v1786_v31  ;;  %v1163_v21 = vpop.f32.mrf.mxu1 }
 0x20c   : > { %v10325_v62 = vpop.f32.mrf.mxu1  ;;  %v10349_v2 = vpop.f32.mrf.mxu0 }
 0x20e   : > { %v1206_v37 = vpop.f32.mrf.mxu1  ;;  %v1436_v3 = vpop.f32.mrf.mxu0 }
 0x20f   : > { %v12311_v13 = vmul.f32 0.35355338, %v1206_v37  ;;  %v12313_v30 = vmul.f32 0.35355338, %v1436_v3 }
 0x210   : > { %v10330_v43 = vpop.f32.mrf.mxu1  ;;  %v10360_v46 = vpop.f32.mrf.mxu0 }
 0x211   : > { %v1804_v53 = vsel %vm1027_vm2, %v12313_v30, -inf  ;;  %v1789_v39 = vsel %vm1027_vm2, %v12311_v13, -inf }
 0x212   : > { %v1439_v40 = vpop.f32.mrf.mxu0  ;;  %1805 = vmax.xlane.f32.xlu0 %v1804_v53  ;;  %1790 = vmax.xlane.f32.xlu1 %v1789_v39  ;;  %v1209_v29 = vpop.f32.mrf.mxu1 }
 0x214   : > { %v10331_v31 = vpop.f32.mrf.mxu1  ;;  %v10361_v21 = vpop.f32.mrf.mxu0 }
 0x216   : > { %v1298_v62 = vpop.f32.mrf.mxu1  ;;  %v1528_v2 = vpop.f32.mrf.mxu0 }
 0x217   : > { %v12319_v37 = vmul.f32 0.35355338, %v1298_v62  ;;  %v12321_v3 = vmul.f32 0.35355338, %v1528_v2 }
 0x218   : > { %v10342_v43 = vpop.f32.mrf.mxu1  ;;  %v10372_v46 = vpop.f32.mrf.mxu0 }
 0x219   : > { %v1810_v44 = vsel %vm1027_vm2, %v12321_v3, -inf  ;;  %v1795_v16 = vsel %vm1027_vm2, %v12319_v37, -inf }
 0x21a   : > { %v1531_v40 = vpop.f32.mrf.mxu0  ;;  %1811 = vmax.xlane.f32.xlu0 %v1810_v44  ;;  %1796 = vmax.xlane.f32.xlu1 %v1795_v16  ;;  %v1301_v39 = vpop.f32.mrf.mxu1 }
 0x21c   : > { %v10343_v53 = vpop.f32.mrf.mxu1  ;;  %v10373_v29 = vpop.f32.mrf.mxu0 }
 0x21e   : > { %v1390_v31 = vpop.f32.mrf.mxu1  ;;  %v1620_v21 = vpop.f32.mrf.mxu0 }
 0x21f   : > { %v12327_v62 = vmul.f32 0.35355338, %v1390_v31  ;;  %v12329_v2 = vmul.f32 0.35355338, %v1620_v21 }
 0x220   : > { %v10354_v43 = vpop.f32.mrf.mxu1  ;;  %v10384_v46 = vpop.f32.mrf.mxu0 }
 0x221   : > { %v1816_v50 = vsel %vm1027_vm2, %v12329_v2, -inf  ;;  %v1801_v55 = vsel %vm1027_vm2, %v12327_v62, -inf }
 0x222   : > { %v1623_v40 = vpop.f32.mrf.mxu0  ;;  %1817 = vmax.xlane.f32.xlu0 %v1816_v50  ;;  %1802 = vmax.xlane.f32.xlu1 %v1801_v55  ;;  %v1393_v44 = vpop.f32.mrf.mxu1 }
 0x224   : > { %v10355_v16 = vpop.f32.mrf.mxu1  ;;  %v10385_v39 = vpop.f32.mrf.mxu0 }
 0x226   : > { %v1482_v53 = vpop.f32.mrf.mxu1  ;;  %v1712_v29 = vpop.f32.mrf.mxu0 }
 0x227   : > { %v12335_v31 = vmul.f32 0.35355338, %v1482_v53  ;;  %v12337_v21 = vmul.f32 0.35355338, %v1712_v29 }
 0x228   : > { %v10366_v43 = vpop.f32.mrf.mxu1  ;;  %v10396_v46 = vpop.f32.mrf.mxu0 }
 0x229   : > { %v1822_v26 = vsel %vm1027_vm2, %v12337_v21, -inf  ;;  %v1807_v41 = vsel %vm1027_vm2, %v12335_v31, -inf }
 0x22a   : > { %v1715_v40 = vpop.f32.mrf.mxu0  ;;  %1823 = vmax.xlane.f32.xlu0 %v1822_v26  ;;  %1808 = vmax.xlane.f32.xlu1 %v1807_v41  ;;  %v1485_v50 = vpop.f32.mrf.mxu1 }
 0x22c   : > { %v10367_v55 = vpop.f32.mrf.mxu1  ;;  %v10397_v44 = vpop.f32.mrf.mxu0 }
 0x22e   : > { %v1574_v16 = vpop.f32.mrf.mxu1 }
 0x22f   : > { %v12343_v39 = vmul.f32 0.35355338, %v1574_v16 }
 0x230   : > { %v10378_v53 = vpop.f32.mrf.mxu1 }
 0x231   : > { %v1813_v29 = vsel %vm1027_vm2, %v12343_v39, -inf }
 0x232   : > { %1814 = vmax.xlane.f32.xlu1 %v1813_v29  ;;  %v1577_v43 = vpop.f32.mrf.mxu1 }
 0x234   : > { %v10379_v46 = vpop.f32.mrf.mxu1 }
 0x236   : > { %v1666_v28 = vpop.f32.mrf.mxu1 }
 0x237   : > { %v12347_v5 = vmul.f32 0.35355338, %v1666_v28 }
 0x238   : > { %v10390_v14 = vpop.f32.mrf.mxu1 }
 0x239   : > { %v1819_v26 = vsel %vm1027_vm2, %v12347_v5, -inf }
 0x23a   : > { %1820 = vmax.xlane.f32.xlu1 %v1819_v26  ;;  %v1669_v41 = vpop.f32.mrf.mxu1 }
 0x23c   : > { %v10391_v40 = vpop.f32.mrf.mxu1 }
 0x23e   : > { %v1758_v50 = vpop.f32.mrf.mxu1 }
 0x23f   : > { %v12351_v55 = vmul.f32 0.35355338, %v1758_v50 }
 0x240   : > { %v10402_v44 = vpop.f32.mrf.mxu1 }
 0x241   : > { %v1825_v16 = vsel %vm1027_vm2, %v12351_v55, -inf }
 0x242   : > { %1826 = vmax.xlane.f32.xlu1 %v1825_v16  ;;  %v1761_v53 = vpop.f32.mrf.mxu1 }
 0x244   : > { %v10403_v29 = vpop.f32.mrf.mxu1 }
 0x283   : > { %v1782_v43 = vpop.xlane.xlu0 %1781 }
 0x284   : > { %v1828_v28 = vsub.f32 %v12289_v33, %v1782_v43 }
 0x286   : > { %v1844_v14 = vmul.f32 1.442695, %v1828_v28 }
 0x288   : > { %11279 = vpow2.f32 %v1844_v14 }
 0x28b   : > { %v1785_v46 = vpop.xlane.xlu0 %1784 }
 0x28c   : > { %v1829_v26 = vsub.f32 %v12295_v15, %v1785_v46 }
 0x28e   : > { %v1846_v41 = vmul.f32 1.442695, %v1829_v26 }
 0x28f   : > { %v1794_v40 = vpop.xlane.xlu0 %1793 }
 0x290   : > { %11281 = vpow2.f32 %v1846_v41  ;;  %v1832_v50 = vsub.f32 %v12297_v27, %v1794_v40 }
 0x292   : > { %v1852_v29 = vmul.f32 1.442695, %v1832_v50 }
 0x293   : > { %v1788_v44 = vpop.xlane.xlu1 %1787  ;;  %v1800_v25 = vpop.xlane.xlu0 %1799 }
 0x294   : > { %v1830_v8 = vsub.f32 %v12305_v38, %v1788_v44  ;;  %v1834_v43 = vsub.f32 %v12303_v17, %v1800_v25 }
 0x295   : > { %v12359_v16 = vpop.eup %11279 }
 0x296   : > { %v1848_v53 = vmul.f32 1.442695, %v1830_v8  ;;  %v1876_v33 = vsel %vm1027_vm2, %v12359_v16, 0.0  ;;  %v1856_v15 = vmul.f32 1.442695, %v1834_v43 }
 0x297   : > { %1877 = vadd.xlane.f32.xlu0 %v1876_v33 }
 0x298   : > { %11283 = vpow2.f32 %v1848_v53 }
 0x299   : > { %11285 = vpow2.f32 %v1852_v29 }
 0x29a   : > { %11287 = vpow2.f32 %v1856_v15 }
 0x29b   : > { %v1806_v28 = vpop.xlane.xlu0 %1805  ;;  %v1791_v14 = vpop.xlane.xlu1 %1790 }
 0x29c   : > { %v1836_v27 = vsub.f32 %v12313_v30, %v1806_v28  ;;  %v1831_v46 = vsub.f32 %v12311_v13, %v1791_v14 }
 0x29d   : > { %v12366_v38 = vpop.eup %11281 }
 0x29e   : > { %v1850_v26 = vmul.f32 1.442695, %v1831_v46  ;;  %v1879_v8 = vsel %vm1027_vm2, %v12366_v38, 0.0  ;;  %v1860_v41 = vmul.f32 1.442695, %v1836_v27 }
 0x29f   : > { %1880 = vadd.xlane.f32.xlu1 %v1879_v8 }
 0x2a0   : > { %11289 = vpow2.f32 %v1850_v26 }
 0x2a1   : > { %11291 = vpow2.f32 %v1860_v41 }
 0x2a3   : > { %v1812_v25 = vpop.xlane.xlu0 %1811  ;;  %v1797_v17 = vpop.xlane.xlu1 %1796 }
 0x2a4   : > { %v1838_v40 = vsub.f32 %v12321_v3, %v1812_v25  ;;  %v1833_v50 = vsub.f32 %v12319_v37, %v1797_v17 }
 0x2a5   : > { %v12372_v30 = vpop.eup %11283 }
 0x2a6   : > { %v1864_v13 = vmul.f32 1.442695, %v1838_v40  ;;  %v1854_v44 = vmul.f32 1.442695, %v1833_v50  ;;  %v1882_v53 = vsel %vm1027_vm2, %v12372_v30, 0.0  ;;  %v12376_v33 = vpop.eup %11285 }
 0x2a7   : > { %1883 = vadd.xlane.f32.xlu0 %v1882_v53  ;;  %v1888_v43 = vsel %vm1027_vm2, %v12376_v33, 0.0  ;;  %v12380_v3 = vpop.eup %11287 }
 0x2a8   : > { %11293 = vpow2.f32 %v1864_v13  ;;  %v1894_v26 = vsel %vm1027_vm2, %v12380_v3, 0.0 }
 0x2a9   : > { %11295 = vpow2.f32 %v1854_v44 }
 0x2ab   : > { %v1818_v29 = vpop.xlane.xlu0 %1817  ;;  %v1803_v15 = vpop.xlane.xlu1 %1802  ;;  %1889 = vadd.xlane.f32.xlu0 %v1888_v43 }
 0x2ac   : > { %v1840_v37 = vsub.f32 %v12329_v2, %v1818_v29  ;;  %v1835_v28 = vsub.f32 %v12327_v62, %v1803_v15 }
 0x2ad   : > { %v12384_v14 = vpop.eup %11289 }
 0x2ae   : > { %v1868_v27 = vmul.f32 1.442695, %v1840_v37  ;;  %v1858_v46 = vmul.f32 1.442695, %v1835_v28  ;;  %v1885_v8 = vsel %vm1027_vm2, %v12384_v14, 0.0  ;;  %v12390_v41 = vpop.eup %11291 }
 0x2af   : > { %1895 = vadd.xlane.f32.xlu0 %v1894_v26  ;;  %1886 = vadd.xlane.f32.xlu1 %v1885_v8  ;;  %v1900_v62 = vsel %vm1027_vm2, %v12390_v41, 0.0 }
 0x2b0   : > { %11297 = vpow2.f32 %v1868_v27 }
 0x2b1   : > { %11299 = vpow2.f32 %v1858_v46 }
 0x2b3   : > { %v1824_v2 = vpop.xlane.xlu0 %1823  ;;  %v1809_v25 = vpop.xlane.xlu1 %1808  ;;  %1901 = vadd.xlane.f32.xlu0 %v1900_v62 }
 0x2b4   : > { %v1842_v17 = vsub.f32 %v12337_v21, %v1824_v2  ;;  %v1837_v40 = vsub.f32 %v12335_v31, %v1809_v25 }
 0x2b5   : > { %v12396_v50 = vpop.eup %11293 }
 0x2b6   : > { %v12398_v13 = vpop.eup %11295  ;;  %v1872_v44 = vmul.f32 1.442695, %v1842_v17  ;;  %v1862_v53 = vmul.f32 1.442695, %v1837_v40  ;;  %v1906_v29 = vsel %vm1027_vm2, %v12396_v50, 0.0 }
 0x2b7   : > { %v1891_v43 = vsel %vm1027_vm2, %v12398_v13, 0.0  ;;  %1907 = vadd.xlane.f32.xlu0 %v1906_v29 }
 0x2b8   : > { %11301 = vpow2.f32 %v1872_v44  ;;  %1892 = vadd.xlane.f32.xlu1 %v1891_v43  ;;  %v12468_v43 = vpack.c.bf16 %v12178_v18, %v12178_v18 }
 0x2b9   : > { %11303 = vpow2.f32 %v1862_v53 }
 0x2ba   : > { %15055 = vst [vmem:[#allocation38_spill] sm:$0xff] %v12468_v43 }
 0x2bb   : > { %v1815_v8 = vpop.xlane.xlu1 %1814 }
 0x2bc   : > { %v1839_v2 = vsub.f32 %v12343_v39, %v1815_v8  ;;  %v12481_v8 = vpack.c.bf16 %v12209_v45, %v12209_v45  ;;  %v2069_v45 = vsel %vm1975_vm3, %v12468_v43, 0 }
 0x2bd   : > { %v12404_v21 = vpop.eup %11297 }
 0x2be   : > { %v12406_v15 = vpop.eup %11299  ;;  %v1912_v31 = vsel %vm1027_vm2, %v12404_v21, 0.0  ;;  %v1866_v25 = vmul.f32 1.442695, %v1839_v2  ;;  %15057 = vst [vmem:[#allocation40_spill] sm:$0xff] %v12481_v8 }
 0x2bf   : > { %1913 = vadd.xlane.f32.xlu0 %v1912_v31  ;;  %v1897_v37 = vsel %vm1027_vm2, %v12406_v15, 0.0 }
 0x2c0   : > { %1898 = vadd.xlane.f32.xlu1 %v1897_v37  ;;  %11305 = vpow2.f32 %v1866_v25  ;;  %v12475_v37 = vpack.c.bf16 %v12219_v52, %v12219_v52 }
 0x2c2   : > { %15056 = vst [vmem:[#allocation39_spill] sm:$0xff] %v12475_v37 }
 0x2c3   : > { %v1821_v62 = vpop.xlane.xlu1 %1820 }
 0x2c4   : > { %v1841_v17 = vsub.f32 %v12347_v5, %v1821_v62 }
 0x2c5   : > { %v12412_v28 = vpop.eup %11301 }
 0x2c6   : > { %v12414_v27 = vpop.eup %11303  ;;  %v1918_v46 = vsel %vm1027_vm2, %v12412_v28, 0.0  ;;  %v1870_v40 = vmul.f32 1.442695, %v1841_v17  ;;  %v15058_v17 = vmov 0.0  }
 0x2c7   : > { %1919 = vadd.xlane.f32.xlu0 %v1918_v46  ;;  %v1903_v26 = vsel %vm1027_vm2, %v12414_v27, 0.0 }
 0x2c8   : > { %1904 = vadd.xlane.f32.xlu1 %v1903_v26  ;;  %11307 = vpow2.f32 %v1870_v40 }
 0x2cb   : > { %v1827_v29 = vpop.xlane.xlu1 %1826 }
 0x2cc   : > { %v1843_v31 = vsub.f32 %v12351_v55, %v1827_v29 }
 0x2cd   : > { %v12438_v39 = vpop.eup %11305 }
 0x2ce   : > { %v1909_v5 = vsel %vm1027_vm2, %v12438_v39, 0.0  ;;  %v1874_v26 = vmul.f32 1.442695, %v1843_v31 }
 0x2d5   : > { %v12444_v44 = vpop.eup %11307 }
 0x2d6   : > { %v1915_v53 = vsel %vm1027_vm2, %v12444_v44, 0.0 }
 0x2d9   : > { %2774 = vrot.lane.b32.xlu1 %v12020_v58, %s11714_s0 }
 0x2dd   : > { %2722 = vrot.lane.b32.xlu0 %v12013_v49, %s11714_s0 }
 0x2e1   : > { %2826 = vrot.lane.b32.xlu0 %v12045_v10, %s11714_s0 }
 0x2e5   : > { %2823 = vrot.lane.b32.xlu0 %v12077_v24, %s11714_s0 }
 0x2e9   : > { %2930 = vrot.lane.b32.xlu0 %v12028_v0, %s11714_s0 }
 0x2ed   : > { %2927 = vrot.lane.b32.xlu0 %v12047_v11, %s11714_s0 }
 0x2f1   : > { %3034 = vrot.lane.b32.xlu0 %v12038_v7, %s11714_s0 }
 0x2f5   : > { %3031 = vrot.lane.b32.xlu0 %v12075_v23, %s11714_s0 }
 0x2f9   : > { %3138 = vrot.lane.b32.xlu0 %v12065_v20, %s11714_s0 }
 0x2fd   : > { %1910 = vadd.xlane.f32.xlu1 %v1909_v5  ;;  %3135 = vrot.lane.b32.xlu0 %v12103_v32, %s11714_s0 }
 0x301   : > { %1916 = vadd.xlane.f32.xlu1 %v1915_v53  ;;  %3242 = vrot.lane.b32.xlu0 %v12093_v42, %s11714_s0  ;;  %v12498_v53 = vpack.c.bf16 %v12193_v34, %v12193_v34 }
 0x303   : > { %15059 = vst [vmem:[#allocation41_spill] sm:$0xff] %v12498_v53 }
 0x305   : > { %3239 = vrot.lane.b32.xlu0 %v12131_v59, %s11714_s0 }
 0x309   : > { %3346 = vrot.lane.b32.xlu0 %v12121_v56, %s11714_s0 }
 0x30d   : > { %3343 = vrot.lane.b32.xlu0 %v12158_v6, %s11714_s0 }
 0x311   : > { %3450 = vrot.lane.b32.xlu0 %v12148_v4, %s11714_s0 }
 0x312   : > { %2719 = vrot.lane.b32.xlu1 %v12026_v63, %s11714_s0 }
 0x315   : > { %3447 = vrot.lane.b32.xlu0 %v12197_v35, %s11714_s0 }
 0x319   : > { %3759 = vrot.lane.b32.xlu0 %v12279_v51, %s11714_s0 }
 0x31d   : > { %3857 = vrot.lane.b32.xlu0 %v12468_v43, %s11714_s0 }
 0x320   : > { %v1878_v46 = vpop.xlane.xlu0 %1877 }
 0x321   : > { %11309 = vrcp.f32 %v1878_v46  ;;  %3955 = vrot.lane.b32.xlu0 %v12475_v37, %s11714_s0 }
 0x322   : > { %11311 = vpow2.f32 %v1874_v26 }
 0x325   : > { %4053 = vrot.lane.b32.xlu0 %v12481_v8, %s11714_s0 }
 0x328   : > { %v1881_v18 = vpop.xlane.xlu1 %1880 }
 0x329   : > { %11313 = vrcp.f32 %v1881_v18  ;;  %v2115_v18 = vsel %vm1975_vm3, %v12498_v53, 0 }
 0x32e   : > { %v11310_v55 = vpop.eup %11309 }
 0x32f   : > { %v1940_v52 = vmul.f32 %v11310_v55, %v12359_v16  ;;  %v12486_v25 = vpop.eup %11311 }
 0x330   : > { %v1884_v2 = vpop.xlane.xlu0 %1883  ;;  %v1921_v5 = vsel %vm1027_vm2, %v12486_v25, 0.0 }
 0x331   : > { %v1956_v62 = vpack.c.bf16 %v1940_v52, %v1940_v52  ;;  %11315 = vrcp.f32 %v1884_v2 }
 0x333   : > { %10407 = vmatmul.mubr.msk.bf16.vlgmr.msra.gmra.mxu0 %vm1027_vm2, %v1956_v62 }
 0x334   : > { %10417 = vmatpush3.bf16.msra.mxu0 %v2069_v45  ;;  %10418 = vmatprep.mubr.msk.bf16.mxu0 %vm11713_vm1, %v15058_v17  ;;  %v1890_v40 = vpop.xlane.xlu0 %1889  ;;  %v2161_v45 = vsel %vm1975_vm3, %v12475_v37, 0 }
 0x335   : > { %10428 = vmatprep.subr.bf16.mxu0 %v15058_v17  ;;  %11317 = vrcp.f32 %v1890_v40  ;;  %v936_v40 = vadd.f32 %v12167_v9, %v12229_v61 }
 0x336   : > { %v11314_v16 = vpop.eup %11313  ;;  %1922 = vadd.xlane.f32.xlu1 %v1921_v5 }
 0x337   : > { %v1941_v29 = vmul.f32 %v11314_v16, %v12366_v38  ;;  %v12519_v16 = vpack.c.bf16 %v936_v40, %v936_v40 }
 0x338   : > { %v1887_v31 = vpop.xlane.xlu1 %1886  ;;  %v1896_v26 = vpop.xlane.xlu0 %1895 }
 0x339   : > { %v1957_v46 = vpack.c.bf16 %v1941_v29, %v1941_v29  ;;  %11319 = vrcp.f32 %v1887_v31  ;;  %15060 = vst [vmem:[#allocation42_spill] sm:$0xff] %v12519_v16 }
 0x33a   : > { %11321 = vrcp.f32 %v1896_v26 }
 0x33b   : > { %10413 = vmatmul.mubr.msk.bf16.vlgmr.msra.gmra.mxu1 %vm1027_vm2, %v1957_v46 }
 0x33c   : > { %10423 = vmatpush3.bf16.msra.mxu1 %v2115_v18  ;;  %10424 = vmatprep.mubr.msk.bf16.mxu1 %vm11713_vm1, %v15058_v17  ;;  %v1902_v62 = vpop.xlane.xlu0 %1901 }
 0x33d   : > { %10434 = vmatprep.subr.bf16.mxu1 %v15058_v17 }
 0x33e   : > { %v11316_v34 = vpop.eup %11315 }
 0x33f   : > { %v1942_v55 = vmul.f32 %v11316_v34, %v12372_v30  ;;  %v2207_v34 = vsel %vm1975_vm3, %v12519_v16, 0 }
 0x340   : > { %v1908_v26 = vpop.xlane.xlu0 %1907 }
 0x341   : > { %v1893_v38 = vpop.xlane.xlu1 %1892  ;;  %v1958_v52 = vpack.c.bf16 %v1942_v55, %v1942_v55 }
 0x342   : > { %v11318_v2 = vpop.eup %11317  ;;  %11323 = vrcp.f32 %v1893_v38  ;;  %v12538_v38 = vpack.c.bf16 %v12244_v36, %v12244_v36 }
 0x343   : > { %10419 = vmatmul.mubr.msk.bf16.vlgmr.msra.gmra.mxu0 %vm1027_vm2, %v1958_v52  ;;  %11325 = vrcp.f32 %v1902_v62  ;;  %v1944_v30 = vmul.f32 %v11318_v2, %v12376_v33  ;;  %v2253_v33 = vsel %vm1975_vm3, %v12481_v8, 0  ;;  %v12545_v52 = vpack.c.bf16 %v12222_v54, %v12222_v54 }
 0x344   : > { %10429 = vmatpush3.bf16.msra.mxu0 %v2161_v45  ;;  %10430 = vmatprep.mubr.msk.bf16.mxu0 %vm11713_vm1, %v15058_v17  ;;  %15061 = vst [vmem:[#allocation43_spill] sm:$0xff] %v12538_v38  ;;  %v952_v54 = vadd.f32 %v12167_v9, %v12253_v19  ;;  %v12566_v19 = vpack.c.bf16 %v12236_v1, %v12236_v1 }
 0x345   : > { %10440 = vmatprep.subr.bf16.mxu0 %v15058_v17  ;;  %v1960_v61 = vpack.c.bf16 %v1944_v30, %v1944_v30  ;;  %15062 = vst [vmem:[#allocation44_spill] sm:$0xff] %v12545_v52  ;;  %v2345_v30 = vsel %vm1975_vm3, %v12538_v38, 0 }
 0x346   : > { %v11320_v5 = vpop.eup %11319  ;;  %15063 = vst [vmem:[#allocation45_spill] sm:$0xff] %v12566_v19  ;;  %v2437_v1 = vsel %vm1975_vm3, %v12566_v19, 0 }
 0x347   : > { %2771 = vrot.lane.b32.xlu1 %v12049_v12, %s11714_s0  ;;  %v1943_v31 = vmul.f32 %v11320_v5, %v12384_v14  ;;  %v11322_v46 = vpop.eup %11321 }
 0x348   : > { %v1946_v14 = vmul.f32 %v11322_v46, %v12380_v3  ;;  %v1914_v40 = vpop.xlane.xlu0 %1913 }
 0x349   : > { %v1899_v29 = vpop.xlane.xlu1 %1898  ;;  %v1959_v18 = vpack.c.bf16 %v1943_v31, %v1943_v31 }
 0x34a   : > { %11327 = vrcp.f32 %v1899_v29  ;;  %v1962_v62 = vpack.c.bf16 %v1946_v14, %v1946_v14  ;;  %v15065_v14 = vld [vmem:[#allocation22_spill] sm:$0xff] }
 0x34b   : > { %2878 = vrot.lane.b32.xlu1 %v12073_v22, %s11714_s0  ;;  %10431 = vmatmul.mubr.msk.bf16.vlgmr.msra.gmra.mxu0 %vm1027_vm2, %v1960_v61  ;;  %11329 = vrcp.f32 %v1908_v26  ;;  %v12572_v61 = vpack.c.bf16 %v952_v54, %v952_v54 }
 0x34c   : > { %10425 = vmatmul.mubr.msk.bf16.vlgmr.msra.gmra.mxu1 %vm1027_vm2, %v1959_v18  ;;  %10441 = vmatpush3.bf16.msra.mxu0 %v2253_v33 }
 0x34d   : > { %10435 = vmatpush3.bf16.msra.mxu1 %v2207_v34  ;;  %10442 = vmatprep.mubr.msk.bf16.mxu0 %vm11713_vm1, %v15058_v17  ;;  %15064 = vst [vmem:[#allocation46_spill] sm:$0xff] %v12572_v61  ;;  %v2391_v33 = vsel %vm1975_vm3, %v12572_v61, 0 }
 0x34e   : > { %10452 = vmatprep.subr.bf16.mxu0 %v15058_v17  ;;  %10436 = vmatprep.mubr.msk.bf16.mxu1 %vm11713_vm1, %v15058_v17 }
 0x34f   : > { %2875 = vrot.lane.b32.xlu1 %v12105_v48, %s11714_s0  ;;  %v11324_v55 = vpop.eup %11323  ;;  %10446 = vmatprep.subr.bf16.mxu1 %v15058_v17 }
 0x350   : > { %v1945_v2 = vmul.f32 %v11324_v55, %v12398_v13  ;;  %v11326_v45 = vpop.eup %11325  ;;  %v2299_v13 = vsel %vm1975_vm3, %v12545_v52, 0  ;;  %v1920_v18 = vpop.xlane.xlu0 %1919  ;;  %v15066_v55 = vld [vmem:[#allocation32_spill] sm:$0xff] }
 0x351   : > { %v1905_v3 = vpop.xlane.xlu1 %1904  ;;  %v1948_v5 = vmul.f32 %v11326_v45, %v12390_v41 }
 0x352   : > { %11331 = vrcp.f32 %v1905_v3  ;;  %v1961_v36 = vpack.c.bf16 %v1945_v2, %v1945_v2  ;;  %v12590_v3 = vpack.c.bf16 %v15066_v55, %v15066_v55  ;;  %v15074_v55 = vld [vmem:[#allocation26_spill] sm:$0xff] }
 0x353   : > { %2982 = vrot.lane.b32.xlu1 %v12101_v47, %s11714_s0  ;;  %10443 = vmatmul.mubr.msk.bf16.vlgmr.msra.gmra.mxu0 %vm1027_vm2, %v1962_v62  ;;  %11333 = vrcp.f32 %v1914_v40  ;;  %v1964_v46 = vpack.c.bf16 %v1948_v5, %v1948_v5  ;;  %v15067_v62 = vld [vmem:[#allocation29_spill] sm:$0xff]  ;;  %v15070_v5 = vld [vmem:[#allocation24_spill] sm:$0xff] }
 0x354   : > { %10437 = vmatmul.mubr.msk.bf16.vlgmr.msra.gmra.mxu1 %vm1027_vm2, %v1961_v36  ;;  %10453 = vmatpush3.bf16.msra.mxu0 %v2345_v30  ;;  %11335 = vrcp.f32 %v1920_v18  ;;  %v15069_v30 = vld [vmem:[#allocation20_spill] sm:$0xff]  ;;  %v2529_v54 = vsel %vm1975_vm3, %v12590_v3, 0  ;;  %v15072_v18 = vld [vmem:[#allocation23_spill] sm:$0xff] }
 0x355   : > { %10447 = vmatpush3.bf16.msra.mxu1 %v2299_v13  ;;  %10454 = vmatprep.mubr.msk.bf16.mxu0 %vm11713_vm1, %v15058_v17 }
 0x356   : > { %10464 = vmatprep.subr.bf16.mxu0 %v15058_v17  ;;  %10448 = vmatprep.mubr.msk.bf16.mxu1 %vm11713_vm1, %v15058_v17 }
 0x357   : > { %v11328_v29 = vpop.eup %11327  ;;  %2979 = vrot.lane.b32.xlu1 %v12134_v60, %s11714_s0  ;;  %10458 = vmatprep.subr.bf16.mxu1 %v15058_v17 }
 0x358   : > { %v1947_v31 = vmul.f32 %v11328_v29, %v12406_v15  ;;  %v11330_v26 = vpop.eup %11329  ;;  %v15071_v29 = vld [vmem:[#allocation31_spill] sm:$0xff] }
 0x359   : > { %v1950_v15 = vmul.f32 %v11330_v26, %v12396_v50  ;;  %v12598_v50 = vpack.c.bf16 %v15067_v62, %v15067_v62 }
 0x35a   : > { %v1963_v41 = vpack.c.bf16 %v1947_v31, %v1947_v31  ;;  %v12616_v31 = vpack.c.bf16 %v15071_v29, %v15071_v29 }
 0x35b   : > { %3086 = vrot.lane.b32.xlu1 %v12129_v57, %s11714_s0  ;;  %10455 = vmatmul.mubr.msk.bf16.vlgmr.msra.gmra.mxu0 %vm1027_vm2, %v1964_v46  ;;  %15068 = vst [vmem:[#allocation22_spill] sm:$0xff] %v12598_v50  ;;  %v1966_v40 = vpack.c.bf16 %v1950_v15, %v1950_v15 }
 0x35c   : > { %10449 = vmatmul.mubr.msk.bf16.vlgmr.msra.gmra.mxu1 %vm1027_vm2, %v1963_v41  ;;  %10465 = vmatpush3.bf16.msra.mxu0 %v2437_v1  ;;  %v2723_v41 = vpop.permute.xlu0 %2722 }
 0x35d   : > { %10459 = vmatpush3.bf16.msra.mxu1 %v2391_v33  ;;  %10466 = vmatprep.mubr.msk.bf16.mxu0 %vm11713_vm1, %v15058_v17  ;;  %v15073_v33 = vld [vmem:[#allocation27_spill] sm:$0xff] }
 0x35e   : > { %10476 = vmatprep.subr.bf16.mxu0 %v15058_v17  ;;  %10460 = vmatprep.mubr.msk.bf16.mxu1 %vm11713_vm1, %v15058_v17 }
 0x35f   : > { %v11332_v34 = vpop.eup %11331  ;;  %3083 = vrot.lane.b32.xlu1 %v15065_v14, %s11714_s0  ;;  %10470 = vmatprep.subr.bf16.mxu1 %v15058_v17 }
 0x360   : > { %v1949_v2 = vmul.f32 %v11332_v34, %v12414_v27  ;;  %v11334_v36 = vpop.eup %11333  ;;  %v2483_v27 = vsel %vm1975_vm3, %v12598_v50, 0  ;;  %v2827_v15 = vpop.permute.xlu0 %2826 }
 0x361   : > { %v1952_v13 = vmul.f32 %v11334_v36, %v12404_v21  ;;  %v11336_v26 = vpop.eup %11335  ;;  %v2621_v21 = vsel %vm1975_vm3, %v12616_v31, 0  ;;  %v15077_v36 = vld [vmem:[#allocation34_spill] sm:$0xff] }
 0x362   : > { %v1965_v45 = vpack.c.bf16 %v1949_v2, %v1949_v2  ;;  %v1954_v1 = vmul.f32 %v11336_v26, %v12412_v28  ;;  %v2728_v2 = vsel %vm1027_vm2, %v2723_v41, 0  ;;  %v15075_v28 = vld [vmem:[#allocation30_spill] sm:$0xff] }
 0x363   : > { %3190 = vrot.lane.b32.xlu1 %v15069_v30, %s11714_s0  ;;  %10467 = vmatmul.mubr.msk.bf16.vlgmr.msra.gmra.mxu0 %vm1027_vm2, %v1966_v40  ;;  %v1968_v46 = vpack.c.bf16 %v1952_v13, %v1952_v13  ;;  %v15078_v13 = vld [vmem:[#allocation36_spill] sm:$0xff] }
 0x364   : > { %10461 = vmatmul.mubr.msk.bf16.vlgmr.msra.gmra.mxu1 %vm1027_vm2, %v1965_v45  ;;  %10477 = vmatpush3.bf16.msra.mxu0 %v2529_v54  ;;  %v1970_v34 = vpack.c.bf16 %v1954_v1, %v1954_v1  ;;  %v2824_v62 = vpop.permute.xlu0 %2823  ;;  %v15076_v45 = vld [vmem:[#allocation28_spill] sm:$0xff]  ;;  %v12645_v54 = vpop.permute.xlu1 %2774  ;;  %v2832_v1 = vsel %vm1027_vm2, %v2827_v15, 0 }
 0x365   : > { %10471 = vmatpush3.bf16.msra.mxu1 %v2483_v27  ;;  %10478 = vmatprep.mubr.msk.bf16.mxu0 %vm11713_vm1, %v15058_v17 }
 0x366   : > { %10488 = vmatprep.subr.bf16.mxu0 %v15058_v17  ;;  %10472 = vmatprep.mubr.msk.bf16.mxu1 %vm11713_vm1, %v15058_v17 }
 0x367   : > { %3187 = vrot.lane.b32.xlu1 %v15070_v5, %s11714_s0  ;;  %10482 = vmatprep.subr.bf16.mxu1 %v15058_v17 }
 0x368   : > { %v2931_v40 = vpop.permute.xlu0 %2930 }
 0x369   : > { %v2936_v37 = vsel %vm1027_vm2, %v2931_v40, 0 }
 0x36b   : > { %3294 = vrot.lane.b32.xlu1 %v15072_v18, %s11714_s0  ;;  %10479 = vmatmul.mubr.msk.bf16.vlgmr.msra.gmra.mxu0 %vm1027_vm2, %v1968_v46 }
 0x36c   : > { %10489 = vmatpush3.bf16.msra.mxu0 %v2621_v21  ;;  %10490 = vmatprep.mubr.msk.bf16.mxu0 %vm11713_vm1, %v15058_v17  ;;  %v2928_v27 = vpop.permute.xlu0 %2927 }
 0x36d   : > { %10500 = vmatprep.subr.bf16.mxu0 %v15058_v17 }
 0x36f   : > { %3291 = vrot.lane.b32.xlu1 %v15073_v33, %s11714_s0 }
 0x370   : > { %v3035_v41 = vpop.permute.xlu0 %3034 }
 0x371   : > { %v3040_v40 = vsel %vm1027_vm2, %v3035_v41, 0 }
 0x373   : > { %3398 = vrot.lane.b32.xlu1 %v15074_v55, %s11714_s0  ;;  %10491 = vmatmul.mubr.msk.bf16.vlgmr.msra.gmra.mxu0 %vm1027_vm2, %v1970_v34  ;;  %v15079_v34 = vld [vmem:[#allocation37_spill] sm:$0xff] }
 0x374   : > { %10501 = vmatpush3.bf16.xpose.msra.mxu0 %v2728_v2  ;;  %10502 = vmatprep.mubr.msk.bf16.mxu0 %vm11713_vm1, %v15058_v17  ;;  %v3032_v26 = vpop.permute.xlu0 %3031  ;;  %v968_v2 = vadd.f32 %v12167_v9, %v15079_v34 }
 0x375   : > { %10512 = vmatprep.subr.bf16.mxu0 %v15058_v17 }
 0x376   : > { %v12662_v8 = vpack.c.bf16 %v968_v2, %v968_v2 }
 0x377   : > { %3395 = vrot.lane.b32.xlu1 %v15075_v28, %s11714_s0 }
 0x378   : > { %v2575_v9 = vsel %vm1975_vm3, %v12662_v8, 0 }
 0x37b   : > { %3502 = vrot.lane.b32.xlu1 %v15076_v45, %s11714_s0 }
 0x37f   : > { %3499 = vrot.lane.b32.xlu1 %v15077_v36, %s11714_s0 }
 0x383   : > { %3808 = vrot.lane.b32.xlu1 %v15078_v13, %s11714_s0 }
 0x386   : > { %v1911_v29 = vpop.xlane.xlu1 %1910 }
 0x387   : > { %11337 = vrcp.f32 %v1911_v29  ;;  %3906 = vrot.lane.b32.xlu1 %v12498_v53, %s11714_s0 }
 0x38a   : > { %v1917_v46 = vpop.xlane.xlu1 %1916 }
 0x38b   : > { %11339 = vrcp.f32 %v1917_v46  ;;  %4004 = vrot.lane.b32.xlu1 %v12519_v16, %s11714_s0  ;;  %v3139_v46 = vpop.permute.xlu0 %3138 }
 0x38e   : > { %v2720_v21 = vpop.permute.xlu1 %2719 }
 0x38f   : > { %4102 = vrot.lane.b32.xlu1 %v12545_v52, %s11714_s0  ;;  %10503 = vmatmul.mubr.msk.bf16.vlgmr.msra.gmra.mxu0 %vm1027_vm2, %v2720_v21  ;;  %v3136_v34 = vpop.permute.xlu0 %3135 }
 0x390   : > { %10513 = vmatpush3.bf16.xpose.msra.mxu0 %v2832_v1  ;;  %10514 = vmatprep.mubr.msk.bf16.mxu0 %vm11713_vm1, %v15058_v17 }
 0x391   : > { %10524 = vmatprep.subr.bf16.mxu0 %v15058_v17 }
 0x394   : > { %v11338_v29 = vpop.eup %11337 }
 0x395   : > { %v1951_v15 = vmul.f32 %v11338_v29, %v12438_v39  ;;  %v3243_v29 = vpop.permute.xlu0 %3242 }
 0x397   : > { %10515 = vmatmul.mubr.msk.bf16.vlgmr.msra.gmra.mxu0 %vm1027_vm2, %v2824_v62  ;;  %v1967_v21 = vpack.c.bf16 %v1951_v15, %v1951_v15 }
 0x398   : > { %v11340_v1 = vpop.eup %11339  ;;  %10525 = vmatpush3.bf16.xpose.msra.mxu0 %v2936_v37  ;;  %10526 = vmatprep.mubr.msk.bf16.mxu0 %vm11713_vm1, %v15058_v17  ;;  %v15080_v37 = vld [vmem:[#allocation33_spill] sm:$0xff] }
 0x399   : > { %10473 = vmatmul.mubr.msk.bf16.vlgmr.msra.gmra.mxu1 %vm1027_vm2, %v1967_v21  ;;  %10536 = vmatprep.subr.bf16.mxu0 %v15058_v17  ;;  %v1953_v39 = vmul.f32 %v11340_v1, %v12444_v44  ;;  %v12679_v62 = vpack.c.bf16 %v15080_v37, %v15080_v37  ;;  %v3240_v44 = vpop.permute.xlu0 %3239  ;;  %v3248_v21 = vsel %vm1027_vm2, %v3243_v29, 0 }
 0x39a   : > { %10483 = vmatpush3.bf16.msra.mxu1 %v2575_v9  ;;  %10484 = vmatprep.mubr.msk.bf16.mxu1 %vm11713_vm1, %v15058_v17 }
 0x39b   : > { %10494 = vmatprep.subr.bf16.mxu1 %v15058_v17  ;;  %v1969_v2 = vpack.c.bf16 %v1953_v39, %v1953_v39  ;;  %v2667_v15 = vsel %vm1975_vm3, %v12679_v62, 0 }
 0x39d   : > { %v3347_v41 = vpop.permute.xlu0 %3346 }
 0x39f   : > { %10527 = vmatmul.mubr.msk.bf16.vlgmr.msra.gmra.mxu0 %vm1027_vm2, %v2928_v27  ;;  %v3144_v27 = vsel %vm1027_vm2, %v3139_v46, 0 }
 0x3a0   : > { %10537 = vmatpush3.bf16.xpose.msra.mxu0 %v3040_v40  ;;  %10538 = vmatprep.mubr.msk.bf16.mxu0 %vm11713_vm1, %v15058_v17 }
 0x3a1   : > { %10485 = vmatmul.mubr.msk.bf16.vlgmr.msra.gmra.mxu1 %vm1027_vm2, %v1969_v2  ;;  %10548 = vmatprep.subr.bf16.mxu0 %v15058_v17  ;;  %v3344_v46 = vpop.permute.xlu0 %3343 }
 0x3a2   : > { %10495 = vmatpush3.bf16.msra.mxu1 %v2667_v15  ;;  %10496 = vmatprep.mubr.msk.bf16.mxu1 %vm11713_vm1, %v15058_v17 }
 0x3a3   : > { %10506 = vmatprep.subr.bf16.mxu1 %v15058_v17 }
 0x3a5   : > { %v3451_v1 = vpop.permute.xlu0 %3450 }
 0x3a7   : > { %10539 = vmatmul.mubr.msk.bf16.vlgmr.msra.gmra.mxu0 %vm1027_vm2, %v3032_v26  ;;  %v3352_v26 = vsel %vm1027_vm2, %v3347_v41, 0 }
 0x3a8   : > { %10549 = vmatpush3.bf16.xpose.msra.mxu0 %v3144_v27  ;;  %10550 = vmatprep.mubr.msk.bf16.mxu0 %vm11713_vm1, %v15058_v17 }
 0x3a9   : > { %10560 = vmatprep.subr.bf16.mxu0 %v15058_v17  ;;  %v3448_v9 = vpop.permute.xlu0 %3447 }
 0x3ad   : > { %v3760_v40 = vpop.permute.xlu0 %3759 }
 0x3ae   : > { %v3765_v2 = vsel %vm1975_vm3, %v3760_v40, 0 }
 0x3af   : > { %10551 = vmatmul.mubr.msk.bf16.vlgmr.msra.gmra.mxu0 %vm1027_vm2, %v3136_v34  ;;  %v3456_v34 = vsel %vm1027_vm2, %v3451_v1, 0 }
 0x3b0   : > { %10561 = vmatpush3.bf16.xpose.msra.mxu0 %v3248_v21  ;;  %10562 = vmatprep.mubr.msk.bf16.mxu0 %vm11713_vm1, %v15058_v17 }
 0x3b1   : > { %10572 = vmatprep.subr.bf16.mxu0 %v15058_v17  ;;  %v12868_v59 = vpop.permute.xlu0 %3857 }
 0x3b7   : > { %10563 = vmatmul.mubr.msk.bf16.vlgmr.msra.gmra.mxu0 %vm1027_vm2, %v3240_v44 }
 0x3b8   : > { %10573 = vmatpush3.bf16.xpose.msra.mxu0 %v3352_v26  ;;  %10574 = vmatprep.mubr.msk.bf16.mxu0 %vm11713_vm1, %v15058_v17 }
 0x3b9   : > { %10584 = vmatprep.subr.bf16.mxu0 %v15058_v17 }
 0x3bf   : > { %10575 = vmatmul.mubr.msk.bf16.vlgmr.msra.gmra.mxu0 %vm1027_vm2, %v3344_v46  ;;  %v1923_v39 = vpop.xlane.xlu1 %1922  ;;  %v2780_v46 = vsel %vm1027_vm2, %v12645_v54, 0 }
 0x3c0   : > { %10585 = vmatpush3.bf16.xpose.msra.mxu0 %v3456_v34  ;;  %11341 = vrcp.f32 %v1923_v39  ;;  %10586 = vmatprep.mubr.msk.bf16.mxu0 %vm11713_vm1, %v15058_v17 }
 0x3c1   : > { %10596 = vmatprep.subr.bf16.mxu0 %v15058_v17 }
 0x3c3   : > { %v2772_v37 = vpop.permute.xlu1 %2771 }
 0x3c7   : > { %10587 = vmatmul.mubr.msk.bf16.vlgmr.msra.gmra.mxu0 %vm1027_vm2, %v3448_v9  ;;  %v2879_v29 = vpop.permute.xlu1 %2878 }
 0x3c8   : > { %10597 = vmatpush3.bf16.msra.mxu0 %v3765_v2  ;;  %10598 = vmatprep.mubr.msk.bf16.mxu0 %vm11713_vm1, %v15058_v17  ;;  %v2884_v9 = vsel %vm1027_vm2, %v2879_v29, 0 }
 0x3c9   : > { %10608 = vmatprep.subr.bf16.mxu0 %v15058_v17 }
 0x3cb   : > { %v2876_v15 = vpop.permute.xlu1 %2875 }
 0x3cd   : > { %v11342_v44 = vpop.eup %11341 }
 0x3ce   : > { %v1955_v27 = vmul.f32 %v11342_v44, %v12486_v25 }
 0x3cf   : > { %v2983_v41 = vpop.permute.xlu1 %2982 }
 0x3d0   : > { %v1971_v21 = vpack.c.bf16 %v1955_v27, %v1955_v27  ;;  %v2988_v34 = vsel %vm1027_vm2, %v2983_v41, 0 }
 0x3d2   : > { %10497 = vmatmul.mubr.msk.bf16.vlgmr.msra.gmra.mxu1 %vm1027_vm2, %v1971_v21 }
 0x3d3   : > { %10507 = vmatpush3.bf16.xpose.msra.mxu1 %v2780_v46  ;;  %v2980_v26 = vpop.permute.xlu1 %2979  ;;  %10508 = vmatprep.mubr.msk.bf16.mxu1 %vm11713_vm1, %v15058_v17 }
 0x3d4   : > { %10518 = vmatprep.subr.bf16.mxu1 %v15058_v17 }
 0x3d7   : > { %v3087_v1 = vpop.permute.xlu1 %3086 }
 0x3da   : > { %10509 = vmatmul.mubr.msk.bf16.vlgmr.msra.gmra.mxu1 %vm1027_vm2, %v2772_v37  ;;  %v3092_v37 = vsel %vm1027_vm2, %v3087_v1, 0 }
 0x3db   : > { %10519 = vmatpush3.bf16.xpose.msra.mxu1 %v2884_v9  ;;  %v3084_v25 = vpop.permute.xlu1 %3083  ;;  %10520 = vmatprep.mubr.msk.bf16.mxu1 %vm11713_vm1, %v15058_v17 }
 0x3dc   : > { %10530 = vmatprep.subr.bf16.mxu1 %v15058_v17 }
 0x3df   : > { %v3191_v54 = vpop.permute.xlu1 %3190 }
 0x3e0   : > { %v3196_v29 = vsel %vm1027_vm2, %v3191_v54, 0 }
 0x3e2   : > { %10521 = vmatmul.mubr.msk.bf16.vlgmr.msra.gmra.mxu1 %vm1027_vm2, %v2876_v15 }
 0x3e3   : > { %10531 = vmatpush3.bf16.xpose.msra.mxu1 %v2988_v34  ;;  %10532 = vmatprep.mubr.msk.bf16.mxu1 %vm11713_vm1, %v15058_v17  ;;  %v3188_v39 = vpop.permute.xlu1 %3187 }
 0x3e4   : > { %10542 = vmatprep.subr.bf16.mxu1 %v15058_v17 }
 0x3e7   : > { %v3295_v40 = vpop.permute.xlu1 %3294 }
 0x3e8   : > { %v3300_v46 = vsel %vm1027_vm2, %v3295_v40, 0 }
 0x3ea   : > { %10533 = vmatmul.mubr.msk.bf16.vlgmr.msra.gmra.mxu1 %vm1027_vm2, %v2980_v26 }
 0x3eb   : > { %10543 = vmatpush3.bf16.xpose.msra.mxu1 %v3092_v37  ;;  %10544 = vmatprep.mubr.msk.bf16.mxu1 %vm11713_vm1, %v15058_v17  ;;  %v3292_v2 = vpop.permute.xlu1 %3291 }
 0x3ec   : > { %10554 = vmatprep.subr.bf16.mxu1 %v15058_v17 }
 0x3ef   : > { %v3399_v27 = vpop.permute.xlu1 %3398 }
 0x3f0   : > { %v3404_v37 = vsel %vm1027_vm2, %v3399_v27, 0 }
 0x3f2   : > { %10545 = vmatmul.mubr.msk.bf16.vlgmr.msra.gmra.mxu1 %vm1027_vm2, %v3084_v25 }
 0x3f3   : > { %10555 = vmatpush3.bf16.xpose.msra.mxu1 %v3196_v29  ;;  %v12741_v15 = vpop.f32.mrf.mxu0  ;;  %10556 = vmatprep.mubr.msk.bf16.mxu1 %vm11713_vm1, %v15058_v17  ;;  %v3396_v9 = vpop.permute.xlu1 %3395 }
 0x3f4   : > { %15081 = vst [vmem:[#allocation32_spill] sm:$0xff] %v12741_v15  ;;  %10566 = vmatprep.subr.bf16.mxu1 %v15058_v17 }
 0x3f5   : > { %v10408_v44 = vpop.f32.mrf.mxu0 }
 0x3f7   : > { %v2016_v41 = vpop.f32.mrf.mxu0 }
 0x3f9   : > { %v10409_v21 = vpop.f32.mrf.mxu0 }
 0x3fa   : > { %10557 = vmatmul.mubr.msk.bf16.vlgmr.msra.gmra.mxu1 %vm1027_vm2, %v3188_v39  ;;  %v3503_v39 = vpop.permute.xlu1 %3502 }
 0x3fb   : > { %10567 = vmatpush3.bf16.xpose.msra.mxu1 %v3300_v46  ;;  %v12748_v26 = vpop.f32.mrf.mxu1  ;;  %10568 = vmatprep.mubr.msk.bf16.mxu1 %vm11713_vm1, %v15058_v17  ;;  %v3508_v21 = vsel %vm1027_vm2, %v3503_v39, 0 }
 0x3fc   : > { %15082 = vst [vmem:[#allocation29_spill] sm:$0xff] %v12748_v26  ;;  %10578 = vmatprep.subr.bf16.mxu1 %v15058_v17 }
 0x3fd   : > { %v10414_v25 = vpop.f32.mrf.mxu1 }
 0x3fe   : > { %v3500_v41 = vpop.permute.xlu1 %3499 }
 0x3ff   : > { %v2062_v54 = vpop.f32.mrf.mxu1 }
 0x401   : > { %v10415_v34 = vpop.f32.mrf.mxu1 }
 0x402   : > { %10569 = vmatmul.mubr.msk.bf16.vlgmr.msra.gmra.mxu1 %vm1027_vm2, %v3292_v2  ;;  %v3809_v34 = vpop.permute.xlu1 %3808 }
 0x403   : > { %10579 = vmatpush3.bf16.xpose.msra.mxu1 %v3404_v37  ;;  %10580 = vmatprep.mubr.msk.bf16.mxu1 %vm11713_vm1, %v15058_v17  ;;  %v12759_v40 = vpop.f32.mrf.mxu0 }
 0x404   : > { %15083 = vst [vmem:[#allocation20_spill] sm:$0xff] %v12759_v40  ;;  %10590 = vmatprep.subr.bf16.mxu1 %v15058_v17 }
 0x405   : > { %v10420_v29 = vpop.f32.mrf.mxu0 }
 0x407   : > { %v2108_v44 = vpop.f32.mrf.mxu0 }
 0x409   : > { %v10421_v46 = vpop.f32.mrf.mxu0 }
 0x40a   : > { %10581 = vmatmul.mubr.msk.bf16.vlgmr.msra.gmra.mxu1 %vm1027_vm2, %v3396_v9  ;;  %v3814_v9 = vsel %vm1975_vm3, %v3809_v34, 0 }
 0x40b   : > { %10591 = vmatpush3.bf16.xpose.msra.mxu1 %v3508_v21  ;;  %10592 = vmatprep.mubr.msk.bf16.mxu1 %vm11713_vm1, %v15058_v17  ;;  %v12766_v2 = vpop.f32.mrf.mxu0 }
 0x40c   : > { %15084 = vst [vmem:[#allocation24_spill] sm:$0xff] %v12766_v2  ;;  %10602 = vmatprep.subr.bf16.mxu1 %v15058_v17  ;;  %v12769_v27 = vpop.f32.mrf.mxu1 }
 0x40d   : > { %15085 = vst [vmem:[#allocation31_spill] sm:$0xff] %v12769_v27  ;;  %v10432_v54 = vpop.f32.mrf.mxu0 }
 0x40e   : > { %v10426_v37 = vpop.f32.mrf.mxu1 }
 0x40f   : > { %v2200_v39 = vpop.f32.mrf.mxu0 }
 0x410   : > { %v2154_v29 = vpop.f32.mrf.mxu1 }
 0x411   : > { %v10433_v44 = vpop.f32.mrf.mxu0 }
 0x412   : > { %10593 = vmatmul.mubr.msk.bf16.vlgmr.msra.gmra.mxu1 %vm1027_vm2, %v3500_v41  ;;  %v10427_v21 = vpop.f32.mrf.mxu1 }
 0x413   : > { %10603 = vmatpush3.bf16.msra.mxu1 %v3814_v9  ;;  %10604 = vmatprep.mubr.msk.bf16.mxu1 %vm11713_vm1, %v15058_v17  ;;  %v12777_v46 = vpop.f32.mrf.mxu0 }
 0x414   : > { %15086 = vst [vmem:[#allocation23_spill] sm:$0xff] %v12777_v46  ;;  %10614 = vmatprep.subr.bf16.mxu1 %v15058_v17  ;;  %v12780_v25 = vpop.f32.mrf.mxu1 }
 0x415   : > { %15087 = vst [vmem:[#allocation27_spill] sm:$0xff] %v12780_v25  ;;  %v10444_v37 = vpop.f32.mrf.mxu0 }
 0x416   : > { %v10438_v39 = vpop.f32.mrf.mxu1 }
 0x417   : > { %v2292_v34 = vpop.f32.mrf.mxu0 }
 0x418   : > { %v2246_v29 = vpop.f32.mrf.mxu1 }
 0x419   : > { %v10445_v44 = vpop.f32.mrf.mxu0 }
 0x41a   : > { %v10439_v41 = vpop.f32.mrf.mxu1 }
 0x41b   : > { %v12784_v21 = vpop.f32.mrf.mxu0 }
 0x41c   : > { %15088 = vst [vmem:[#allocation26_spill] sm:$0xff] %v12784_v21  ;;  %v12786_v9 = vpop.f32.mrf.mxu1 }
 0x41d   : > { %15089 = vst [vmem:[#allocation37_spill] sm:$0xff] %v12786_v9  ;;  %v10456_v52 = vpop.f32.mrf.mxu0 }
 0x41e   : > { %v10450_v16 = vpop.f32.mrf.mxu1 }
 0x41f   : > { %v2384_v40 = vpop.f32.mrf.mxu0 }
 0x420   : > { %v2338_v27 = vpop.f32.mrf.mxu1 }
 0x421   : > { %v10457_v15 = vpop.f32.mrf.mxu0 }
 0x422   : > { %v10451_v26 = vpop.f32.mrf.mxu1 }
 0x423   : > { %v12790_v54 = vpop.f32.mrf.mxu0 }
 0x424   : > { %15090 = vst [vmem:[#allocation33_spill] sm:$0xff] %v12790_v54  ;;  %v12792_v37 = vpop.f32.mrf.mxu1 }
 0x425   : > { %15091 = vst [vmem:[#allocation47_spill] sm:$0xff] %v12792_v37  ;;  %v10468_v34 = vpop.f32.mrf.mxu0 }
 0x426   : > { %v10462_v29 = vpop.f32.mrf.mxu1 }
 0x427   : > { %v2476_v44 = vpop.f32.mrf.mxu0 }
 0x428   : > { %v2430_v41 = vpop.f32.mrf.mxu1 }
 0x429   : > { %v10469_v2 = vpop.f32.mrf.mxu0 }
 0x42a   : > { %v10463_v25 = vpop.f32.mrf.mxu1 }
 0x42b   : > { %v12796_v1 = vpop.f32.mrf.mxu0 }
 0x42c   : > { %15092 = vst [vmem:[#allocation48_spill] sm:$0xff] %v12796_v1 }
 0x42d   : > { %v10480_v16 = vpop.f32.mrf.mxu0 }
 0x42f   : > { %v2568_v52 = vpop.f32.mrf.mxu0 }
 0x431   : > { %v10481_v40 = vpop.f32.mrf.mxu0 }
 0x433   : > { %v12798_v15 = vpop.f32.mrf.mxu0 }
 0x434   : > { %15093 = vst [vmem:[#allocation49_spill] sm:$0xff] %v12798_v15 }
 0x435   : > { %v10492_v26 = vpop.f32.mrf.mxu0 }
 0x437   : > { %v2660_v27 = vpop.f32.mrf.mxu0 }
 0x439   : > { %v10493_v46 = vpop.f32.mrf.mxu0 }
 0x44f   : > { %v2764_v9 = vpop.f32.mrf.mxu0 }
 0x450   : > { %v12800_v43 = vmul.f32 0.35355338, %v2764_v9 }
 0x451   : > { %v10504_v39 = vpop.f32.mrf.mxu0 }
 0x452   : > { %v3566_v34 = vsel %vm1027_vm2, %v12800_v43, -inf }
 0x453   : > { %3567 = vmax.xlane.f32.xlu0 %v3566_v34  ;;  %v2767_v2 = vpop.f32.mrf.mxu0 }
 0x455   : > { %v10505_v25 = vpop.f32.mrf.mxu0 }
 0x457   : > { %v2868_v29 = vpop.f32.mrf.mxu0 }
 0x458   : > { %v12804_v44 = vmul.f32 0.35355338, %v2868_v29 }
 0x459   : > { %v12806_v41 = vpop.f32.mrf.mxu1  ;;  %v10516_v16 = vpop.f32.mrf.mxu0 }
 0x45a   : > { %15094 = vst [vmem:[#allocation50_spill] sm:$0xff] %v12806_v41  ;;  %v3572_v46 = vsel %vm1027_vm2, %v12804_v44, -inf }
 0x45b   : > { %3573 = vmax.xlane.f32.xlu0 %v3572_v46  ;;  %v10474_v9 = vpop.f32.mrf.mxu1  ;;  %v2871_v39 = vpop.f32.mrf.mxu0 }
 0x45d   : > { %v2522_v40 = vpop.f32.mrf.mxu1  ;;  %v10517_v26 = vpop.f32.mrf.mxu0 }
 0x45f   : > { %v10475_v27 = vpop.f32.mrf.mxu1  ;;  %v2972_v34 = vpop.f32.mrf.mxu0 }
 0x461   : > { %v12812_v2 = vpop.f32.mrf.mxu1  ;;  %v10528_v25 = vpop.f32.mrf.mxu0 }
 0x462   : > { %15095 = vst [vmem:[#allocation51_spill] sm:$0xff] %v12812_v2 }
 0x463   : > { %v10486_v16 = vpop.f32.mrf.mxu1  ;;  %v2975_v15 = vpop.f32.mrf.mxu0 }
 0x465   : > { %v2614_v21 = vpop.f32.mrf.mxu1  ;;  %v10529_v52 = vpop.f32.mrf.mxu0 }
 0x467   : > { %v10487_v54 = vpop.f32.mrf.mxu1  ;;  %v3076_v41 = vpop.f32.mrf.mxu0 }
 0x469   : > { %v10540_v37 = vpop.f32.mrf.mxu0 }
 0x46b   : > { %v3079_v46 = vpop.f32.mrf.mxu0 }
 0x46d   : > { %v10541_v9 = vpop.f32.mrf.mxu0 }
 0x46f   : > { %v3180_v39 = vpop.f32.mrf.mxu0 }
 0x471   : > { %v10552_v40 = vpop.f32.mrf.mxu0 }
 0x473   : > { %v3183_v26 = vpop.f32.mrf.mxu0 }
 0x475   : > { %v10553_v27 = vpop.f32.mrf.mxu0 }
 0x477   : > { %v3284_v51 = vpop.f32.mrf.mxu0 }
 0x479   : > { %v10564_v35 = vpop.f32.mrf.mxu0 }
 0x47b   : > { %v3287_v4 = vpop.f32.mrf.mxu0 }
 0x47d   : > { %v10565_v25 = vpop.f32.mrf.mxu0 }
 0x47f   : > { %v3388_v6 = vpop.f32.mrf.mxu0 }
 0x481   : > { %v10576_v56 = vpop.f32.mrf.mxu0 }
 0x483   : > { %v3391_v29 = vpop.f32.mrf.mxu0 }
 0x485   : > { %v10577_v16 = vpop.f32.mrf.mxu0 }
 0x487   : > { %v3492_v15 = vpop.f32.mrf.mxu0 }
 0x489   : > { %v10588_v21 = vpop.f32.mrf.mxu0 }
 0x48a   : > { %v12824_v21 = vmul.f32 0.35355338, %v2972_v34 }
 0x48b   : > { %v3495_v52 = vpop.f32.mrf.mxu0 }
 0x48d   : > { %v10589_v54 = vpop.f32.mrf.mxu0 }
 0x492   : > { %v12816_v1 = vpop.f32.mrf.mxu1 }
 0x493   : > { %15096 = vst [vmem:[#allocation52_spill] sm:$0xff] %v12816_v1 }
 0x494   : > { %v10498_v37 = vpop.f32.mrf.mxu1 }
 0x496   : > { %v2706_v46 = vpop.f32.mrf.mxu1 }
 0x497   : > { %v12828_v46 = vmul.f32 0.35355338, %v3076_v41 }
 0x498   : > { %v10499_v9 = vpop.f32.mrf.mxu1 }
 0x499   : > { %v3578_v9 = vsel %vm1027_vm2, %v12824_v21, -inf  ;;  %v3584_v34 = vsel %vm1027_vm2, %v12828_v46, -inf }
 0x49a   : > { %v2816_v40 = vpop.f32.mrf.mxu1 }
 0x49b   : > { %v12818_v26 = vmul.f32 0.35355338, %v2816_v40 }
 0x49c   : > { %v10510_v27 = vpop.f32.mrf.mxu1 }
 0x49d   : > { %v3569_v4 = vsel %vm1027_vm2, %v12818_v26, -inf }
 0x49e   : > { %3570 = vmax.xlane.f32.xlu1 %v3569_v4  ;;  %v2819_v56 = vpop.f32.mrf.mxu1 }
 0x49f   : > { %v12834_v56 = vmul.f32 0.35355338, %v3180_v39 }
 0x4a0   : > { %v10511_v35 = vpop.f32.mrf.mxu1 }
 0x4a2   : > { %v2920_v29 = vpop.f32.mrf.mxu1 }
 0x4a3   : > { %v12822_v25 = vmul.f32 0.35355338, %v2920_v29 }
 0x4a4   : > { %v10522_v16 = vpop.f32.mrf.mxu1 }
 0x4a5   : > { %v3575_v52 = vsel %vm1027_vm2, %v12822_v25, -inf  ;;  %v12840_v16 = vmul.f32 0.35355338, %v3284_v51 }
 0x4a6   : > { %3576 = vmax.xlane.f32.xlu0 %v3575_v52  ;;  %v2923_v54 = vpop.f32.mrf.mxu1  ;;  %v3590_v52 = vsel %vm1027_vm2, %v12834_v56, -inf }
 0x4a8   : > { %v10523_v37 = vpop.f32.mrf.mxu1 }
 0x4aa   : > { %3579 = vmax.xlane.f32.xlu0 %v3578_v9  ;;  %v3024_v40 = vpop.f32.mrf.mxu1  ;;  %v12846_v9 = vmul.f32 0.35355338, %v3388_v6 }
 0x4ab   : > { %v12832_v27 = vmul.f32 0.35355338, %v3024_v40  ;;  %v3596_v40 = vsel %vm1027_vm2, %v12840_v16, -inf }
 0x4ac   : > { %v10534_v4 = vpop.f32.mrf.mxu1 }
 0x4ad   : > { %v3581_v35 = vsel %vm1027_vm2, %v12832_v27, -inf }
 0x4ae   : > { %3585 = vmax.xlane.f32.xlu0 %v3584_v34  ;;  %3582 = vmax.xlane.f32.xlu1 %v3581_v35  ;;  %v3027_v41 = vpop.f32.mrf.mxu1  ;;  %v12852_v35 = vmul.f32 0.35355338, %v3492_v15 }
 0x4af   : > { %v3602_v41 = vsel %vm1027_vm2, %v12846_v9, -inf }
 0x4b0   : > { %v10535_v29 = vpop.f32.mrf.mxu1 }
 0x4b2   : > { %3591 = vmax.xlane.f32.xlu0 %v3590_v52  ;;  %v3128_v54 = vpop.f32.mrf.mxu1 }
 0x4b3   : > { %v12844_v37 = vmul.f32 0.35355338, %v3128_v54  ;;  %v3608_v54 = vsel %vm1027_vm2, %v12852_v35, -inf }
 0x4b4   : > { %v10546_v39 = vpop.f32.mrf.mxu1 }
 0x4b5   : > { %v3587_v4 = vsel %vm1027_vm2, %v12844_v37, -inf }
 0x4b6   : > { %3597 = vmax.xlane.f32.xlu0 %v3596_v40  ;;  %3588 = vmax.xlane.f32.xlu1 %v3587_v4  ;;  %v3131_v51 = vpop.f32.mrf.mxu1 }
 0x4b8   : > { %v10547_v34 = vpop.f32.mrf.mxu1 }
 0x4ba   : > { %3603 = vmax.xlane.f32.xlu0 %v3602_v41  ;;  %v3232_v29 = vpop.f32.mrf.mxu1 }
 0x4bb   : > { %v12856_v52 = vmul.f32 0.35355338, %v3232_v29 }
 0x4bc   : > { %v10558_v6 = vpop.f32.mrf.mxu1 }
 0x4bd   : > { %v3593_v39 = vsel %vm1027_vm2, %v12856_v52, -inf }
 0x4be   : > { %3609 = vmax.xlane.f32.xlu0 %v3608_v54  ;;  %3594 = vmax.xlane.f32.xlu1 %v3593_v39  ;;  %v3235_v40 = vpop.f32.mrf.mxu1 }
 0x4c0   : > { %v10559_v4 = vpop.f32.mrf.mxu1 }
 0x4c1   : > { %v12872_v4 = vpop.permute.xlu0 %3955 }
 0x4c2   : > { %v3336_v15 = vpop.f32.mrf.mxu1 }
 0x4c3   : > { %v12862_v51 = vmul.f32 0.35355338, %v3336_v15 }
 0x4c4   : > { %v10570_v34 = vpop.f32.mrf.mxu1 }
 0x4c5   : > { %v3599_v41 = vsel %vm1027_vm2, %v12862_v51, -inf }
 0x4c6   : > { %3600 = vmax.xlane.f32.xlu1 %v3599_v41  ;;  %v3339_v29 = vpop.f32.mrf.mxu1 }
 0x4c7   : > { %v12876_v29 = vpop.permute.xlu0 %4053 }
 0x4c8   : > { %v10571_v6 = vpop.f32.mrf.mxu1 }
 0x4ca   : > { %v3440_v1 = vpop.f32.mrf.mxu1 }
 0x4cb   : > { %v12866_v2 = vmul.f32 0.35355338, %v3440_v1 }
 0x4cc   : > { %v10582_v53 = vpop.f32.mrf.mxu1 }
 0x4cd   : > { %v3605_v54 = vsel %vm1027_vm2, %v12866_v2, -inf }
 0x4ce   : > { %3606 = vmax.xlane.f32.xlu1 %v3605_v54  ;;  %v3443_v39 = vpop.f32.mrf.mxu1 }
 0x4d0   : > { %v10583_v40 = vpop.f32.mrf.mxu1 }
 0x4d2   : > { %v3544_v15 = vpop.f32.mrf.mxu1 }
 0x4d4   : > { %4151 = vrot.lane.b32.xlu0 %v12538_v38, %s11714_s0  ;;  %v10594_v34 = vpop.f32.mrf.mxu1 }
 0x4d6   : > { %v3547_v41 = vpop.f32.mrf.mxu1 }
 0x4d8   : > { %v10595_v1 = vpop.f32.mrf.mxu1 }
 0x4d9   : > { %v12894_v1 = vmul.f32 0.35355338, %v3544_v15 }
 0x4dc   : > { %v3568_v6 = vpop.xlane.xlu0 %3567 }
 0x4dd   : > { %v3614_v53 = vsub.f32 %v12800_v43, %v3568_v6  ;;  %v12898_v6 = vpop.permute.xlu1 %3906 }
 0x4df   : > { %v3630_v42 = vmul.f32 1.442695, %v3614_v53  ;;  %4200 = vrot.lane.b32.xlu1 %v12572_v61, %s11714_s0 }
 0x4e1   : > { %11343 = vpow2.f32 %v3630_v42  ;;  %v12900_v53 = vpop.permute.xlu1 %4004 }
 0x4e3   : > { %4249 = vrot.lane.b32.xlu1 %v12566_v19, %s11714_s0 }
 0x4e4   : > { %v3574_v54 = vpop.xlane.xlu0 %3573 }
 0x4e5   : > { %v3616_v39 = vsub.f32 %v12804_v44, %v3574_v54  ;;  %v3611_v44 = vsel %vm1027_vm2, %v12894_v1, -inf  ;;  %v12902_v54 = vpop.permute.xlu1 %4102 }
 0x4e6   : > { %15097 = vst [vmem:[#allocation53_spill] sm:$0xff] %v12902_v54 }
 0x4e7   : > { %v3634_v40 = vmul.f32 1.442695, %v3616_v39  ;;  %4298 = vrot.lane.b32.xlu1 %v12598_v50, %s11714_s0 }
 0x4e9   : > { %11345 = vpow2.f32 %v3634_v40 }
 0x4ee   : > { %v12886_v34 = vpop.eup %11343 }
 0x4ef   : > { %v3662_v43 = vsel %vm1027_vm2, %v12886_v34, 0.0 }
 0x4f3   : > { %3663 = vadd.xlane.f32.xlu0 %v3662_v43 }
 0x4f6   : > { %v12890_v41 = vpop.eup %11345 }
 0x4f7   : > { %v3668_v42 = vsel %vm1027_vm2, %v12890_v41, 0.0 }
 0x4f8   : > { %3669 = vadd.xlane.f32.xlu0 %v3668_v42 }
 0x50b   : > { %3612 = vmax.xlane.f32.xlu1 %v3611_v44 }
 0x527   : > { %v3571_v39 = vpop.xlane.xlu1 %3570 }
 0x528   : > { %v3615_v40 = vsub.f32 %v12818_v26, %v3571_v39 }
 0x52a   : > { %v3632_v43 = vmul.f32 1.442695, %v3615_v40 }
 0x52c   : > { %11347 = vpow2.f32 %v3632_v43 }
 0x52f   : > { %v3577_v38 = vpop.xlane.xlu0 %3576 }
 0x530   : > { %v3617_v42 = vsub.f32 %v12822_v25, %v3577_v38 }
 0x532   : > { %v3636_v15 = vmul.f32 1.442695, %v3617_v42 }
 0x533   : > { %v3580_v50 = vpop.xlane.xlu0 %3579 }
 0x534   : > { %11349 = vpow2.f32 %v3636_v15  ;;  %v3618_v19 = vsub.f32 %v12824_v21, %v3580_v50 }
 0x536   : > { %v3638_v44 = vmul.f32 1.442695, %v3618_v19 }
 0x537   : > { %v3586_v61 = vpop.xlane.xlu0 %3585  ;;  %v3583_v13 = vpop.xlane.xlu1 %3582 }
 0x538   : > { %11351 = vpow2.f32 %v3638_v44  ;;  %v3620_v32 = vsub.f32 %v12828_v46, %v3586_v61  ;;  %v3619_v54 = vsub.f32 %v12832_v27, %v3583_v13 }
 0x539   : > { %v12909_v36 = vpop.eup %11347 }
 0x53a   : > { %v3642_v26 = vmul.f32 1.442695, %v3620_v32  ;;  %v3640_v39 = vmul.f32 1.442695, %v3619_v54  ;;  %v3665_v38 = vsel %vm1027_vm2, %v12909_v36, 0.0 }
 0x53b   : > { %v3592_v25 = vpop.xlane.xlu0 %3591  ;;  %3666 = vadd.xlane.f32.xlu1 %v3665_v38 }
 0x53c   : > { %11353 = vpow2.f32 %v3642_v26  ;;  %v3622_v19 = vsub.f32 %v12834_v56, %v3592_v25 }
 0x53d   : > { %11355 = vpow2.f32 %v3640_v39 }
 0x53e   : > { %v3646_v46 = vmul.f32 1.442695, %v3622_v19 }
 0x53f   : > { %v3589_v50 = vpop.xlane.xlu1 %3588  ;;  %v3598_v21 = vpop.xlane.xlu0 %3597 }
 0x540   : > { %v3621_v40 = vsub.f32 %v12844_v37, %v3589_v50  ;;  %v3624_v27 = vsub.f32 %v12840_v16, %v3598_v21 }
 0x541   : > { %v12915_v61 = vpop.eup %11349 }
 0x542   : > { %v3644_v13 = vmul.f32 1.442695, %v3621_v40  ;;  %v3671_v32 = vsel %vm1027_vm2, %v12915_v61, 0.0  ;;  %v3650_v43 = vmul.f32 1.442695, %v3624_v27 }
 0x543   : > { %3672 = vadd.xlane.f32.xlu1 %v3671_v32 }
 0x544   : > { %11357 = vpow2.f32 %v3644_v13 }
 0x545   : > { %v12920_v54 = vpop.eup %11351  ;;  %11359 = vpow2.f32 %v3646_v46 }
 0x546   : > { %v3674_v56 = vsel %vm1027_vm2, %v12920_v54, 0.0  ;;  %11361 = vpow2.f32 %v3650_v43  ;;  %v3604_v43 = vpop.xlane.xlu0 %3603 }
 0x547   : > { %3675 = vadd.xlane.f32.xlu0 %v3674_v56  ;;  %v3595_v37 = vpop.xlane.xlu1 %3594 }
 0x548   : > { %v3623_v42 = vsub.f32 %v12856_v52, %v3595_v37 }
 0x549   : > { %v12925_v15 = vpop.eup %11353 }
 0x54a   : > { %v12927_v44 = vpop.eup %11355  ;;  %v3648_v26 = vmul.f32 1.442695, %v3623_v42  ;;  %v3680_v16 = vsel %vm1027_vm2, %v12925_v15, 0.0  ;;  %v3610_v37 = vpop.xlane.xlu0 %3609  ;;  %v3626_v42 = vsub.f32 %v12846_v9, %v3604_v43 }
 0x54b   : > { %3681 = vadd.xlane.f32.xlu0 %v3680_v16  ;;  %v3677_v39 = vsel %vm1027_vm2, %v12927_v44, 0.0 }
 0x54c   : > { %3678 = vadd.xlane.f32.xlu1 %v3677_v39  ;;  %11363 = vpow2.f32 %v3648_v26  ;;  %v3654_v16 = vmul.f32 1.442695, %v3626_v42  ;;  %v3628_v39 = vsub.f32 %v12852_v35, %v3610_v37 }
 0x54e   : > { %v12957_v26 = vpop.permute.xlu0 %4151 }
 0x54f   : > { %v3601_v38 = vpop.xlane.xlu1 %3600 }
 0x550   : > { %v3625_v25 = vsub.f32 %v12862_v51, %v3601_v38 }
 0x551   : > { %v12934_v19 = vpop.eup %11357 }
 0x552   : > { %v3652_v52 = vmul.f32 1.442695, %v3625_v25  ;;  %v3683_v50 = vsel %vm1027_vm2, %v12934_v19, 0.0  ;;  %v12938_v21 = vpop.eup %11359 }
 0x553   : > { %3684 = vadd.xlane.f32.xlu1 %v3683_v50  ;;  %v3686_v40 = vsel %vm1027_vm2, %v12938_v21, 0.0  ;;  %v12942_v13 = vpop.eup %11361  ;;  %v3658_v50 = vmul.f32 1.442695, %v3628_v39 }
 0x554   : > { %11365 = vpow2.f32 %v3652_v52  ;;  %v3692_v46 = vsel %vm1027_vm2, %v12942_v13, 0.0 }
 0x557   : > { %3687 = vadd.xlane.f32.xlu1 %v3686_v40  ;;  %v3607_v38 = vpop.xlane.xlu1 %3606 }
 0x558   : > { %v3627_v52 = vsub.f32 %v12866_v2, %v3607_v38  ;;  %v3863_v2 = vsel %vm1975_vm3, %v12868_v59, 0 }
 0x559   : > { %v12944_v32 = vpop.eup %11363 }
 0x55a   : > { %v3689_v51 = vsel %vm1027_vm2, %v12944_v32, 0.0 }
 0x55b   : > { %3690 = vadd.xlane.f32.xlu0 %v3689_v51  ;;  %3693 = vadd.xlane.f32.xlu1 %v3692_v46  ;;  %v3656_v51 = vmul.f32 1.442695, %v3627_v52  ;;  %v12963_v9 = vpop.permute.xlu1 %4200 }
 0x561   : > { %v12950_v27 = vpop.eup %11365 }
 0x562   : > { %v3695_v56 = vsel %vm1027_vm2, %v12950_v27, 0.0 }
 0x563   : > { %3696 = vadd.xlane.f32.xlu0 %v3695_v56  ;;  %v12965_v56 = vpop.permute.xlu1 %4249 }
 0x56c   : > { %4396 = vrot.lane.b32.xlu1 %v12662_v8, %s11714_s0 }
 0x579   : > { %4347 = vrot.lane.b32.xlu0 %v12590_v3, %s11714_s0 }
 0x57c   : > { %v3664_v25 = vpop.xlane.xlu0 %3663 }
 0x57d   : > { %11367 = vrcp.f32 %v3664_v25 }
 0x57e   : > { %11369 = vpow2.f32 %v3654_v16  ;;  %v12973_v16 = vpop.permute.xlu1 %4298 }
 0x581   : > { %v3670_v40 = vpop.xlane.xlu0 %3669 }
 0x582   : > { %11371 = vrcp.f32 %v3670_v40 }
 0x583   : > { %11373 = vpow2.f32 %v3658_v50 }
 0x584   : > { %11375 = vpow2.f32 %v3656_v51  ;;  %v3961_v51 = vsel %vm1975_vm3, %v12872_v4, 0 }
 0x58a   : > { %v11368_v46 = vpop.eup %11367 }
 0x58b   : > { %v3726_v43 = vmul.f32 %v11368_v46, %v12886_v34  ;;  %v12968_v35 = vpop.eup %11369 }
 0x58c   : > { %v3698_v39 = vsel %vm1027_vm2, %v12968_v35, 0.0 }
 0x58d   : > { %v3742_v37 = vpack.c.bf16 %v3726_v43, %v3726_v43 }
 0x58f   : > { %v11372_v42 = vpop.eup %11371  ;;  %10599 = vmatmul.mubr.msk.bf16.vlgmr.msra.gmra.mxu0 %vm1027_vm2, %v3742_v37 }
 0x590   : > { %10609 = vmatpush3.bf16.msra.mxu0 %v3863_v2  ;;  %10610 = vmatprep.mubr.msk.bf16.mxu0 %vm11713_vm1, %v15058_v17  ;;  %v12979_v38 = vpop.eup %11373  ;;  %v3728_v34 = vmul.f32 %v11372_v42, %v12890_v41 }
 0x591   : > { %3699 = vadd.xlane.f32.xlu1 %v3698_v39  ;;  %10620 = vmatprep.subr.bf16.mxu0 %v15058_v17  ;;  %v12983_v25 = vpop.eup %11375  ;;  %v3704_v59 = vsel %vm1027_vm2, %v12979_v38, 0.0 }
 0x592   : > { %v3744_v50 = vpack.c.bf16 %v3728_v34, %v3728_v34  ;;  %v3701_v41 = vsel %vm1027_vm2, %v12983_v25, 0.0 }
 0x594   : > { %v3613_v52 = vpop.xlane.xlu1 %3612 }
 0x595   : > { %3705 = vadd.xlane.f32.xlu1 %v3704_v59  ;;  %v3629_v40 = vsub.f32 %v12894_v1, %v3613_v52 }
 0x597   : > { %v3660_v46 = vmul.f32 1.442695, %v3629_v40  ;;  %10611 = vmatmul.mubr.msk.bf16.vlgmr.msra.gmra.mxu0 %vm1027_vm2, %v3744_v50  ;;  %v3912_v50 = vsel %vm1975_vm3, %v12898_v6, 0 }
 0x598   : > { %10621 = vmatpush3.bf16.msra.mxu0 %v3961_v51  ;;  %3702 = vadd.xlane.f32.xlu0 %v3701_v41  ;;  %v4010_v41 = vsel %vm1975_vm3, %v12900_v53, 0 }
 0x599   : > { %11377 = vpow2.f32 %v3660_v46  ;;  %10622 = vmatprep.mubr.msk.bf16.mxu0 %vm11713_vm1, %v15058_v17  ;;  %10632 = vmatprep.subr.bf16.mxu0 %v15058_v17 }
 0x5a6   : > { %v12996_v43 = vpop.eup %11377  ;;  %4494 = vrot.lane.b32.xlu1 %v12679_v62, %s11714_s0 }
 0x5a7   : > { %v3707_v4 = vsel %vm1027_vm2, %v12996_v43, 0.0 }
 0x5a8   : > { %3708 = vadd.xlane.f32.xlu0 %v3707_v4 }
 0x5aa   : > { %4852 = vrot.lane.b32.xlu1 %v12020_v58, %s11715_s30 }
 0x5ae   : > { %4850 = vrot.lane.b32.xlu1 %v12049_v12, %s11715_s30 }
 0x5b2   : > { %4952 = vrot.lane.b32.xlu1 %v12073_v22, %s11715_s30 }
 0x5b6   : > { %4950 = vrot.lane.b32.xlu1 %v12105_v48, %s11715_s30 }
 0x5ba   : > { %5052 = vrot.lane.b32.xlu1 %v12101_v47, %s11715_s30 }
 0x5be   : > { %5050 = vrot.lane.b32.xlu1 %v12134_v60, %s11715_s30  ;;  %4445 = vrot.lane.b32.xlu0 %v12616_v31, %s11714_s0 }
 0x5c2   : > { %5152 = vrot.lane.b32.xlu1 %v12129_v57, %s11715_s30  ;;  %4802 = vrot.lane.b32.xlu0 %v12013_v49, %s11715_s30 }
 0x5c4   : > { %v3667_v1 = vpop.xlane.xlu1 %3666 }
 0x5c5   : > { %11379 = vrcp.f32 %v3667_v1 }
 0x5c6   : > { %5150 = vrot.lane.b32.xlu1 %v15065_v14, %s11715_s30  ;;  %4800 = vrot.lane.b32.xlu0 %v12026_v63, %s11715_s30 }
 0x5ca   : > { %5252 = vrot.lane.b32.xlu1 %v15069_v30, %s11715_s30  ;;  %4902 = vrot.lane.b32.xlu0 %v12045_v10, %s11715_s30 }
 0x5cc   : > { %v3673_v37 = vpop.xlane.xlu1 %3672 }
 0x5cd   : > { %11381 = vrcp.f32 %v3673_v37 }
 0x5ce   : > { %5250 = vrot.lane.b32.xlu1 %v15070_v5, %s11715_s30  ;;  %4900 = vrot.lane.b32.xlu0 %v12077_v24, %s11715_s30 }
 0x5d0   : > { %v3676_v42 = vpop.xlane.xlu0 %3675 }
 0x5d1   : > { %11383 = vrcp.f32 %v3676_v42 }
 0x5d2   : > { %v11380_v2 = vpop.eup %11379  ;;  %5352 = vrot.lane.b32.xlu1 %v15072_v18, %s11715_s30  ;;  %5002 = vrot.lane.b32.xlu0 %v12028_v0, %s11715_s30 }
 0x5d3   : > { %v3727_v39 = vmul.f32 %v11380_v2, %v12909_v36 }
 0x5d4   : > { %v3682_v34 = vpop.xlane.xlu0 %3681 }
 0x5d5   : > { %v3743_v59 = vpack.c.bf16 %v3727_v39, %v3727_v39  ;;  %11385 = vrcp.f32 %v3682_v34  ;;  %v3679_v52 = vpop.xlane.xlu1 %3678 }
 0x5d6   : > { %11387 = vrcp.f32 %v3679_v52  ;;  %5350 = vrot.lane.b32.xlu1 %v15073_v33, %s11715_s30  ;;  %5000 = vrot.lane.b32.xlu0 %v12047_v11, %s11715_s30  ;;  %v15098_v52 = vld [vmem:[#allocation34_spill] sm:$0xff] }
 0x5d7   : > { %10605 = vmatmul.mubr.msk.bf16.vlgmr.msra.gmra.mxu1 %vm1027_vm2, %v3743_v59 }
 0x5d8   : > { %10615 = vmatpush3.bf16.msra.mxu1 %v3912_v50  ;;  %10616 = vmatprep.mubr.msk.bf16.mxu1 %vm11713_vm1, %v15058_v17 }
 0x5d9   : > { %10626 = vmatprep.subr.bf16.mxu1 %v15058_v17 }
 0x5da   : > { %v11382_v36 = vpop.eup %11381  ;;  %5452 = vrot.lane.b32.xlu1 %v15074_v55, %s11715_s30  ;;  %5102 = vrot.lane.b32.xlu0 %v12038_v7, %s11715_s30 }
 0x5db   : > { %v3729_v40 = vmul.f32 %v11382_v36, %v12915_v61 }
 0x5dc   : > { %v3685_v46 = vpop.xlane.xlu1 %3684 }
 0x5dd   : > { %v3745_v51 = vpack.c.bf16 %v3729_v40, %v3729_v40  ;;  %11389 = vrcp.f32 %v3685_v46  ;;  %v15102_v40 = vld [vmem:[#allocation15_spill] sm:$0xff]  ;;  %v4157_v46 = vsel %vm1975_vm3, %v12957_v26, 0  ;;  %v15104_v26 = vld [vmem:[#allocation18_spill] sm:$0xff] }
 0x5de   : > { %v11384_v6 = vpop.eup %11383  ;;  %5450 = vrot.lane.b32.xlu1 %v15075_v28, %s11715_s30  ;;  %5100 = vrot.lane.b32.xlu0 %v12075_v23, %s11715_s30 }
 0x5df   : > { %v3730_v4 = vmul.f32 %v11384_v6, %v12920_v54  ;;  %10617 = vmatmul.mubr.msk.bf16.vlgmr.msra.gmra.mxu1 %vm1027_vm2, %v3745_v51  ;;  %v4059_v54 = vsel %vm1975_vm3, %v12876_v29, 0  ;;  %v15099_v29 = vld [vmem:[#allocation16_spill] sm:$0xff] }
 0x5e0   : > { %10627 = vmatpush3.bf16.msra.mxu1 %v4010_v41  ;;  %10628 = vmatprep.mubr.msk.bf16.mxu1 %vm11713_vm1, %v15058_v17  ;;  %v3688_v1 = vpop.xlane.xlu1 %3687 }
 0x5e1   : > { %v3746_v61 = vpack.c.bf16 %v3730_v4, %v3730_v4  ;;  %10638 = vmatprep.subr.bf16.mxu1 %v15058_v17  ;;  %11391 = vrcp.f32 %v3688_v1 }
 0x5e2   : > { %v11386_v37 = vpop.eup %11385  ;;  %5552 = vrot.lane.b32.xlu1 %v15076_v45, %s11715_s30  ;;  %5202 = vrot.lane.b32.xlu0 %v12065_v20, %s11715_s30 }
 0x5e3   : > { %v11388_v53 = vpop.eup %11387  ;;  %10623 = vmatmul.mubr.msk.bf16.vlgmr.msra.gmra.mxu0 %vm1027_vm2, %v3746_v61  ;;  %v3732_v2 = vmul.f32 %v11386_v37, %v12925_v15  ;;  %v15101_v15 = vld [vmem:[#allocation36_spill] sm:$0xff]  ;;  %v15103_v61 = vld [vmem:[#allocation41_spill] sm:$0xff]  ;;  %v4206_v37 = vsel %vm1975_vm3, %v12963_v9, 0 }
 0x5e4   : > { %v3731_v42 = vmul.f32 %v11388_v53, %v12927_v44  ;;  %10633 = vmatpush3.bf16.msra.mxu0 %v4059_v54  ;;  %10634 = vmatprep.mubr.msk.bf16.mxu0 %vm11713_vm1, %v15058_v17  ;;  %v3691_v39 = vpop.xlane.xlu0 %3690  ;;  %v3694_v34 = vpop.xlane.xlu1 %3693  ;;  %v15100_v44 = vld [vmem:[#allocation53_spill] sm:$0xff] }
 0x5e5   : > { %10644 = vmatprep.subr.bf16.mxu0 %v15058_v17  ;;  %11393 = vrcp.f32 %v3691_v39  ;;  %v4108_v50 = vsel %vm1975_vm3, %v15100_v44, 0  ;;  %v3748_v36 = vpack.c.bf16 %v3732_v2, %v3732_v2  ;;  %v15105_v54 = vld [vmem:[#allocation17_spill] sm:$0xff]  ;;  %v4255_v39 = vsel %vm1975_vm3, %v12965_v56, 0 }
 0x5e6   : > { %v3747_v59 = vpack.c.bf16 %v3731_v42, %v3731_v42  ;;  %5550 = vrot.lane.b32.xlu1 %v15098_v52, %s11715_s30  ;;  %5200 = vrot.lane.b32.xlu0 %v15099_v29, %s11715_s30  ;;  %11395 = vrcp.f32 %v3694_v34  ;;  %v4304_v44 = vsel %vm1975_vm3, %v12973_v16, 0 }
 0x5e8   : > { %10629 = vmatmul.mubr.msk.bf16.vlgmr.msra.gmra.mxu1 %vm1027_vm2, %v3747_v59  ;;  %v15106_v59 = vld [vmem:[#allocation21_spill] sm:$0xff]  ;;  %v4397_v16 = vpop.permute.xlu1 %4396 }
 0x5e9   : > { %10639 = vmatpush3.bf16.msra.mxu1 %v4108_v50  ;;  %10640 = vmatprep.mubr.msk.bf16.mxu1 %vm11713_vm1, %v15058_v17 }
 0x5ea   : > { %5856 = vrot.lane.b32.xlu1 %v15101_v15, %s11715_s30  ;;  %5302 = vrot.lane.b32.xlu0 %v15102_v40, %s11715_s30  ;;  %v11390_v51 = vpop.eup %11389 }
 0x5eb   : > { %10635 = vmatmul.mubr.msk.bf16.vlgmr.msra.gmra.mxu0 %vm1027_vm2, %v3748_v36  ;;  %10650 = vmatprep.subr.bf16.mxu1 %v15058_v17  ;;  %v3733_v6 = vmul.f32 %v11390_v51, %v12934_v19  ;;  %v15107_v36 = vld [vmem:[#allocation19_spill] sm:$0xff] }
 0x5ec   : > { %10645 = vmatpush3.bf16.msra.mxu0 %v4157_v46  ;;  %v3697_v41 = vpop.xlane.xlu0 %3696  ;;  %10646 = vmatprep.mubr.msk.bf16.mxu0 %vm11713_vm1, %v15058_v17 }
 0x5ed   : > { %11397 = vrcp.f32 %v3697_v41  ;;  %10656 = vmatprep.subr.bf16.mxu0 %v15058_v17  ;;  %v3749_v4 = vpack.c.bf16 %v3733_v6, %v3733_v6  ;;  %v15108_v6 = vld [vmem:[#allocation25_spill] sm:$0xff]  ;;  %v4402_v41 = vsel %vm1975_vm3, %v4397_v16, 0 }
 0x5ee   : > { %5952 = vrot.lane.b32.xlu1 %v15103_v61, %s11715_s30  ;;  %5300 = vrot.lane.b32.xlu0 %v15104_v26, %s11715_s30  ;;  %v11392_v1 = vpop.eup %11391 }
 0x5ef   : > { %v3734_v19 = vmul.f32 %v11392_v1, %v12938_v21 }
 0x5f0   : > { %10641 = vmatmul.mubr.msk.bf16.vlgmr.msra.gmra.mxu1 %vm1027_vm2, %v3749_v4  ;;  %v15110_v4 = vld [vmem:[#allocation38_spill] sm:$0xff] }
 0x5f1   : > { %10651 = vmatpush3.bf16.msra.mxu1 %v4206_v37  ;;  %10652 = vmatprep.mubr.msk.bf16.mxu1 %vm11713_vm1, %v15058_v17  ;;  %v3750_v53 = vpack.c.bf16 %v3734_v19, %v3734_v19 }
 0x5f2   : > { %5402 = vrot.lane.b32.xlu0 %v15105_v54, %s11715_s30  ;;  %10662 = vmatprep.subr.bf16.mxu1 %v15058_v17  ;;  %v11394_v42 = vpop.eup %11393 }
 0x5f3   : > { %v11396_v2 = vpop.eup %11395  ;;  %v3735_v9 = vmul.f32 %v11394_v42, %v12944_v32  ;;  %10647 = vmatmul.mubr.msk.bf16.vlgmr.msra.gmra.mxu0 %vm1027_vm2, %v3750_v53  ;;  %v4348_v32 = vpop.permute.xlu0 %4347 }
 0x5f4   : > { %10657 = vmatpush3.bf16.msra.mxu0 %v4255_v39  ;;  %10658 = vmatprep.mubr.msk.bf16.mxu0 %vm11713_vm1, %v15058_v17  ;;  %v3736_v34 = vmul.f32 %v11396_v2, %v12942_v13  ;;  %v4353_v51 = vsel %vm1975_vm3, %v4348_v32, 0 }
 0x5f5   : > { %v3751_v21 = vpack.c.bf16 %v3735_v9, %v3735_v9  ;;  %10668 = vmatprep.subr.bf16.mxu0 %v15058_v17 }
 0x5f6   : > { %5400 = vrot.lane.b32.xlu0 %v15106_v59, %s11715_s30  ;;  %v3752_v50 = vpack.c.bf16 %v3736_v34, %v3736_v34 }
 0x5f8   : > { %10653 = vmatmul.mubr.msk.bf16.vlgmr.msra.gmra.mxu1 %vm1027_vm2, %v3751_v21 }
 0x5f9   : > { %10663 = vmatpush3.bf16.msra.mxu1 %v4304_v44  ;;  %10664 = vmatprep.mubr.msk.bf16.mxu1 %vm11713_vm1, %v15058_v17 }
 0x5fa   : > { %v11398_v56 = vpop.eup %11397  ;;  %5502 = vrot.lane.b32.xlu0 %v15107_v36, %s11715_s30  ;;  %10674 = vmatprep.subr.bf16.mxu1 %v15058_v17 }
 0x5fb   : > { %v3737_v13 = vmul.f32 %v11398_v56, %v12950_v27  ;;  %10659 = vmatmul.mubr.msk.bf16.vlgmr.msra.gmra.mxu0 %vm1027_vm2, %v3752_v50  ;;  %v15109_v27 = vld [vmem:[#allocation35_spill] sm:$0xff] }
 0x5fc   : > { %10669 = vmatpush3.bf16.msra.mxu0 %v4353_v51  ;;  %10670 = vmatprep.mubr.msk.bf16.mxu0 %vm11713_vm1, %v15058_v17  ;;  %v2717_v56 = vld [vmem:[%s14910_s7] sm:$0xf] }
 0x5fd   : > { %v3753_v46 = vpack.c.bf16 %v3737_v13, %v3737_v13  ;;  %10680 = vmatprep.subr.bf16.mxu0 %v15058_v17 }
 0x5fe   : > { %5500 = vrot.lane.b32.xlu0 %v15108_v6, %s11715_s30 }
 0x600   : > { %10665 = vmatmul.mubr.msk.bf16.vlgmr.msra.gmra.mxu1 %vm1027_vm2, %v3753_v46 }
 0x601   : > { %10675 = vmatpush3.bf16.msra.mxu1 %v4402_v41  ;;  %10676 = vmatprep.mubr.msk.bf16.mxu1 %vm11713_vm1, %v15058_v17 }
 0x602   : > { %5808 = vrot.lane.b32.xlu0 %v15109_v27, %s11715_s30  ;;  %10686 = vmatprep.subr.bf16.mxu1 %v15058_v17 }
 0x606   : > { %5904 = vrot.lane.b32.xlu0 %v15110_v4, %s11715_s30 }
 0x61a   : > { %v3700_v1 = vpop.xlane.xlu1 %3699 }
 0x61b   : > { %11399 = vrcp.f32 %v3700_v1 }
 0x61e   : > { %v3706_v37 = vpop.xlane.xlu1 %3705 }
 0x621   : > { %v3703_v19 = vpop.xlane.xlu0 %3702 }
 0x622   : > { %11401 = vrcp.f32 %v3703_v19  ;;  %v4495_v34 = vpop.permute.xlu1 %4494  ;;  %v4701_v19 = vsel %vm1975_vm3, %v2717_v56, 0 }
 0x623   : > { %11403 = vrcp.f32 %v3706_v37  ;;  %v4500_v50 = vsel %vm1975_vm3, %v4495_v34, 0  ;;  %v15115_v34 = vld [vmem:[#allocation20_spill] sm:$0xff] }
 0x626   : > { %v4853_v1 = vpop.permute.xlu1 %4852 }
 0x628   : > { %v11400_v53 = vpop.eup %11399 }
 0x629   : > { %v3738_v42 = vmul.f32 %v11400_v53, %v12968_v35  ;;  %v15111_v53 = vld [vmem:[#allocation29_spill] sm:$0xff] }
 0x62b   : > { %v3754_v2 = vpack.c.bf16 %v3738_v42, %v3738_v42  ;;  %v15112_v42 = vld [vmem:[#allocation32_spill] sm:$0xff] }
 0x62d   : > { %10671 = vmatmul.mubr.msk.bf16.vlgmr.msra.gmra.mxu0 %vm1027_vm2, %v3754_v2  ;;  %v15113_v2 = vpack.c.bf16 %v15111_v53, %v15112_v42 }
 0x62e   : > { %10682 = vmatprep.mubr.msk.bf16.mxu0 %vm11713_vm1, %v15058_v17 }
 0x62f   : > { %v11402_v39 = vpop.eup %11401 }
 0x630   : > { %v3739_v9 = vmul.f32 %v11402_v39, %v12983_v25  ;;  %v11404_v21 = vpop.eup %11403  ;;  %v9769_v25 = vld [vmem:[%s14910_s7 + $0x4] sm:$0xf]  ;;  %v4851_v39 = vpop.permute.xlu1 %4850 }
 0x631   : > { %v3709_v44 = vpop.xlane.xlu0 %3708  ;;  %v3740_v35 = vmul.f32 %v11404_v21, %v12979_v38  ;;  %v4577_v38 = vsel %vm1975_vm3, %v9769_v25, 0  ;;  %v15114_v21 = vld [vmem:[#allocation31_spill] sm:$0xff] }
 0x632   : > { %v3755_v32 = vpack.c.bf16 %v3739_v9, %v3739_v9  ;;  %11405 = vrcp.f32 %v3709_v44  ;;  %v4858_v9 = vsel %vm1027_vm2, %v4853_v1, 0  ;;  %v15123_v1 = vld [vmem:[#allocation47_spill] sm:$0xff] }
 0x633   : > { %v3756_v16 = vpack.c.bf16 %v3740_v35, %v3740_v35 }
 0x634   : > { %10677 = vmatmul.mubr.msk.bf16.vlgmr.msra.gmra.mxu1 %vm1027_vm2, %v3755_v32  ;;  %v4953_v44 = vpop.permute.xlu1 %4952  ;;  %v15117_v32 = vld [vmem:[#allocation27_spill] sm:$0xff] }
 0x635   : > { %10687 = vmatpush3.bf16.msra.mxu1 %v4500_v50  ;;  %v4446_v13 = vpop.permute.xlu0 %4445  ;;  %10688 = vmatprep.mubr.msk.bf16.mxu1 %vm11713_vm1, %v15058_v17 }
 0x636   : > { %v4451_v51 = vsel %vm1975_vm3, %v4446_v13, 0  ;;  %11205 = vmatprep.subr.msk.bf16.mxu1 %vm1975_vm3, %v2717_v56  ;;  %v15118_v56 = vld [vmem:[#allocation24_spill] sm:$0xff] }
 0x637   : > { %10681 = vmatpush3.bf16.msra.mxu0 %v4451_v51  ;;  %v15119_v35 = vpack.c.bf16 %v15117_v32, %v15118_v56  ;;  %v15129_v56 = vld [vmem:[#allocation51_spill] sm:$0xff] }
 0x638   : > { %11204 = vmatprep.subr.msk.bf16.mxu0 %vm1975_vm3, %v9769_v25  ;;  %v4951_v25 = vpop.permute.xlu1 %4950 }
 0x63a   : > { %10683 = vmatmul.mubr.msk.bf16.vlgmr.msra.gmra.mxu0 %vm1027_vm2, %v3756_v16  ;;  %v15120_v16 = vld [vmem:[#allocation37_spill] sm:$0xff] }
 0x63b   : > { %10693 = vmatpush3.bf16.msra.mxu0 %v4577_v38  ;;  %v15121_v38 = vld [vmem:[#allocation23_spill] sm:$0xff] }
 0x63c   : > { %10728 = vmatprep.subr.bf16.mxu0 %v15058_v17  ;;  %v5053_v42 = vpop.permute.xlu1 %5052 }
 0x63f   : > { %v11406_v46 = vpop.eup %11405 }
 0x640   : > { %v3741_v41 = vmul.f32 %v11406_v46, %v12996_v43  ;;  %v15116_v43 = vpack.c.bf16 %v15114_v21, %v15115_v34  ;;  %v15122_v46 = vpack.c.bf16 %v15120_v16, %v15121_v38  ;;  %v15126_v21 = vld [vmem:[#allocation50_spill] sm:$0xff]  ;;  %v15127_v34 = vld [vmem:[#allocation33_spill] sm:$0xff]  ;;  %v15133_v38 = vld [vmem:[#allocation52_spill] sm:$0xff] }
 0x641   : > { %v15132_v16 = vld [vmem:[#allocation49_spill] sm:$0xff] }
 0x642   : > { %v3757_v37 = vpack.c.bf16 %v3741_v41, %v3741_v41 }
 0x644   : > { %10689 = vmatmul.mubr.msk.bf16.vlgmr.msra.gmra.mxu1 %vm1027_vm2, %v3757_v37  ;;  %v15124_v37 = vld [vmem:[#allocation26_spill] sm:$0xff] }
 0x645   : > { %10712 = vmatprep.mubr.msk.bf16.mxu1 %vm1027_vm2, %v15113_v2  ;;  %10711 = vmatpush3.bf16.msra.mxu1 %v4701_v19  ;;  %v15125_v19 = vpack.c.bf16 %v15123_v1, %v15124_v37  ;;  %v4958_v37 = vsel %vm1027_vm2, %v4953_v44, 0 }
 0x646   : > { %10734 = vmatprep.subr.bf16.mxu1 %v15058_v17 }
 0x64c   : > { %10713 = vmatmul.mubr.msk.bf16.vlgmr.msra.gmra.mxu1 %vm1027_vm2, %v15116_v43  ;;  %v15128_v43 = vpack.c.bf16 %v15126_v21, %v15127_v34 }
 0x64d   : > { %10735 = vmatpush3.bf16.xpose.msra.mxu1 %v4858_v9  ;;  %10716 = vmatprep.mubr.msk.bf16.mxu1 %vm1027_vm2, %v15119_v35  ;;  %v15130_v35 = vld [vmem:[#allocation48_spill] sm:$0xff] }
 0x64e   : > { %10746 = vmatprep.subr.bf16.mxu1 %v15058_v17 }
 0x64f   : > { %v3801_v50 = vpop.f32.mrf.mxu0 }
 0x651   : > { %v10600_v13 = vpop.f32.mrf.mxu0 }
 0x652   : > { %v15131_v13 = vpack.c.bf16 %v15129_v56, %v15130_v35 }
 0x653   : > { %v3804_v51 = vpop.f32.mrf.mxu0 }
 0x654   : > { %10717 = vmatmul.mubr.msk.bf16.gmra.mxu1 %vm1027_vm2, %v15122_v46  ;;  %v5051_v51 = vpop.permute.xlu1 %5050  ;;  %v2716_v46 = vpack.c.bf16 %v15133_v38, %v15132_v16 }
 0x655   : > { %v10601_v41 = vpop.f32.mrf.mxu0  ;;  %10720 = vmatprep.mubr.msk.bf16.mxu1 %vm1027_vm2, %v15125_v19 }
 0x657   : > { %v13192_v53 = vpop.f32.mrf.mxu0 }
 0x658   : > { %v5153_v41 = vpop.permute.xlu1 %5152 }
 0x659   : > { %v10612_v2 = vpop.f32.mrf.mxu0 }
 0x65a   : > { %v5058_v2 = vsel %vm1027_vm2, %v5053_v42, 0 }
 0x65b   : > { %v3902_v9 = vpop.f32.mrf.mxu0 }
 0x65c   : > { %10721 = vmatmul.mubr.msk.bf16.gmra.mxu1 %vm1027_vm2, %v15128_v43  ;;  %v5151_v1 = vpop.permute.xlu1 %5150 }
 0x65d   : > { %v10613_v32 = vpop.f32.mrf.mxu0  ;;  %10724 = vmatprep.mubr.msk.bf16.mxu1 %vm1027_vm2, %v15131_v13 }
 0x660   : > { %v5253_v19 = vpop.permute.xlu1 %5252 }
 0x664   : > { %10725 = vmatmul.mubr.msk.bf16.gmra.mxu1 %vm1027_vm2, %v2716_v46  ;;  %v5251_v44 = vpop.permute.xlu1 %5250 }
 0x665   : > { %10736 = vmatprep.mubr.msk.bf16.mxu1 %vm11713_vm1, %v15058_v17 }
 0x668   : > { %v5353_v9 = vpop.permute.xlu1 %5352 }
 0x669   : > { %v5358_v34 = vsel %vm1027_vm2, %v5353_v9, 0 }
 0x66c   : > { %10737 = vmatmul.mubr.msk.bf16.vlgmr.msra.gmra.mxu1 %vm1027_vm2, %v4851_v39  ;;  %v5158_v39 = vsel %vm1027_vm2, %v5153_v41, 0  ;;  %v5351_v42 = vpop.permute.xlu1 %5350 }
 0x66d   : > { %10747 = vmatpush3.bf16.xpose.msra.mxu1 %v4958_v37  ;;  %10748 = vmatprep.mubr.msk.bf16.mxu1 %vm11713_vm1, %v15058_v17 }
 0x66e   : > { %10758 = vmatprep.subr.bf16.mxu1 %v15058_v17 }
 0x670   : > { %v5453_v21 = vpop.permute.xlu1 %5452 }
 0x671   : > { %v5458_v32 = vsel %vm1027_vm2, %v5453_v21, 0 }
 0x674   : > { %10749 = vmatmul.mubr.msk.bf16.vlgmr.msra.gmra.mxu1 %vm1027_vm2, %v4951_v25  ;;  %v5258_v25 = vsel %vm1027_vm2, %v5253_v19, 0  ;;  %v5451_v43 = vpop.permute.xlu1 %5450 }
 0x675   : > { %10759 = vmatpush3.bf16.xpose.msra.mxu1 %v5058_v2  ;;  %10760 = vmatprep.mubr.msk.bf16.mxu1 %vm11713_vm1, %v15058_v17 }
 0x676   : > { %10770 = vmatprep.subr.bf16.mxu1 %v15058_v17 }
 0x678   : > { %v5553_v56 = vpop.permute.xlu1 %5552 }
 0x679   : > { %v5558_v46 = vsel %vm1027_vm2, %v5553_v56, 0 }
 0x67c   : > { %10761 = vmatmul.mubr.msk.bf16.vlgmr.msra.gmra.mxu1 %vm1027_vm2, %v5051_v51  ;;  %v5551_v16 = vpop.permute.xlu1 %5550 }
 0x67d   : > { %10771 = vmatpush3.bf16.xpose.msra.mxu1 %v5158_v39  ;;  %10772 = vmatprep.mubr.msk.bf16.mxu1 %vm11713_vm1, %v15058_v17 }
 0x67e   : > { %10782 = vmatprep.subr.bf16.mxu1 %v15058_v17 }
 0x680   : > { %v5857_v19 = vpop.permute.xlu1 %5856 }
 0x684   : > { %10773 = vmatmul.mubr.msk.bf16.vlgmr.msra.gmra.mxu1 %vm1027_vm2, %v5151_v1  ;;  %v4803_v1 = vpop.permute.xlu0 %4802 }
 0x685   : > { %10783 = vmatpush3.bf16.xpose.msra.mxu1 %v5258_v25  ;;  %10784 = vmatprep.mubr.msk.bf16.mxu1 %vm11713_vm1, %v15058_v17 }
 0x686   : > { %10794 = vmatprep.subr.bf16.mxu1 %v15058_v17 }
 0x68c   : > { %10785 = vmatmul.mubr.msk.bf16.vlgmr.msra.gmra.mxu1 %vm1027_vm2, %v5251_v44  ;;  %v4808_v44 = vsel %vm1027_vm2, %v4803_v1, 0 }
 0x68d   : > { %10795 = vmatpush3.bf16.xpose.msra.mxu1 %v5358_v34  ;;  %10796 = vmatprep.mubr.msk.bf16.mxu1 %vm11713_vm1, %v15058_v17 }
 0x68e   : > { %10806 = vmatprep.subr.bf16.mxu1 %v15058_v17 }
 0x694   : > { %10797 = vmatmul.mubr.msk.bf16.vlgmr.msra.gmra.mxu1 %vm1027_vm2, %v5351_v42  ;;  %v5862_v42 = vsel %vm1975_vm3, %v5857_v19, 0 }
 0x695   : > { %10807 = vmatpush3.bf16.xpose.msra.mxu1 %v5458_v32  ;;  %10808 = vmatprep.mubr.msk.bf16.mxu1 %vm11713_vm1, %v15058_v17 }
 0x696   : > { %10818 = vmatprep.subr.bf16.mxu1 %v15058_v17 }
 0x697   : > { %v3850_v35 = vpop.f32.mrf.mxu1 }
 0x698   : > { %v4542_v13 = vpack.c.bf16 %v3850_v35, %v3801_v50 }
 0x699   : > { %v10606_v51 = vpop.f32.mrf.mxu1 }
 0x69a   : > { %10694 = vmatprep.mubr.msk.bf16.mxu0 %vm1027_vm2, %v4542_v13 }
 0x69b   : > { %v3853_v38 = vpop.f32.mrf.mxu1 }
 0x69c   : > { %10809 = vmatmul.mubr.msk.bf16.vlgmr.msra.gmra.mxu1 %vm1027_vm2, %v5451_v43 }
 0x69d   : > { %10819 = vmatpush3.bf16.xpose.msra.mxu1 %v5558_v46  ;;  %v10607_v41 = vpop.f32.mrf.mxu1  ;;  %10820 = vmatprep.mubr.msk.bf16.mxu1 %vm11713_vm1, %v15058_v17 }
 0x69e   : > { %10830 = vmatprep.subr.bf16.mxu1 %v15058_v17 }
 0x69f   : > { %v3948_v37 = vpop.f32.mrf.mxu1 }
 0x6a0   : > { %v4543_v50 = vpack.c.bf16 %v3948_v37, %v13192_v53 }
 0x6a1   : > { %v10618_v2 = vpop.f32.mrf.mxu1 }
 0x6a2   : > { %10695 = vmatmul.mubr.msk.bf16.vlgmr.msra.gmra.mxu0 %vm1027_vm2, %v4543_v50 }
 0x6a3   : > { %10729 = vmatpush3.bf16.xpose.msra.mxu0 %v4808_v44  ;;  %v3951_v39 = vpop.f32.mrf.mxu1  ;;  %v3997_v9 = vpop.f32.mrf.mxu0 }
 0x6a4   : > { %10821 = vmatmul.mubr.msk.bf16.vlgmr.msra.gmra.mxu1 %vm1027_vm2, %v5551_v16  ;;  %10740 = vmatprep.subr.bf16.mxu0 %v15058_v17 }
 0x6a5   : > { %10831 = vmatpush3.bf16.msra.mxu1 %v5862_v42  ;;  %v10619_v25 = vpop.f32.mrf.mxu1  ;;  %v10624_v21 = vpop.f32.mrf.mxu0  ;;  %10832 = vmatprep.mubr.msk.bf16.mxu1 %vm11713_vm1, %v15058_v17 }
 0x6a6   : > { %10842 = vmatprep.subr.bf16.mxu1 %v15058_v17 }
 0x6a7   : > { %v4000_v53 = vpop.f32.mrf.mxu0 }
 0x6a8   : > { %v4046_v34 = vpop.f32.mrf.mxu1 }
 0x6a9   : > { %v4544_v43 = vpack.c.bf16 %v4046_v34, %v3997_v9  ;;  %v10625_v32 = vpop.f32.mrf.mxu0 }
 0x6aa   : > { %v10630_v56 = vpop.f32.mrf.mxu1 }
 0x6ab   : > { %10698 = vmatprep.mubr.msk.bf16.mxu0 %vm1027_vm2, %v4544_v43  ;;  %v4095_v35 = vpop.f32.mrf.mxu0 }
 0x6ac   : > { %v4049_v13 = vpop.f32.mrf.mxu1 }
 0x6ad   : > { %v10636_v51 = vpop.f32.mrf.mxu0 }
 0x6ae   : > { %v10631_v16 = vpop.f32.mrf.mxu1 }
 0x6af   : > { %v4098_v38 = vpop.f32.mrf.mxu0 }
 0x6b0   : > { %v4144_v46 = vpop.f32.mrf.mxu1 }
 0x6b1   : > { %v4545_v41 = vpack.c.bf16 %v4144_v46, %v4095_v35  ;;  %v10637_v1 = vpop.f32.mrf.mxu0 }
 0x6b2   : > { %v10642_v37 = vpop.f32.mrf.mxu1 }
 0x6b3   : > { %10699 = vmatmul.mubr.msk.bf16.gmra.mxu0 %vm1027_vm2, %v4545_v41  ;;  %v4193_v19 = vpop.f32.mrf.mxu0  ;;  %v4801_v41 = vpop.permute.xlu0 %4800 }
 0x6b4   : > { %v4147_v50 = vpop.f32.mrf.mxu1 }
 0x6b5   : > { %v10648_v44 = vpop.f32.mrf.mxu0 }
 0x6b6   : > { %v10643_v2 = vpop.f32.mrf.mxu1 }
 0x6b7   : > { %v4196_v39 = vpop.f32.mrf.mxu0  ;;  %v4903_v50 = vpop.permute.xlu0 %4902 }
 0x6b8   : > { %v4242_v9 = vpop.f32.mrf.mxu1 }
 0x6b9   : > { %v4546_v42 = vpack.c.bf16 %v4242_v9, %v4193_v19  ;;  %v10649_v25 = vpop.f32.mrf.mxu0 }
 0x6ba   : > { %v10654_v21 = vpop.f32.mrf.mxu1 }
 0x6bb   : > { %10702 = vmatprep.mubr.msk.bf16.mxu0 %vm1027_vm2, %v4546_v42  ;;  %v4291_v34 = vpop.f32.mrf.mxu0  ;;  %v4901_v9 = vpop.permute.xlu0 %4900 }
 0x6bc   : > { %v4245_v53 = vpop.f32.mrf.mxu1 }
 0x6bd   : > { %v10660_v32 = vpop.f32.mrf.mxu0 }
 0x6be   : > { %v10655_v43 = vpop.f32.mrf.mxu1 }
 0x6bf   : > { %v4294_v56 = vpop.f32.mrf.mxu0 }
 0x6c0   : > { %v4340_v35 = vpop.f32.mrf.mxu1 }
 0x6c1   : > { %v4547_v13 = vpack.c.bf16 %v4340_v35, %v4291_v34  ;;  %v10661_v51 = vpop.f32.mrf.mxu0  ;;  %v5003_v34 = vpop.permute.xlu0 %5002 }
 0x6c2   : > { %v10666_v16 = vpop.f32.mrf.mxu1 }
 0x6c3   : > { %10703 = vmatmul.mubr.msk.bf16.gmra.mxu0 %vm1027_vm2, %v4547_v13 }
 0x6c4   : > { %v4343_v38 = vpop.f32.mrf.mxu1 }
 0x6c5   : > { %v5001_v35 = vpop.permute.xlu0 %5000 }
 0x6c6   : > { %v10667_v46 = vpop.f32.mrf.mxu1 }
 0x6c9   : > { %v5103_v38 = vpop.permute.xlu0 %5102 }
 0x6ed   : > { %v4389_v1 = vpop.f32.mrf.mxu0 }
 0x6ef   : > { %v10672_v37 = vpop.f32.mrf.mxu0 }
 0x6f1   : > { %v4392_v19 = vpop.f32.mrf.mxu0 }
 0x6f2   : > { %v5101_v19 = vpop.permute.xlu0 %5100 }
 0x6f3   : > { %v10673_v2 = vpop.f32.mrf.mxu0 }
 0x6f4   : > { %v4438_v44 = vpop.f32.mrf.mxu1 }
 0x6f5   : > { %v4548_v39 = vpack.c.bf16 %v4438_v44, %v4389_v1  ;;  %v4908_v44 = vsel %vm1027_vm2, %v4903_v50, 0 }
 0x6f6   : > { %v10678_v42 = vpop.f32.mrf.mxu1 }
 0x6f7   : > { %10706 = vmatprep.mubr.msk.bf16.mxu0 %vm1027_vm2, %v4548_v39 }
 0x6f8   : > { %v4441_v25 = vpop.f32.mrf.mxu1 }
 0x6f9   : > { %v5203_v25 = vpop.permute.xlu0 %5202 }
 0x6fa   : > { %v10679_v21 = vpop.f32.mrf.mxu1  ;;  %v4487_v53 = vpop.f32.mrf.mxu0 }
 0x6fc   : > { %v10684_v43 = vpop.f32.mrf.mxu0 }
 0x6fd   : > { %v5008_v43 = vsel %vm1027_vm2, %v5003_v34, 0  ;;  %v5201_v50 = vpop.permute.xlu0 %5200 }
 0x6fe   : > { %v4490_v32 = vpop.f32.mrf.mxu0 }
 0x700   : > { %v10685_v56 = vpop.f32.mrf.mxu0 }
 0x704   : > { %v4536_v13 = vpop.f32.mrf.mxu1 }
 0x705   : > { %v4549_v51 = vpack.c.bf16 %v4536_v13, %v4487_v53 }
 0x706   : > { %v10690_v16 = vpop.f32.mrf.mxu1 }
 0x707   : > { %10707 = vmatmul.mubr.msk.bf16.gmra.mxu0 %vm1027_vm2, %v4549_v51  ;;  %v5108_v51 = vsel %vm1027_vm2, %v5103_v38, 0  ;;  %v5208_v38 = vsel %vm1027_vm2, %v5203_v25, 0 }
 0x708   : > { %v4539_v46 = vpop.f32.mrf.mxu1  ;;  %10730 = vmatprep.mubr.msk.bf16.mxu0 %vm11713_vm1, %v15058_v17 }
 0x70a   : > { %v10691_v1 = vpop.f32.mrf.mxu1 }
 0x70c   : > { %v13260_v37 = vpop.f32.mrf.mxu1 }
 0x70d   : > { %15134 = vst [vmem:[#allocation16_spill] sm:$0xff] %v13260_v37 }
 0x70e   : > { %v13262_v2 = vpop.f32.mrf.mxu1 }
 0x70f   : > { %15135 = vst [vmem:[#allocation53_spill] sm:$0xff] %v13262_v2  ;;  %10731 = vmatmul.mubr.msk.bf16.vlgmr.msra.gmra.mxu0 %vm1027_vm2, %v4801_v41 }
 0x710   : > { %10741 = vmatpush3.bf16.xpose.msra.mxu0 %v4908_v44  ;;  %v13266_v39 = vpop.f32.mrf.mxu1  ;;  %10742 = vmatprep.mubr.msk.bf16.mxu0 %vm11713_vm1, %v15058_v17 }
 0x711   : > { %15136 = vst [vmem:[#allocation15_spill] sm:$0xff] %v13266_v39  ;;  %10752 = vmatprep.subr.bf16.mxu0 %v15058_v17 }
 0x712   : > { %v13271_v42 = vpop.f32.mrf.mxu1 }
 0x713   : > { %15137 = vst [vmem:[#allocation18_spill] sm:$0xff] %v13271_v42 }
 0x714   : > { %v13273_v21 = vpop.f32.mrf.mxu1 }
 0x715   : > { %15138 = vst [vmem:[#allocation17_spill] sm:$0xff] %v13273_v21 }
 0x716   : > { %v13275_v53 = vpop.f32.mrf.mxu1 }
 0x717   : > { %15139 = vst [vmem:[#allocation21_spill] sm:$0xff] %v13275_v53  ;;  %10743 = vmatmul.mubr.msk.bf16.vlgmr.msra.gmra.mxu0 %vm1027_vm2, %v4901_v9  ;;  %v5303_v9 = vpop.permute.xlu0 %5302 }
 0x718   : > { %10753 = vmatpush3.bf16.xpose.msra.mxu0 %v5008_v43  ;;  %v13279_v41 = vpop.f32.mrf.mxu1  ;;  %10754 = vmatprep.mubr.msk.bf16.mxu0 %vm11713_vm1, %v15058_v17 }
 0x719   : > { %15140 = vst [vmem:[#allocation29_spill] sm:$0xff] %v13279_v41  ;;  %10764 = vmatprep.subr.bf16.mxu0 %v15058_v17 }
 0x71a   : > { %v13284_v32 = vpop.f32.mrf.mxu1 }
 0x71b   : > { %15141 = vst [vmem:[#allocation32_spill] sm:$0xff] %v13284_v32  ;;  %v5301_v1 = vpop.permute.xlu0 %5300 }
 0x71c   : > { %v13286_v56 = vpop.f32.mrf.mxu1 }
 0x71d   : > { %15142 = vst [vmem:[#allocation31_spill] sm:$0xff] %v13286_v56 }
 0x71e   : > { %v13288_v13 = vpop.f32.mrf.mxu1 }
 0x71f   : > { %15143 = vst [vmem:[#allocation20_spill] sm:$0xff] %v13288_v13  ;;  %10755 = vmatmul.mubr.msk.bf16.vlgmr.msra.gmra.mxu0 %vm1027_vm2, %v5001_v35 }
 0x720   : > { %10765 = vmatpush3.bf16.xpose.msra.mxu0 %v5108_v51  ;;  %v13292_v34 = vpop.f32.mrf.mxu1  ;;  %10766 = vmatprep.mubr.msk.bf16.mxu0 %vm11713_vm1, %v15058_v17  ;;  %v5403_v51 = vpop.permute.xlu0 %5402 }
 0x721   : > { %15144 = vst [vmem:[#allocation27_spill] sm:$0xff] %v13292_v34  ;;  %10776 = vmatprep.subr.bf16.mxu0 %v15058_v17 }
 0x722   : > { %v13297_v16 = vpop.f32.mrf.mxu1 }
 0x723   : > { %15145 = vst [vmem:[#allocation24_spill] sm:$0xff] %v13297_v16 }
 0x724   : > { %v13299_v46 = vpop.f32.mrf.mxu1 }
 0x725   : > { %15146 = vst [vmem:[#allocation37_spill] sm:$0xff] %v13299_v46 }
 0x726   : > { %v13301_v44 = vpop.f32.mrf.mxu1 }
 0x727   : > { %15147 = vst [vmem:[#allocation23_spill] sm:$0xff] %v13301_v44  ;;  %10767 = vmatmul.mubr.msk.bf16.vlgmr.msra.gmra.mxu0 %vm1027_vm2, %v5101_v19  ;;  %v5308_v44 = vsel %vm1027_vm2, %v5303_v9, 0  ;;  %v5408_v9 = vsel %vm1027_vm2, %v5403_v51, 0 }
 0x728   : > { %10777 = vmatpush3.bf16.xpose.msra.mxu0 %v5208_v38  ;;  %v13305_v35 = vpop.f32.mrf.mxu1  ;;  %10778 = vmatprep.mubr.msk.bf16.mxu0 %vm11713_vm1, %v15058_v17  ;;  %v5401_v38 = vpop.permute.xlu0 %5400 }
 0x729   : > { %15148 = vst [vmem:[#allocation47_spill] sm:$0xff] %v13305_v35  ;;  %10788 = vmatprep.subr.bf16.mxu0 %v15058_v17 }
 0x72a   : > { %v13310_v43 = vpop.f32.mrf.mxu1 }
 0x72b   : > { %15149 = vst [vmem:[#allocation26_spill] sm:$0xff] %v13310_v43 }
 0x72c   : > { %v4894_v16 = vpop.f32.mrf.mxu1 }
 0x72d   : > { %v13312_v32 = vmul.f32 0.35355338, %v4894_v16 }
 0x72e   : > { %v10738_v42 = vpop.f32.mrf.mxu1 }
 0x72f   : > { %10779 = vmatmul.mubr.msk.bf16.vlgmr.msra.gmra.mxu0 %vm1027_vm2, %v5201_v50  ;;  %v5619_v19 = vsel %vm1027_vm2, %v13312_v32, -inf }
 0x730   : > { %10789 = vmatpush3.bf16.xpose.msra.mxu0 %v5308_v44  ;;  %5620 = vmax.xlane.f32.xlu1 %v5619_v19  ;;  %v4897_v25 = vpop.f32.mrf.mxu1  ;;  %v5503_v44 = vpop.permute.xlu0 %5502 }
 0x731   : > { %10790 = vmatprep.mubr.msk.bf16.mxu0 %vm11713_vm1, %v15058_v17  ;;  %10800 = vmatprep.subr.bf16.mxu0 %v15058_v17 }
 0x732   : > { %v10739_v43 = vpop.f32.mrf.mxu1 }
 0x734   : > { %v4994_v16 = vpop.f32.mrf.mxu1 }
 0x735   : > { %v13321_v35 = vmul.f32 0.35355338, %v4994_v16 }
 0x736   : > { %v10750_v42 = vpop.f32.mrf.mxu1 }
 0x737   : > { %10791 = vmatmul.mubr.msk.bf16.vlgmr.msra.gmra.mxu0 %vm1027_vm2, %v5301_v1  ;;  %v5625_v50 = vsel %vm1027_vm2, %v13321_v35, -inf  ;;  %v5501_v42 = vpop.permute.xlu0 %5500  ;;  %v5508_v1 = vsel %vm1027_vm2, %v5503_v44, 0 }
 0x738   : > { %10801 = vmatpush3.bf16.xpose.msra.mxu0 %v5408_v9  ;;  %5626 = vmax.xlane.f32.xlu0 %v5625_v50  ;;  %v4997_v19 = vpop.f32.mrf.mxu1 }
 0x739   : > { %10802 = vmatprep.mubr.msk.bf16.mxu0 %vm11713_vm1, %v15058_v17  ;;  %10812 = vmatprep.subr.bf16.mxu0 %v15058_v17 }
 0x73a   : > { %v10751_v43 = vpop.f32.mrf.mxu1 }
 0x73b   : > { %v5809_v43 = vpop.permute.xlu0 %5808 }
 0x73c   : > { %v5094_v25 = vpop.f32.mrf.mxu1  ;;  %v5814_v44 = vsel %vm1975_vm3, %v5809_v43, 0 }
 0x73d   : > { %v13330_v16 = vmul.f32 0.35355338, %v5094_v25 }
 0x73e   : > { %v10762_v51 = vpop.f32.mrf.mxu1 }
 0x73f   : > { %10803 = vmatmul.mubr.msk.bf16.vlgmr.msra.gmra.mxu0 %vm1027_vm2, %v5401_v38  ;;  %v5631_v9 = vsel %vm1027_vm2, %v13330_v16, -inf  ;;  %v13385_v2 = vpop.permute.xlu0 %5904 }
 0x740   : > { %10813 = vmatpush3.bf16.xpose.msra.mxu0 %v5508_v1  ;;  %5632 = vmax.xlane.f32.xlu1 %v5631_v9  ;;  %v5097_v50 = vpop.f32.mrf.mxu1 }
 0x741   : > { %10814 = vmatprep.mubr.msk.bf16.mxu0 %vm11713_vm1, %v15058_v17  ;;  %10824 = vmatprep.subr.bf16.mxu0 %v15058_v17 }
 0x742   : > { %v10763_v19 = vpop.f32.mrf.mxu1 }
 0x744   : > { %v5194_v25 = vpop.f32.mrf.mxu1 }
 0x745   : > { %v13339_v46 = vmul.f32 0.35355338, %v5194_v25 }
 0x746   : > { %v10774_v51 = vpop.f32.mrf.mxu1 }
 0x747   : > { %10815 = vmatmul.mubr.msk.bf16.vlgmr.msra.gmra.mxu0 %vm1027_vm2, %v5501_v42  ;;  %v5637_v38 = vsel %vm1027_vm2, %v13339_v46, -inf }
 0x748   : > { %10825 = vmatpush3.bf16.msra.mxu0 %v5814_v44  ;;  %5638 = vmax.xlane.f32.xlu1 %v5637_v38  ;;  %v5197_v1 = vpop.f32.mrf.mxu1 }
 0x749   : > { %10826 = vmatprep.mubr.msk.bf16.mxu0 %vm11713_vm1, %v15058_v17  ;;  %10836 = vmatprep.subr.bf16.mxu0 %v15058_v17 }
 0x74a   : > { %v10775_v9 = vpop.f32.mrf.mxu1 }
 0x74c   : > { %v5294_v50 = vpop.f32.mrf.mxu1 }
 0x74d   : > { %v13348_v19 = vmul.f32 0.35355338, %v5294_v50 }
 0x74e   : > { %v10786_v25 = vpop.f32.mrf.mxu1 }
 0x74f   : > { %v5643_v43 = vsel %vm1027_vm2, %v13348_v19, -inf }
 0x750   : > { %5644 = vmax.xlane.f32.xlu1 %v5643_v43  ;;  %v5297_v42 = vpop.f32.mrf.mxu1 }
 0x752   : > { %v10787_v51 = vpop.f32.mrf.mxu1 }
 0x754   : > { %v5394_v34 = vpop.f32.mrf.mxu1 }
 0x755   : > { %v13352_v44 = vmul.f32 0.35355338, %v5394_v34 }
 0x756   : > { %v10798_v38 = vpop.f32.mrf.mxu1 }
 0x757   : > { %v5649_v1 = vsel %vm1027_vm2, %v13352_v44, -inf }
 0x758   : > { %5650 = vmax.xlane.f32.xlu1 %v5649_v1  ;;  %v5397_v13 = vpop.f32.mrf.mxu1 }
 0x75a   : > { %v10799_v9 = vpop.f32.mrf.mxu1 }
 0x75c   : > { %v5494_v56 = vpop.f32.mrf.mxu1 }
 0x75d   : > { %v13356_v50 = vmul.f32 0.35355338, %v5494_v56 }
 0x75e   : > { %v10810_v25 = vpop.f32.mrf.mxu1 }
 0x75f   : > { %v5655_v41 = vsel %vm1027_vm2, %v13356_v50, -inf }
 0x760   : > { %5656 = vmax.xlane.f32.xlu1 %v5655_v41  ;;  %v5497_v43 = vpop.f32.mrf.mxu1 }
 0x762   : > { %v10811_v42 = vpop.f32.mrf.mxu1  ;;  %v13364_v9 = vpop.f32.mrf.mxu0 }
 0x763   : > { %15150 = vst [vmem:[#allocation50_spill] sm:$0xff] %v13364_v9 }
 0x764   : > { %v5594_v51 = vpop.f32.mrf.mxu1  ;;  %v13366_v56 = vpop.f32.mrf.mxu0 }
 0x765   : > { %v13360_v34 = vmul.f32 0.35355338, %v5594_v51  ;;  %15151 = vst [vmem:[#allocation33_spill] sm:$0xff] %v13366_v56  ;;  %v13378_v51 = vpop.permute.xlu1 %5952 }
 0x766   : > { %v10822_v38 = vpop.f32.mrf.mxu1  ;;  %v13368_v25 = vpop.f32.mrf.mxu0 }
 0x767   : > { %v5661_v53 = vsel %vm1027_vm2, %v13360_v34, -inf  ;;  %15152 = vst [vmem:[#allocation51_spill] sm:$0xff] %v13368_v25 }
 0x768   : > { %5662 = vmax.xlane.f32.xlu1 %v5661_v53  ;;  %v5597_v13 = vpop.f32.mrf.mxu1  ;;  %v13370_v21 = vpop.f32.mrf.mxu0 }
 0x769   : > { %15153 = vst [vmem:[#allocation48_spill] sm:$0xff] %v13370_v21 }
 0x76a   : > { %v10823_v1 = vpop.f32.mrf.mxu1 }
 0x773   : > { %v13372_v41 = vpop.f32.mrf.mxu0 }
 0x774   : > { %15154 = vst [vmem:[#allocation49_spill] sm:$0xff] %v13372_v41 }
 0x775   : > { %v13374_v43 = vpop.f32.mrf.mxu0 }
 0x776   : > { %15155 = vst [vmem:[#allocation52_spill] sm:$0xff] %v13374_v43 }
 0x777   : > { %v13376_v42 = vpop.f32.mrf.mxu0 }
 0x778   : > { %15156 = vst [vmem:[#allocation54_spill] sm:$0xff] %v13376_v42 }
 0x779   : > { %v13380_v38 = vpop.f32.mrf.mxu0 }
 0x77a   : > { %15157 = vst [vmem:[#allocation55_spill] sm:$0xff] %v13380_v38 }
 0x783   : > { %v13382_v53 = vpop.f32.mrf.mxu0 }
 0x784   : > { %15158 = vst [vmem:[#allocation56_spill] sm:$0xff] %v13382_v53 }
 0x785   : > { %v13387_v25 = vpop.f32.mrf.mxu0 }
 0x786   : > { %15159 = vst [vmem:[#allocation57_spill] sm:$0xff] %v13387_v25 }
 0x787   : > { %v13389_v21 = vpop.f32.mrf.mxu0 }
 0x788   : > { %15160 = vst [vmem:[#allocation58_spill] sm:$0xff] %v13389_v21 }
 0x789   : > { %v13392_v56 = vpop.f32.mrf.mxu0 }
 0x78a   : > { %15161 = vst [vmem:[#allocation59_spill] sm:$0xff] %v13392_v56 }
 0x7b9   : > { %v5621_v13 = vpop.xlane.xlu1 %5620 }
 0x7ba   : > { %v5665_v1 = vsub.f32 %v13312_v32, %v5621_v13 }
 0x7bc   : > { %v5682_v39 = vmul.f32 1.442695, %v5665_v1 }
 0x7be   : > { %11407 = vpow2.f32 %v5682_v39 }
 0x7c1   : > { %v5627_v43 = vpop.xlane.xlu0 %5626 }
 0x7c2   : > { %v5667_v42 = vsub.f32 %v13321_v35, %v5627_v43 }
 0x7c4   : > { %v5686_v41 = vmul.f32 1.442695, %v5667_v42 }
 0x7c6   : > { %11409 = vpow2.f32 %v5686_v41 }
 0x7c7   : > { %v13394_v38 = vpop.f32.mrf.mxu0 }
 0x7c8   : > { %15162 = vst [vmem:[#allocation60_spill] sm:$0xff] %v13394_v38 }
 0x7c9   : > { %v13396_v53 = vpop.f32.mrf.mxu0 }
 0x7ca   : > { %15163 = vst [vmem:[#allocation61_spill] sm:$0xff] %v13396_v53 }
 0x7cb   : > { %v13398_v32 = vpop.eup %11407  ;;  %v13400_v13 = vpop.f32.mrf.mxu0 }
 0x7cc   : > { %15164 = vst [vmem:[#allocation62_spill] sm:$0xff] %v13400_v13  ;;  %v5715_v39 = vsel %vm1027_vm2, %v13398_v32, 0.0 }
 0x7cd   : > { %v13404_v1 = vpop.f32.mrf.mxu0  ;;  %5716 = vadd.xlane.f32.xlu1 %v5715_v39 }
 0x7ce   : > { %15165 = vst [vmem:[#allocation63_spill] sm:$0xff] %v13404_v1 }
 0x7cf   : > { %v4844_v21 = vpop.f32.mrf.mxu0 }
 0x7d0   : > { %v13406_v35 = vmul.f32 0.35355338, %v4844_v21 }
 0x7d1   : > { %v10732_v43 = vpop.f32.mrf.mxu0 }
 0x7d2   : > { %v5616_v41 = vsel %vm1027_vm2, %v13406_v35, -inf }
 0x7d3   : > { %v13410_v42 = vpop.eup %11409  ;;  %v4847_v56 = vpop.f32.mrf.mxu0  ;;  %5617 = vmax.xlane.f32.xlu0 %v5616_v41  ;;  %v15166_v41 = vld [vmem:[#allocation42_spill] sm:$0xff] }
 0x7d4   : > { %v5721_v13 = vsel %vm1027_vm2, %v13410_v42, 0.0 }
 0x7d5   : > { %v10733_v53 = vpop.f32.mrf.mxu0  ;;  %5722 = vadd.xlane.f32.xlu1 %v5721_v13 }
 0x7d7   : > { %v4944_v38 = vpop.f32.mrf.mxu0 }
 0x7d8   : > { %v13414_v25 = vmul.f32 0.35355338, %v4944_v38  ;;  %v5633_v38 = vpop.xlane.xlu1 %5632 }
 0x7d9   : > { %v10744_v39 = vpop.f32.mrf.mxu0 }
 0x7da   : > { %v5622_v21 = vsel %vm1027_vm2, %v13414_v25, -inf  ;;  %v5669_v39 = vsub.f32 %v13330_v16, %v5633_v38 }
 0x7db   : > { %v4947_v43 = vpop.f32.mrf.mxu0  ;;  %5623 = vmax.xlane.f32.xlu0 %v5622_v21 }
 0x7dc   : > { %v15167_v43 = vld [vmem:[#allocation39_spill] sm:$0xff] }
 0x7dd   : > { %v10745_v1 = vpop.f32.mrf.mxu0 }
 0x7de   : > { %v5639_v1 = vpop.xlane.xlu1 %5638 }
 0x7df   : > { %v5044_v37 = vpop.f32.mrf.mxu0 }
 0x7e1   : > { %v10756_v9 = vpop.f32.mrf.mxu0 }
 0x7e2   : > { %v5690_v9 = vmul.f32 1.442695, %v5669_v39 }
 0x7e3   : > { %v5047_v61 = vpop.f32.mrf.mxu0 }
 0x7e4   : > { %v5671_v61 = vsub.f32 %v13339_v46, %v5639_v1  ;;  %11411 = vpow2.f32 %v5690_v9 }
 0x7e5   : > { %v10757_v56 = vpop.f32.mrf.mxu0 }
 0x7e6   : > { %6048 = vrot.lane.b32.xlu1 %v15166_v41, %s11715_s30  ;;  %v5694_v41 = vmul.f32 1.442695, %v5671_v61 }
 0x7e7   : > { %v5144_v4 = vpop.f32.mrf.mxu0 }
 0x7e8   : > { %11413 = vpow2.f32 %v5694_v41 }
 0x7e9   : > { %v10768_v53 = vpop.f32.mrf.mxu0 }
 0x7eb   : > { %v5147_v13 = vpop.f32.mrf.mxu0 }
 0x7ed   : > { %v10769_v15 = vpop.f32.mrf.mxu0 }
 0x7ee   : > { %v5645_v15 = vpop.xlane.xlu1 %5644 }
 0x7ef   : > { %v5244_v27 = vpop.f32.mrf.mxu0  ;;  %v5673_v16 = vsub.f32 %v13348_v19, %v5645_v15 }
 0x7f1   : > { %v10780_v52 = vpop.f32.mrf.mxu0  ;;  %6000 = vrot.lane.b32.xlu0 %v15167_v43, %s11715_s30  ;;  %v5698_v36 = vmul.f32 1.442695, %v5673_v16  ;;  %v13425_v39 = vpop.eup %11411 }
 0x7f2   : > { %v5651_v28 = vpop.xlane.xlu1 %5650  ;;  %v5727_v61 = vsel %vm1027_vm2, %v13425_v39, 0.0 }
 0x7f3   : > { %v5247_v21 = vpop.f32.mrf.mxu0  ;;  %11415 = vpow2.f32 %v5698_v36  ;;  %v5675_v46 = vsub.f32 %v13352_v44, %v5651_v28  ;;  %v13436_v28 = vmul.f32 0.35355338, %v5144_v4 }
 0x7f5   : > { %v10781_v56 = vpop.f32.mrf.mxu0  ;;  %v13430_v41 = vpop.eup %11413  ;;  %v5702_v19 = vmul.f32 1.442695, %v5675_v46 }
 0x7f7   : > { %v5344_v6 = vpop.f32.mrf.mxu0  ;;  %11417 = vpow2.f32 %v5702_v19 }
 0x7f8   : > { %v13453_v46 = vmul.f32 0.35355338, %v5344_v6  ;;  %v15170_v6 = vld [vmem:[#allocation45_spill] sm:$0xff] }
 0x7f9   : > { %v10792_v53 = vpop.f32.mrf.mxu0 }
 0x7fa   : > { %v5646_v19 = vsel %vm1027_vm2, %v13453_v46, -inf }
 0x7fb   : > { %v5347_v13 = vpop.f32.mrf.mxu0 }
 0x7fc   : > { %v5733_v13 = vsel %vm1027_vm2, %v13430_v41, 0.0 }
 0x7fd   : > { %v10793_v45 = vpop.f32.mrf.mxu0 }
 0x7fe   : > { %v13432_v45 = vmul.f32 0.35355338, %v5044_v37  ;;  %v5634_v37 = vsel %vm1027_vm2, %v13436_v28, -inf }
 0x7ff   : > { %v5444_v52 = vpop.f32.mrf.mxu0 }
 0x800   : > { %v5628_v44 = vsel %vm1027_vm2, %v13432_v45, -inf  ;;  %v13443_v16 = vpop.eup %11415 }
 0x801   : > { %v10804_v38 = vpop.f32.mrf.mxu0  ;;  %v5739_v4 = vsel %vm1027_vm2, %v13443_v16, 0.0 }
 0x802   : > { %v13445_v38 = vmul.f32 0.35355338, %v5244_v27  ;;  %v15169_v27 = vld [vmem:[#allocation46_spill] sm:$0xff] }
 0x803   : > { %v5447_v43 = vpop.f32.mrf.mxu0 }
 0x804   : > { %v5657_v43 = vpop.xlane.xlu1 %5656 }
 0x805   : > { %v10805_v21 = vpop.f32.mrf.mxu0  ;;  %v5677_v36 = vsub.f32 %v13356_v50, %v5657_v43  ;;  %v5640_v50 = vsel %vm1027_vm2, %v13445_v38, -inf  ;;  %v13465_v43 = vmul.f32 0.35355338, %v5444_v52 }
 0x806   : > { %v13451_v21 = vpop.eup %11417 }
 0x807   : > { %v5544_v1 = vpop.f32.mrf.mxu0  ;;  %v5706_v15 = vmul.f32 1.442695, %v5677_v36  ;;  %v15171_v36 = vld [vmem:[#allocation22_spill] sm:$0xff] }
 0x809   : > { %v10816_v9 = vpop.f32.mrf.mxu0  ;;  %11419 = vpow2.f32 %v5706_v15  ;;  %v13479_v15 = vpop.xlane.xlu1 %5662 }
 0x80a   : > { %5728 = vadd.xlane.f32.xlu1 %v5727_v61  ;;  %v15168_v9 = vld [vmem:[#allocation44_spill] sm:$0xff]  ;;  %v5745_v61 = vsel %vm1027_vm2, %v13451_v21, 0.0 }
 0x80b   : > { %v5547_v56 = vpop.f32.mrf.mxu0 }
 0x80d   : > { %v10817_v53 = vpop.f32.mrf.mxu0 }
 0x80e   : > { %5734 = vadd.xlane.f32.xlu1 %v5733_v13  ;;  %v13471_v13 = vmul.f32 0.35355338, %v5544_v1 }
 0x810   : > { %5629 = vmax.xlane.f32.xlu0 %v5628_v44  ;;  %v5652_v44 = vsel %vm1027_vm2, %v13465_v43, -inf  ;;  %v5658_v52 = vsel %vm1027_vm2, %v13471_v13, -inf }
 0x814   : > { %5635 = vmax.xlane.f32.xlu0 %v5634_v37 }
 0x816   : > { %v13463_v56 = vpop.eup %11419 }
 0x817   : > { %v5751_v53 = vsel %vm1027_vm2, %v13463_v56, 0.0 }
 0x818   : > { %5740 = vadd.xlane.f32.xlu0 %v5739_v4 }
 0x81c   : > { %5641 = vmax.xlane.f32.xlu0 %v5640_v50 }
 0x81f   : > { %6144 = vrot.lane.b32.xlu1 %v15168_v9, %s11715_s30 }
 0x820   : > { %5746 = vadd.xlane.f32.xlu0 %v5745_v61 }
 0x823   : > { %6240 = vrot.lane.b32.xlu1 %v15169_v27, %s11715_s30 }
 0x824   : > { %5647 = vmax.xlane.f32.xlu0 %v5646_v19 }
 0x827   : > { %6288 = vrot.lane.b32.xlu1 %v15170_v6, %s11715_s30 }
 0x828   : > { %5752 = vadd.xlane.f32.xlu0 %v5751_v53 }
 0x82b   : > { %6336 = vrot.lane.b32.xlu1 %v15171_v36, %s11715_s30 }
 0x82c   : > { %5653 = vmax.xlane.f32.xlu0 %v5652_v44 }
 0x830   : > { %5659 = vmax.xlane.f32.xlu0 %v5658_v52  ;;  %v5958_v52 = vsel %vm1975_vm3, %v13378_v51, 0 }
 0x856   : > { %v5717_v37 = vpop.xlane.xlu1 %5716 }
 0x857   : > { %11421 = vrcp.f32 %v5717_v37 }
 0x85c   : > { %v5618_v4 = vpop.xlane.xlu0 %5617 }
 0x85d   : > { %v5664_v50 = vsub.f32 %v13406_v35, %v5618_v4 }
 0x85e   : > { %v5723_v1 = vpop.xlane.xlu1 %5722 }
 0x85f   : > { %v5680_v61 = vmul.f32 1.442695, %v5664_v50  ;;  %11423 = vrcp.f32 %v5723_v1 }
 0x861   : > { %11425 = vpow2.f32 %v5680_v61 }
 0x864   : > { %v11422_v19 = vpop.eup %11421  ;;  %v5624_v53 = vpop.xlane.xlu0 %5623 }
 0x865   : > { %v5777_v36 = vmul.f32 %v11422_v19, %v13398_v32  ;;  %v5666_v44 = vsub.f32 %v13414_v25, %v5624_v53  ;;  %v6049_v25 = vpop.permute.xlu1 %6048 }
 0x866   : > { %v6054_v51 = vsel %vm1975_vm3, %v6049_v25, 0 }
 0x867   : > { %v5793_v6 = vpack.c.bf16 %v5777_v36, %v5777_v36  ;;  %v5684_v27 = vmul.f32 1.442695, %v5666_v44 }
 0x868   : > { %v13504_v50 = vpop.permute.xlu0 %6000 }
 0x869   : > { %11427 = vpow2.f32 %v5684_v27  ;;  %10833 = vmatmul.mubr.msk.bf16.vlgmr.msra.gmra.mxu1 %vm1027_vm2, %v5793_v6 }
 0x86a   : > { %10843 = vmatpush3.bf16.msra.mxu1 %v5958_v52  ;;  %10844 = vmatprep.mubr.msk.bf16.mxu1 %vm11713_vm1, %v15058_v17 }
 0x86b   : > { %10854 = vmatprep.subr.bf16.mxu1 %v15058_v17 }
 0x86c   : > { %v11424_v35 = vpop.eup %11423 }
 0x86d   : > { %v5779_v37 = vmul.f32 %v11424_v35, %v13410_v42 }
 0x86e   : > { %v13491_v32 = vpop.eup %11425 }
 0x86f   : > { %v5795_v36 = vpack.c.bf16 %v5779_v37, %v5779_v37  ;;  %v5712_v4 = vsel %vm1027_vm2, %v13491_v32, 0.0 }
 0x870   : > { %5713 = vadd.xlane.f32.xlu0 %v5712_v4 }
 0x871   : > { %10845 = vmatmul.mubr.msk.bf16.vlgmr.msra.gmra.mxu1 %vm1027_vm2, %v5795_v36 }
 0x872   : > { %10855 = vmatpush3.bf16.msra.mxu1 %v6054_v51  ;;  %10856 = vmatprep.mubr.msk.bf16.mxu1 %vm11713_vm1, %v15058_v17 }
 0x873   : > { %10866 = vmatprep.subr.bf16.mxu1 %v15058_v17 }
 0x876   : > { %v13500_v27 = vpop.eup %11427 }
 0x877   : > { %v5718_v42 = vsel %vm1027_vm2, %v13500_v27, 0.0 }
 0x878   : > { %5719 = vadd.xlane.f32.xlu0 %v5718_v42 }
 0x893   : > { %v5729_v6 = vpop.xlane.xlu1 %5728 }
 0x894   : > { %11429 = vrcp.f32 %v5729_v6 }
 0x897   : > { %v5735_v1 = vpop.xlane.xlu1 %5734 }
 0x898   : > { %11431 = vrcp.f32 %v5735_v1 }
 0x899   : > { %v5630_v61 = vpop.xlane.xlu0 %5629 }
 0x89a   : > { %v5668_v19 = vsub.f32 %v13432_v45, %v5630_v61 }
 0x89b   : > { %v6145_v35 = vpop.permute.xlu1 %6144 }
 0x89c   : > { %v5688_v53 = vmul.f32 1.442695, %v5668_v19  ;;  %v6150_v42 = vsel %vm1975_vm3, %v6145_v35, 0 }
 0x89d   : > { %v5636_v44 = vpop.xlane.xlu0 %5635 }
 0x89e   : > { %11433 = vpow2.f32 %v5688_v53 }
 0x89f   : > { %v6241_v1 = vpop.permute.xlu1 %6240 }
 0x8a0   : > { %v6246_v35 = vsel %vm1975_vm3, %v6241_v1, 0 }
 0x8a1   : > { %v11430_v52 = vpop.eup %11429  ;;  %v5741_v37 = vpop.xlane.xlu0 %5740 }
 0x8a2   : > { %v5781_v25 = vmul.f32 %v11430_v52, %v13425_v39  ;;  %11435 = vrcp.f32 %v5741_v37 }
 0x8a3   : > { %v13519_v52 = vpop.permute.xlu1 %6288 }
 0x8a4   : > { %v5797_v36 = vpack.c.bf16 %v5781_v25, %v5781_v25 }
 0x8a5   : > { %v11432_v4 = vpop.eup %11431  ;;  %v5642_v51 = vpop.xlane.xlu0 %5641 }
 0x8a6   : > { %v5672_v6 = vsub.f32 %v13445_v38, %v5642_v51  ;;  %10857 = vmatmul.mubr.msk.bf16.vlgmr.msra.gmra.mxu1 %vm1027_vm2, %v5797_v36  ;;  %v5783_v45 = vmul.f32 %v11432_v4, %v13430_v41 }
 0x8a7   : > { %10867 = vmatpush3.bf16.msra.mxu1 %v6150_v42  ;;  %10868 = vmatprep.mubr.msk.bf16.mxu1 %vm11713_vm1, %v15058_v17  ;;  %v6337_v25 = vpop.permute.xlu1 %6336 }
 0x8a8   : > { %v5696_v61 = vmul.f32 1.442695, %v5672_v6  ;;  %10878 = vmatprep.subr.bf16.mxu1 %v15058_v17  ;;  %v5799_v53 = vpack.c.bf16 %v5783_v45, %v5783_v45  ;;  %v6342_v4 = vsel %vm1975_vm3, %v6337_v25, 0  ;;  %v15172_v45 = vld [vmem:[#allocation40_spill] sm:$0xff] }
 0x8a9   : > { %v5747_v39 = vpop.xlane.xlu0 %5746 }
 0x8aa   : > { %11437 = vpow2.f32 %v5696_v61 }
 0x8ab   : > { %v13515_v19 = vpop.eup %11433  ;;  %11439 = vrcp.f32 %v5747_v39  ;;  %v5670_v39 = vsub.f32 %v13436_v28, %v5636_v44 }
 0x8ac   : > { %v5724_v38 = vsel %vm1027_vm2, %v13515_v19, 0.0 }
 0x8ad   : > { %5725 = vadd.xlane.f32.xlu0 %v5724_v38  ;;  %v5648_v61 = vpop.xlane.xlu0 %5647 }
 0x8ae   : > { %10869 = vmatmul.mubr.msk.bf16.vlgmr.msra.gmra.mxu1 %vm1027_vm2, %v5799_v53  ;;  %v5679_v53 = vsub.f32 %v13360_v34, %v13479_v15 }
 0x8af   : > { %10879 = vmatpush3.bf16.msra.mxu1 %v6246_v35  ;;  %10880 = vmatprep.mubr.msk.bf16.mxu1 %vm11713_vm1, %v15058_v17  ;;  %v11436_v41 = vpop.eup %11435 }
 0x8b0   : > { %10890 = vmatprep.subr.bf16.mxu1 %v15058_v17  ;;  %v5785_v37 = vmul.f32 %v11436_v41, %v13443_v16  ;;  %v5710_v35 = vmul.f32 1.442695, %v5679_v53 }
 0x8b1   : > { %v13547_v38 = vpop.xlane.xlu0 %5752 }
 0x8b2   : > { %v5801_v36 = vpack.c.bf16 %v5785_v37, %v5785_v37  ;;  %v5674_v37 = vsub.f32 %v13453_v46, %v5648_v61 }
 0x8b4   : > { %v5700_v25 = vmul.f32 1.442695, %v5674_v37 }
 0x8b5   : > { %v5654_v41 = vpop.xlane.xlu0 %5653 }
 0x8b6   : > { %10881 = vmatmul.mubr.msk.bf16.vlgmr.msra.gmra.mxu1 %vm1027_vm2, %v5801_v36  ;;  %v5676_v36 = vsub.f32 %v13465_v43, %v5654_v41 }
 0x8b7   : > { %v13529_v51 = vpop.eup %11437  ;;  %10891 = vmatpush3.bf16.msra.mxu1 %v6342_v4  ;;  %10892 = vmatprep.mubr.msk.bf16.mxu1 %vm11713_vm1, %v15058_v17 }
 0x8b8   : > { %v11440_v42 = vpop.eup %11439  ;;  %v5736_v6 = vsel %vm1027_vm2, %v13529_v51, 0.0  ;;  %10902 = vmatprep.subr.bf16.mxu1 %v15058_v17  ;;  %v5704_v28 = vmul.f32 1.442695, %v5676_v36  ;;  %v5910_v36 = vsel %vm1975_vm3, %v13385_v2, 0 }
 0x8b9   : > { %v5787_v16 = vmul.f32 %v11440_v42, %v13451_v21  ;;  %5737 = vadd.xlane.f32.xlu1 %v5736_v6  ;;  %v5692_v21 = vmul.f32 1.442695, %v5670_v39  ;;  %v5660_v4 = vpop.xlane.xlu0 %5659 }
 0x8ba   : > { %v5678_v44 = vsub.f32 %v13471_v13, %v5660_v4 }
 0x8bb   : > { %v5803_v1 = vpack.c.bf16 %v5787_v16, %v5787_v16  ;;  %11441 = vpow2.f32 %v5692_v21  ;;  %v15173_v21 = vld [vmem:[#allocation43_spill] sm:$0xff] }
 0x8bc   : > { %11443 = vpow2.f32 %v5710_v35  ;;  %v5708_v34 = vmul.f32 1.442695, %v5678_v44 }
 0x8bd   : > { %11445 = vpow2.f32 %v5700_v25 }
 0x8be   : > { %10893 = vmatmul.mubr.msk.bf16.vlgmr.msra.gmra.mxu1 %vm1027_vm2, %v5803_v1  ;;  %11447 = vpow2.f32 %v5704_v28 }
 0x8bf   : > { %10904 = vmatprep.mubr.msk.bf16.mxu1 %vm11713_vm1, %v15058_v17  ;;  %11449 = vpow2.f32 %v5708_v34 }
 0x8c3   : > { %6096 = vrot.lane.b32.xlu0 %v15172_v45, %s11715_s30 }
 0x8c8   : > { %v13552_v42 = vpop.eup %11441 }
 0x8c9   : > { %v5730_v15 = vsel %vm1027_vm2, %v13552_v42, 0.0  ;;  %v13556_v6 = vpop.eup %11443 }
 0x8ca   : > { %6432 = vrot.lane.b32.xlu1 %v12662_v8, %s11715_s30  ;;  %v5757_v46 = vsel %vm1027_vm2, %v13556_v6, 0.0  ;;  %v13560_v43 = vpop.eup %11445 }
 0x8cb   : > { %v5742_v13 = vsel %vm1027_vm2, %v13560_v43, 0.0  ;;  %v13564_v16 = vpop.eup %11447 }
 0x8cc   : > { %v5748_v1 = vsel %vm1027_vm2, %v13564_v16, 0.0  ;;  %v13568_v61 = vpop.eup %11449 }
 0x8cd   : > { %v5754_v39 = vsel %vm1027_vm2, %v13568_v61, 0.0 }
 0x8e2   : > { %5731 = vadd.xlane.f32.xlu0 %v5730_v15 }
 0x8e6   : > { %5758 = vadd.xlane.f32.xlu0 %v5757_v46 }
 0x8ee   : > { %5743 = vadd.xlane.f32.xlu1 %v5742_v13 }
 0x8f2   : > { %5749 = vadd.xlane.f32.xlu1 %v5748_v1 }
 0x8f6   : > { %5755 = vadd.xlane.f32.xlu1 %v5754_v39 }
 0x8f9   : > { %v5714_v53 = vpop.xlane.xlu0 %5713 }
 0x8fa   : > { %11451 = vrcp.f32 %v5714_v53 }
 0x8fc   : > { %6192 = vrot.lane.b32.xlu0 %v15173_v21, %s11715_s30 }
 0x900   : > { %6384 = vrot.lane.b32.xlu0 %v12590_v3, %s11715_s30 }
 0x901   : > { %v5720_v35 = vpop.xlane.xlu0 %5719 }
 0x902   : > { %11453 = vrcp.f32 %v5720_v35 }
 0x903   : > { %11455 = vrcp.f32 %v13547_v38 }
 0x904   : > { %6480 = vrot.lane.b32.xlu0 %v12616_v31, %s11715_s30 }
 0x907   : > { %v11452_v41 = vpop.eup %11451  ;;  %6528 = vrot.lane.b32.xlu1 %v12679_v62, %s11715_s30 }
 0x908   : > { %v5776_v37 = vmul.f32 %v11452_v41, %v13491_v32  ;;  %6728 = vrot.lane.b32.xlu0 %v12013_v49, %s11716_s20 }
 0x90a   : > { %v5792_v25 = vpack.c.bf16 %v5776_v37, %v5776_v37 }
 0x90b   : > { %6726 = vrot.lane.b32.xlu1 %v12026_v63, %s11716_s20 }
 0x90c   : > { %10827 = vmatmul.mubr.msk.bf16.vlgmr.msra.gmra.mxu0 %vm1027_vm2, %v5792_v25  ;;  %6778 = vrot.lane.b32.xlu0 %v12020_v58, %s11716_s20  ;;  %v6006_v58 = vsel %vm1975_vm3, %v13504_v50, 0  ;;  %v15181_v50 = vld [vmem:[#allocation38_spill] sm:$0xff] }
 0x90d   : > { %10837 = vmatpush3.bf16.msra.mxu0 %v5910_v36  ;;  %10838 = vmatprep.mubr.msk.bf16.mxu0 %vm11713_vm1, %v15058_v17 }
 0x90e   : > { %10848 = vmatprep.subr.bf16.mxu0 %v15058_v17 }
 0x90f   : > { %v11454_v32 = vpop.eup %11453  ;;  %6776 = vrot.lane.b32.xlu1 %v12049_v12, %s11716_s20 }
 0x910   : > { %v5778_v49 = vmul.f32 %v11454_v32, %v13500_v27  ;;  %6828 = vrot.lane.b32.xlu0 %v12045_v10, %s11716_s20 }
 0x912   : > { %v5794_v63 = vpack.c.bf16 %v5778_v49, %v5778_v49 }
 0x913   : > { %6826 = vrot.lane.b32.xlu1 %v12077_v24, %s11716_s20 }
 0x914   : > { %10839 = vmatmul.mubr.msk.bf16.vlgmr.msra.gmra.mxu0 %vm1027_vm2, %v5794_v63  ;;  %6878 = vrot.lane.b32.xlu0 %v12073_v22, %s11716_s20 }
 0x915   : > { %10849 = vmatpush3.bf16.msra.mxu0 %v6006_v58  ;;  %10850 = vmatprep.mubr.msk.bf16.mxu0 %vm11713_vm1, %v15058_v17 }
 0x916   : > { %10860 = vmatprep.subr.bf16.mxu0 %v15058_v17 }
 0x917   : > { %6876 = vrot.lane.b32.xlu1 %v12105_v48, %s11716_s20  ;;  %v15175_v48 = vld [vmem:[#allocation19_spill] sm:$0xff] }
 0x918   : > { %6928 = vrot.lane.b32.xlu0 %v12028_v0, %s11716_s20 }
 0x91b   : > { %6978 = vrot.lane.b32.xlu1 %v12101_v47, %s11716_s20  ;;  %v15174_v47 = vld [vmem:[#allocation30_spill] sm:$0xff] }
 0x91c   : > { %6926 = vrot.lane.b32.xlu0 %v12047_v11, %s11716_s20 }
 0x91f   : > { %6976 = vrot.lane.b32.xlu1 %v12134_v60, %s11716_s20 }
 0x920   : > { %7028 = vrot.lane.b32.xlu0 %v12038_v7, %s11716_s20 }
 0x923   : > { %7078 = vrot.lane.b32.xlu1 %v12129_v57, %s11716_s20  ;;  %v11456_v57 = vpop.eup %11455 }
 0x924   : > { %7026 = vrot.lane.b32.xlu0 %v12075_v23, %s11716_s20 }
 0x927   : > { %7076 = vrot.lane.b32.xlu1 %v15065_v14, %s11716_s20  ;;  %v15176_v14 = vld [vmem:[#allocation28_spill] sm:$0xff] }
 0x928   : > { %7128 = vrot.lane.b32.xlu0 %v12065_v20, %s11716_s20 }
 0x929   : > { %v13628_v0 = vpop.f32.mrf.mxu1 }
 0x92b   : > { %7178 = vrot.lane.b32.xlu1 %v15069_v30, %s11716_s20  ;;  %v10834_v10 = vpop.f32.mrf.mxu1 }
 0x92c   : > { %7126 = vrot.lane.b32.xlu0 %v15099_v29, %s11716_s20 }
 0x92d   : > { %v5901_v7 = vpop.f32.mrf.mxu1 }
 0x92f   : > { %7176 = vrot.lane.b32.xlu1 %v15070_v5, %s11716_s20  ;;  %v10835_v11 = vpop.f32.mrf.mxu1  ;;  %v15177_v5 = vld [vmem:[#allocation25_spill] sm:$0xff] }
 0x930   : > { %7228 = vrot.lane.b32.xlu0 %v15102_v40, %s11716_s20 }
 0x931   : > { %v13638_v12 = vpop.f32.mrf.mxu1 }
 0x933   : > { %7278 = vrot.lane.b32.xlu1 %v15072_v18, %s11716_s20  ;;  %v10846_v20 = vpop.f32.mrf.mxu1  ;;  %v5789_v18 = vmul.f32 %v11456_v57, %v13463_v56  ;;  %v15180_v56 = vld [vmem:[#allocation36_spill] sm:$0xff] }
 0x934   : > { %7226 = vrot.lane.b32.xlu0 %v15104_v26, %s11716_s20 }
 0x935   : > { %v5997_v22 = vpop.f32.mrf.mxu1  ;;  %v5805_v2 = vpack.c.bf16 %v5789_v18, %v5789_v18 }
 0x936   : > { %v5726_v23 = vpop.xlane.xlu0 %5725 }
 0x937   : > { %11457 = vrcp.f32 %v5726_v23  ;;  %7276 = vrot.lane.b32.xlu1 %v15073_v33, %s11716_s20  ;;  %v10847_v24 = vpop.f32.mrf.mxu1 }
 0x938   : > { %7328 = vrot.lane.b32.xlu0 %v15105_v54, %s11716_s20  ;;  %v15178_v54 = vld [vmem:[#allocation34_spill] sm:$0xff] }
 0x93b   : > { %7378 = vrot.lane.b32.xlu1 %v15074_v55, %s11716_s20  ;;  %v6097_v55 = vpop.permute.xlu0 %6096 }
 0x93c   : > { %7326 = vrot.lane.b32.xlu0 %v15106_v59, %s11716_s20  ;;  %v15179_v59 = vld [vmem:[#allocation35_spill] sm:$0xff]  ;;  %v6102_v27 = vsel %vm1975_vm3, %v6097_v55, 0  ;;  %v6294_v55 = vsel %vm1975_vm3, %v13519_v52, 0 }
 0x93f   : > { %7376 = vrot.lane.b32.xlu1 %v15174_v47, %s11716_s20 }
 0x940   : > { %7428 = vrot.lane.b32.xlu0 %v15175_v48, %s11716_s20 }
 0x942   : > { %v5738_v60 = vpop.xlane.xlu1 %5737 }
 0x943   : > { %7478 = vrot.lane.b32.xlu1 %v15176_v14, %s11716_s20 }
 0x944   : > { %v11458_v30 = vpop.eup %11457  ;;  %7426 = vrot.lane.b32.xlu0 %v15177_v5, %s11716_s20 }
 0x945   : > { %v5780_v33 = vmul.f32 %v11458_v30, %v13515_v19  ;;  %v15182_v19 = vld [vmem:[#allocation41_spill] sm:$0xff] }
 0x946   : > { %v6433_v29 = vpop.permute.xlu1 %6432 }
 0x947   : > { %v5796_v40 = vpack.c.bf16 %v5780_v33, %v5780_v33  ;;  %v6438_v26 = vsel %vm1975_vm3, %v6433_v29, 0  ;;  %7476 = vrot.lane.b32.xlu1 %v15178_v54, %s11716_s20 }
 0x948   : > { %7734 = vrot.lane.b32.xlu0 %v15179_v59, %s11716_s20  ;;  %10903 = vmatpush3.bf16.msra.mxu1 %v6438_v26 }
 0x949   : > { %10851 = vmatmul.mubr.msk.bf16.vlgmr.msra.gmra.mxu0 %vm1027_vm2, %v5796_v40  ;;  %10914 = vmatprep.subr.bf16.mxu1 %v15058_v17 }
 0x94a   : > { %10861 = vmatpush3.bf16.msra.mxu0 %v6102_v27  ;;  %10862 = vmatprep.mubr.msk.bf16.mxu0 %vm11713_vm1, %v15058_v17 }
 0x94b   : > { %7782 = vrot.lane.b32.xlu1 %v15180_v56, %s11716_s20  ;;  %10905 = vmatmul.mubr.msk.bf16.vlgmr.msra.gmra.mxu1 %vm1027_vm2, %v5805_v2 }
 0x94c   : > { %7830 = vrot.lane.b32.xlu0 %v15181_v50, %s11716_s20  ;;  %10872 = vmatprep.subr.bf16.mxu0 %v15058_v17 }
 0x94d   : > { %10916 = vmatprep.mubr.msk.bf16.mxu1 %vm11713_vm1, %v15058_v17 }
 0x94f   : > { %7878 = vrot.lane.b32.xlu1 %v15182_v19, %s11716_s20 }
 0x966   : > { %v13683_v38 = vpop.f32.mrf.mxu1 }
 0x968   : > { %v10858_v4 = vpop.f32.mrf.mxu1 }
 0x96a   : > { %v6093_v28 = vpop.f32.mrf.mxu1 }
 0x96b   : > { %v5732_v44 = vpop.xlane.xlu0 %5731 }
 0x96c   : > { %11459 = vrcp.f32 %v5732_v44  ;;  %v10859_v34 = vpop.f32.mrf.mxu1 }
 0x96d   : > { %11461 = vrcp.f32 %v5738_v60 }
 0x96e   : > { %v13685_v15 = vpop.f32.mrf.mxu1 }
 0x96f   : > { %v5759_v46 = vpop.xlane.xlu0 %5758 }
 0x970   : > { %v10870_v13 = vpop.f32.mrf.mxu1  ;;  %11463 = vrcp.f32 %v5759_v46 }
 0x972   : > { %v6189_v1 = vpop.f32.mrf.mxu1 }
 0x973   : > { %v6193_v39 = vpop.permute.xlu0 %6192 }
 0x974   : > { %v10871_v53 = vpop.f32.mrf.mxu1  ;;  %v6198_v11 = vsel %vm1975_vm3, %v6193_v39, 0 }
 0x976   : > { %v13687_v35 = vpop.f32.mrf.mxu1 }
 0x977   : > { %v5744_v41 = vpop.xlane.xlu1 %5743  ;;  %v6385_v36 = vpop.permute.xlu0 %6384 }
 0x978   : > { %11465 = vrcp.f32 %v5744_v41  ;;  %v10882_v37 = vpop.f32.mrf.mxu1  ;;  %v6390_v2 = vsel %vm1975_vm3, %v6385_v36, 0 }
 0x979   : > { %v11460_v25 = vpop.eup %11459 }
 0x97a   : > { %v5782_v32 = vmul.f32 %v11460_v25, %v13552_v42  ;;  %v6285_v49 = vpop.f32.mrf.mxu1  ;;  %v11462_v7 = vpop.eup %11461 }
 0x97b   : > { %v5750_v63 = vpop.xlane.xlu1 %5749  ;;  %v6481_v23 = vpop.permute.xlu0 %6480  ;;  %v5784_v42 = vmul.f32 %v11462_v7, %v13529_v51 }
 0x97c   : > { %v5798_v58 = vpack.c.bf16 %v5782_v32, %v5782_v32  ;;  %v10883_v10 = vpop.f32.mrf.mxu1  ;;  %11467 = vrcp.f32 %v5750_v63  ;;  %v6486_v44 = vsel %vm1975_vm3, %v6481_v23, 0 }
 0x97d   : > { %v11464_v22 = vpop.eup %11463  ;;  %v5800_v14 = vpack.c.bf16 %v5784_v42, %v5784_v42 }
 0x97e   : > { %10863 = vmatmul.mubr.msk.bf16.vlgmr.msra.gmra.mxu0 %vm1027_vm2, %v5798_v58  ;;  %v13692_v20 = vpop.f32.mrf.mxu1  ;;  %v5791_v48 = vmul.f32 %v11464_v22, %v13556_v6 }
 0x97f   : > { %10873 = vmatpush3.bf16.msra.mxu0 %v6198_v11  ;;  %v5756_v24 = vpop.xlane.xlu1 %5755  ;;  %10874 = vmatprep.mubr.msk.bf16.mxu0 %vm11713_vm1, %v15058_v17  ;;  %v6729_v33 = vpop.permute.xlu0 %6728 }
 0x980   : > { %v10894_v47 = vpop.f32.mrf.mxu1  ;;  %10884 = vmatprep.subr.bf16.mxu0 %v15058_v17  ;;  %v5807_v29 = vpack.c.bf16 %v5791_v48, %v5791_v48  ;;  %v6734_v40 = vsel %vm1027_vm2, %v6729_v33, 0  ;;  %11469 = vrcp.f32 %v5756_v24 }
 0x982   : > { %v6381_v57 = vpop.f32.mrf.mxu1 }
 0x983   : > { %v6529_v60 = vpop.permute.xlu1 %6528  ;;  %v6779_v59 = vpop.permute.xlu0 %6778 }
 0x984   : > { %v6534_v30 = vsel %vm1975_vm3, %v6529_v60, 0  ;;  %v10895_v5 = vpop.f32.mrf.mxu1  ;;  %v6784_v56 = vsel %vm1027_vm2, %v6779_v59, 0 }
 0x985   : > { %v11466_v18 = vpop.eup %11465  ;;  %10915 = vmatpush3.bf16.msra.mxu1 %v6534_v30 }
 0x986   : > { %10875 = vmatmul.mubr.msk.bf16.vlgmr.msra.gmra.mxu0 %vm1027_vm2, %v5800_v14  ;;  %10938 = vmatprep.subr.bf16.mxu1 %v15058_v17  ;;  %v5786_v6 = vmul.f32 %v11466_v18, %v13560_v43 }
 0x987   : > { %10885 = vmatpush3.bf16.msra.mxu0 %v6294_v55  ;;  %v6727_v51 = vpop.permute.xlu1 %6726  ;;  %10886 = vmatprep.mubr.msk.bf16.mxu0 %vm11713_vm1, %v15058_v17  ;;  %v6829_v28 = vpop.permute.xlu0 %6828 }
 0x988   : > { %10917 = vmatmul.mubr.msk.bf16.vlgmr.msra.gmra.mxu1 %vm1027_vm2, %v5807_v29  ;;  %10896 = vmatprep.subr.bf16.mxu0 %v15058_v17  ;;  %v5802_v26 = vpack.c.bf16 %v5786_v6, %v5786_v6  ;;  %v6834_v13 = vsel %vm1027_vm2, %v6829_v28, 0 }
 0x989   : > { %10939 = vmatpush3.bf16.xpose.msra.mxu1 %v6734_v40  ;;  %10940 = vmatprep.mubr.msk.bf16.mxu1 %vm11713_vm1, %v15058_v17  ;;  %v11468_v54 = vpop.eup %11467 }
 0x98a   : > { %10944 = vmatprep.subr.bf16.mxu1 %v15058_v17  ;;  %v5788_v27 = vmul.f32 %v11468_v54, %v13564_v16  ;;  %v9818_v16 = vld [vmem:[%s14910_s7 + $0x8] sm:$0xf] }
 0x98b   : > { %v6777_v52 = vpop.permute.xlu1 %6776  ;;  %v6611_v53 = vsel %vm1975_vm3, %v9818_v16, 0  ;;  %v6879_v41 = vpop.permute.xlu0 %6878 }
 0x98c   : > { %v5804_v19 = vpack.c.bf16 %v5788_v27, %v5788_v27  ;;  %v6884_v37 = vsel %vm1027_vm2, %v6879_v41, 0 }
 0x98d   : > { %v11470_v4 = vpop.eup %11469 }
 0x98e   : > { %10887 = vmatmul.mubr.msk.bf16.vlgmr.msra.gmra.mxu0 %vm1027_vm2, %v5802_v26  ;;  %v5790_v46 = vmul.f32 %v11470_v4, %v13568_v61 }
 0x98f   : > { %10897 = vmatpush3.bf16.msra.mxu0 %v6390_v2  ;;  %v6827_v43 = vpop.permute.xlu1 %6826  ;;  %10898 = vmatprep.mubr.msk.bf16.mxu0 %vm11713_vm1, %v15058_v17  ;;  %v6929_v18 = vpop.permute.xlu0 %6928 }
 0x990   : > { %10941 = vmatmul.mubr.msk.bf16.vlgmr.msra.gmra.mxu1 %vm1027_vm2, %v6727_v51  ;;  %10908 = vmatprep.subr.bf16.mxu0 %v15058_v17  ;;  %v5806_v39 = vpack.c.bf16 %v5790_v46, %v5790_v46  ;;  %v6934_v51 = vsel %vm1027_vm2, %v6929_v18, 0 }
 0x991   : > { %10945 = vmatpush3.bf16.xpose.msra.mxu1 %v6784_v56  ;;  %10946 = vmatprep.mubr.msk.bf16.mxu1 %vm11713_vm1, %v15058_v17 }
 0x992   : > { %10950 = vmatprep.subr.bf16.mxu1 %v15058_v17 }
 0x993   : > { %v6877_v50 = vpop.permute.xlu1 %6876 }
 0x996   : > { %10899 = vmatmul.mubr.msk.bf16.vlgmr.msra.gmra.mxu0 %vm1027_vm2, %v5804_v19 }
 0x997   : > { %10909 = vmatpush3.bf16.msra.mxu0 %v6486_v44  ;;  %v6979_v34 = vpop.permute.xlu1 %6978  ;;  %10910 = vmatprep.mubr.msk.bf16.mxu0 %vm11713_vm1, %v15058_v17 }
 0x998   : > { %10947 = vmatmul.mubr.msk.bf16.vlgmr.msra.gmra.mxu1 %vm1027_vm2, %v6777_v52  ;;  %11206 = vmatprep.subr.msk.bf16.mxu0 %vm1975_vm3, %v9818_v16  ;;  %v6984_v32 = vsel %vm1027_vm2, %v6979_v34, 0 }
 0x999   : > { %10951 = vmatpush3.bf16.xpose.msra.mxu1 %v6834_v13  ;;  %10952 = vmatprep.mubr.msk.bf16.mxu1 %vm11713_vm1, %v15058_v17 }
 0x99a   : > { %10956 = vmatprep.subr.bf16.mxu1 %v15058_v17 }
 0x99b   : > { %v6977_v1 = vpop.permute.xlu1 %6976 }
 0x99e   : > { %10911 = vmatmul.mubr.msk.bf16.vlgmr.msra.gmra.mxu0 %vm1027_vm2, %v5806_v39 }
 0x99f   : > { %v7079_v61 = vpop.permute.xlu1 %7078  ;;  %10921 = vmatpush3.bf16.msra.mxu0 %v6611_v53  ;;  %v6927_v53 = vpop.permute.xlu0 %6926 }
 0x9a0   : > { %10953 = vmatmul.mubr.msk.bf16.vlgmr.msra.gmra.mxu1 %vm1027_vm2, %v6827_v43  ;;  %10962 = vmatprep.subr.bf16.mxu0 %v15058_v17  ;;  %v7084_v63 = vsel %vm1027_vm2, %v7079_v61, 0 }
 0x9a1   : > { %10957 = vmatpush3.bf16.xpose.msra.mxu1 %v6884_v37  ;;  %10958 = vmatprep.mubr.msk.bf16.mxu1 %vm11713_vm1, %v15058_v17 }
 0x9a2   : > { %10968 = vmatprep.subr.bf16.mxu1 %v15058_v17 }
 0x9a3   : > { %v7077_v25 = vpop.permute.xlu1 %7076 }
 0x9a7   : > { %v7179_v36 = vpop.permute.xlu1 %7178 }
 0x9a8   : > { %10959 = vmatmul.mubr.msk.bf16.vlgmr.msra.gmra.mxu1 %vm1027_vm2, %v6877_v50  ;;  %v7184_v7 = vsel %vm1027_vm2, %v7179_v36, 0 }
 0x9a9   : > { %10969 = vmatpush3.bf16.xpose.msra.mxu1 %v6984_v32  ;;  %10970 = vmatprep.mubr.msk.bf16.mxu1 %vm11713_vm1, %v15058_v17 }
 0x9aa   : > { %10980 = vmatprep.subr.bf16.mxu1 %v15058_v17 }
 0x9ab   : > { %v7177_v49 = vpop.permute.xlu1 %7176 }
 0x9af   : > { %v7279_v58 = vpop.permute.xlu1 %7278 }
 0x9b0   : > { %10971 = vmatmul.mubr.msk.bf16.vlgmr.msra.gmra.mxu1 %vm1027_vm2, %v6977_v1  ;;  %v7284_v22 = vsel %vm1027_vm2, %v7279_v58, 0 }
 0x9b1   : > { %10981 = vmatpush3.bf16.xpose.msra.mxu1 %v7084_v63  ;;  %10982 = vmatprep.mubr.msk.bf16.mxu1 %vm11713_vm1, %v15058_v17 }
 0x9b2   : > { %10992 = vmatprep.subr.bf16.mxu1 %v15058_v17 }
 0x9b3   : > { %v7277_v10 = vpop.permute.xlu1 %7276 }
 0x9b7   : > { %v7379_v11 = vpop.permute.xlu1 %7378 }
 0x9b8   : > { %10983 = vmatmul.mubr.msk.bf16.vlgmr.msra.gmra.mxu1 %vm1027_vm2, %v7077_v25  ;;  %v7384_v24 = vsel %vm1027_vm2, %v7379_v11, 0 }
 0x9b9   : > { %10993 = vmatpush3.bf16.xpose.msra.mxu1 %v7184_v7  ;;  %10994 = vmatprep.mubr.msk.bf16.mxu1 %vm11713_vm1, %v15058_v17 }
 0x9ba   : > { %11004 = vmatprep.subr.bf16.mxu1 %v15058_v17 }
 0x9bb   : > { %v7377_v23 = vpop.permute.xlu1 %7376 }
 0x9bf   : > { %v7479_v42 = vpop.permute.xlu1 %7478 }
 0x9c0   : > { %10995 = vmatmul.mubr.msk.bf16.vlgmr.msra.gmra.mxu1 %vm1027_vm2, %v7177_v49  ;;  %v7484_v14 = vsel %vm1027_vm2, %v7479_v42, 0  ;;  %v7029_v49 = vpop.permute.xlu0 %7028 }
 0x9c1   : > { %11005 = vmatpush3.bf16.xpose.msra.mxu1 %v7284_v22  ;;  %11006 = vmatprep.mubr.msk.bf16.mxu1 %vm11713_vm1, %v15058_v17 }
 0x9c2   : > { %11016 = vmatprep.subr.bf16.mxu1 %v15058_v17 }
 0x9c3   : > { %v7477_v60 = vpop.permute.xlu1 %7476 }
 0x9c7   : > { %v7783_v55 = vpop.permute.xlu1 %7782 }
 0x9c8   : > { %11007 = vmatmul.mubr.msk.bf16.vlgmr.msra.gmra.mxu1 %vm1027_vm2, %v7277_v10  ;;  %v7788_v6 = vsel %vm1975_vm3, %v7783_v55, 0 }
 0x9c9   : > { %11017 = vmatpush3.bf16.xpose.msra.mxu1 %v7384_v24  ;;  %11018 = vmatprep.mubr.msk.bf16.mxu1 %vm11713_vm1, %v15058_v17  ;;  %v7027_v24 = vpop.permute.xlu0 %7026 }
 0x9ca   : > { %11028 = vmatprep.subr.bf16.mxu1 %v15058_v17 }
 0x9cc   : > { %v5850_v47 = vpop.f32.mrf.mxu0 }
 0x9cd   : > { %v6576_v48 = vpack.c.bf16 %v13628_v0, %v5850_v47  ;;  %v7129_v18 = vpop.permute.xlu0 %7128 }
 0x9ce   : > { %v10828_v57 = vpop.f32.mrf.mxu0 }
 0x9cf   : > { %10922 = vmatprep.mubr.msk.bf16.mxu0 %vm1027_vm2, %v6576_v48 }
 0x9d0   : > { %v5853_v30 = vpop.f32.mrf.mxu0  ;;  %11019 = vmatmul.mubr.msk.bf16.vlgmr.msra.gmra.mxu1 %vm1027_vm2, %v7377_v23 }
 0x9d1   : > { %11029 = vmatpush3.bf16.xpose.msra.mxu1 %v7484_v14  ;;  %11030 = vmatprep.mubr.msk.bf16.mxu1 %vm11713_vm1, %v15058_v17 }
 0x9d2   : > { %v10829_v5 = vpop.f32.mrf.mxu0  ;;  %11040 = vmatprep.subr.bf16.mxu1 %v15058_v17 }
 0x9d4   : > { %v5946_v33 = vpop.f32.mrf.mxu0 }
 0x9d5   : > { %v6577_v0 = vpack.c.bf16 %v13638_v12, %v5946_v33 }
 0x9d6   : > { %v10840_v29 = vpop.f32.mrf.mxu0 }
 0x9d7   : > { %10923 = vmatmul.mubr.msk.bf16.vlgmr.msra.gmra.mxu0 %vm1027_vm2, %v6577_v0 }
 0x9d8   : > { %10963 = vmatpush3.bf16.xpose.msra.mxu0 %v6934_v51  ;;  %v5949_v40 = vpop.f32.mrf.mxu0  ;;  %11031 = vmatmul.mubr.msk.bf16.vlgmr.msra.gmra.mxu1 %vm1027_vm2, %v7477_v60 }
 0x9d9   : > { %11041 = vmatpush3.bf16.msra.mxu1 %v7788_v6  ;;  %10974 = vmatprep.subr.bf16.mxu0 %v15058_v17 }
 0x9da   : > { %v10841_v52 = vpop.f32.mrf.mxu0  ;;  %11042 = vmatprep.mubr.msk.bf16.mxu1 %vm11713_vm1, %v15058_v17  ;;  %11052 = vmatprep.subr.bf16.mxu1 %v15058_v17 }
 0xa09   : > { %v6042_v12 = vpop.f32.mrf.mxu0 }
 0xa0a   : > { %v6578_v26 = vpack.c.bf16 %v13683_v38, %v6042_v12  ;;  %v7127_v12 = vpop.permute.xlu0 %7126 }
 0xa0b   : > { %v10852_v54 = vpop.f32.mrf.mxu0  ;;  %v6474_v59 = vpop.f32.mrf.mxu1 }
 0xa0c   : > { %10926 = vmatprep.mubr.msk.bf16.mxu0 %vm1027_vm2, %v6578_v26 }
 0xa0d   : > { %v6045_v2 = vpop.f32.mrf.mxu0  ;;  %v10906_v43 = vpop.f32.mrf.mxu1 }
 0xa0f   : > { %v10853_v27 = vpop.f32.mrf.mxu0  ;;  %v6477_v56 = vpop.f32.mrf.mxu1 }
 0xa10   : > { %v7034_v27 = vsel %vm1027_vm2, %v7029_v49, 0 }
 0xa11   : > { %v10907_v50 = vpop.f32.mrf.mxu1 }
 0xa12   : > { %v7229_v50 = vpop.permute.xlu0 %7228 }
 0xa3e   : > { %v6138_v19 = vpop.f32.mrf.mxu0 }
 0xa3f   : > { %v6579_v4 = vpack.c.bf16 %v13685_v15, %v6138_v19 }
 0xa40   : > { %v10864_v28 = vpop.f32.mrf.mxu0 }
 0xa41   : > { %10927 = vmatmul.mubr.msk.bf16.gmra.mxu0 %vm1027_vm2, %v6579_v4 }
 0xa42   : > { %v6141_v16 = vpop.f32.mrf.mxu0 }
 0xa44   : > { %v10865_v44 = vpop.f32.mrf.mxu0 }
 0xa45   : > { %v7227_v44 = vpop.permute.xlu0 %7226 }
 0xa46   : > { %v6234_v34 = vpop.f32.mrf.mxu0 }
 0xa47   : > { %v6580_v38 = vpack.c.bf16 %v13687_v35, %v6234_v34 }
 0xa48   : > { %v10876_v46 = vpop.f32.mrf.mxu0  ;;  %v6570_v13 = vpop.f32.mrf.mxu1 }
 0xa49   : > { %10930 = vmatprep.mubr.msk.bf16.mxu0 %vm1027_vm2, %v6580_v38  ;;  %v7134_v38 = vsel %vm1027_vm2, %v7129_v18, 0 }
 0xa4a   : > { %v6237_v1 = vpop.f32.mrf.mxu0  ;;  %v10918_v39 = vpop.f32.mrf.mxu1 }
 0xa4c   : > { %v10877_v41 = vpop.f32.mrf.mxu0  ;;  %v6573_v61 = vpop.f32.mrf.mxu1 }
 0xa4e   : > { %v6330_v37 = vpop.f32.mrf.mxu0  ;;  %v10919_v25 = vpop.f32.mrf.mxu1 }
 0xa4f   : > { %v6581_v15 = vpack.c.bf16 %v13692_v20, %v6330_v37  ;;  %v7234_v37 = vsel %vm1027_vm2, %v7229_v50, 0 }
 0xa50   : > { %v10888_v36 = vpop.f32.mrf.mxu0  ;;  %v6770_v32 = vpop.f32.mrf.mxu1 }
 0xa51   : > { %v13794_v63 = vmul.f32 0.35355338, %v6770_v32  ;;  %10931 = vmatmul.mubr.msk.bf16.gmra.mxu0 %vm1027_vm2, %v6581_v15 }
 0xa52   : > { %v6333_v35 = vpop.f32.mrf.mxu0  ;;  %v10942_v58 = vpop.f32.mrf.mxu1 }
 0xa53   : > { %v7542_v10 = vsel %vm1027_vm2, %v13794_v63, -inf }
 0xa54   : > { %v10889_v7 = vpop.f32.mrf.mxu0  ;;  %7543 = vmax.xlane.f32.xlu0 %v7542_v10  ;;  %v6773_v11 = vpop.f32.mrf.mxu1 }
 0xa56   : > { %v6426_v22 = vpop.f32.mrf.mxu0  ;;  %v10943_v23 = vpop.f32.mrf.mxu1 }
 0xa57   : > { %v6582_v42 = vpack.c.bf16 %v6474_v59, %v6426_v22 }
 0xa58   : > { %v10900_v20 = vpop.f32.mrf.mxu0  ;;  %v6820_v47 = vpop.f32.mrf.mxu1 }
 0xa59   : > { %v13799_v48 = vmul.f32 0.35355338, %v6820_v47  ;;  %10934 = vmatprep.mubr.msk.bf16.mxu0 %vm1027_vm2, %v6582_v42 }
 0xa5a   : > { %v6429_v57 = vpop.f32.mrf.mxu0  ;;  %v10948_v60 = vpop.f32.mrf.mxu1 }
 0xa5b   : > { %v7545_v14 = vsel %vm1027_vm2, %v13799_v48, -inf }
 0xa5c   : > { %v10901_v30 = vpop.f32.mrf.mxu0  ;;  %7546 = vmax.xlane.f32.xlu1 %v7545_v14  ;;  %v6823_v5 = vpop.f32.mrf.mxu1 }
 0xa5e   : > { %v6522_v33 = vpop.f32.mrf.mxu0  ;;  %v10949_v55 = vpop.f32.mrf.mxu1 }
 0xa5f   : > { %v6583_v0 = vpack.c.bf16 %v6570_v13, %v6522_v33 }
 0xa60   : > { %v10912_v29 = vpop.f32.mrf.mxu0  ;;  %v6870_v51 = vpop.f32.mrf.mxu1 }
 0xa61   : > { %v13804_v6 = vmul.f32 0.35355338, %v6870_v51  ;;  %10935 = vmatmul.mubr.msk.bf16.gmra.mxu0 %vm1027_vm2, %v6583_v0 }
 0xa62   : > { %v6525_v40 = vpop.f32.mrf.mxu0  ;;  %v10954_v52 = vpop.f32.mrf.mxu1  ;;  %10964 = vmatprep.mubr.msk.bf16.mxu0 %vm11713_vm1, %v15058_v17 }
 0xa63   : > { %v7548_v26 = vsel %vm1027_vm2, %v13804_v6, -inf }
 0xa64   : > { %v10913_v54 = vpop.f32.mrf.mxu0  ;;  %7549 = vmax.xlane.f32.xlu0 %v7548_v26  ;;  %v6873_v59 = vpop.f32.mrf.mxu1  ;;  %v15184_v26 = vld [vmem:[#allocation16_spill] sm:$0xff] }
 0xa66   : > { %v10955_v2 = vpop.f32.mrf.mxu1 }
 0xa68   : > { %v6920_v43 = vpop.f32.mrf.mxu1 }
 0xa69   : > { %v13812_v56 = vmul.f32 0.35355338, %v6920_v43  ;;  %10965 = vmatmul.mubr.msk.bf16.vlgmr.msra.gmra.mxu0 %vm1027_vm2, %v6927_v53  ;;  %v7329_v53 = vpop.permute.xlu0 %7328  ;;  %v15185_v43 = vld [vmem:[#allocation33_spill] sm:$0xff] }
 0xa6a   : > { %10975 = vmatpush3.bf16.xpose.msra.mxu0 %v7034_v27  ;;  %v10960_v19 = vpop.f32.mrf.mxu1  ;;  %10976 = vmatprep.mubr.msk.bf16.mxu0 %vm11713_vm1, %v15058_v17  ;;  %v7334_v10 = vsel %vm1027_vm2, %v7329_v53, 0  ;;  %v15186_v27 = vld [vmem:[#allocation53_spill] sm:$0xff] }
 0xa6b   : > { %v7551_v4 = vsel %vm1027_vm2, %v13812_v56, -inf  ;;  %10986 = vmatprep.subr.bf16.mxu0 %v15058_v17  ;;  %v4738_v50 = vadd.f32 %v15186_v27, %v15185_v43 }
 0xa6c   : > { %7552 = vmax.xlane.f32.xlu0 %v7551_v4  ;;  %v6923_v28 = vpop.f32.mrf.mxu1 }
 0xa6d   : > { %v7327_v32 = vpop.permute.xlu0 %7326 }
 0xa6e   : > { %v10961_v16 = vpop.f32.mrf.mxu1 }
 0xa70   : > { %v7020_v34 = vpop.f32.mrf.mxu1 }
 0xa71   : > { %v13821_v46 = vmul.f32 0.35355338, %v7020_v34  ;;  %10977 = vmatmul.mubr.msk.bf16.vlgmr.msra.gmra.mxu0 %vm1027_vm2, %v7027_v24  ;;  %v7429_v11 = vpop.permute.xlu0 %7428  ;;  %v15188_v34 = vld [vmem:[#allocation15_spill] sm:$0xff] }
 0xa72   : > { %10987 = vmatpush3.bf16.xpose.msra.mxu0 %v7134_v38  ;;  %v10972_v13 = vpop.f32.mrf.mxu1  ;;  %10988 = vmatprep.mubr.msk.bf16.mxu0 %vm11713_vm1, %v15058_v17  ;;  %v7434_v57 = vsel %vm1027_vm2, %v7429_v11, 0 }
 0xa73   : > { %v7557_v1 = vsel %vm1027_vm2, %v13821_v46, -inf  ;;  %10998 = vmatprep.subr.bf16.mxu0 %v15058_v17 }
 0xa74   : > { %7558 = vmax.xlane.f32.xlu1 %v7557_v1  ;;  %v7023_v39 = vpop.f32.mrf.mxu1 }
 0xa75   : > { %v7427_v20 = vpop.permute.xlu0 %7426 }
 0xa76   : > { %v10973_v41 = vpop.f32.mrf.mxu1 }
 0xa78   : > { %v7120_v61 = vpop.f32.mrf.mxu1 }
 0xa79   : > { %v13830_v25 = vmul.f32 0.35355338, %v7120_v61  ;;  %10989 = vmatmul.mubr.msk.bf16.vlgmr.msra.gmra.mxu0 %vm1027_vm2, %v7127_v12  ;;  %v7735_v18 = vpop.permute.xlu0 %7734  ;;  %v15183_v12 = vld [vmem:[#allocation50_spill] sm:$0xff] }
 0xa7a   : > { %10999 = vmatpush3.bf16.xpose.msra.mxu0 %v7234_v37  ;;  %v10984_v15 = vpop.f32.mrf.mxu1  ;;  %11000 = vmatprep.mubr.msk.bf16.mxu0 %vm11713_vm1, %v15058_v17  ;;  %v7740_v0 = vsel %vm1975_vm3, %v7735_v18, 0  ;;  %v4746_v54 = vadd.f32 %v15184_v26, %v15183_v12  ;;  %v15192_v12 = vld [vmem:[#allocation21_spill] sm:$0xff] }
 0xa7b   : > { %v7563_v36 = vsel %vm1027_vm2, %v13830_v25, -inf  ;;  %11010 = vmatprep.subr.bf16.mxu0 %v15058_v17 }
 0xa7c   : > { %7564 = vmax.xlane.f32.xlu1 %v7563_v36  ;;  %v7123_v49 = vpop.f32.mrf.mxu1 }
 0xa7d   : > { %v13881_v15 = vpop.permute.xlu0 %7830 }
 0xa7e   : > { %v10985_v35 = vpop.f32.mrf.mxu1 }
 0xa7f   : > { %v13884_v35 = vpop.permute.xlu1 %7878 }
 0xa80   : > { %v7220_v58 = vpop.f32.mrf.mxu1 }
 0xa81   : > { %v13839_v7 = vmul.f32 0.35355338, %v7220_v58  ;;  %11001 = vmatmul.mubr.msk.bf16.vlgmr.msra.gmra.mxu0 %vm1027_vm2, %v7227_v44  ;;  %v15187_v44 = vld [vmem:[#allocation51_spill] sm:$0xff] }
 0xa82   : > { %11011 = vmatpush3.bf16.xpose.msra.mxu0 %v7334_v10  ;;  %v10996_v22 = vpop.f32.mrf.mxu1  ;;  %11012 = vmatprep.mubr.msk.bf16.mxu0 %vm11713_vm1, %v15058_v17  ;;  %v4749_v38 = vadd.f32 %v15188_v34, %v15187_v44 }
 0xa83   : > { %v7569_v23 = vsel %vm1027_vm2, %v13839_v7, -inf  ;;  %11022 = vmatprep.subr.bf16.mxu0 %v15058_v17 }
 0xa84   : > { %7570 = vmax.xlane.f32.xlu1 %v7569_v23  ;;  %v7223_v24 = vpop.f32.mrf.mxu1 }
 0xa86   : > { %v10997_v42 = vpop.f32.mrf.mxu1 }
 0xa88   : > { %v7320_v47 = vpop.f32.mrf.mxu1 }
 0xa89   : > { %v13848_v60 = vmul.f32 0.35355338, %v7320_v47  ;;  %11013 = vmatmul.mubr.msk.bf16.vlgmr.msra.gmra.mxu0 %vm1027_vm2, %v7327_v32 }
 0xa8a   : > { %11023 = vmatpush3.bf16.xpose.msra.mxu0 %v7434_v57  ;;  %v11008_v14 = vpop.f32.mrf.mxu1  ;;  %11024 = vmatprep.mubr.msk.bf16.mxu0 %vm11713_vm1, %v15058_v17 }
 0xa8b   : > { %v7575_v30 = vsel %vm1027_vm2, %v13848_v60, -inf  ;;  %11034 = vmatprep.subr.bf16.mxu0 %v15058_v17 }
 0xa8c   : > { %7576 = vmax.xlane.f32.xlu1 %v7575_v30  ;;  %v7323_v5 = vpop.f32.mrf.mxu1 }
 0xa8e   : > { %v11009_v33 = vpop.f32.mrf.mxu1 }
 0xa8f   : > { %v15189_v33 = vld [vmem:[#allocation49_spill] sm:$0xff] }
 0xa90   : > { %v7420_v55 = vpop.f32.mrf.mxu1 }
 0xa91   : > { %v13857_v29 = vmul.f32 0.35355338, %v7420_v55  ;;  %11025 = vmatmul.mubr.msk.bf16.vlgmr.msra.gmra.mxu0 %vm1027_vm2, %v7427_v20  ;;  %v15190_v55 = vld [vmem:[#allocation17_spill] sm:$0xff] }
 0xa92   : > { %11035 = vmatpush3.bf16.msra.mxu0 %v7740_v0  ;;  %v11020_v51 = vpop.f32.mrf.mxu1  ;;  %11036 = vmatprep.mubr.msk.bf16.mxu0 %vm11713_vm1, %v15058_v17  ;;  %v4762_v0 = vadd.f32 %v15190_v55, %v15189_v33 }
 0xa93   : > { %v7581_v40 = vsel %vm1027_vm2, %v13857_v29, -inf  ;;  %11046 = vmatprep.subr.bf16.mxu0 %v15058_v17 }
 0xa94   : > { %7582 = vmax.xlane.f32.xlu1 %v7581_v40  ;;  %v7423_v52 = vpop.f32.mrf.mxu1 }
 0xa95   : > { %v15191_v52 = vld [vmem:[#allocation52_spill] sm:$0xff] }
 0xa96   : > { %v11021_v59 = vpop.f32.mrf.mxu1  ;;  %v4754_v26 = vadd.f32 %v15192_v12, %v15191_v52  ;;  %v15201_v52 = vld [vmem:[#allocation60_spill] sm:$0xff]  ;;  %v15202_v12 = vld [vmem:[#allocation37_spill] sm:$0xff] }
 0xa97   : > { %v10924_v2 = vpop.f32.mrf.mxu0  ;;  %v15193_v59 = vld [vmem:[#allocation54_spill] sm:$0xff] }
 0xa98   : > { %v13869_v19 = vadd.f32 %v10924_v2, %v4746_v54  ;;  %v7520_v4 = vpop.f32.mrf.mxu1  ;;  %v15194_v2 = vld [vmem:[#allocation29_spill] sm:$0xff] }
 0xa99   : > { %v13871_v28 = vmul.f32 0.35355338, %v7520_v4  ;;  %v6647_v16 = vpop.f32.mrf.mxu0  ;;  %v4765_v43 = vadd.f32 %v15194_v2, %v15193_v59  ;;  %v15204_v2 = vld [vmem:[#allocation23_spill] sm:$0xff] }
 0xa9a   : > { %v13875_v13 = vadd.f32 %v6647_v16, %v4738_v50  ;;  %v11032_v1 = vpop.f32.mrf.mxu1 }
 0xa9b   : > { %v10925_v39 = vpop.f32.mrf.mxu0  ;;  %v7587_v53 = vsel %vm1027_vm2, %v13871_v28, -inf }
 0xa9c   : > { %v13879_v41 = vadd.f32 %v10925_v39, %v4749_v38  ;;  %7588 = vmax.xlane.f32.xlu1 %v7587_v53  ;;  %v7523_v61 = vpop.f32.mrf.mxu1 }
 0xa9d   : > { %v13900_v18 = vpop.f32.mrf.mxu0 }
 0xa9e   : > { %v11033_v37 = vpop.f32.mrf.mxu1 }
 0xadd   : > { %v7544_v36 = vpop.xlane.xlu0 %7543 }
 0xade   : > { %v7590_v32 = vsub.f32 %v13794_v63, %v7544_v36  ;;  %v15195_v36 = vld [vmem:[#allocation56_spill] sm:$0xff] }
 0xae0   : > { %v7606_v49 = vmul.f32 1.442695, %v7590_v32  ;;  %v15196_v32 = vld [vmem:[#allocation31_spill] sm:$0xff] }
 0xae2   : > { %11471 = vpow2.f32 %v7606_v49  ;;  %v4778_v49 = vadd.f32 %v15196_v32, %v15195_v36 }
 0xae5   : > { %v7547_v58 = vpop.xlane.xlu1 %7546 }
 0xae6   : > { %v7591_v10 = vsub.f32 %v13799_v48, %v7547_v58 }
 0xae8   : > { %v7608_v11 = vmul.f32 1.442695, %v7591_v10 }
 0xaea   : > { %11473 = vpow2.f32 %v7608_v11  ;;  %v15197_v11 = vld [vmem:[#allocation57_spill] sm:$0xff] }
 0xaed   : > { %v7550_v22 = vpop.xlane.xlu0 %7549 }
 0xaee   : > { %v7592_v23 = vsub.f32 %v13804_v6, %v7550_v22  ;;  %v15198_v22 = vld [vmem:[#allocation20_spill] sm:$0xff] }
 0xaef   : > { %v13888_v24 = vpop.eup %11471 }
 0xaf0   : > { %v7610_v42 = vmul.f32 1.442695, %v7592_v23  ;;  %v7638_v20 = vsel %vm1027_vm2, %v13888_v24, 0.0  ;;  %v4770_v23 = vadd.f32 %v15198_v22, %v15197_v11  ;;  %v15207_v11 = vld [vmem:[#allocation42_spill] sm:$0xff] }
 0xaf1   : > { %7639 = vadd.xlane.f32.xlu0 %v7638_v20  ;;  %v15199_v20 = vld [vmem:[#allocation58_spill] sm:$0xff] }
 0xaf2   : > { %11475 = vpow2.f32 %v7610_v42 }
 0xaf5   : > { %v7553_v63 = vpop.xlane.xlu0 %7552 }
 0xaf6   : > { %v7593_v47 = vsub.f32 %v13812_v56, %v7553_v63  ;;  %v15200_v63 = vld [vmem:[#allocation27_spill] sm:$0xff] }
 0xaf7   : > { %v13893_v57 = vpop.eup %11473 }
 0xaf8   : > { %v7612_v14 = vmul.f32 1.442695, %v7593_v47  ;;  %v7641_v48 = vsel %vm1027_vm2, %v13893_v57, 0.0  ;;  %v4781_v47 = vadd.f32 %v15200_v63, %v15199_v20 }
 0xaf9   : > { %7642 = vadd.xlane.f32.xlu1 %v7641_v48 }
 0xafa   : > { %11477 = vpow2.f32 %v7612_v14 }
 0xafd   : > { %v7559_v6 = vpop.xlane.xlu1 %7558 }
 0xafe   : > { %v7595_v30 = vsub.f32 %v13821_v46, %v7559_v6 }
 0xaff   : > { %v13898_v5 = vpop.eup %11475 }
 0xb00   : > { %v7616_v51 = vmul.f32 1.442695, %v7595_v30  ;;  %v7644_v56 = vsel %vm1027_vm2, %v13898_v5, 0.0 }
 0xb01   : > { %v10928_v40 = vpop.f32.mrf.mxu0  ;;  %7645 = vadd.xlane.f32.xlu0 %v7644_v56 }
 0xb02   : > { %11479 = vpow2.f32 %v7616_v51  ;;  %v13908_v54 = vadd.f32 %v10928_v40, %v4762_v0 }
 0xb03   : > { %v6663_v46 = vpop.f32.mrf.mxu0 }
 0xb04   : > { %v13912_v27 = vadd.f32 %v6663_v46, %v4754_v26  ;;  %v4794_v26 = vadd.f32 %v15202_v12, %v15201_v52 }
 0xb05   : > { %v10929_v50 = vpop.f32.mrf.mxu0  ;;  %v7565_v4 = vpop.xlane.xlu1 %7564 }
 0xb06   : > { %v13914_v16 = vadd.f32 %v10929_v50, %v4765_v43  ;;  %v7597_v44 = vsub.f32 %v13830_v25, %v7565_v4 }
 0xb07   : > { %v13917_v34 = vpop.eup %11477  ;;  %v13924_v37 = vpop.f32.mrf.mxu0 }
 0xb08   : > { %v7620_v38 = vmul.f32 1.442695, %v7597_v44  ;;  %v7647_v1 = vsel %vm1027_vm2, %v13917_v34, 0.0  ;;  %v15205_v44 = vld [vmem:[#allocation62_spill] sm:$0xff] }
 0xb09   : > { %7648 = vadd.xlane.f32.xlu1 %v7647_v1 }
 0xb0a   : > { %11481 = vpow2.f32 %v7620_v38  ;;  %v15206_v38 = vld [vmem:[#allocation47_spill] sm:$0xff] }
 0xb0b   : > { %v4797_v1 = vadd.f32 %v15206_v38, %v15205_v44 }
 0xb0d   : > { %v7571_v39 = vpop.xlane.xlu1 %7570 }
 0xb0e   : > { %v7599_v53 = vsub.f32 %v13839_v7, %v7571_v39 }
 0xb0f   : > { %v13922_v61 = vpop.eup %11479 }
 0xb10   : > { %v7624_v58 = vmul.f32 1.442695, %v7599_v53  ;;  %v7653_v25 = vsel %vm1027_vm2, %v13922_v61, 0.0 }
 0xb11   : > { %v10932_v10 = vpop.f32.mrf.mxu0  ;;  %7654 = vadd.xlane.f32.xlu1 %v7653_v25 }
 0xb12   : > { %11483 = vpow2.f32 %v7624_v58  ;;  %v13932_v42 = vadd.f32 %v10932_v10, %v4778_v49 }
 0xb13   : > { %v6679_v7 = vpop.f32.mrf.mxu0 }
 0xb14   : > { %v13936_v14 = vadd.f32 %v6679_v7, %v4770_v23 }
 0xb15   : > { %v10933_v48 = vpop.f32.mrf.mxu0  ;;  %v7577_v6 = vpop.xlane.xlu1 %7576 }
 0xb16   : > { %v13938_v30 = vadd.f32 %v10933_v48, %v4781_v47  ;;  %v7601_v33 = vsub.f32 %v13848_v60, %v7577_v6  ;;  %v15203_v60 = vld [vmem:[#allocation61_spill] sm:$0xff]  ;;  %v15208_v48 = vld [vmem:[#allocation46_spill] sm:$0xff] }
 0xb17   : > { %v13941_v55 = vpop.eup %11481  ;;  %v13947_v40 = vpop.f32.mrf.mxu0  ;;  %v4786_v43 = vadd.f32 %v15204_v2, %v15203_v60 }
 0xb18   : > { %v7628_v0 = vmul.f32 1.442695, %v7601_v33  ;;  %v7659_v51 = vsel %vm1027_vm2, %v13941_v55, 0.0 }
 0xb19   : > { %7660 = vadd.xlane.f32.xlu1 %v7659_v51  ;;  %v15209_v51 = vld [vmem:[#allocation45_spill] sm:$0xff] }
 0xb1a   : > { %11485 = vpow2.f32 %v7628_v0 }
 0xb1f   : > { %v13945_v56 = vpop.eup %11483 }
 0xb20   : > { %v7665_v46 = vsel %vm1027_vm2, %v13945_v56, 0.0 }
 0xb21   : > { %v10936_v59 = vpop.f32.mrf.mxu0  ;;  %7666 = vadd.xlane.f32.xlu0 %v7665_v46 }
 0xb22   : > { %v13955_v50 = vadd.f32 %v10936_v59, %v4794_v26 }
 0xb23   : > { %v6695_v4 = vpop.f32.mrf.mxu0 }
 0xb24   : > { %v13959_v39 = vadd.f32 %v6695_v4, %v4786_v43 }
 0xb25   : > { %v10937_v53 = vpop.f32.mrf.mxu0 }
 0xb26   : > { %v13961_v36 = vadd.f32 %v10937_v53, %v4797_v1 }
 0xb27   : > { %v13963_v32 = vpop.eup %11485  ;;  %v13965_v49 = vpop.f32.mrf.mxu0 }
 0xb28   : > { %v7671_v58 = vsel %vm1027_vm2, %v13963_v32, 0.0 }
 0xb29   : > { %v6970_v25 = vpop.f32.mrf.mxu0  ;;  %7672 = vadd.xlane.f32.xlu0 %v7671_v58 }
 0xb2a   : > { %v13969_v10 = vmul.f32 0.35355338, %v6970_v25  ;;  %7974 = vrot.lane.b32.xlu1 %v15207_v11, %s11716_s20 }
 0xb2b   : > { %v10966_v22 = vpop.f32.mrf.mxu0 }
 0xb2c   : > { %v7554_v23 = vsel %vm1027_vm2, %v13969_v10, -inf }
 0xb2d   : > { %v6973_v7 = vpop.f32.mrf.mxu0  ;;  %7555 = vmax.xlane.f32.xlu0 %v7554_v23 }
 0xb2e   : > { %8070 = vrot.lane.b32.xlu1 %v15168_v9, %s11716_s20  ;;  %v15210_v9 = vld [vmem:[#allocation22_spill] sm:$0xff] }
 0xb2f   : > { %v10967_v20 = vpop.f32.mrf.mxu0 }
 0xb31   : > { %v7070_v63 = vpop.f32.mrf.mxu0 }
 0xb32   : > { %v13977_v47 = vmul.f32 0.35355338, %v7070_v63  ;;  %8166 = vrot.lane.b32.xlu1 %v15208_v48, %s11716_s20  ;;  %v15211_v48 = vld [vmem:[#allocation39_spill] sm:$0xff] }
 0xb33   : > { %v10978_v6 = vpop.f32.mrf.mxu0 }
 0xb34   : > { %v7560_v33 = vsel %vm1027_vm2, %v13977_v47, -inf  ;;  %v7583_v6 = vpop.xlane.xlu1 %7582 }
 0xb35   : > { %v7073_v0 = vpop.f32.mrf.mxu0  ;;  %7561 = vmax.xlane.f32.xlu0 %v7560_v33  ;;  %v7603_v33 = vsub.f32 %v13857_v29, %v7583_v6 }
 0xb36   : > { %8214 = vrot.lane.b32.xlu1 %v15209_v51, %s11716_s20 }
 0xb37   : > { %v10979_v52 = vpop.f32.mrf.mxu0  ;;  %v7632_v0 = vmul.f32 1.442695, %v7603_v33 }
 0xb39   : > { %v7170_v12 = vpop.f32.mrf.mxu0  ;;  %11487 = vpow2.f32 %v7632_v0 }
 0xb3a   : > { %v13985_v26 = vmul.f32 0.35355338, %v7170_v12  ;;  %8262 = vrot.lane.b32.xlu1 %v15210_v9, %s11716_s20 }
 0xb3b   : > { %v10990_v46 = vpop.f32.mrf.mxu0 }
 0xb3c   : > { %v7566_v59 = vsel %vm1027_vm2, %v13985_v26, -inf }
 0xb3d   : > { %v7173_v60 = vpop.f32.mrf.mxu0  ;;  %7567 = vmax.xlane.f32.xlu0 %v7566_v59 }
 0xb3e   : > { %v14008_v60 = vpop.xlane.xlu1 %7588 }
 0xb3f   : > { %v10991_v2 = vpop.f32.mrf.mxu0 }
 0xb41   : > { %v7270_v43 = vpop.f32.mrf.mxu0 }
 0xb42   : > { %v13991_v4 = vmul.f32 0.35355338, %v7270_v43 }
 0xb43   : > { %v11002_v44 = vpop.f32.mrf.mxu0 }
 0xb44   : > { %v7572_v38 = vsel %vm1027_vm2, %v13991_v4, -inf }
 0xb45   : > { %v7273_v1 = vpop.f32.mrf.mxu0  ;;  %7573 = vmax.xlane.f32.xlu0 %v7572_v38 }
 0xb46   : > { %v14002_v12 = vpop.eup %11487 }
 0xb47   : > { %v11003_v53 = vpop.f32.mrf.mxu0  ;;  %v7677_v59 = vsel %vm1027_vm2, %v14002_v12, 0.0 }
 0xb48   : > { %v7836_v53 = vsel %vm1975_vm3, %v13881_v15, 0 }
 0xb49   : > { %v7370_v58 = vpop.f32.mrf.mxu0 }
 0xb4a   : > { %v13998_v51 = vmul.f32 0.35355338, %v7370_v58 }
 0xb4b   : > { %v11014_v25 = vpop.f32.mrf.mxu0 }
 0xb4c   : > { %v7578_v52 = vsel %vm1027_vm2, %v13998_v51, -inf }
 0xb4d   : > { %v7373_v11 = vpop.f32.mrf.mxu0 }
 0xb4f   : > { %v11015_v22 = vpop.f32.mrf.mxu0 }
 0xb51   : > { %v7470_v23 = vpop.f32.mrf.mxu0 }
 0xb52   : > { %v14004_v46 = vmul.f32 0.35355338, %v7470_v23 }
 0xb53   : > { %v11026_v7 = vpop.f32.mrf.mxu0 }
 0xb54   : > { %v7584_v29 = vsel %vm1027_vm2, %v14004_v46, -inf }
 0xb55   : > { %v7473_v20 = vpop.f32.mrf.mxu0 }
 0xb57   : > { %v11027_v63 = vpop.f32.mrf.mxu0 }
 0xb5b   : > { %7926 = vrot.lane.b32.xlu0 %v15211_v48, %s11716_s20 }
 0xb7a   : > { %v7640_v9 = vpop.xlane.xlu0 %7639  ;;  %7579 = vmax.xlane.f32.xlu0 %v7578_v52 }
 0xb7b   : > { %11489 = vrcp.f32 %v7640_v9 }
 0xb7e   : > { %7678 = vadd.xlane.f32.xlu0 %v7677_v59 }
 0xb82   : > { %7585 = vmax.xlane.f32.xlu0 %v7584_v29  ;;  %v7643_v2 = vpop.xlane.xlu1 %7642 }
 0xb83   : > { %11491 = vrcp.f32 %v7643_v2 }
 0xb88   : > { %v11490_v43 = vpop.eup %11489 }
 0xb89   : > { %v7702_v44 = vmul.f32 %v11490_v43, %v13888_v24  ;;  %v7884_v24 = vsel %vm1975_vm3, %v13884_v35, 0 }
 0xb8a   : > { %v7646_v38 = vpop.xlane.xlu0 %7645 }
 0xb8b   : > { %v7718_v1 = vpack.c.bf16 %v7702_v44, %v7702_v44  ;;  %11493 = vrcp.f32 %v7646_v38 }
 0xb8d   : > { %11037 = vmatmul.mubr.msk.bf16.vlgmr.msra.gmra.mxu0 %vm1027_vm2, %v7718_v1 }
 0xb8e   : > { %11047 = vmatpush3.bf16.msra.mxu0 %v7836_v53  ;;  %11048 = vmatprep.mubr.msk.bf16.mxu0 %vm11713_vm1, %v15058_v17 }
 0xb8f   : > { %11058 = vmatprep.subr.bf16.mxu0 %v15058_v17 }
 0xb90   : > { %v11492_v58 = vpop.eup %11491 }
 0xb91   : > { %v7703_v25 = vmul.f32 %v11492_v58, %v13893_v57 }
 0xb92   : > { %v7649_v11 = vpop.xlane.xlu1 %7648 }
 0xb93   : > { %v7719_v22 = vpack.c.bf16 %v7703_v25, %v7703_v25  ;;  %11495 = vrcp.f32 %v7649_v11 }
 0xb95   : > { %11043 = vmatmul.mubr.msk.bf16.vlgmr.msra.gmra.mxu1 %vm1027_vm2, %v7719_v22 }
 0xb96   : > { %11053 = vmatpush3.bf16.msra.mxu1 %v7884_v24  ;;  %11054 = vmatprep.mubr.msk.bf16.mxu1 %vm11713_vm1, %v15058_v17 }
 0xb97   : > { %11064 = vmatprep.subr.bf16.mxu1 %v15058_v17 }
 0xb98   : > { %v11494_v15 = vpop.eup %11493 }
 0xb99   : > { %v7704_v23 = vmul.f32 %v11494_v15, %v13898_v5 }
 0xb9a   : > { %v7655_v7 = vpop.xlane.xlu1 %7654 }
 0xb9b   : > { %v7720_v20 = vpack.c.bf16 %v7704_v23, %v7704_v23  ;;  %11497 = vrcp.f32 %v7655_v7 }
 0xb9d   : > { %11049 = vmatmul.mubr.msk.bf16.vlgmr.msra.gmra.mxu0 %vm1027_vm2, %v7720_v20 }
 0xb9e   : > { %11060 = vmatprep.mubr.msk.bf16.mxu0 %vm11713_vm1, %v15058_v17 }
 0xba0   : > { %v11496_v35 = vpop.eup %11495 }
 0xba1   : > { %v7705_v57 = vmul.f32 %v11496_v35, %v13917_v34 }
 0xba2   : > { %v7661_v63 = vpop.xlane.xlu1 %7660 }
 0xba3   : > { %v7721_v48 = vpack.c.bf16 %v7705_v57, %v7705_v57  ;;  %11499 = vrcp.f32 %v7661_v63 }
 0xba5   : > { %11055 = vmatmul.mubr.msk.bf16.vlgmr.msra.gmra.mxu1 %vm1027_vm2, %v7721_v48 }
 0xba6   : > { %v7975_v6 = vpop.permute.xlu1 %7974  ;;  %11066 = vmatprep.mubr.msk.bf16.mxu1 %vm11713_vm1, %v15058_v17 }
 0xba7   : > { %v7980_v5 = vsel %vm1975_vm3, %v7975_v6, 0 }
 0xba8   : > { %v11498_v33 = vpop.eup %11497  ;;  %11065 = vmatpush3.bf16.msra.mxu1 %v7980_v5 }
 0xba9   : > { %v7707_v0 = vmul.f32 %v11498_v33, %v13922_v61  ;;  %11076 = vmatprep.subr.bf16.mxu1 %v15058_v17 }
 0xbaa   : > { %v7667_v52 = vpop.xlane.xlu0 %7666  ;;  %v8071_v9 = vpop.permute.xlu1 %8070 }
 0xbab   : > { %v7723_v34 = vpack.c.bf16 %v7707_v0, %v7707_v0  ;;  %11501 = vrcp.f32 %v7667_v52  ;;  %v8076_v59 = vsel %vm1975_vm3, %v8071_v9, 0  ;;  %v7605_v52 = vsub.f32 %v13871_v28, %v14008_v60 }
 0xbad   : > { %11067 = vmatmul.mubr.msk.bf16.vlgmr.msra.gmra.mxu1 %vm1027_vm2, %v7723_v34  ;;  %v7636_v34 = vmul.f32 1.442695, %v7605_v52 }
 0xbae   : > { %11077 = vmatpush3.bf16.msra.mxu1 %v8076_v59  ;;  %v8167_v29 = vpop.permute.xlu1 %8166  ;;  %11078 = vmatprep.mubr.msk.bf16.mxu1 %vm11713_vm1, %v15058_v17 }
 0xbaf   : > { %11088 = vmatprep.subr.bf16.mxu1 %v15058_v17  ;;  %v8172_v1 = vsel %vm1975_vm3, %v8167_v29, 0 }
 0xbb0   : > { %v11500_v2 = vpop.eup %11499 }
 0xbb1   : > { %v7709_v61 = vmul.f32 %v11500_v2, %v13941_v55 }
 0xbb2   : > { %v7673_v43 = vpop.xlane.xlu0 %7672  ;;  %v14043_v38 = vpop.permute.xlu1 %8214 }
 0xbb3   : > { %v7725_v44 = vpack.c.bf16 %v7709_v61, %v7709_v61  ;;  %11503 = vrcp.f32 %v7673_v43 }
 0xbb5   : > { %11079 = vmatmul.mubr.msk.bf16.vlgmr.msra.gmra.mxu1 %vm1027_vm2, %v7725_v44 }
 0xbb6   : > { %11089 = vmatpush3.bf16.msra.mxu1 %v8172_v1  ;;  %v7556_v53 = vpop.xlane.xlu0 %7555  ;;  %11090 = vmatprep.mubr.msk.bf16.mxu1 %vm11713_vm1, %v15058_v17  ;;  %v8263_v22 = vpop.permute.xlu1 %8262 }
 0xbb7   : > { %v7594_v58 = vsub.f32 %v13969_v10, %v7556_v53  ;;  %11100 = vmatprep.subr.bf16.mxu1 %v15058_v17  ;;  %v8268_v15 = vsel %vm1975_vm3, %v8263_v22, 0 }
 0xbb8   : > { %v11502_v25 = vpop.eup %11501 }
 0xbb9   : > { %v7711_v55 = vmul.f32 %v11502_v25, %v13945_v56  ;;  %v7614_v11 = vmul.f32 1.442695, %v7594_v58 }
 0xbbb   : > { %v7727_v24 = vpack.c.bf16 %v7711_v55, %v7711_v55  ;;  %11505 = vpow2.f32 %v7614_v11 }
 0xbbd   : > { %11091 = vmatmul.mubr.msk.bf16.vlgmr.msra.gmra.mxu1 %vm1027_vm2, %v7727_v24 }
 0xbbe   : > { %11101 = vmatpush3.bf16.msra.mxu1 %v8268_v15  ;;  %11102 = vmatprep.mubr.msk.bf16.mxu1 %vm11713_vm1, %v15058_v17  ;;  %v7562_v7 = vpop.xlane.xlu0 %7561 }
 0xbbf   : > { %11112 = vmatprep.subr.bf16.mxu1 %v15058_v17  ;;  %v7596_v0 = vsub.f32 %v13977_v47, %v7562_v7 }
 0xbc0   : > { %v11504_v10 = vpop.eup %11503 }
 0xbc1   : > { %v7713_v23 = vmul.f32 %v11504_v10, %v13963_v32  ;;  %v7618_v9 = vmul.f32 1.442695, %v7596_v0 }
 0xbc3   : > { %v7729_v20 = vpack.c.bf16 %v7713_v23, %v7713_v23 }
 0xbc5   : > { %11103 = vmatmul.mubr.msk.bf16.vlgmr.msra.gmra.mxu1 %vm1027_vm2, %v7729_v20 }
 0xbc6   : > { %v7568_v56 = vpop.xlane.xlu0 %7567  ;;  %11114 = vmatprep.mubr.msk.bf16.mxu1 %vm11713_vm1, %v15058_v17 }
 0xbc7   : > { %v7598_v35 = vsub.f32 %v13985_v26, %v7568_v56 }
 0xbc8   : > { %v14062_v57 = vpop.eup %11505 }
 0xbc9   : > { %v7622_v63 = vmul.f32 1.442695, %v7598_v35  ;;  %v7650_v48 = vsel %vm1027_vm2, %v14062_v57, 0.0 }
 0xbca   : > { %7651 = vadd.xlane.f32.xlu0 %v7650_v48 }
 0xbcb   : > { %11507 = vpow2.f32 %v7622_v63 }
 0xbcc   : > { %11509 = vpow2.f32 %v7618_v9 }
 0xbcd   : > { %11511 = vpow2.f32 %v7636_v34 }
 0xbce   : > { %v7574_v6 = vpop.xlane.xlu0 %7573 }
 0xbcf   : > { %v7600_v59 = vsub.f32 %v13991_v4, %v7574_v6 }
 0xbd1   : > { %v7626_v29 = vmul.f32 1.442695, %v7600_v59 }
 0xbd2   : > { %v7927_v32 = vpop.permute.xlu0 %7926 }
 0xbd3   : > { %v7932_v5 = vsel %vm1975_vm3, %v7927_v32, 0  ;;  %11513 = vpow2.f32 %v7626_v29 }
 0xbd4   : > { %11059 = vmatpush3.bf16.msra.mxu0 %v7932_v5 }
 0xbd5   : > { %11070 = vmatprep.subr.bf16.mxu0 %v15058_v17 }
 0xbd8   : > { %v14068_v33 = vpop.eup %11507 }
 0xbd9   : > { %v7662_v26 = vsel %vm1027_vm2, %v14068_v33, 0.0  ;;  %v14080_v2 = vpop.eup %11509 }
 0xbda   : > { %7663 = vadd.xlane.f32.xlu1 %v7662_v26  ;;  %v14084_v47 = vpop.eup %11511 }
 0xbdb   : > { %v7683_v28 = vsel %vm1027_vm2, %v14084_v47, 0.0 }
 0xbe0   : > { %8022 = vrot.lane.b32.xlu0 %v15172_v45, %s11716_s20  ;;  %v7656_v45 = vsel %vm1027_vm2, %v14080_v2, 0.0  ;;  %v14089_v4 = vpop.eup %11513 }
 0xbe1   : > { %v7668_v58 = vsel %vm1027_vm2, %v14089_v4, 0.0 }
 0xbeb   : > { %8358 = vrot.lane.b32.xlu1 %v12662_v8, %s11716_s20 }
 0xbff   : > { %7657 = vadd.xlane.f32.xlu0 %v7656_v45 }
 0xc03   : > { %v7580_v60 = vpop.xlane.xlu0 %7579  ;;  %7684 = vadd.xlane.f32.xlu0 %v7683_v28 }
 0xc04   : > { %v7602_v8 = vsub.f32 %v13998_v51, %v7580_v60 }
 0xc06   : > { %v7630_v61 = vmul.f32 1.442695, %v7602_v8 }
 0xc07   : > { %v7679_v43 = vpop.xlane.xlu0 %7678 }
 0xc08   : > { %11515 = vpow2.f32 %v7630_v61 }
 0xc0b   : > { %v7586_v44 = vpop.xlane.xlu0 %7585 }
 0xc0c   : > { %v7604_v1 = vsub.f32 %v14004_v46, %v7586_v44 }
 0xc0e   : > { %v7634_v53 = vmul.f32 1.442695, %v7604_v1 }
 0xc0f   : > { %7669 = vadd.xlane.f32.xlu1 %v7668_v58 }
 0xc10   : > { %11517 = vpow2.f32 %v7634_v53 }
 0xc15   : > { %v14094_v25 = vpop.eup %11515 }
 0xc16   : > { %v7674_v55 = vsel %vm1027_vm2, %v14094_v25, 0.0 }
 0xc17   : > { %7675 = vadd.xlane.f32.xlu1 %v7674_v55 }
 0xc19   : > { %8118 = vrot.lane.b32.xlu0 %v15173_v21, %s11716_s20 }
 0xc1d   : > { %v14100_v51 = vpop.eup %11517  ;;  %8310 = vrot.lane.b32.xlu0 %v12590_v3, %s11716_s20 }
 0xc1e   : > { %v7680_v46 = vsel %vm1027_vm2, %v14100_v51, 0.0 }
 0xc1f   : > { %7681 = vadd.xlane.f32.xlu1 %v7680_v46 }
 0xc21   : > { %8406 = vrot.lane.b32.xlu0 %v12616_v31, %s11716_s20 }
 0xc30   : > { %8454 = vrot.lane.b32.xlu1 %v12679_v62, %s11716_s20 }
 0xc4d   : > { %v14110_v11 = vpop.f32.mrf.mxu0 }
 0xc4f   : > { %v11038_v22 = vpop.f32.mrf.mxu0 }
 0xc51   : > { %v7779_v24 = vpop.f32.mrf.mxu0 }
 0xc53   : > { %v11039_v21 = vpop.f32.mrf.mxu0  ;;  %v7652_v15 = vpop.xlane.xlu0 %7651 }
 0xc54   : > { %11519 = vrcp.f32 %v7652_v15 }
 0xc55   : > { %v14112_v10 = vpop.f32.mrf.mxu1  ;;  %11521 = vrcp.f32 %v7679_v43 }
 0xc56   : > { %v8502_v3 = vpack.c.bf16 %v14112_v10, %v14110_v11 }
 0xc57   : > { %v11044_v23 = vpop.f32.mrf.mxu1  ;;  %v8023_v48 = vpop.permute.xlu0 %8022 }
 0xc58   : > { %v8028_v9 = vsel %vm1975_vm3, %v8023_v48, 0 }
 0xc59   : > { %v7827_v7 = vpop.f32.mrf.mxu1 }
 0xc5b   : > { %v11045_v20 = vpop.f32.mrf.mxu1 }
 0xc5d   : > { %v14116_v31 = vpop.f32.mrf.mxu0 }
 0xc5f   : > { %v11050_v56 = vpop.f32.mrf.mxu0 }
 0xc61   : > { %v11520_v62 = vpop.eup %11519  ;;  %v7875_v35 = vpop.f32.mrf.mxu0 }
 0xc62   : > { %v7706_v63 = vmul.f32 %v11520_v62, %v14062_v57  ;;  %v11522_v6 = vpop.eup %11521 }
 0xc63   : > { %v11051_v32 = vpop.f32.mrf.mxu0  ;;  %v7664_v5 = vpop.xlane.xlu1 %7663  ;;  %v7715_v52 = vmul.f32 %v11522_v6, %v14002_v12 }
 0xc64   : > { %v7722_v26 = vpack.c.bf16 %v7706_v63, %v7706_v63 }
 0xc65   : > { %v14119_v0 = vpop.f32.mrf.mxu1  ;;  %v7731_v12 = vpack.c.bf16 %v7715_v52, %v7715_v52 }
 0xc66   : > { %v8503_v34 = vpack.c.bf16 %v14119_v0, %v14116_v31  ;;  %11061 = vmatmul.mubr.msk.bf16.vlgmr.msra.gmra.mxu0 %vm1027_vm2, %v7722_v26 }
 0xc67   : > { %11071 = vmatpush3.bf16.msra.mxu0 %v8028_v9  ;;  %v8359_v59 = vpop.permute.xlu1 %8358  ;;  %v11056_v29 = vpop.f32.mrf.mxu1  ;;  %11072 = vmatprep.mubr.msk.bf16.mxu0 %vm11713_vm1, %v15058_v17  ;;  %v8220_v9 = vsel %vm1975_vm3, %v14043_v38, 0 }
 0xc68   : > { %v8364_v57 = vsel %vm1975_vm3, %v8359_v59, 0  ;;  %11082 = vmatprep.subr.bf16.mxu0 %v15058_v17 }
 0xc69   : > { %v7923_v45 = vpop.f32.mrf.mxu1  ;;  %11113 = vmatpush3.bf16.msra.mxu1 %v8364_v57 }
 0xc6a   : > { %11124 = vmatprep.subr.bf16.mxu1 %v15058_v17 }
 0xc6b   : > { %v11057_v28 = vpop.f32.mrf.mxu1 }
 0xc6c   : > { %11115 = vmatmul.mubr.msk.bf16.vlgmr.msra.gmra.mxu1 %vm1027_vm2, %v7731_v12 }
 0xc6d   : > { %v14132_v60 = vpop.f32.mrf.mxu1  ;;  %11126 = vmatprep.mubr.msk.bf16.mxu1 %vm11713_vm1, %v15058_v17 }
 0xc6f   : > { %v11068_v8 = vpop.f32.mrf.mxu1 }
 0xc71   : > { %v8019_v61 = vpop.f32.mrf.mxu1 }
 0xc73   : > { %v11069_v43 = vpop.f32.mrf.mxu1 }
 0xc75   : > { %v14136_v44 = vpop.f32.mrf.mxu1 }
 0xc77   : > { %v11080_v1 = vpop.f32.mrf.mxu1 }
 0xc79   : > { %v8115_v53 = vpop.f32.mrf.mxu1 }
 0xc7b   : > { %v11081_v58 = vpop.f32.mrf.mxu1 }
 0xc7c   : > { %v9859_v58 = vld [vmem:[%s14910_s7 + $0xc] sm:$0xf] }
 0xc7d   : > { %v14138_v55 = vpop.f32.mrf.mxu1 }
 0xc7f   : > { %v11092_v46 = vpop.f32.mrf.mxu1 }
 0xc81   : > { %v8211_v22 = vpop.f32.mrf.mxu1 }
 0xc83   : > { %v11093_v24 = vpop.f32.mrf.mxu1 }
 0xc85   : > { %v14140_v21 = vpop.f32.mrf.mxu1 }
 0xc87   : > { %v11104_v15 = vpop.f32.mrf.mxu1 }
 0xc88   : > { %v7658_v23 = vpop.xlane.xlu0 %7657  ;;  %v8537_v15 = vsel %vm1975_vm3, %v9859_v58, 0 }
 0xc89   : > { %11523 = vrcp.f32 %v7658_v23  ;;  %v8307_v7 = vpop.f32.mrf.mxu1 }
 0xc8a   : > { %11525 = vrcp.f32 %v7664_v5 }
 0xc8b   : > { %v11105_v20 = vpop.f32.mrf.mxu1 }
 0xc8c   : > { %v7685_v56 = vpop.xlane.xlu0 %7684 }
 0xc90   : > { %v8119_v63 = vpop.permute.xlu0 %8118 }
 0xc91   : > { %v8124_v26 = vsel %vm1975_vm3, %v8119_v63, 0 }
 0xc94   : > { %v8311_v57 = vpop.permute.xlu0 %8310 }
 0xc95   : > { %v8316_v38 = vsel %vm1975_vm3, %v8311_v57, 0 }
 0xc96   : > { %v11524_v62 = vpop.eup %11523 }
 0xc97   : > { %v7708_v35 = vmul.f32 %v11524_v62, %v14080_v2  ;;  %v11526_v32 = vpop.eup %11525 }
 0xc98   : > { %v7670_v48 = vpop.xlane.xlu1 %7669  ;;  %v7710_v5 = vmul.f32 %v11526_v32, %v14068_v33  ;;  %v8407_v53 = vpop.permute.xlu0 %8406 }
 0xc99   : > { %v7724_v6 = vpack.c.bf16 %v7708_v35, %v7708_v35  ;;  %11527 = vrcp.f32 %v7670_v48  ;;  %v8412_v46 = vsel %vm1975_vm3, %v8407_v53, 0  ;;  %v14198_v53 = vld [vmem:[%s14911_s8] ss:$0 sm:$0xff] }
 0xc9a   : > { %11529 = vrcp.f32 %v7685_v56  ;;  %v7726_v2 = vpack.c.bf16 %v7710_v5, %v7710_v5 }
 0xc9b   : > { %11073 = vmatmul.mubr.msk.bf16.vlgmr.msra.gmra.mxu0 %vm1027_vm2, %v7724_v6 }
 0xc9c   : > { %11083 = vmatpush3.bf16.msra.mxu0 %v8124_v26  ;;  %11084 = vmatprep.mubr.msk.bf16.mxu0 %vm11713_vm1, %v15058_v17 }
 0xc9d   : > { %11094 = vmatprep.subr.bf16.mxu0 %v15058_v17 }
 0xca0   : > { %v7676_v52 = vpop.xlane.xlu1 %7675 }
 0xca1   : > { %11531 = vrcp.f32 %v7676_v52 }
 0xca3   : > { %11085 = vmatmul.mubr.msk.bf16.vlgmr.msra.gmra.mxu0 %vm1027_vm2, %v7726_v2 }
 0xca4   : > { %11095 = vmatpush3.bf16.msra.mxu0 %v8220_v9  ;;  %11096 = vmatprep.mubr.msk.bf16.mxu0 %vm11713_vm1, %v15058_v17 }
 0xca5   : > { %11106 = vmatprep.subr.bf16.mxu0 %v15058_v17 }
 0xca6   : > { %v11528_v59 = vpop.eup %11527 }
 0xca7   : > { %v7712_v29 = vmul.f32 %v11528_v59, %v14089_v4  ;;  %v11530_v33 = vpop.eup %11529 }
 0xca8   : > { %v7682_v45 = vpop.xlane.xlu1 %7681  ;;  %v7717_v28 = vmul.f32 %v11530_v33, %v14084_v47 }
 0xca9   : > { %v7728_v12 = vpack.c.bf16 %v7712_v29, %v7712_v29  ;;  %11533 = vrcp.f32 %v7682_v45 }
 0xcaa   : > { %v7733_v43 = vpack.c.bf16 %v7717_v28, %v7717_v28 }
 0xcab   : > { %11097 = vmatmul.mubr.msk.bf16.vlgmr.msra.gmra.mxu0 %vm1027_vm2, %v7728_v12 }
 0xcac   : > { %11107 = vmatpush3.bf16.msra.mxu0 %v8316_v38  ;;  %v8455_v8 = vpop.permute.xlu1 %8454  ;;  %11108 = vmatprep.mubr.msk.bf16.mxu0 %vm11713_vm1, %v15058_v17 }
 0xcad   : > { %v8460_v61 = vsel %vm1975_vm3, %v8455_v8, 0  ;;  %11118 = vmatprep.subr.bf16.mxu0 %v15058_v17 }
 0xcae   : > { %v11532_v4 = vpop.eup %11531  ;;  %11125 = vmatpush3.bf16.msra.mxu1 %v8460_v61 }
 0xcaf   : > { %v7714_v1 = vmul.f32 %v11532_v4, %v14094_v25 }
 0xcb1   : > { %v7730_v47 = vpack.c.bf16 %v7714_v1, %v7714_v1  ;;  %11127 = vmatmul.mubr.msk.bf16.vlgmr.msra.gmra.mxu1 %vm1027_vm2, %v7733_v43 }
 0xcb3   : > { %11109 = vmatmul.mubr.msk.bf16.vlgmr.msra.gmra.mxu0 %vm1027_vm2, %v7730_v47 }
 0xcb4   : > { %11119 = vmatpush3.bf16.msra.mxu0 %v8412_v46  ;;  %11120 = vmatprep.mubr.msk.bf16.mxu0 %vm11713_vm1, %v15058_v17  ;;  %v15213_v46 = vld [vmem:[#allocation18_spill] sm:$0xff] }
 0xcb5   : > { %11207 = vmatprep.subr.msk.bf16.mxu0 %vm1975_vm3, %v9859_v58  ;;  %v15212_v58 = vld [vmem:[#allocation48_spill] sm:$0xff] }
 0xcb6   : > { %v11534_v22 = vpop.eup %11533 }
 0xcb7   : > { %v7716_v25 = vmul.f32 %v11534_v22, %v14100_v51  ;;  %v4741_v22 = vadd.f32 %v15213_v46, %v15212_v58  ;;  %v15216_v46 = vld [vmem:[#allocation59_spill] sm:$0xff] }
 0xcb9   : > { %v7732_v24 = vpack.c.bf16 %v7716_v25, %v7716_v25 }
 0xcbb   : > { %11121 = vmatmul.mubr.msk.bf16.vlgmr.msra.gmra.mxu0 %vm1027_vm2, %v7732_v24 }
 0xcbc   : > { %11132 = vmatprep.mubr.msk.bf16.mxu0 %vm1027_vm2, %v8502_v3  ;;  %11131 = vmatpush3.bf16.msra.mxu0 %v8537_v15  ;;  %v6711_v15 = vadd.f32 %v13900_v18, %v4741_v22  ;;  %v11600_v18 = vld [vmem:[%s11913_s23 + $0x10] sm:$0xff]  ;;  %v15217_v22 = vld [vmem:[#allocation24_spill] sm:$0xff] }
 0xcc3   : > { %11133 = vmatmul.mubr.msk.bf16.vlgmr.msra.gmra.mxu0 %vm1027_vm2, %v8503_v34 }
 0xd26   : > { %v7968_v17 = vpop.f32.mrf.mxu0 }
 0xd27   : > { %v8504_v23 = vpack.c.bf16 %v14132_v60, %v7968_v17 }
 0xd28   : > { %v11062_v51 = vpop.f32.mrf.mxu0 }
 0xd29   : > { %11136 = vmatprep.mubr.msk.bf16.mxu0 %vm1027_vm2, %v8504_v23 }
 0xd2a   : > { %v7971_v7 = vpop.f32.mrf.mxu0 }
 0xd2c   : > { %v11063_v20 = vpop.f32.mrf.mxu0  ;;  %v8400_v56 = vpop.f32.mrf.mxu1 }
 0xd2d   : > { %v11599_v20 = vld [vmem:[%s11913_s23] sm:$0xff] }
 0xd2e   : > { %v11116_v62 = vpop.f32.mrf.mxu1 }
 0xd30   : > { %v8403_v35 = vpop.f32.mrf.mxu1 }
 0xd32   : > { %v11117_v11 = vpop.f32.mrf.mxu1 }
 0xd5b   : > { %v8064_v10 = vpop.f32.mrf.mxu0 }
 0xd5c   : > { %v8505_v3 = vpack.c.bf16 %v14136_v44, %v8064_v10  ;;  %v11601_v10 = vld [vmem:[%s11913_s23 + $0x8] sm:$0xff] }
 0xd5d   : > { %v11074_v63 = vpop.f32.mrf.mxu0 }
 0xd5e   : > { %11137 = vmatmul.mubr.msk.bf16.gmra.mxu0 %vm1027_vm2, %v8505_v3 }
 0xd5f   : > { %v8067_v31 = vpop.f32.mrf.mxu0 }
 0xd60   : > { %v11602_v31 = vld [vmem:[%s11913_s23 + $0x18] sm:$0xff] }
 0xd61   : > { %v11075_v0 = vpop.f32.mrf.mxu0 }
 0xd63   : > { %v8160_v34 = vpop.f32.mrf.mxu0 }
 0xd64   : > { %v8506_v60 = vpack.c.bf16 %v14138_v55, %v8160_v34 }
 0xd65   : > { %v11086_v48 = vpop.f32.mrf.mxu0 }
 0xd66   : > { %11140 = vmatprep.mubr.msk.bf16.mxu0 %vm1027_vm2, %v8506_v60 }
 0xd67   : > { %v8163_v6 = vpop.f32.mrf.mxu0 }
 0xd69   : > { %v11087_v32 = vpop.f32.mrf.mxu0 }
 0xd6a   : > { %v15214_v32 = vld [vmem:[#allocation55_spill] sm:$0xff] }
 0xd6b   : > { %v8256_v26 = vpop.f32.mrf.mxu0 }
 0xd6c   : > { %v8507_v5 = vpack.c.bf16 %v14140_v21, %v8256_v26  ;;  %v15215_v26 = vld [vmem:[#allocation32_spill] sm:$0xff] }
 0xd6d   : > { %v11098_v52 = vpop.f32.mrf.mxu0 }
 0xd6e   : > { %11141 = vmatmul.mubr.msk.bf16.gmra.mxu0 %vm1027_vm2, %v8507_v5  ;;  %v4757_v5 = vadd.f32 %v15215_v26, %v15214_v32 }
 0xd6f   : > { %v8259_v44 = vpop.f32.mrf.mxu0 }
 0xd71   : > { %v11099_v2 = vpop.f32.mrf.mxu0  ;;  %v8496_v9 = vpop.f32.mrf.mxu1 }
 0xd72   : > { %v6715_v2 = vadd.f32 %v13924_v37, %v4757_v5  ;;  %v11604_v37 = vld [vmem:[%s11913_s23 + $0x30] sm:$0xff]  ;;  %v15218_v5 = vld [vmem:[#allocation63_spill] sm:$0xff] }
 0xd73   : > { %v8352_v59 = vpop.f32.mrf.mxu0  ;;  %v11128_v29 = vpop.f32.mrf.mxu1 }
 0xd74   : > { %v8508_v33 = vpack.c.bf16 %v8400_v56, %v8352_v59 }
 0xd75   : > { %v11110_v57 = vpop.f32.mrf.mxu0  ;;  %v8499_v45 = vpop.f32.mrf.mxu1 }
 0xd76   : > { %11144 = vmatprep.mubr.msk.bf16.mxu0 %vm1027_vm2, %v8508_v33  ;;  %v11603_v57 = vld [vmem:[%s11913_s23 + $0x20] sm:$0xff] }
 0xd77   : > { %v8355_v55 = vpop.f32.mrf.mxu0  ;;  %v11129_v12 = vpop.f32.mrf.mxu1 }
 0xd79   : > { %v11111_v28 = vpop.f32.mrf.mxu0 }
 0xd7b   : > { %v8448_v38 = vpop.f32.mrf.mxu0 }
 0xd7c   : > { %v8509_v8 = vpack.c.bf16 %v8496_v9, %v8448_v38  ;;  %v11605_v38 = vld [vmem:[%s11913_s23 + $0x28] sm:$0xff] }
 0xd7d   : > { %v11122_v61 = vpop.f32.mrf.mxu0 }
 0xd7e   : > { %11145 = vmatmul.mubr.msk.bf16.gmra.mxu0 %vm1027_vm2, %v8509_v8 }
 0xd7f   : > { %v8451_v21 = vpop.f32.mrf.mxu0 }
 0xd80   : > { %v11606_v21 = vld [vmem:[%s11913_s23 + $0x38] sm:$0xff] }
 0xd81   : > { %v11123_v4 = vpop.f32.mrf.mxu0 }
 0xd83   : > { %v11134_v43 = vpop.f32.mrf.mxu0 }
 0xd84   : > { %v8638_v1 = vadd.f32 %v11134_v43, %v13869_v19 }
 0xd85   : > { %v8573_v47 = vpop.f32.mrf.mxu0 }
 0xd86   : > { %v8636_v25 = vadd.f32 %v8573_v47, %v13875_v13  ;;  %v8661_v17 = vadd.f32 %v14198_v53, %v8638_v1 }
 0xd87   : > { %v11135_v24 = vpop.f32.mrf.mxu0 }
 0xd88   : > { %v8659_v19 = vadd.f32 %v14198_v53, %v8636_v25  ;;  %v8639_v23 = vadd.f32 %v11135_v24, %v13879_v41  ;;  %v14215_v11 = vadd.f32 %v11600_v18, %v8661_v17  ;;  %v4773_v25 = vadd.f32 %v15217_v22, %v15216_v46 }
 0xd89   : > { %v8576_v51 = vpop.f32.mrf.mxu0 }
 0xd8a   : > { %v8637_v7 = vadd.f32 %v8576_v51, %v6711_v15  ;;  %v14208_v56 = vadd.f32 %v11599_v20, %v8659_v19  ;;  %v8662_v62 = vadd.f32 %v14198_v53, %v8639_v23  ;;  %v8697_v63 = vsel %vm617_vm0, %v14215_v11, 0.0  ;;  %v11607_v20 = vld [vmem:[%s11913_s23 + $0x40] sm:$0xff] }
 0xd8b   : > { %v6719_v17 = vadd.f32 %v13947_v40, %v4773_v25  ;;  %v11608_v40 = vld [vmem:[%s11913_s23 + $0x50] sm:$0xff] }
 0xd8c   : > { %v8660_v13 = vadd.f32 %v14198_v53, %v8637_v7  ;;  %v8691_v35 = vsel %vm617_vm0, %v14208_v56, 0.0  ;;  %v14225_v0 = vadd.f32 %v11602_v31, %v8662_v62  ;;  %v11610_v31 = vld [vmem:[%s11913_s23 + $0x58] sm:$0xff] }
 0xd8d   : > { %8692 = vadd.xlane.f32.xlu0 %v8691_v35 }
 0xd8e   : > { %v14218_v3 = vadd.f32 %v11601_v10, %v8660_v13  ;;  %v8700_v34 = vsel %vm617_vm0, %v14225_v0, 0.0  ;;  %v11609_v10 = vld [vmem:[%s11913_s23 + $0x48] sm:$0xff] }
 0xd90   : > { %v8694_v41 = vsel %vm617_vm0, %v14218_v3, 0.0 }
 0xd91   : > { %8695 = vadd.xlane.f32.xlu1 %v8694_v41  ;;  %8698 = vadd.xlane.f32.xlu0 %v8697_v63 }
 0xd95   : > { %8701 = vadd.xlane.f32.xlu0 %v8700_v34 }
 0xe1e   : > { %v11138_v60 = vpop.f32.mrf.mxu0 }
 0xe1f   : > { %v8642_v48 = vadd.f32 %v11138_v60, %v13908_v54  ;;  %v8693_v60 = vpop.xlane.xlu0 %8692 }
 0xe20   : > { %v8589_v6 = vpop.f32.mrf.mxu0 }
 0xe21   : > { %v8640_v52 = vadd.f32 %v8589_v6, %v13912_v27  ;;  %v8665_v9 = vadd.f32 %v14198_v53, %v8642_v48 }
 0xe22   : > { %v11139_v44 = vpop.f32.mrf.mxu0 }
 0xe23   : > { %v8663_v59 = vadd.f32 %v14198_v53, %v8640_v52  ;;  %v8643_v29 = vadd.f32 %v11139_v44, %v13914_v16  ;;  %v14245_v28 = vadd.f32 %v11604_v37, %v8665_v9  ;;  %v15219_v52 = vld [vmem:[#allocation26_spill] sm:$0xff]  ;;  %v8740_v9 = vmul.f32 0.03125, %v8693_v60  ;;  %v11611_v37 = vld [vmem:[%s11913_s23 + $0x60] sm:$0xff] }
 0xe24   : > { %v8592_v33 = vpop.f32.mrf.mxu0  ;;  %v4789_v44 = vadd.f32 %v15219_v52, %v15218_v5 }
 0xe25   : > { %v8641_v54 = vadd.f32 %v8592_v33, %v6715_v2  ;;  %v14238_v45 = vadd.f32 %v11603_v57, %v8663_v59  ;;  %v8666_v55 = vadd.f32 %v14198_v53, %v8643_v29  ;;  %v8709_v61 = vsel %vm617_vm0, %v14245_v28, 0.0  ;;  %v8699_v59 = vpop.xlane.xlu0 %8698 }
 0xe26   : > { %v6723_v33 = vadd.f32 %v13965_v49, %v4789_v44 }
 0xe27   : > { %v8664_v27 = vadd.f32 %v14198_v53, %v8641_v54  ;;  %v8703_v12 = vsel %vm617_vm0, %v14238_v45, 0.0  ;;  %v14255_v4 = vadd.f32 %v11606_v21, %v8666_v55  ;;  %v8696_v54 = vpop.xlane.xlu1 %8695 }
 0xe28   : > { %8704 = vadd.xlane.f32.xlu0 %v8703_v12 }
 0xe29   : > { %v14248_v8 = vadd.f32 %v11605_v38, %v8664_v27  ;;  %v8712_v47 = vsel %vm617_vm0, %v14255_v4, 0.0 }
 0xe2b   : > { %v8706_v16 = vsel %vm617_vm0, %v14248_v8, 0.0 }
 0xe2c   : > { %8707 = vadd.xlane.f32.xlu1 %v8706_v16  ;;  %8710 = vadd.xlane.f32.xlu0 %v8709_v61  ;;  %v8741_v16 = vmul.f32 0.03125, %v8696_v54  ;;  %v8742_v61 = vmul.f32 0.03125, %v8699_v59 }
 0xe2e   : > { %v11142_v43 = vpop.f32.mrf.mxu0  ;;  %v14317_v22 = vsub.f32 %v14215_v11, %v8742_v61 }
 0xe2f   : > { %v8646_v1 = vadd.f32 %v11142_v43, %v13932_v42 }
 0xe30   : > { %v8605_v58 = vpop.f32.mrf.mxu0  ;;  %8713 = vadd.xlane.f32.xlu1 %v8712_v47  ;;  %v8702_v47 = vpop.xlane.xlu0 %8701 }
 0xe31   : > { %v8644_v24 = vadd.f32 %v8605_v58, %v13936_v14  ;;  %v8669_v19 = vadd.f32 %v14198_v53, %v8646_v1  ;;  %v11612_v1 = vld [vmem:[%s11913_s23 + $0x70] sm:$0xff]  ;;  %v11613_v58 = vld [vmem:[%s11913_s23 + $0x68] sm:$0xff]  ;;  %v8743_v25 = vmul.f32 0.03125, %v8702_v47 }
 0xe32   : > { %v11143_v15 = vpop.f32.mrf.mxu0 }
 0xe33   : > { %v8667_v23 = vadd.f32 %v14198_v53, %v8644_v24  ;;  %v8647_v42 = vadd.f32 %v11143_v15, %v13938_v30  ;;  %v14275_v18 = vadd.f32 %v11608_v40, %v8669_v19  ;;  %v14330_v11 = vsub.f32 %v14225_v0, %v8743_v25 }
 0xe34   : > { %v8608_v51 = vpop.f32.mrf.mxu0 }
 0xe35   : > { %v8645_v7 = vadd.f32 %v8608_v51, %v6719_v17  ;;  %v14268_v62 = vadd.f32 %v11607_v20, %v8667_v23  ;;  %v8670_v13 = vadd.f32 %v14198_v53, %v8647_v42  ;;  %v8721_v63 = vsel %vm617_vm0, %v14275_v18, 0.0  ;;  %v11614_v17 = vld [vmem:[%s11913_s23 + $0x78] sm:$0xff]  ;;  %s14776_s23 = scalar_lea.vmem [#allocation5], %s9670_s1  ;;  %s15221_s1 = sld [smem:[#allocation10_spill]] }
 0xe36   : > { %v8774_v51 = vmul.f32 %v14317_v22, %v14317_v22  ;;  %s9590_s18 = sshll.u32 %s14776_s23, 4  ;;  %s14857_s18 = int_to_ptr.vmem [resolvable:$true] %s9590_s18 }
 0xe37   : > { %v8668_v14 = vadd.f32 %v14198_v53, %v8645_v7  ;;  %v8715_v35 = vsel %vm617_vm0, %v14268_v62, 0.0  ;;  %v14285_v34 = vadd.f32 %v11610_v31, %v8670_v13  ;;  %v8775_v13 = vmul.f32 %v14330_v11, %v14330_v11 }
 0xe38   : > { %8716 = vadd.xlane.f32.xlu0 %v8715_v35  ;;  %v8794_v20 = vsel %vm617_vm0, %v8774_v51, 0.0  ;;  %v11270_v35 = vld [vmem:[%s14914_s11] sm:$0xff]  }
 0xe39   : > { %v14278_v41 = vadd.f32 %v11609_v10, %v8668_v14  ;;  %v8724_v32 = vsel %vm617_vm0, %v14285_v34, 0.0  ;;  %v8797_v0 = vsel %vm617_vm0, %v8775_v13, 0.0  ;;  %v11269_v14 = vld [vmem:[%s14914_s11 + $0x8] sm:$0xff]  }
 0xe3a   : > { %11148 = vmatprep.subr.bf16.mxu1 %v11269_v14 }
 0xe3b   : > { %v8718_v30 = vsel %vm617_vm0, %v14278_v41, 0.0  ;;  %11149 = vmatpush3.bf16.msra.mxu1 %v11269_v14  ;;  %s9899_s21 = sshll.u32 %s15221_s1, 11  ;;  %s11717_s1 = smov [#allocation5]  }
 0xe3c   : > { %8719 = vadd.xlane.f32.xlu1 %v8718_v30  ;;  %8722 = vadd.xlane.f32.xlu0 %v8721_v63  ;;  %s14855_s0 = scalar_lea.hbm %s15223_s24, %s9899_s21  ;;  %s11647_s2 = sshll.u32 %s11717_s1, 4  ;;  %s11648_s2 = int_to_ptr.vmem [resolvable:$false] %s11647_s2 }
 0xe3d   : > { %11150 = vmatprep.subr.bf16.mxu1 %v11270_v35  ;;  %s11649_s21 = scalar_lea.vmem %s11648_s2, 4096  ;;  %p11650_p5 = scmp.lt.s32.totalorder %s14857_s18, %s11648_s2 }
 0xe3e   : > { %v11146_v48 = vpop.f32.mrf.mxu0 }
 0xe3f   : > { %v8650_v6 = vadd.f32 %v11146_v48, %v13955_v50  ;;  %11151 = vmatpush3.bf16.msra.mxu1 %v11270_v35 }
 0xe40   : > { %v8621_v26 = vpop.f32.mrf.mxu0  ;;  %8725 = vadd.xlane.f32.xlu1 %v8724_v32 }
 0xe41   : > { %v8648_v2 = vadd.f32 %v8621_v26, %v13959_v39  ;;  %v8673_v50 = vadd.f32 %v14198_v53, %v8650_v6  ;;  %v14301_v39 = vsub.f32 %v14208_v56, %v8740_v9  ;;  %v14314_v56 = vsub.f32 %v14218_v3, %v8741_v16 }
 0xe42   : > { %v11147_v29 = vpop.f32.mrf.mxu0 }
 0xe43   : > { %v8671_v57 = vadd.f32 %v14198_v53, %v8648_v2  ;;  %v8651_v55 = vadd.f32 %v11147_v29, %v13961_v36  ;;  %v14308_v36 = vadd.f32 %v11612_v1, %v8673_v50  ;;  %v8773_v42 = vmul.f32 %v14314_v56, %v14314_v56 }
 0xe44   : > { %v8624_v27 = vpop.f32.mrf.mxu0 }
 0xe45   : > { %v8649_v12 = vadd.f32 %v8624_v27, %v6723_v33  ;;  %v14298_v38 = vadd.f32 %v11611_v37, %v8671_v57  ;;  %v8674_v49 = vadd.f32 %v14198_v53, %v8651_v55  ;;  %v8733_v15 = vsel %vm617_vm0, %v14308_v36, 0.0 }
 0xe46   : > { %v8791_v7 = vsel %vm617_vm0, %v8773_v42, 0.0 }
 0xe47   : > { %v8672_v21 = vadd.f32 %v14198_v53, %v8649_v12  ;;  %v8727_v43 = vsel %vm617_vm0, %v14298_v38, 0.0  ;;  %v8772_v53 = vmul.f32 %v14301_v39, %v14301_v39  ;;  %v14326_v19 = vadd.f32 %v11614_v17, %v8674_v49 }
 0xe48   : > { %8728 = vadd.xlane.f32.xlu0 %v8727_v43 }
 0xe49   : > { %v14311_v46 = vadd.f32 %v11613_v58, %v8672_v21  ;;  %v8788_v3 = vsel %vm617_vm0, %v8772_v53, 0.0  ;;  %v8736_v23 = vsel %vm617_vm0, %v14326_v19, 0.0 }
 0xe4b   : > { %v8730_v24 = vsel %vm617_vm0, %v14311_v46, 0.0 }
 0xe4c   : > { %8731 = vadd.xlane.f32.xlu1 %v8730_v24  ;;  %8734 = vadd.xlane.f32.xlu0 %v8733_v15 }
 0xe50   : > { %8737 = vadd.xlane.f32.xlu1 %v8736_v23  ;;  %8789 = vadd.xlane.f32.xlu0 %v8788_v3 }
 0xe54   : > { %8792 = vadd.xlane.f32.xlu1 %v8791_v7  ;;  %8795 = vadd.xlane.f32.xlu0 %v8794_v20 }
 0xe58   : > { %8798 = vadd.xlane.f32.xlu1 %v8797_v0 }
 0xeb1   : > { %v8705_v40 = vpop.xlane.xlu0 %8704 }
 0xeb2   : > { %v8744_v10 = vmul.f32 0.03125, %v8705_v40 }
 0xeb4   : > { %v14350_v30 = vsub.f32 %v14238_v45, %v8744_v10 }
 0xeb5   : > { %v8708_v63 = vpop.xlane.xlu1 %8707  ;;  %v8711_v31 = vpop.xlane.xlu0 %8710 }
 0xeb6   : > { %v8745_v60 = vmul.f32 0.03125, %v8708_v63  ;;  %v8746_v48 = vmul.f32 0.03125, %v8711_v31  ;;  %v8776_v6 = vmul.f32 %v14350_v30, %v14350_v30 }
 0xeb8   : > { %v14355_v32 = vsub.f32 %v14248_v8, %v8745_v60  ;;  %v14358_v26 = vsub.f32 %v14245_v28, %v8746_v48  ;;  %v8800_v5 = vsel %vm617_vm0, %v8776_v6, 0.0 }
 0xeb9   : > { %v8714_v52 = vpop.xlane.xlu1 %8713  ;;  %8801 = vadd.xlane.f32.xlu0 %v8800_v5 }
 0xeba   : > { %v8747_v44 = vmul.f32 0.03125, %v8714_v52  ;;  %v8777_v45 = vmul.f32 %v14355_v32, %v14355_v32  ;;  %v8778_v2 = vmul.f32 %v14358_v26, %v14358_v26 }
 0xebc   : > { %v14366_v9 = vsub.f32 %v14255_v4, %v8747_v44  ;;  %v8803_v8 = vsel %vm617_vm0, %v8777_v45, 0.0  ;;  %v8806_v59 = vsel %vm617_vm0, %v8778_v2, 0.0 }
 0xebd   : > { %8804 = vadd.xlane.f32.xlu1 %v8803_v8  ;;  %8807 = vadd.xlane.f32.xlu0 %v8806_v59 }
 0xebe   : > { %v8779_v28 = vmul.f32 %v14366_v9, %v14366_v9 }
 0xec0   : > { %v8809_v29 = vsel %vm617_vm0, %v8779_v28, 0.0  ;;  %v14425_v28 = vld [vmem:[%s14912_s9] ss:$0 sm:$0xff] }
 0xec1   : > { %8810 = vadd.xlane.f32.xlu1 %v8809_v29  ;;  %v8717_v33 = vpop.xlane.xlu0 %8716 }
 0xec2   : > { %v8748_v54 = vmul.f32 0.03125, %v8717_v33 }
 0xec4   : > { %v14374_v50 = vsub.f32 %v14268_v62, %v8748_v54 }
 0xec5   : > { %v8720_v57 = vpop.xlane.xlu1 %8719  ;;  %v8723_v4 = vpop.xlane.xlu0 %8722 }
 0xec6   : > { %v8749_v55 = vmul.f32 0.03125, %v8720_v57  ;;  %v8750_v27 = vmul.f32 0.03125, %v8723_v4  ;;  %v8780_v12 = vmul.f32 %v14374_v50, %v14374_v50 }
 0xec8   : > { %v14379_v37 = vsub.f32 %v14278_v41, %v8749_v55  ;;  %v14382_v16 = vsub.f32 %v14275_v18, %v8750_v27  ;;  %v8812_v61 = vsel %vm617_vm0, %v8780_v12, 0.0  ;;  %v14433_v55 = vld [vmem:[%s14913_s10] ss:$0 sm:$0xff] }
 0xec9   : > { %v8726_v49 = vpop.xlane.xlu1 %8725  ;;  %8813 = vadd.xlane.f32.xlu0 %v8812_v61 }
 0xeca   : > { %v8751_v21 = vmul.f32 0.03125, %v8726_v49  ;;  %v8781_v62 = vmul.f32 %v14379_v37, %v14379_v37  ;;  %v8782_v43 = vmul.f32 %v14382_v16, %v14382_v16 }
 0xecc   : > { %v14390_v1 = vsub.f32 %v14285_v34, %v8751_v21  ;;  %v8815_v41 = vsel %vm617_vm0, %v8781_v62, 0.0  ;;  %v8818_v47 = vsel %vm617_vm0, %v8782_v43, 0.0 }
 0xecd   : > { %8816 = vadd.xlane.f32.xlu1 %v8815_v41  ;;  %8819 = vadd.xlane.f32.xlu0 %v8818_v47  ;;  %v11271_v41 = vld [vmem:[%s14916_s13 + $0x38] sm:$0xff]   ;;  %v11272_v47 = vld [vmem:[%s14916_s13 + $0x30] sm:$0xff]  }
 0xece   : > { %v8783_v18 = vmul.f32 %v14390_v1, %v14390_v1  ;;  %11168 = vmatprep.subr.bf16.mxu0 %v11271_v41 }
 0xecf   : > { %11169 = vmatpush3.bf16.msra.mxu0 %v11271_v41 }
 0xed0   : > { %v8821_v58 = vsel %vm617_vm0, %v8783_v18, 0.0  ;;  %11170 = vmatprep.subr.bf16.mxu0 %v11272_v47  ;;  %v11273_v18 = vld [vmem:[%s14916_s13 + $0x28] sm:$0xff]  }
 0xed1   : > { %8822 = vadd.xlane.f32.xlu1 %v8821_v58  ;;  %v8729_v53 = vpop.xlane.xlu0 %8728  ;;  %v11274_v58 = vld [vmem:[%s14916_s13 + $0x20] sm:$0xff]  }
 0xed2   : > { %v8752_v25 = vmul.f32 0.03125, %v8729_v53  ;;  %v11275_v53 = vld [vmem:[%s14916_s13 + $0x18] sm:$0xff]  }
 0xed3   : > { %11171 = vmatpush3.bf16.msra.mxu0 %v11272_v47 }
 0xed4   : > { %v14398_v24 = vsub.f32 %v14298_v38, %v8752_v25  ;;  %11172 = vmatprep.subr.bf16.mxu0 %v11273_v18  ;;  %v11276_v25 = vld [vmem:[%s14916_s13 + $0x10] sm:$0xff]  }
 0xed5   : > { %v8732_v15 = vpop.xlane.xlu1 %8731  ;;  %v8735_v34 = vpop.xlane.xlu0 %8734 }
 0xed6   : > { %v8753_v17 = vmul.f32 0.03125, %v8732_v15  ;;  %v8754_v3 = vmul.f32 0.03125, %v8735_v34  ;;  %v8784_v23 = vmul.f32 %v14398_v24, %v14398_v24  ;;  %v11277_v34 = vld [vmem:[%s14916_s13 + $0x8] sm:$0xff]  }
 0xed7   : > { %11173 = vmatpush3.bf16.msra.mxu0 %v11273_v18 }
 0xed8   : > { %v14403_v42 = vsub.f32 %v14311_v46, %v8753_v17  ;;  %v14406_v51 = vsub.f32 %v14308_v36, %v8754_v3  ;;  %v8824_v7 = vsel %vm617_vm0, %v8784_v23, 0.0  ;;  %11174 = vmatprep.subr.bf16.mxu0 %v11274_v58 }
 0xed9   : > { %v8738_v20 = vpop.xlane.xlu1 %8737  ;;  %8825 = vadd.xlane.f32.xlu0 %v8824_v7  ;;  %v8790_v13 = vpop.xlane.xlu0 %8789 }
 0xeda   : > { %v8755_v38 = vmul.f32 0.03125, %v8738_v20  ;;  %v8836_v0 = vmul.f32 0.03125, %v8790_v13  ;;  %v8785_v14 = vmul.f32 %v14403_v42, %v14403_v42  ;;  %v8786_v35 = vmul.f32 %v14406_v51, %v14406_v51  ;;  %v11278_v20 = vld [vmem:[%s14916_s13] sm:$0xff]  }
 0xedb   : > { %11175 = vmatpush3.bf16.msra.mxu0 %v11274_v58 }
 0xedc   : > { %v14414_v40 = vsub.f32 %v14326_v19, %v8755_v38  ;;  %v8852_v46 = vadd.f32 1e-05, %v8836_v0  ;;  %v8827_v36 = vsel %vm617_vm0, %v8785_v14, 0.0  ;;  %v8830_v10 = vsel %vm617_vm0, %v8786_v35, 0.0  ;;  %11176 = vmatprep.subr.bf16.mxu0 %v11275_v53 }
 0xedd   : > { %v8793_v63 = vpop.xlane.xlu1 %8792  ;;  %8828 = vadd.xlane.f32.xlu1 %v8827_v36  ;;  %8831 = vadd.xlane.f32.xlu0 %v8830_v10  ;;  %v8796_v31 = vpop.xlane.xlu0 %8795 }
 0xede   : > { %11535 = vrsqrt.f32 %v8852_v46  ;;  %v8837_v60 = vmul.f32 0.03125, %v8793_v63  ;;  %v8838_v48 = vmul.f32 0.03125, %v8796_v31  ;;  %v8787_v6 = vmul.f32 %v14414_v40, %v14414_v40 }
 0xedf   : > { %11177 = vmatpush3.bf16.msra.mxu0 %v11275_v53 }
 0xee0   : > { %v8853_v5 = vadd.f32 1e-05, %v8837_v60  ;;  %v8854_v52 = vadd.f32 1e-05, %v8838_v48  ;;  %v8833_v19 = vsel %vm617_vm0, %v8787_v6, 0.0  ;;  %11178 = vmatprep.subr.bf16.mxu0 %v11276_v25 }
 0xee1   : > { %8834 = vadd.xlane.f32.xlu1 %v8833_v19  ;;  %v8799_v44 = vpop.xlane.xlu1 %8798 }
 0xee2   : > { %11537 = vrsqrt.f32 %v8853_v5  ;;  %v8839_v45 = vmul.f32 0.03125, %v8799_v44 }
 0xee3   : > { %11539 = vrsqrt.f32 %v8854_v52  ;;  %11179 = vmatpush3.bf16.msra.mxu0 %v11276_v25 }
 0xee4   : > { %v8855_v2 = vadd.f32 1e-05, %v8839_v45  ;;  %11180 = vmatprep.subr.bf16.mxu0 %v11277_v34 }
 0xee6   : > { %11541 = vrsqrt.f32 %v8855_v2 }
 0xee7   : > { %11181 = vmatpush3.bf16.msra.mxu0 %v11277_v34 }
 0xee8   : > { %11182 = vmatprep.subr.bf16.mxu0 %v11278_v20 }
 0xeeb   : > { %v11536_v8 = vpop.eup %11535  ;;  %11183 = vmatpush3.bf16.msra.mxu0 %v11278_v20 }
 0xeec   : > { %v8884_v59 = vmul.f32 %v11536_v8, %v14301_v39 }
 0xeee   : > { %v8907_v57 = vmul.f32 %v14425_v28, %v8884_v59 }
 0xeef   : > { %v11538_v29 = vpop.eup %11537 }
 0xef0   : > { %v11540_v33 = vpop.eup %11539  ;;  %v8885_v54 = vmul.f32 %v11538_v29, %v14314_v56  ;;  %v14439_v49 = vadd.f32 %v14433_v55, %v8907_v57 }
 0xef1   : > { %v8886_v4 = vmul.f32 %v11540_v33, %v14317_v22 }
 0xef2   : > { %v8908_v39 = vmul.f32 %v14425_v28, %v8885_v54 }
 0xef3   : > { %v11542_v27 = vpop.eup %11541  ;;  %v8909_v12 = vmul.f32 %v14425_v28, %v8886_v4 }
 0xef4   : > { %v8887_v61 = vmul.f32 %v11542_v27, %v14330_v11  ;;  %v14442_v56 = vadd.f32 %v14433_v55, %v8908_v39 }
 0xef5   : > { %v14449_v62 = vadd.f32 %v14433_v55, %v8909_v12 }
 0xef6   : > { %v8910_v22 = vmul.f32 %v14425_v28, %v8887_v61  ;;  %v8946_v21 = vpack.c.bf16 %v14442_v56, %v14439_v49 }
 0xef8   : > { %11152 = vmatprep.mubr.msk.bf16.mxu1 %vm617_vm0, %v8946_v21  ;;  %v14452_v43 = vadd.f32 %v14433_v55, %v8910_v22 }
 0xefa   : > { %v8947_v11 = vpack.c.bf16 %v14452_v43, %v14449_v62 }
 0xefc   : > { %11153 = vmatmul.mubr.msk.bf16.vlgmr.msra.gmra.mxu1 %vm617_vm0, %v8947_v11 }
 0xf42   : > { %v8802_v15 = vpop.xlane.xlu0 %8801 }
 0xf43   : > { %v8840_v17 = vmul.f32 0.03125, %v8802_v15 }
 0xf45   : > { %v8856_v3 = vadd.f32 1e-05, %v8840_v17 }
 0xf46   : > { %v8805_v23 = vpop.xlane.xlu1 %8804  ;;  %v8808_v7 = vpop.xlane.xlu0 %8807 }
 0xf47   : > { %11543 = vrsqrt.f32 %v8856_v3  ;;  %v8841_v13 = vmul.f32 0.03125, %v8805_v23  ;;  %v8842_v38 = vmul.f32 0.03125, %v8808_v7 }
 0xf49   : > { %v8857_v0 = vadd.f32 1e-05, %v8841_v13  ;;  %v8858_v14 = vadd.f32 1e-05, %v8842_v38 }
 0xf4a   : > { %v8811_v35 = vpop.xlane.xlu1 %8810 }
 0xf4b   : > { %11545 = vrsqrt.f32 %v8857_v0  ;;  %v8843_v46 = vmul.f32 0.03125, %v8811_v35 }
 0xf4c   : > { %11547 = vrsqrt.f32 %v8858_v14 }
 0xf4d   : > { %v8859_v36 = vadd.f32 1e-05, %v8843_v46 }
 0xf4f   : > { %11549 = vrsqrt.f32 %v8859_v36 }
 0xf52   : > { %v8814_v10 = vpop.xlane.xlu0 %8813 }
 0xf53   : > { %v8844_v63 = vmul.f32 0.03125, %v8814_v10 }
 0xf54   : > { %v11544_v31 = vpop.eup %11543 }
 0xf55   : > { %v8860_v60 = vadd.f32 1e-05, %v8844_v63  ;;  %v8888_v48 = vmul.f32 %v11544_v31, %v14350_v30 }
 0xf56   : > { %v8817_v6 = vpop.xlane.xlu1 %8816  ;;  %v8820_v5 = vpop.xlane.xlu0 %8819 }
 0xf57   : > { %11551 = vrsqrt.f32 %v8860_v60  ;;  %v8845_v52 = vmul.f32 0.03125, %v8817_v6  ;;  %v8846_v19 = vmul.f32 0.03125, %v8820_v5  ;;  %v8911_v45 = vmul.f32 %v14425_v28, %v8888_v48 }
 0xf58   : > { %v11546_v44 = vpop.eup %11545 }
 0xf59   : > { %v11548_v2 = vpop.eup %11547  ;;  %v8861_v8 = vadd.f32 1e-05, %v8845_v52  ;;  %v8862_v59 = vadd.f32 1e-05, %v8846_v19  ;;  %v8889_v29 = vmul.f32 %v11546_v44, %v14355_v32  ;;  %v14487_v39 = vadd.f32 %v14433_v55, %v8911_v45 }
 0xf5a   : > { %v8890_v33 = vmul.f32 %v11548_v2, %v14358_v26  ;;  %v8823_v54 = vpop.xlane.xlu1 %8822 }
 0xf5b   : > { %11553 = vrsqrt.f32 %v8861_v8  ;;  %v8847_v57 = vmul.f32 0.03125, %v8823_v54  ;;  %v8912_v30 = vmul.f32 %v14425_v28, %v8889_v29 }
 0xf5c   : > { %v11550_v4 = vpop.eup %11549  ;;  %11555 = vrsqrt.f32 %v8862_v59  ;;  %v8913_v32 = vmul.f32 %v14425_v28, %v8890_v33 }
 0xf5d   : > { %v8891_v27 = vmul.f32 %v11550_v4, %v14366_v9  ;;  %v8863_v12 = vadd.f32 1e-05, %v8847_v57  ;;  %v14491_v61 = vadd.f32 %v14433_v55, %v8912_v30 }
 0xf5e   : > { %v14499_v21 = vadd.f32 %v14433_v55, %v8913_v32  ;;  %v9871_v32 = vld [vmem:[%s14915_s12] ss:$0 sm:$0xff] }
 0xf5f   : > { %11557 = vrsqrt.f32 %v8863_v12  ;;  %v8948_v26 = vpack.c.bf16 %v14491_v61, %v14487_v39  ;;  %v8914_v22 = vmul.f32 %v14425_v28, %v8891_v27 }
 0xf61   : > { %11156 = vmatprep.mubr.msk.bf16.mxu1 %vm617_vm0, %v8948_v26  ;;  %v14502_v11 = vadd.f32 %v14433_v55, %v8914_v22 }
 0xf62   : > { %v8826_v9 = vpop.xlane.xlu0 %8825 }
 0xf63   : > { %v8848_v41 = vmul.f32 0.03125, %v8826_v9  ;;  %v8949_v47 = vpack.c.bf16 %v14502_v11, %v14499_v21 }
 0xf64   : > { %v11552_v18 = vpop.eup %11551 }
 0xf65   : > { %v8864_v58 = vadd.f32 1e-05, %v8848_v41  ;;  %11157 = vmatmul.mubr.msk.bf16.gmra.mxu1 %vm617_vm0, %v8949_v47  ;;  %v8892_v53 = vmul.f32 %v11552_v18, %v14374_v50 }
 0xf66   : > { %v8829_v25 = vpop.xlane.xlu1 %8828  ;;  %v8832_v15 = vpop.xlane.xlu0 %8831 }
 0xf67   : > { %11559 = vrsqrt.f32 %v8864_v58  ;;  %v8849_v34 = vmul.f32 0.03125, %v8829_v25  ;;  %v8850_v17 = vmul.f32 0.03125, %v8832_v15  ;;  %v8915_v23 = vmul.f32 %v14425_v28, %v8892_v53 }
 0xf68   : > { %v11554_v3 = vpop.eup %11553 }
 0xf69   : > { %v11556_v7 = vpop.eup %11555  ;;  %v8865_v20 = vadd.f32 1e-05, %v8849_v34  ;;  %v8866_v13 = vadd.f32 1e-05, %v8850_v17  ;;  %v8893_v38 = vmul.f32 %v11554_v3, %v14379_v37  ;;  %v14513_v36 = vadd.f32 %v14433_v55, %v8915_v23 }
 0xf6a   : > { %v8894_v0 = vmul.f32 %v11556_v7, %v14382_v16  ;;  %v8835_v14 = vpop.xlane.xlu1 %8834 }
 0xf6b   : > { %11561 = vrsqrt.f32 %v8865_v20  ;;  %v8851_v35 = vmul.f32 0.03125, %v8835_v14  ;;  %v8916_v50 = vmul.f32 %v14425_v28, %v8893_v38 }
 0xf6c   : > { %v11558_v46 = vpop.eup %11557  ;;  %11563 = vrsqrt.f32 %v8866_v13  ;;  %v8917_v37 = vmul.f32 %v14425_v28, %v8894_v0 }
 0xf6d   : > { %v8895_v10 = vmul.f32 %v11558_v46, %v14390_v1  ;;  %v8867_v63 = vadd.f32 1e-05, %v8851_v35  ;;  %v14517_v31 = vadd.f32 %v14433_v55, %v8916_v50 }
 0xf6e   : > { %v14525_v48 = vadd.f32 %v14433_v55, %v8917_v37 }
 0xf6f   : > { %11565 = vrsqrt.f32 %v8867_v63  ;;  %v8950_v16 = vpack.c.bf16 %v14517_v31, %v14513_v36  ;;  %v8918_v60 = vmul.f32 %v14425_v28, %v8895_v10 }
 0xf71   : > { %11160 = vmatprep.mubr.msk.bf16.mxu1 %vm617_vm0, %v8950_v16  ;;  %v14528_v6 = vadd.f32 %v14433_v55, %v8918_v60 }
 0xf73   : > { %v8951_v1 = vpack.c.bf16 %v14528_v6, %v14525_v48 }
 0xf74   : > { %v11560_v5 = vpop.eup %11559 }
 0xf75   : > { %11161 = vmatmul.mubr.msk.bf16.gmra.mxu1 %vm617_vm0, %v8951_v1  ;;  %v8896_v52 = vmul.f32 %v11560_v5, %v14398_v24 }
 0xf77   : > { %v8919_v2 = vmul.f32 %v14425_v28, %v8896_v52 }
 0xf78   : > { %v11562_v19 = vpop.eup %11561 }
 0xf79   : > { %v11564_v44 = vpop.eup %11563  ;;  %v8897_v45 = vmul.f32 %v11562_v19, %v14403_v42  ;;  %v14540_v54 = vadd.f32 %v14433_v55, %v8919_v2 }
 0xf7a   : > { %v8898_v8 = vmul.f32 %v11564_v44, %v14406_v51 }
 0xf7b   : > { %v8920_v59 = vmul.f32 %v14425_v28, %v8897_v45 }
 0xf7c   : > { %v11566_v29 = vpop.eup %11565  ;;  %v8921_v24 = vmul.f32 %v14425_v28, %v8898_v8 }
 0xf7d   : > { %v8899_v33 = vmul.f32 %v11566_v29, %v14414_v40  ;;  %v14543_v57 = vadd.f32 %v14433_v55, %v8920_v59 }
 0xf7e   : > { %v14551_v51 = vadd.f32 %v14433_v55, %v8921_v24 }
 0xf7f   : > { %v8952_v42 = vpack.c.bf16 %v14543_v57, %v14540_v54  ;;  %v8922_v30 = vmul.f32 %v14425_v28, %v8899_v33 }
 0xf81   : > { %11164 = vmatprep.mubr.msk.bf16.mxu1 %vm617_vm0, %v8952_v42  ;;  %v14554_v40 = vadd.f32 %v14433_v55, %v8922_v30 }
 0xf83   : > { %v8953_v4 = vpack.c.bf16 %v14554_v40, %v14551_v51 }
 0xf85   : > { %11165 = vmatmul.mubr.msk.bf16.gmra.mxu1 %vm617_vm0, %v8953_v4 }
 0xfbc   : > { %v11154_v27 = vpop.f32.mrf.mxu1 }
 0xfbd   : > { %v9044_v9 = vadd.f32 %v11154_v27, %v9871_v32 }
 0xfbe   : > { %v9035_v12 = vpop.f32.mrf.mxu1 }
 0xfbf   : > { %v9036_v26 = vadd.f32 %v9871_v32, %v9035_v12  ;;  %v9100_v53 = vmax.f32 %v9044_v9, 0.0 }
 0xfc0   : > { %v11155_v28 = vpop.f32.mrf.mxu1 }
 0xfc1   : > { %v9047_v22 = vadd.f32 %v11155_v28, %v9871_v32  ;;  %v9098_v55 = vmax.f32 %v9036_v26, 0.0 }
 0xfc2   : > { %v9038_v41 = vpop.f32.mrf.mxu1 }
 0xfc3   : > { %v9039_v47 = vadd.f32 %v9871_v32, %v9038_v41  ;;  %v9101_v18 = vmax.f32 %v9047_v22, 0.0 }
 0xfc5   : > { %v9099_v58 = vmax.f32 %v9039_v47, 0.0  ;;  %v9115_v15 = vpack.c.bf16 %v9101_v18, %v9100_v53 }
 0xfc7   : > { %v9114_v25 = vpack.c.bf16 %v9099_v58, %v9098_v55  ;;  %v14565_v55 = vld [vmem:[%s14917_s14] ss:$0 sm:$0xff] }
 0xfc9   : > { %11184 = vmatprep.mubr.bf16.mxu0 %v9114_v25 }
 0xfca   : > { %11185 = vmatmul.mubr.bf16.vlgmr.msra.gmra.mxu0 %v9115_v15 }
0x1025   : > { %v11158_v34 = vpop.f32.mrf.mxu1 }
0x1026   : > { %v9060_v20 = vadd.f32 %v11158_v34, %v9871_v32 }
0x1027   : > { %v9051_v17 = vpop.f32.mrf.mxu1 }
0x1028   : > { %v9052_v23 = vadd.f32 %v9871_v32, %v9051_v17  ;;  %v9104_v50 = vmax.f32 %v9060_v20, 0.0 }
0x1029   : > { %v11159_v3 = vpop.f32.mrf.mxu1 }
0x102a   : > { %v9063_v7 = vadd.f32 %v11159_v3, %v9871_v32  ;;  %v9102_v14 = vmax.f32 %v9052_v23, 0.0 }
0x102b   : > { %v9054_v13 = vpop.f32.mrf.mxu1 }
0x102c   : > { %v9055_v38 = vadd.f32 %v9871_v32, %v9054_v13  ;;  %v9105_v0 = vmax.f32 %v9063_v7, 0.0 }
0x102e   : > { %v9103_v35 = vmax.f32 %v9055_v38, 0.0  ;;  %v9117_v10 = vpack.c.bf16 %v9105_v0, %v9104_v50 }
0x1030   : > { %v9116_v46 = vpack.c.bf16 %v9103_v35, %v9102_v14 }
0x1032   : > { %11188 = vmatprep.mubr.bf16.mxu0 %v9116_v46 }
0x1033   : > { %11189 = vmatmul.mubr.bf16.gmra.mxu0 %v9117_v10 }
0x1035   : > { %v11162_v63 = vpop.f32.mrf.mxu1 }
0x1036   : > { %v9076_v5 = vadd.f32 %v11162_v63, %v9871_v32 }
0x1037   : > { %v9067_v37 = vpop.f32.mrf.mxu1 }
0x1038   : > { %v9068_v60 = vadd.f32 %v9871_v32, %v9067_v37  ;;  %v9108_v8 = vmax.f32 %v9076_v5, 0.0 }
0x1039   : > { %v11163_v16 = vpop.f32.mrf.mxu1 }
0x103a   : > { %v9079_v1 = vadd.f32 %v11163_v16, %v9871_v32  ;;  %v9106_v45 = vmax.f32 %v9068_v60, 0.0 }
0x103b   : > { %v9070_v52 = vpop.f32.mrf.mxu1 }
0x103c   : > { %v9071_v19 = vadd.f32 %v9871_v32, %v9070_v52  ;;  %v9109_v44 = vmax.f32 %v9079_v1, 0.0 }
0x103e   : > { %v9107_v2 = vmax.f32 %v9071_v19, 0.0  ;;  %v9119_v29 = vpack.c.bf16 %v9109_v44, %v9108_v8 }
0x1040   : > { %v9118_v59 = vpack.c.bf16 %v9107_v2, %v9106_v45 }
0x1042   : > { %11192 = vmatprep.mubr.bf16.mxu0 %v9118_v59 }
0x1043   : > { %11193 = vmatmul.mubr.bf16.gmra.mxu0 %v9119_v29 }
0x1045   : > { %v11166_v33 = vpop.f32.mrf.mxu1 }
0x1046   : > { %v9092_v27 = vadd.f32 %v11166_v33, %v9871_v32 }
0x1047   : > { %v9083_v24 = vpop.f32.mrf.mxu1 }
0x1048   : > { %v9084_v30 = vadd.f32 %v9871_v32, %v9083_v24  ;;  %v9112_v41 = vmax.f32 %v9092_v27, 0.0 }
0x1049   : > { %v11167_v42 = vpop.f32.mrf.mxu1 }
0x104a   : > { %v9095_v4 = vadd.f32 %v11167_v42, %v9871_v32  ;;  %v9110_v22 = vmax.f32 %v9084_v30, 0.0 }
0x104b   : > { %v9086_v12 = vpop.f32.mrf.mxu1 }
0x104c   : > { %v9087_v28 = vadd.f32 %v9871_v32, %v9086_v12  ;;  %v9113_v26 = vmax.f32 %v9095_v4, 0.0 }
0x104e   : > { %v9111_v9 = vmax.f32 %v9087_v28, 0.0  ;;  %v9121_v18 = vpack.c.bf16 %v9113_v26, %v9112_v41 }
0x1050   : > { %v9120_v47 = vpack.c.bf16 %v9111_v9, %v9110_v22 }
0x1052   : > { %11196 = vmatprep.mubr.bf16.mxu0 %v9120_v47 }
0x1053   : > { %11197 = vmatmul.mubr.bf16.gmra.mxu0 %v9121_v18 }
0x108a   : > { %v11186_v58 = vpop.f32.mrf.mxu0 }
0x108b   : > { %v9236_v53 = vadd.f32 %v11186_v58, %v14565_v55 }
0x108c   : > { %v9227_v25 = vpop.f32.mrf.mxu0 }
0x108d   : > { %v14569_v15 = vadd.f32 %v9236_v53, %v14449_v62  ;;  %v9228_v32 = vadd.f32 %v14565_v55, %v9227_v25 }
0x108e   : > { %v11187_v34 = vpop.f32.mrf.mxu0 }
0x108f   : > { %v14573_v17 = vadd.f32 %v9228_v32, %v14439_v49  ;;  %v9239_v3 = vadd.f32 %v11187_v34, %v14565_v55  ;;  %v9312_v23 = vsel %vm617_vm0, %v14569_v15, 0.0 }
0x1090   : > { %9313 = vadd.xlane.f32.xlu0 %v9312_v23  ;;  %v9230_v7 = vpop.f32.mrf.mxu0 }
0x1091   : > { %v14579_v20 = vadd.f32 %v9239_v3, %v14452_v43  ;;  %v9231_v13 = vadd.f32 %v14565_v55, %v9230_v7  ;;  %v9306_v49 = vsel %vm617_vm0, %v14573_v17, 0.0 }
0x1093   : > { %v14583_v62 = vadd.f32 %v9231_v13, %v14442_v56  ;;  %v9315_v38 = vsel %vm617_vm0, %v14579_v20, 0.0 }
0x1094   : > { %9316 = vadd.xlane.f32.xlu1 %v9315_v38  ;;  %9307 = vadd.xlane.f32.xlu0 %v9306_v49 }
0x1095   : > { %v9309_v0 = vsel %vm617_vm0, %v14583_v62, 0.0 }
0x1098   : > { %9310 = vadd.xlane.f32.xlu1 %v9309_v0 }
0x10f3   : > { %v11190_v14 = vpop.f32.mrf.mxu0 }
0x10f4   : > { %v9252_v43 = vadd.f32 %v11190_v14, %v14565_v55 }
0x10f5   : > { %v9243_v35 = vpop.f32.mrf.mxu0 }
0x10f6   : > { %v14593_v50 = vadd.f32 %v9252_v43, %v14499_v21  ;;  %v9244_v56 = vadd.f32 %v14565_v55, %v9243_v35 }
0x10f7   : > { %v11191_v46 = vpop.f32.mrf.mxu0 }
0x10f8   : > { %v14597_v10 = vadd.f32 %v9244_v56, %v14487_v39  ;;  %v9255_v63 = vadd.f32 %v11191_v46, %v14565_v55  ;;  %v9324_v37 = vsel %vm617_vm0, %v14593_v50, 0.0 }
0x10f9   : > { %9325 = vadd.xlane.f32.xlu0 %v9324_v37  ;;  %v9246_v16 = vpop.f32.mrf.mxu0 }
0x10fa   : > { %v14603_v60 = vadd.f32 %v9255_v63, %v14502_v11  ;;  %v9247_v1 = vadd.f32 %v14565_v55, %v9246_v16  ;;  %v9318_v39 = vsel %vm617_vm0, %v14597_v10, 0.0 }
0x10fc   : > { %v14607_v21 = vadd.f32 %v9247_v1, %v14491_v61  ;;  %v9327_v5 = vsel %vm617_vm0, %v14603_v60, 0.0 }
0x10fd   : > { %9328 = vadd.xlane.f32.xlu1 %v9327_v5  ;;  %9319 = vadd.xlane.f32.xlu0 %v9318_v39 }
0x10fe   : > { %v9321_v52 = vsel %vm617_vm0, %v14607_v21, 0.0 }
0x1101   : > { %9322 = vadd.xlane.f32.xlu1 %v9321_v52 }
0x1103   : > { %v11194_v19 = vpop.f32.mrf.mxu0 }
0x1104   : > { %v9268_v11 = vadd.f32 %v11194_v19, %v14565_v55 }
0x1105   : > { %v9259_v44 = vpop.f32.mrf.mxu0 }
0x1106   : > { %v14617_v45 = vadd.f32 %v9268_v11, %v14525_v48  ;;  %v9260_v61 = vadd.f32 %v14565_v55, %v9259_v44 }
0x1107   : > { %v11195_v2 = vpop.f32.mrf.mxu0 }
0x1108   : > { %v14621_v8 = vadd.f32 %v9260_v61, %v14513_v36  ;;  %v9271_v59 = vadd.f32 %v11195_v2, %v14565_v55  ;;  %v9336_v29 = vsel %vm617_vm0, %v14617_v45, 0.0 }
0x1109   : > { %9337 = vadd.xlane.f32.xlu0 %v9336_v29  ;;  %v9262_v33 = vpop.f32.mrf.mxu0 }
0x110a   : > { %v14627_v24 = vadd.f32 %v9271_v59, %v14528_v6  ;;  %v9263_v42 = vadd.f32 %v14565_v55, %v9262_v33  ;;  %v9330_v36 = vsel %vm617_vm0, %v14621_v8, 0.0 }
0x110c   : > { %v14631_v48 = vadd.f32 %v9263_v42, %v14517_v31  ;;  %v9339_v30 = vsel %vm617_vm0, %v14627_v24, 0.0 }
0x110d   : > { %9340 = vadd.xlane.f32.xlu1 %v9339_v30  ;;  %9331 = vadd.xlane.f32.xlu0 %v9330_v36 }
0x110e   : > { %v9333_v4 = vsel %vm617_vm0, %v14631_v48, 0.0 }
0x1111   : > { %9334 = vadd.xlane.f32.xlu1 %v9333_v4 }
0x1113   : > { %v11198_v27 = vpop.f32.mrf.mxu0 }
0x1114   : > { %v9284_v12 = vadd.f32 %v11198_v27, %v14565_v55 }
0x1115   : > { %v9275_v6 = vpop.f32.mrf.mxu0 }
0x1116   : > { %v9276_v28 = vadd.f32 %v14565_v55, %v9275_v6  ;;  %v14645_v41 = vadd.f32 %v9284_v12, %v14551_v51 }
0x1117   : > { %v11199_v31 = vpop.f32.mrf.mxu0 }
0x1118   : > { %v14642_v26 = vadd.f32 %v9276_v28, %v14540_v54  ;;  %v9287_v47 = vadd.f32 %v11199_v31, %v14565_v55 }
0x1119   : > { %v9278_v22 = vpop.f32.mrf.mxu0  ;;  %v9314_v9 = vpop.xlane.xlu0 %9313 }
0x111a   : > { %v9279_v18 = vadd.f32 %v14565_v55, %v9278_v22  ;;  %v9342_v58 = vsel %vm617_vm0, %v14642_v26, 0.0  ;;  %v9356_v25 = vmul.f32 0.03125, %v9314_v9  ;;  %v14655_v34 = vadd.f32 %v9287_v47, %v14554_v40 }
0x111b   : > { %9343 = vadd.xlane.f32.xlu0 %v9342_v58  ;;  %v9348_v55 = vsel %vm617_vm0, %v14645_v41, 0.0 }
0x111c   : > { %v14652_v53 = vadd.f32 %v9279_v18, %v14543_v57  ;;  %v14662_v23 = vsub.f32 %v14569_v15, %v9356_v25  ;;  %v9351_v40 = vsel %vm617_vm0, %v14655_v34, 0.0 }
0x111d   : > { %v9317_v32 = vpop.xlane.xlu1 %9316  ;;  %v9308_v54 = vpop.xlane.xlu0 %9307 }
0x111e   : > { %v9354_v3 = vmul.f32 0.03125, %v9308_v54  ;;  %v9345_v51 = vsel %vm617_vm0, %v14652_v53, 0.0  ;;  %v9357_v57 = vmul.f32 0.03125, %v9317_v32 }
0x111f   : > { %9346 = vadd.xlane.f32.xlu1 %v9345_v51  ;;  %9349 = vadd.xlane.f32.xlu0 %v9348_v55 }
0x1120   : > { %v14665_v7 = vsub.f32 %v14573_v17, %v9354_v3  ;;  %v14672_v0 = vsub.f32 %v14579_v20, %v9357_v57  ;;  %v9388_v17 = vmul.f32 %v14662_v23, %v14662_v23 }
0x1121   : > { %v9311_v13 = vpop.xlane.xlu1 %9310 }
0x1122   : > { %v9355_v38 = vmul.f32 0.03125, %v9311_v13  ;;  %v9386_v49 = vmul.f32 %v14665_v7, %v14665_v7  ;;  %v9408_v56 = vsel %vm617_vm0, %v9388_v17, 0.0  ;;  %v9389_v20 = vmul.f32 %v14672_v0, %v14672_v0 }
0x1123   : > { %9352 = vadd.xlane.f32.xlu1 %v9351_v40 }
0x1124   : > { %v14675_v14 = vsub.f32 %v14583_v62, %v9355_v38  ;;  %v9402_v15 = vsel %vm617_vm0, %v9386_v49, 0.0  ;;  %v9411_v62 = vsel %vm617_vm0, %v9389_v20, 0.0 }
0x1125   : > { %9403 = vadd.xlane.f32.xlu0 %v9402_v15 }
0x1126   : > { %v9387_v43 = vmul.f32 %v14675_v14, %v14675_v14 }
0x1128   : > { %v9405_v35 = vsel %vm617_vm0, %v9387_v43, 0.0 }
0x1129   : > { %9406 = vadd.xlane.f32.xlu1 %v9405_v35  ;;  %9409 = vadd.xlane.f32.xlu0 %v9408_v56 }
0x112d   : > { %9412 = vadd.xlane.f32.xlu1 %v9411_v62 }
0x1182   : > { %v9326_v46 = vpop.xlane.xlu0 %9325 }
0x1183   : > { %v9360_v63 = vmul.f32 0.03125, %v9326_v46 }
0x1185   : > { %v14688_v37 = vsub.f32 %v14593_v50, %v9360_v63 }
0x1186   : > { %v9329_v16 = vpop.xlane.xlu1 %9328  ;;  %v9320_v1 = vpop.xlane.xlu0 %9319 }
0x1187   : > { %v9361_v5 = vmul.f32 0.03125, %v9329_v16  ;;  %v9358_v39 = vmul.f32 0.03125, %v9320_v1  ;;  %v9392_v52 = vmul.f32 %v14688_v37, %v14688_v37 }
0x1189   : > { %v14693_v19 = vsub.f32 %v14603_v60, %v9361_v5  ;;  %v14696_v11 = vsub.f32 %v14597_v10, %v9358_v39  ;;  %v9420_v44 = vsel %vm617_vm0, %v9392_v52, 0.0 }
0x118a   : > { %v9323_v61 = vpop.xlane.xlu1 %9322  ;;  %9421 = vadd.xlane.f32.xlu0 %v9420_v44 }
0x118b   : > { %v9359_v2 = vmul.f32 0.03125, %v9323_v61  ;;  %v9393_v50 = vmul.f32 %v14693_v19, %v14693_v19  ;;  %v9390_v59 = vmul.f32 %v14696_v11, %v14696_v11 }
0x118d   : > { %v14704_v29 = vsub.f32 %v14607_v21, %v9359_v2  ;;  %v9423_v60 = vsel %vm617_vm0, %v9393_v50, 0.0  ;;  %v9414_v33 = vsel %vm617_vm0, %v9390_v59, 0.0 }
0x118e   : > { %9424 = vadd.xlane.f32.xlu1 %v9423_v60  ;;  %9415 = vadd.xlane.f32.xlu0 %v9414_v33  ;;  %v14762_v33 = vld [vmem:[%s14918_s15] ss:$0 sm:$0xff] }
0x118f   : > { %v9391_v10 = vmul.f32 %v14704_v29, %v14704_v29 }
0x1191   : > { %v9417_v42 = vsel %vm617_vm0, %v9391_v10, 0.0 }
0x1192   : > { %9418 = vadd.xlane.f32.xlu1 %v9417_v42  ;;  %v9338_v30 = vpop.xlane.xlu0 %9337  ;;  %v14768_v42 = vld [vmem:[%s15220_s16] ss:$0 sm:$0xff]  ;;  %s11643_s16 = scalar_lea.vmem %s14857_s18, 2048 }
0x1193   : > { %v9364_v36 = vmul.f32 0.03125, %v9338_v30  ;;  %p11644_p11 = scmp.ne.s32.totalorder %s14857_s18, %s11643_s16  ;;  %p11651_p7 = scmp.lt.s32.totalorder %s11649_s21, %s11643_s16 }
0x1195   : > { %v14712_v4 = vsub.f32 %v14617_v45, %v9364_v36  ;;  %p11645_p13 = pnand %p11644_p11, %p15225_p12  ;;  %p11652_p8 = por %p11651_p7, %p11650_p5 }
0x1196   : > { %v9341_v27 = vpop.xlane.xlu1 %9340  ;;  %v9332_v21 = vpop.xlane.xlu0 %9331 }
0x1197   : > { %v9365_v6 = vmul.f32 0.03125, %v9341_v27  ;;  %v9362_v12 = vmul.f32 0.03125, %v9332_v21  ;;  %v9396_v28 = vmul.f32 %v14712_v4, %v14712_v4  ;;  %p11646_p4 = pneg %p11645_p13 }
0x1199   : > { %v14717_v31 = vsub.f32 %v14627_v24, %v9365_v6  ;;  %v14720_v22 = vsub.f32 %v14621_v8, %v9362_v12  ;;  %v9432_v9 = vsel %vm617_vm0, %v9396_v28, 0.0  ;;  %p11653_p10 = pnand %p11652_p8, %p11646_p4 }
0x119a   : > { %v9335_v47 = vpop.xlane.xlu1 %9334  ;;  %9433 = vadd.xlane.f32.xlu0 %v9432_v9 }
0x119b   : > { %v9363_v18 = vmul.f32 0.03125, %v9335_v47  ;;  %v9397_v45 = vmul.f32 %v14717_v31, %v14717_v31  ;;  %v9394_v58 = vmul.f32 %v14720_v22, %v14720_v22 }
0x119d   : > { %v14728_v25 = vsub.f32 %v14631_v48, %v9363_v18  ;;  %v9435_v24 = vsel %vm617_vm0, %v9397_v45, 0.0  ;;  %v9426_v32 = vsel %vm617_vm0, %v9394_v58, 0.0 }
0x119e   : > { %9436 = vadd.xlane.f32.xlu1 %v9435_v24  ;;  %9427 = vadd.xlane.f32.xlu0 %v9426_v32 }
0x119f   : > { %v9395_v8 = vmul.f32 %v14728_v25, %v14728_v25 }
0x11a1   : > { %v9429_v54 = vsel %vm617_vm0, %v9395_v8, 0.0 }
0x11a2   : > { %9430 = vadd.xlane.f32.xlu1 %v9429_v54 }
0x11a4   : > { %v9344_v3 = vpop.xlane.xlu0 %9343 }
0x11a5   : > { %v9366_v51 = vmul.f32 0.03125, %v9344_v3 }
0x11a7   : > { %v14736_v55 = vsub.f32 %v14642_v26, %v9366_v51 }
0x11a8   : > { %v9347_v57 = vpop.xlane.xlu1 %9346  ;;  %v9350_v48 = vpop.xlane.xlu0 %9349 }
0x11a9   : > { %v9367_v13 = vmul.f32 0.03125, %v9347_v57  ;;  %v9368_v38 = vmul.f32 0.03125, %v9350_v48  ;;  %v9398_v40 = vmul.f32 %v14736_v55, %v14736_v55 }
0x11ab   : > { %v14741_v49 = vsub.f32 %v14652_v53, %v9367_v13  ;;  %v14744_v15 = vsub.f32 %v14645_v41, %v9368_v38  ;;  %v9438_v17 = vsel %vm617_vm0, %v9398_v40, 0.0 }
0x11ac   : > { %v9353_v43 = vpop.xlane.xlu1 %9352  ;;  %9439 = vadd.xlane.f32.xlu0 %v9438_v17 }
0x11ad   : > { %v9369_v35 = vmul.f32 0.03125, %v9353_v43  ;;  %v9399_v26 = vmul.f32 %v14741_v49, %v14741_v49  ;;  %v9400_v56 = vmul.f32 %v14744_v15, %v14744_v15 }
0x11ae   : > { %v9404_v20 = vpop.xlane.xlu0 %9403 }
0x11af   : > { %v14752_v62 = vsub.f32 %v14655_v34, %v9369_v35  ;;  %v9450_v53 = vmul.f32 0.03125, %v9404_v20  ;;  %v9441_v46 = vsel %vm617_vm0, %v9399_v26, 0.0  ;;  %v9444_v41 = vsel %vm617_vm0, %v9400_v56, 0.0 }
0x11b0   : > { %9442 = vadd.xlane.f32.xlu1 %v9441_v46  ;;  %9445 = vadd.xlane.f32.xlu0 %v9444_v41 }
0x11b1   : > { %v9466_v63 = vadd.f32 1e-05, %v9450_v53  ;;  %v9401_v16 = vmul.f32 %v14752_v62, %v14752_v62 }
0x11b2   : > { %v9407_v1 = vpop.xlane.xlu1 %9406  ;;  %v9410_v5 = vpop.xlane.xlu0 %9409 }
0x11b3   : > { %11567 = vrsqrt.f32 %v9466_v63  ;;  %v9451_v39 = vmul.f32 0.03125, %v9407_v1  ;;  %v9452_v52 = vmul.f32 0.03125, %v9410_v5  ;;  %v9447_v44 = vsel %vm617_vm0, %v9401_v16, 0.0 }
0x11b4   : > { %9448 = vadd.xlane.f32.xlu1 %v9447_v44 }
0x11b5   : > { %v9467_v34 = vadd.f32 1e-05, %v9451_v39  ;;  %v9468_v61 = vadd.f32 1e-05, %v9452_v52 }
0x11b6   : > { %v9413_v2 = vpop.xlane.xlu1 %9412 }
0x11b7   : > { %11569 = vrsqrt.f32 %v9467_v34  ;;  %v9453_v50 = vmul.f32 0.03125, %v9413_v2 }
0x11b8   : > { %11571 = vrsqrt.f32 %v9468_v61 }
0x11b9   : > { %v9469_v59 = vadd.f32 1e-05, %v9453_v50 }
0x11bb   : > { %11573 = vrsqrt.f32 %v9469_v59 }
0x11c0   : > { %v11568_v60 = vpop.eup %11567 }
0x11c1   : > { %v9498_v10 = vmul.f32 %v11568_v60, %v14665_v7 }
0x11c3   : > { %v9521_v30 = vmul.f32 %v14762_v33, %v9498_v10 }
0x11c4   : > { %v11570_v36 = vpop.eup %11569 }
0x11c5   : > { %v11572_v27 = vpop.eup %11571  ;;  %v9544_v21 = vadd.f32 %v14768_v42, %v9521_v30  ;;  %v9499_v6 = vmul.f32 %v11570_v36, %v14675_v14 }
0x11c6   : > { %v9500_v12 = vmul.f32 %v11572_v27, %v14662_v23 }
0x11c7   : > { %9560 = vst.msk [vmem:[%s14776_s23] sm:$0xff] %vm617_vm0, %v9544_v21  ;;  %v9522_v7 = vmul.f32 %v14762_v33, %v9499_v6 }
0x11c8   : > { %v11574_v28 = vpop.eup %11573  ;;  %v9523_v9 = vmul.f32 %v14762_v33, %v9500_v12 }
0x11c9   : > { %v9545_v47 = vadd.f32 %v14768_v42, %v9522_v7  ;;  %v9501_v14 = vmul.f32 %v11574_v28, %v14672_v0 }
0x11ca   : > { %v9546_v23 = vadd.f32 %v14768_v42, %v9523_v9 }
0x11cb   : > { %9561 = vst.msk [vmem:[%s14776_s23 + $0x8] sm:$0xff] %vm617_vm0, %v9545_v47  ;;  %v9524_v18 = vmul.f32 %v14762_v33, %v9501_v14 }
0x11cc   : > { %9562 = vst.msk [vmem:[%s14776_s23 + $0x10] sm:$0xff] %vm617_vm0, %v9546_v23 }
0x11cd   : > { %v9547_v45 = vadd.f32 %v14768_v42, %v9524_v18 }
0x11cf   : > { %9563 = vst.msk [vmem:[%s14776_s23 + $0x18] sm:$0xff] %vm617_vm0, %v9547_v45 }
0x1213   : > { %v9422_v58 = vpop.xlane.xlu0 %9421 }
0x1214   : > { %v9456_v24 = vmul.f32 0.03125, %v9422_v58 }
0x1216   : > { %v9472_v32 = vadd.f32 1e-05, %v9456_v24 }
0x1217   : > { %v9425_v8 = vpop.xlane.xlu1 %9424  ;;  %v9416_v54 = vpop.xlane.xlu0 %9415 }
0x1218   : > { %11575 = vrsqrt.f32 %v9472_v32  ;;  %v9457_v3 = vmul.f32 0.03125, %v9425_v8  ;;  %v9454_v0 = vmul.f32 0.03125, %v9416_v54 }
0x121a   : > { %v9473_v51 = vadd.f32 1e-05, %v9457_v3  ;;  %v9470_v57 = vadd.f32 1e-05, %v9454_v0 }
0x121b   : > { %v9419_v48 = vpop.xlane.xlu1 %9418 }
0x121c   : > { %11577 = vrsqrt.f32 %v9473_v51  ;;  %v9455_v13 = vmul.f32 0.03125, %v9419_v48 }
0x121d   : > { %11579 = vrsqrt.f32 %v9470_v57 }
0x121e   : > { %v9471_v38 = vadd.f32 1e-05, %v9455_v13 }
0x1220   : > { %11581 = vrsqrt.f32 %v9471_v38 }
0x1223   : > { %v9434_v40 = vpop.xlane.xlu0 %9433 }
0x1224   : > { %v9460_v17 = vmul.f32 0.03125, %v9434_v40 }
0x1225   : > { %v11576_v43 = vpop.eup %11575 }
0x1226   : > { %v9504_v35 = vmul.f32 %v11576_v43, %v14688_v37  ;;  %v9476_v26 = vadd.f32 1e-05, %v9460_v17 }
0x1227   : > { %v9437_v56 = vpop.xlane.xlu1 %9436  ;;  %v9428_v20 = vpop.xlane.xlu0 %9427 }
0x1228   : > { %v9527_v53 = vmul.f32 %v14762_v33, %v9504_v35  ;;  %11583 = vrsqrt.f32 %v9476_v26  ;;  %v9461_v46 = vmul.f32 0.03125, %v9437_v56  ;;  %v9458_v41 = vmul.f32 0.03125, %v9428_v20 }
0x1229   : > { %v11578_v63 = vpop.eup %11577 }
0x122a   : > { %v11580_v16 = vpop.eup %11579  ;;  %v9550_v1 = vadd.f32 %v14768_v42, %v9527_v53  ;;  %v9505_v5 = vmul.f32 %v11578_v63, %v14693_v19  ;;  %v9477_v39 = vadd.f32 1e-05, %v9461_v46  ;;  %v9474_v52 = vadd.f32 1e-05, %v9458_v41 }
0x122b   : > { %v9502_v37 = vmul.f32 %v11580_v16, %v14696_v11  ;;  %v9431_v44 = vpop.xlane.xlu1 %9430 }
0x122c   : > { %9566 = vst.msk [vmem:[%s14776_s23 + $0x30] sm:$0xff] %vm617_vm0, %v9550_v1  ;;  %v9528_v34 = vmul.f32 %v14762_v33, %v9505_v5  ;;  %11585 = vrsqrt.f32 %v9477_v39  ;;  %v9459_v61 = vmul.f32 0.03125, %v9431_v44 }
0x122d   : > { %v11582_v2 = vpop.eup %11581  ;;  %v9525_v50 = vmul.f32 %v14762_v33, %v9502_v37  ;;  %11587 = vrsqrt.f32 %v9474_v52 }
0x122e   : > { %v9551_v19 = vadd.f32 %v14768_v42, %v9528_v34  ;;  %v9503_v59 = vmul.f32 %v11582_v2, %v14704_v29  ;;  %v9475_v60 = vadd.f32 1e-05, %v9459_v61 }
0x122f   : > { %v9548_v11 = vadd.f32 %v14768_v42, %v9525_v50 }
0x1230   : > { %9567 = vst.msk [vmem:[%s14776_s23 + $0x38] sm:$0xff] %vm617_vm0, %v9551_v19  ;;  %v9526_v10 = vmul.f32 %v14762_v33, %v9503_v59  ;;  %11589 = vrsqrt.f32 %v9475_v60 }
0x1231   : > { %9564 = vst.msk [vmem:[%s14776_s23 + $0x20] sm:$0xff] %vm617_vm0, %v9548_v11 }
0x1232   : > { %v9549_v30 = vadd.f32 %v14768_v42, %v9526_v10 }
0x1234   : > { %9565 = vst.msk [vmem:[%s14776_s23 + $0x28] sm:$0xff] %vm617_vm0, %v9549_v30 }
0x1235   : > { %v11584_v36 = vpop.eup %11583  ;;  %v9440_v27 = vpop.xlane.xlu0 %9439 }
0x1236   : > { %v9508_v21 = vmul.f32 %v11584_v36, %v14712_v4  ;;  %v9462_v29 = vmul.f32 0.03125, %v9440_v27 }
0x1238   : > { %v9531_v6 = vmul.f32 %v14762_v33, %v9508_v21  ;;  %v9478_v12 = vadd.f32 1e-05, %v9462_v29 }
0x1239   : > { %v11586_v7 = vpop.eup %11585  ;;  %v9443_v28 = vpop.xlane.xlu1 %9442 }
0x123a   : > { %v9446_v9 = vpop.xlane.xlu0 %9445  ;;  %v11588_v47 = vpop.eup %11587  ;;  %v9554_v14 = vadd.f32 %v14768_v42, %v9531_v6  ;;  %v9509_v23 = vmul.f32 %v11586_v7, %v14717_v31  ;;  %11591 = vrsqrt.f32 %v9478_v12  ;;  %v9463_v18 = vmul.f32 0.03125, %v9443_v28 }
0x123b   : > { %v9506_v45 = vmul.f32 %v11588_v47, %v14720_v22  ;;  %v9464_v58 = vmul.f32 0.03125, %v9446_v9 }
0x123c   : > { %9570 = vst.msk [vmem:[%s14776_s23 + $0x50] sm:$0xff] %vm617_vm0, %v9554_v14  ;;  %v9532_v4 = vmul.f32 %v14762_v33, %v9509_v23  ;;  %v9479_v24 = vadd.f32 1e-05, %v9463_v18 }
0x123d   : > { %v11590_v32 = vpop.eup %11589  ;;  %v9529_v8 = vmul.f32 %v14762_v33, %v9506_v45  ;;  %v9480_v54 = vadd.f32 1e-05, %v9464_v58  ;;  %v9449_v3 = vpop.xlane.xlu1 %9448 }
0x123e   : > { %v9555_v31 = vadd.f32 %v14768_v42, %v9532_v4  ;;  %v9507_v0 = vmul.f32 %v11590_v32, %v14728_v25  ;;  %11593 = vrsqrt.f32 %v9479_v24  ;;  %v9465_v51 = vmul.f32 0.03125, %v9449_v3 }
0x123f   : > { %v9552_v22 = vadd.f32 %v14768_v42, %v9529_v8  ;;  %11595 = vrsqrt.f32 %v9480_v54 }
0x1240   : > { %9571 = vst.msk [vmem:[%s14776_s23 + $0x58] sm:$0xff] %vm617_vm0, %v9555_v31  ;;  %v9530_v57 = vmul.f32 %v14762_v33, %v9507_v0  ;;  %v9481_v48 = vadd.f32 1e-05, %v9465_v51 }
0x1241   : > { %9568 = vst.msk [vmem:[%s14776_s23 + $0x40] sm:$0xff] %vm617_vm0, %v9552_v22 }
0x1242   : > { %v9553_v13 = vadd.f32 %v14768_v42, %v9530_v57  ;;  %11597 = vrsqrt.f32 %v9481_v48 }
0x1244   : > { %9569 = vst.msk [vmem:[%s14776_s23 + $0x48] sm:$0xff] %vm617_vm0, %v9553_v13 }
0x1247   : > { %v11592_v25 = vpop.eup %11591 }
0x1248   : > { %v9510_v38 = vmul.f32 %v11592_v25, %v14736_v55 }
0x124a   : > { %v9533_v40 = vmul.f32 %v14762_v33, %v9510_v38 }
0x124b   : > { %v11594_v17 = vpop.eup %11593 }
0x124c   : > { %v11596_v43 = vpop.eup %11595  ;;  %v9556_v35 = vadd.f32 %v14768_v42, %v9533_v40  ;;  %v9511_v26 = vmul.f32 %v11594_v17, %v14741_v49 }
0x124d   : > { %v9512_v56 = vmul.f32 %v11596_v43, %v14744_v15 }
0x124e   : > { %9572 = vst.msk [vmem:[%s14776_s23 + $0x60] sm:$0xff] %vm617_vm0, %v9556_v35  ;;  %v9534_v20 = vmul.f32 %v14762_v33, %v9511_v26 }
0x124f   : > { %v11598_v53 = vpop.eup %11597  ;;  %v9535_v55 = vmul.f32 %v14762_v33, %v9512_v56 }
0x1250   : > { %v9557_v46 = vadd.f32 %v14768_v42, %v9534_v20  ;;  %v9513_v41 = vmul.f32 %v11598_v53, %v14752_v62 }
0x1251   : > { %v9558_v49 = vadd.f32 %v14768_v42, %v9535_v55 }
0x1252   : > { %9573 = vst.msk [vmem:[%s14776_s23 + $0x68] sm:$0xff] %vm617_vm0, %v9557_v46  ;;  %v9536_v15 = vmul.f32 %v14762_v33, %v9513_v41 }
0x1253   : > { %9574 = vst.msk [vmem:[%s14776_s23 + $0x70] sm:$0xff] %vm617_vm0, %v9558_v49 }
0x1254   : > { %v9559_v62 = vadd.f32 %v14768_v42, %v9536_v15 }
0x1256   : > { %9575 = vst.msk [vmem:[%s14776_s23 + $0x78] sm:$0xff] %vm617_vm0, %v9559_v62 }
0x1257   : > { %11656 = shalt.err (!%p11653_p10)
}
0x1258   : > { %s11657_s23 = scalar_lea.hbm %s14855_s0, 2048  ;;  %s11661_s24 = scalar_lea.hbm %s15224_s22, 4096 }
0x1259   : > { %p11658_p0 = scmp.ne.s32.totalorder %s14855_s0, %s11657_s23  ;;  %p11662_p1 = scmp.lt.s32.totalorder %s14855_s0, %s15224_s22 }
0x125a   : > { %p11663_p3 = scmp.lt.s32.totalorder %s11661_s24, %s11657_s23 }
0x125b   : > { %p11659_p2 = pnand %p11658_p0, %p15225_p12 }
0x125c   : > { %p11664_p6 = por %p11663_p3, %p11662_p1 }
0x125d   : > { %p11660_p9 = pneg %p11659_p2 }
0x125f   : > { %p11665_p11 = pnand %p11664_p6, %p11660_p9 }
0x1261   : > { %11668 = shalt.err (!%p11665_p11)
}
0x1262   : > { %s11718_s2 = smov 128   ;;  %s11719_s16 = smov 8  }
0x1263   : > { %s15226_s21 = scalar_lea.sflag [#allocation4], %s11907_s19 }
0x1264   : > { %11210 = dma.vmem_to_hbm [thread:$0]  (%p15225_p12), %s14857_s18, 2048, %s14855_s0, %s15226_s21, %s11718_s2, %s11718_s2, %s11719_s16  }
0x1265 PF: > { %s15227_s20 = sld [smem:[#allocation8_spill]]  ;;  %p15230_p4 = scmp.ge.s32.totalorder %s11707_s27, 2 }
0x1266   : > { %s15228_s29 = sld [smem:[#allocation14_spill]] }
0x126b   : > { %s9605_s3 = sand.u32 1, %s15227_s20  }
0x126c   : > { %p15229_p13 = scmp.ne.s32.totalorder %s15228_s29, 0  ;;  %s9606_s30 = scalar_lea.sflag [#allocation4], %s9605_s3 }
0x126e   : > { %p11217_p5 = pnand %p15230_p4, %p15229_p13 }
0x1270   : > { %p11218_p7 = pneg %p11217_p5 }
0x1272   : > { %11690 = dma.done.wait (%p11218_p7), %s9606_s30, 2048  }
0x1273   : > { %11692 = vsyncadd (%p11218_p7), %s9606_s30, 4294965248  ;;  %s15231_s27 = sld [smem:[#allocation11_spill]]  ;;  %s15234_s24 = smov %s11699_s25 }
0x1274   : > { %s15232_s23 = sld [smem:[#allocation9_spill]] }
0x1275   : > { %s15233_s26 = sld [smem:[#allocation12_spill]] }
0x1279   : > { %p30_p8 = scmp.ge.s32.totalorder %s15231_s27, 4  }
0x127a   : > { %s15235_s25 = smov %s15232_s23 }
0x127b   :  { %32 = sbr.rel (!%p30_p8) target bundleno = 12 (0xc), region = 136 }
0x1280   :  { %9611 = vsyncpa [#allocation3], 1 }
0x1281   :  { %9613 = vsyncpa [#allocation3 + $0x1], 1 }
0x1282   :  { %9614 = vsyncpa [#allocation4], 1 }
0x1283   :  { %9616 = vsyncpa [#allocation4 + $0x1], 1 }

</bundles_post_ra>
